<compile_context>
chip_gen: v5e
topology: v5e:2x2
jax: 0.10.0
libtpu: 0.0.40
codegen_flags: <defaults>
</compile_context>

<pallas_src>
import functools

import jax
import jax.numpy as jnp
from jax.experimental import pallas as pl
from jax.experimental.pallas import tpu as pltpu


# ------------------------------ small helpers ---------------------------------

def _round_up(x, m):
    return (x + m - 1) // m * m


def _pad_to(x, shape):
    pads = [(0, s - d) for d, s in zip(x.shape, shape)]
    if all(p == (0, 0) for p in pads):
        return x
    return jnp.pad(x, pads)


def _pick_tile(total, max_tile, granule):
    """Largest multiple of `granule` that divides `total` and is <= max_tile."""
    t = min(max_tile, total)
    t = max(granule, (t // granule) * granule)
    while t > granule and total % t != 0:
        t -= granule
    return t


def _vmem_limit_bytes():
    # Generation-aware budget: ~3/4 of physical VMEM, capped at 100 MiB.
    # v5e/v6e (128 MiB) -> ~96 MiB; v7x (64 MiB) -> 48 MiB; fallback 48 MiB.
    try:
        cap = getattr(pltpu.get_tpu_info(), "vmem_capacity_bytes", None)
        if cap:
            return int(min(cap * 3 // 4, 100 * 2 ** 20))
    except Exception:
        pass
    return 48 * 2 ** 20


_VMEM_LIMIT = _vmem_limit_bytes()


# --------------------------- fused linear kernels ------------------------------

def _linear_nk1_kernel(*refs, activation, has_ln, has_res, eps, k_real):
    """Single-K-tile path: (optional cached LayerNorm) -> dot -> bias ->
    (optional GELU) -> (optional residual + LayerScale) -> store.  No accumulator
    scratch is needed because the whole contraction fits one tile."""
    it = iter(refs)
    x_ref, w_ref, b_ref = next(it), next(it), next(it)
    g_ref = bt_ref = r_ref = ls_ref = xn_ref = None
    if has_ln:
        g_ref, bt_ref = next(it), next(it)
    if has_res:
        r_ref, ls_ref = next(it), next(it)
    o_ref = next(it)
    if has_ln:
        xn_ref = next(it)

    if has_ln:
        # LayerNorm prologue computed once per row tile (at column tile j == 0) and
        # cached in bf16 VMEM scratch for the remaining j tiles.
        # Invariant: padded feature lanes of x / gamma / beta / W are zero, so the
        # normalized padded lanes stay zero and never pollute the matmul.
        @pl.when(pl.program_id(1) == 0)
        def _compute_ln():
            x = x_ref[...].astype(jnp.float32)
            col = jax.lax.broadcasted_iota(jnp.int32, x.shape, 1)
            mask = (col < k_real).astype(jnp.float32)
            inv_k = 1.0 / float(k_real)
            mean = jnp.sum(x * mask, axis=-1, keepdims=True) * inv_k
            xc = (x - mean) * mask
            var = jnp.sum(xc * xc, axis=-1, keepdims=True) * inv_k
            y = (xc * jax.lax.rsqrt(var + eps) * g_ref[...].astype(jnp.float32)
                 + bt_ref[...].astype(jnp.float32))
            xn_ref[...] = y.astype(jnp.bfloat16)

        xin = xn_ref[...]
    else:
        xin = x_ref[...]

    y = (jnp.dot(xin, w_ref[...], preferred_element_type=jnp.float32)
         + b_ref[...].astype(jnp.float32))
    if activation == "gelu":
        # TODO(synk): PyTorch nn.GELU default is exact erf; tanh approximation kept
        # for Mosaic-safe lowering (~1e-3 divergence).
        c = 0.7978845608028654  # sqrt(2/pi)
        y = 0.5 * y * (1.0 + jnp.tanh(c * (y + 0.044715 * y * y * y)))
    if has_res:
        y = r_ref[...].astype(jnp.float32) + ls_ref[...].astype(jnp.float32) * y
    o_ref[...] = y.astype(o_ref.dtype)


def _linear_ktile_kernel(*refs, activation, has_res, nk):
    """K-tiled accumulation path (no fused LayerNorm)."""
    it = iter(refs)
    x_ref, w_ref, b_ref = next(it), next(it), next(it)
    r_ref = ls_ref = None
    if has_res:
        r_ref, ls_ref = next(it), next(it)
    o_ref = next(it)
    acc_ref = next(it)

    k = pl.program_id(2)

    @pl.when(k == 0)
    def _init():
        acc_ref[...] = jnp.zeros_like(acc_ref)

    acc_ref[...] += jnp.dot(x_ref[...], w_ref[...],
                            preferred_element_type=jnp.float32)

    @pl.when(k == nk - 1)
    def _finalize():
        y = acc_ref[...] + b_ref[...].astype(jnp.float32)
        if activation == "gelu":
            c = 0.7978845608028654
            y = 0.5 * y * (1.0 + jnp.tanh(c * (y + 0.044715 * y * y * y)))
        if has_res:
            y = r_ref[...].astype(jnp.float32) + ls_ref[...].astype(jnp.float32) * y
        o_ref[...] = y.astype(o_ref.dtype)


def linear(x, w, b, *, ln=None, k_real=None, activation=None,
           residual=None, ls=None, tm=256, tn=512, tk=1024):
    """Fused (LayerNorm) -> x @ w + b -> (GELU) -> (residual + LayerScale).

    All operands must already be lane/sublane aligned and pre-padded:
      x (M, Kp) bf16, w (Kp, Np) bf16, b / gamma / beta / ls (1, ...) f32,
      residual (M, Np) bf16.  Output is (M, Np) bf16.
    """
    M, Kp = x.shape
    Kp2, Np = w.shape
    assert Kp == Kp2 and M % 8 == 0 and Kp % 128 == 0 and Np % 128 == 0
    has_ln = ln is not None
    has_res = residual is not None
    assert (residual is None) == (ls is None)
    if has_ln:
        assert k_real is not None

    tm_e = _pick_tile(M, tm, 8)
    tn_e = _pick_tile(Np, tn, 128)
    tk_e = Kp if has_ln else _pick_tile(Kp, tk, 128)   # LN prologue needs full K
    nk = Kp // tk_e

    inputs = [x, w, b]
    io_alias = {}

    if nk == 1:
        in_specs = [pl.BlockSpec((tm_e, Kp), lambda i, j: (i, 0)),
                    pl.BlockSpec((Kp, tn_e), lambda i, j: (0, j)),
                    pl.BlockSpec((1, tn_e), lambda i, j: (0, j))]
        if has_ln:
            inputs += [ln[0], ln[1]]
            in_specs += [pl.BlockSpec((1, Kp), lambda i, j: (0, 0)),
                         pl.BlockSpec((1, Kp), lambda i, j: (0, 0))]
        if has_res:
            io_alias = {len(inputs): 0}          # residual buffer aliased to output
            inputs += [residual, ls]
            in_specs += [pl.BlockSpec((tm_e, tn_e), lambda i, j: (i, j)),
                         pl.BlockSpec((1, tn_e), lambda i, j: (0, j))]
        scratch = [pltpu.VMEM((tm_e, Kp), jnp.bfloat16)] if has_ln else []
        kernel = functools.partial(
            _linear_nk1_kernel, activation=activation, has_ln=has_ln,
            has_res=has_res, eps=float(ln[2]) if has_ln else 0.0,
            k_real=int(k_real) if has_ln else 0)
        return pl.pallas_call(
            kernel,
            out_shape=jax.ShapeDtypeStruct((M, Np), jnp.bfloat16),
            grid=(M // tm_e, Np // tn_e),
            in_specs=in_specs,
            out_specs=pl.BlockSpec((tm_e, tn_e), lambda i, j: (i, j)),
            scratch_shapes=scratch,
            input_output_aliases=io_alias,
            compiler_params=pltpu.CompilerParams(
                # j must be sequential when the LN scratch is carried across it.
                dimension_semantics=("parallel",
                                     "arbitrary" if has_ln else "parallel"),
                vmem_limit_bytes=_VMEM_LIMIT),
        )(*inputs)

    # ---- K-tiled accumulation path (patch embed / large fc2) ----
    in_specs = [pl.BlockSpec((tm_e, tk_e), lambda i, j, k: (i, k)),
                pl.BlockSpec((tk_e, tn_e), lambda i, j, k: (k, j)),
                pl.BlockSpec((1, tn_e), lambda i, j, k: (0, j))]
    if has_res:
        io_alias = {len(inputs): 0}
        inputs += [residual, ls]
        in_specs += [pl.BlockSpec((tm_e, tn_e), lambda i, j, k: (i, j)),
                     pl.BlockSpec((1, tn_e), lambda i, j, k: (0, j))]
    kernel = functools.partial(_linear_ktile_kernel, activation=activation,
                               has_res=has_res, nk=nk)
    return pl.pallas_call(
        kernel,
        out_shape=jax.ShapeDtypeStruct((M, Np), jnp.bfloat16),
        grid=(M // tm_e, Np // tn_e, nk),
        in_specs=in_specs,
        out_specs=pl.BlockSpec((tm_e, tn_e), lambda i, j, k: (i, j)),
        scratch_shapes=[pltpu.VMEM((tm_e, tn_e), jnp.float32)],
        input_output_aliases=io_alias,
        compiler_params=pltpu.CompilerParams(
            dimension_semantics=("parallel", "parallel", "arbitrary"),
            vmem_limit_bytes=_VMEM_LIMIT),
    )(*inputs)


# ------------------------------ attention kernel -------------------------------

def _attn_kernel(q_ref, k_ref, v_ref, o_ref, *, heads, dh, dim, d_pad,
                 n_real, scale):
    tq = q_ref.shape[1]
    nkeys = k_ref.shape[1]
    key_idx = jax.lax.broadcasted_iota(jnp.int32, (tq, nkeys), 1)
    valid = key_idx < n_real                    # mask padded key tokens
    outs = []
    for h in range(heads):                      # static unroll over heads
        sl = slice(h * dh, (h + 1) * dh)
        qh = q_ref[0, :, sl]                    # bf16 (tq, dh)
        kh = k_ref[0, :, sl]                    # bf16 (nkeys, dh)
        vh = v_ref[0, :, sl]
        # contract q dim 1 with k dim 1 -> no explicit k.T / XLU transpose
        s = jax.lax.dot_general(qh, kh, (((1,), (1,)), ((), ())),
                                preferred_element_type=jnp.float32) * scale
        s = jnp.where(valid, s, -1e30)
        s = s - jnp.max(s, axis=-1, keepdims=True)
        p = jnp.exp(s)
        p = p / jnp.sum(p, axis=-1, keepdims=True)       # exact softmax normalization
        outs.append(jnp.dot(p.astype(jnp.bfloat16), vh,
                            preferred_element_type=jnp.float32))
    if d_pad > dim:
        outs.append(jnp.zeros((tq, d_pad - dim), jnp.float32))
    # TODO(synk): replace the concat with direct per-head (or 128-lane head-pair)
    # stores into o_ref slices once unaligned-lane ref stores are validated.
    o_ref[0] = jnp.concatenate(outs, axis=-1).astype(o_ref.dtype)


def attention(qkv, *, heads, dim, n_real, tq=256):
    """qkv: (B, n_pad, 3*Dp) bf16 with [q | k | v] sections each Dp wide ->
    (B, n_pad, Dp) bf16.  q-row-tiled; K/V of a batch stay VMEM-resident across the
    q tiles (their block indices do not change), bounding VMEM to a few MB."""
    B, n_pad, three_dp = qkv.shape
    d_pad = three_dp // 3
    dh = dim // heads
    tq_e = _pick_tile(n_pad, tq, 128)
    kernel = functools.partial(_attn_kernel, heads=heads, dh=dh, dim=dim,
                               d_pad=d_pad, n_real=int(n_real),
                               scale=float(dh) ** -0.5)
    return pl.pallas_call(
        kernel,
        out_shape=jax.ShapeDtypeStruct((B, n_pad, d_pad), jnp.bfloat16),
        grid=(B, n_pad // tq_e),
        in_specs=[pl.BlockSpec((1, tq_e, d_pad), lambda b, q: (b, q, 0)),   # q cols
                  pl.BlockSpec((1, n_pad, d_pad), lambda b, q: (b, 0, 1)),  # k cols
                  pl.BlockSpec((1, n_pad, d_pad), lambda b, q: (b, 0, 2))], # v cols
        out_specs=pl.BlockSpec((1, tq_e, d_pad), lambda b, q: (b, q, 0)),
        compiler_params=pltpu.CompilerParams(
            dimension_semantics=("parallel", "parallel"),
            vmem_limit_bytes=_VMEM_LIMIT),
    )(qkv, qkv, qkv)


# ------------------------------ layernorm kernel -------------------------------

def _layernorm_kernel(x_ref, g_ref, b_ref, o_ref, *, eps, d_real):
    x = x_ref[...].astype(jnp.float32)
    col = jax.lax.broadcasted_iota(jnp.int32, x.shape, 1)
    mask = (col < d_real).astype(jnp.float32)
    inv_d = 1.0 / float(d_real)
    mean = jnp.sum(x * mask, axis=-1, keepdims=True) * inv_d
    xc = (x - mean) * mask
    var = jnp.sum(xc * xc, axis=-1, keepdims=True) * inv_d
    o_ref[...] = (xc * jax.lax.rsqrt(var + eps) * g_ref[...]
                  + b_ref[...]).astype(o_ref.dtype)


def layernorm(x, g, b, *, d_real, eps=1e-6):
    """Standalone LayerNorm (only used on the cls-token rows)."""
    M, Dp = x.shape
    Mp = _round_up(M, 8)
    xp = _pad_to(x, (Mp, Dp))
    out = pl.pallas_call(
        functools.partial(_layernorm_kernel, eps=float(eps), d_real=int(d_real)),
        out_shape=jax.ShapeDtypeStruct((Mp, Dp), jnp.float32),
        grid=(1,),
        in_specs=[pl.BlockSpec((Mp, Dp), lambda i: (0, 0)),
                  pl.BlockSpec((1, Dp), lambda i: (0, 0)),
                  pl.BlockSpec((1, Dp), lambda i: (0, 0))],
        out_specs=pl.BlockSpec((Mp, Dp), lambda i: (0, 0)),
        compiler_params=pltpu.CompilerParams(vmem_limit_bytes=_VMEM_LIMIT),
    )(xp, g, b)
    return out[:M]


# --------------------------- parameters & weight prep --------------------------

def init_params(key, *, in_chans=3, img_size=16, patch_size=8, dim=32, depth=2,
                mlp_ratio=4):
    """Deterministic synthetic DINOv2-style ViT parameters (f32, state-dict-like)."""
    num_patches = (img_size // patch_size) ** 2
    num_tokens = num_patches + 1
    hidden = dim * mlp_ratio
    patch_dim = in_chans * patch_size * patch_size
    keys = jax.random.split(key, 3 + depth * 4)
    k_it = iter(keys)

    def w_init(k, shape):
        return (0.02 * jax.random.normal(k, shape)).astype(jnp.float32)

    params = {
        # Conv2d(in_chans, dim, kernel=p, stride=p) weight flattened to (C*p*p, dim):
        # stride==kernel makes it a per-patch matmul.
        "patch_w": w_init(next(k_it), (patch_dim, dim)),
        "patch_b": jnp.zeros((dim,), jnp.float32),
        "cls_token": w_init(next(k_it), (1, 1, dim)),
        "pos_embed": w_init(next(k_it), (1, num_tokens, dim)),
        "norm_w": jnp.ones((dim,), jnp.float32),
        "norm_b": jnp.zeros((dim,), jnp.float32),
        "blocks": [],
    }
    for _ in range(depth):
        params["blocks"].append({
            "norm1_w": jnp.ones((dim,), jnp.float32),
            "norm1_b": jnp.zeros((dim,), jnp.float32),
            "qkv_w": w_init(next(k_it), (dim, 3 * dim)),   # [q | k | v] columns
            "qkv_b": jnp.zeros((3 * dim,), jnp.float32),
            "proj_w": w_init(next(k_it), (dim, dim)),
            "proj_b": jnp.zeros((dim,), jnp.float32),
            "ls1": jnp.full((dim,), 1e-5, jnp.float32),    # DINOv2 LayerScale init
            "norm2_w": jnp.ones((dim,), jnp.float32),
            "norm2_b": jnp.zeros((dim,), jnp.float32),
            "fc1_w": w_init(next(k_it), (dim, hidden)),
            "fc1_b": jnp.zeros((hidden,), jnp.float32),
            "fc2_w": w_init(next(k_it), (hidden, dim)),
            "fc2_b": jnp.zeros((dim,), jnp.float32),
            "ls2": jnp.full((dim,), 1e-5, jnp.float32),
        })
    return params


def prepare_params(params, *, dim, mlp_ratio):
    """One-time weight prep: pad every matrix to lane-aligned shape and cast to
    bf16 (MXU operand dtype); pad vectors to (1, lane-aligned) f32.  The QKV weight
    is laid out as [q | k | v] sections each Dp columns wide so the attention
    kernel can select q/k/v via 128-aligned column block indices.  Padded rows /
    columns are zero (invariant relied on by the LN masking in the kernels)."""
    Dp = _round_up(dim, 128)
    hidden = dim * mlp_ratio
    Hp = _round_up(hidden, 128)
    patch_dim = params["patch_w"].shape[0]
    PDp = _round_up(patch_dim, 128)

    def pw(w, rp, cp):
        return _pad_to(w, (rp, cp)).astype(jnp.bfloat16)

    def pv(v, cp):
        return _pad_to(v.reshape(1, -1), (1, cp)).astype(jnp.float32)

    prep = {
        "patch_w": pw(params["patch_w"], PDp, Dp),
        "patch_b": pv(params["patch_b"], Dp),
        "cls0": pv(params["cls_token"][0, 0] + params["pos_embed"][0, 0], Dp),
        "pos_patch": _pad_to(params["pos_embed"][:, 1:, :],
                             (1, params["pos_embed"].shape[1] - 1, Dp)
                             ).astype(jnp.float32),
        "norm_g": pv(params["norm_w"], Dp),
        "norm_b": pv(params["norm_b"], Dp),
        "blocks": [],
    }
    for blk in params["blocks"]:
        qw, kw, vw = jnp.split(blk["qkv_w"], 3, axis=1)
        qb, kb, vb = jnp.split(blk["qkv_b"], 3)
        prep["blocks"].append({
            "qkv_w": jnp.concatenate([pw(qw, Dp, Dp), pw(kw, Dp, Dp),
                                      pw(vw, Dp, Dp)], axis=1),
            "qkv_b": jnp.concatenate([pv(qb, Dp), pv(kb, Dp), pv(vb, Dp)], axis=1),
            "norm1_g": pv(blk["norm1_w"], Dp),
            "norm1_b": pv(blk["norm1_b"], Dp),
            "proj_w": pw(blk["proj_w"], Dp, Dp),
            "proj_b": pv(blk["proj_b"], Dp),
            "ls1": pv(blk["ls1"], Dp),
            "norm2_g": pv(blk["norm2_w"], Dp),
            "norm2_b": pv(blk["norm2_b"], Dp),
            "fc1_w": pw(blk["fc1_w"], Dp, Hp),
            "fc1_b": pv(blk["fc1_b"], Hp),
            "fc2_w": pw(blk["fc2_w"], Hp, Dp),
            "fc2_b": pv(blk["fc2_b"], Dp),
            "ls2": pv(blk["ls2"], Dp),
        })
    return prep


# --------------------------------- forward ------------------------------------

def dino_forward(prep, img, *, patch_size, dim, heads, eps=1e-6):
    """DINOWrapper.forward: img (B, 3, H, W) NCHW -> cls-token features (B, dim)."""
    B, C, H, W = img.shape
    p = patch_size
    gh, gw = H // p, W // p
    n_patches = gh * gw
    n_tok = n_patches + 1
    PDp, Dp = prep["patch_w"].shape
    assert dim % heads == 0

    # Patch embedding: Conv2d(k=p, s=p) == non-overlapping patch extraction + matmul.
    patches = img.reshape(B, C, gh, p, gw, p).transpose(0, 2, 4, 1, 3, 5)
    patches = patches.reshape(B * n_patches, C * p * p)
    m0 = B * n_patches
    m0p = _round_up(m0, 8)
    patches = _pad_to(patches, (m0p, PDp)).astype(jnp.bfloat16)
    pe = linear(patches, prep["patch_w"], prep["patch_b"], tk=128)   # exercises k-tiled path
    pe = pe[:m0].astype(jnp.float32).reshape(B, n_patches, Dp)

    # Tokens: [cls | patches] + pos embed; token axis padded to a multiple of 128
    # ONCE so every downstream matmul / attention tile is full-lane aligned.
    cls = jnp.broadcast_to(prep["cls0"].reshape(1, 1, Dp), (B, 1, Dp))
    x = jnp.concatenate([cls, pe + prep["pos_patch"]], axis=1)
    n_pad = _round_up(n_tok, 128)
    x = _pad_to(x, (B, n_pad, Dp)).astype(jnp.bfloat16)
    xf = x.reshape(B * n_pad, Dp)                 # bf16 activations end-to-end

    for blk in prep["blocks"]:
        # x = x + ls1 * proj(attn(norm1(x)))
        qkv = linear(xf, blk["qkv_w"], blk["qkv_b"], k_real=dim,
                     ln=(blk["norm1_g"], blk["norm1_b"], eps))
        o = attention(qkv.reshape(B, n_pad, 3 * Dp), heads=heads, dim=dim,
                      n_real=n_tok)
        xf = linear(o.reshape(B * n_pad, Dp), blk["proj_w"], blk["proj_b"],
                    residual=xf, ls=blk["ls1"])
        # x = x + ls2 * fc2(gelu(fc1(norm2(x))))
        h = linear(xf, blk["fc1_w"], blk["fc1_b"], k_real=dim,
                   ln=(blk["norm2_g"], blk["norm2_b"], eps), activation="gelu")
        xf = linear(h, blk["fc2_w"], blk["fc2_b"], residual=xf, ls=blk["ls2"])

    # Final LayerNorm applied only to the cls-token rows (LayerNorm is per-token,
    # identical to norm-all-then-slice).  DINOv2 hub model head is Identity.
    cls_tok = xf.reshape(B, n_pad, Dp)[:, 0, :]
    feats = layernorm(cls_tok, prep["norm_g"], prep["norm_b"], d_real=dim, eps=eps)
    return feats[:, :dim]


# ----------------------------------- main --------------------------------------

if __name__ == "__main__":
    key = jax.random.PRNGKey(0)
    k_params, k_img = jax.random.split(key)

    # Small synthetic shapes consistent with the module: (..., 3, H, W) image input.
    B, C, H, W = 2, 3, 16, 16
    dim, depth, heads, mlp_ratio, patch = 32, 2, 2, 4, 8

    params = init_params(k_params, in_chans=C, img_size=H, patch_size=patch,
                         dim=dim, depth=depth, mlp_ratio=mlp_ratio)
    prep = prepare_params(params, dim=dim, mlp_ratio=mlp_ratio)   # one-time pad + bf16 cast
    img = jax.random.normal(k_img, (B, C, H, W), dtype=jnp.float32)

    fwd = jax.jit(functools.partial(dino_forward, patch_size=patch, dim=dim,
                                    heads=heads))
    feats = jax.block_until_ready(fwd(prep, img))

    assert feats.shape == (B, dim)
    assert feats.dtype == jnp.float32
    assert bool(jnp.all(jnp.isfinite(feats)))
    print("KERNEL_OK")
</pallas_src>

<mosaic_0001>
module attributes {stable_mosaic.version = 11 : i64} {
  func.func @_linear_ktile_kernel(%arg0: i32, %arg1: i32, %arg2: i32, %arg3: memref<8x128xbf16, #tpu.memory_space<vmem>>, %arg4: memref<128x128xbf16, #tpu.memory_space<vmem>>, %arg5: memref<1x128xf32, #tpu.memory_space<vmem>>, %arg6: memref<8x128xbf16, #tpu.memory_space<vmem>>, %arg7: memref<8x128xf32, #tpu.memory_space<vmem>>) attributes {dimension_semantics = [#tpu.dimension_semantics<parallel>, #tpu.dimension_semantics<parallel>, #tpu.dimension_semantics<arbitrary>], iteration_bounds = array<i64: 1, 1, 2>, scalar_prefetch = 0 : i64, scratch_operands = 1 : i64, tpu.core_type = #tpu.core_type<tc>, window_params = [{transform_indices = @transform_0, window_bounds = array<i64: 8, 128>}, {transform_indices = @transform_1, window_bounds = array<i64: 128, 128>}, {transform_indices = @transform_2, window_bounds = array<i64: 1, 128>}, {transform_indices = @transform_3, window_bounds = array<i64: 8, 128>}]} {
    %c0_i32 = arith.constant 0 : i32
    %0 = arith.cmpi eq, %arg2, %c0_i32 : i32
    %1 = arith.extui %0 : i1 to i32
    %c0_i32_0 = arith.constant 0 : i32
    %2 = arith.cmpi ne, %1, %c0_i32_0 : i32
    scf.if %2 {
      %cst_9 = arith.constant 0.000000e+00 : f32
      %12 = vector.broadcast %cst_9 : f32 to vector<8x128xf32>
      %c0_10 = arith.constant 0 : index
      %c0_11 = arith.constant 0 : index
      %13 = vector.load %arg7[%c0_10, %c0_11] : memref<8x128xf32, #tpu.memory_space<vmem>>, vector<8x128xf32>
      tpu.vector_store %arg7[%c0_10, %c0_11], %12 {strides = array<i32>} : memref<8x128xf32, #tpu.memory_space<vmem>>, vector<8x128xf32>,
    } else {
    }
    %c0 = arith.constant 0 : index
    %c0_1 = arith.constant 0 : index
    %3 = vector.load %arg7[%c0, %c0_1] : memref<8x128xf32, #tpu.memory_space<vmem>>, vector<8x128xf32>
    %c0_2 = arith.constant 0 : index
    %c0_3 = arith.constant 0 : index
    %4 = vector.load %arg3[%c0_2, %c0_3] : memref<8x128xbf16, #tpu.memory_space<vmem>>, vector<8x128xbf16>
    %c0_4 = arith.constant 0 : index
    %c0_5 = arith.constant 0 : index
    %5 = vector.load %arg4[%c0_4, %c0_5] : memref<128x128xbf16, #tpu.memory_space<vmem>>, vector<128x128xbf16>
    %cst = arith.constant dense<0.000000e+00> : vector<8x128xf32>
    %6 = tpu.matmul %4, %5, %cst {dimension_numbers = #tpu.dot_dimension_numbers<[1], [0], [0], [1], [0, 0, 1, 1], [], []>} : vector<8x128xbf16>, vector<128x128xbf16>, vector<8x128xf32> -> vector<8x128xf32>
    %7 = arith.addf %3, %6 : vector<8x128xf32>
    %c0_6 = arith.constant 0 : index
    %c0_7 = arith.constant 0 : index
    %8 = vector.load %arg7[%c0_6, %c0_7] : memref<8x128xf32, #tpu.memory_space<vmem>>, vector<8x128xf32>
    tpu.vector_store %arg7[%c0_6, %c0_7], %7 {strides = array<i32>} : memref<8x128xf32, #tpu.memory_space<vmem>>, vector<8x128xf32>,
    %c1_i32 = arith.constant 1 : i32
    %9 = arith.cmpi eq, %arg2, %c1_i32 : i32
    %10 = arith.extui %9 : i1 to i32
    %c0_i32_8 = arith.constant 0 : i32
    %11 = arith.cmpi ne, %10, %c0_i32_8 : i32
    scf.if %11 {
      %c0_9 = arith.constant 0 : index
      %c0_10 = arith.constant 0 : index
      %12 = vector.load %arg7[%c0_9, %c0_10] : memref<8x128xf32, #tpu.memory_space<vmem>>, vector<8x128xf32>
      %c0_11 = arith.constant 0 : index
      %c0_12 = arith.constant 0 : index
      %13 = vector.load %arg5[%c0_11, %c0_12] : memref<1x128xf32, #tpu.memory_space<vmem>>, vector<1x128xf32>
      %14 = vector.broadcast %13 : vector<1x128xf32> to vector<8x128xf32>
      %15 = arith.addf %12, %14 : vector<8x128xf32>
      %16 = arith.truncf %15 : vector<8x128xf32> to vector<8x128xbf16>
      %c0_13 = arith.constant 0 : index
      %c0_14 = arith.constant 0 : index
      %17 = vector.load %arg6[%c0_13, %c0_14] : memref<8x128xbf16, #tpu.memory_space<vmem>>, vector<8x128xbf16>
      tpu.vector_store %arg6[%c0_13, %c0_14], %16 {strides = array<i32>} : memref<8x128xbf16, #tpu.memory_space<vmem>>, vector<8x128xbf16>,
    } else {
    }
    return
  }
  func.func @transform_0(%arg0: i32, %arg1: i32, %arg2: i32) -> (i32, i32) {
    %c0_i32 = arith.constant 0 : i32
    return %arg0, %arg2 : i32, i32
  }
  func.func @transform_1(%arg0: i32, %arg1: i32, %arg2: i32) -> (i32, i32) {
    %c0_i32 = arith.constant 0 : i32
    return %arg2, %arg1 : i32, i32
  }
  func.func @transform_2(%arg0: i32, %arg1: i32, %arg2: i32) -> (i32, i32) {
    %c0_i32 = arith.constant 0 : i32
    %c0_i32_0 = arith.constant 0 : i32
    return %c0_i32, %arg1 : i32, i32
  }
  func.func @transform_3(%arg0: i32, %arg1: i32, %arg2: i32) -> (i32, i32) {
    %c0_i32 = arith.constant 0 : i32
    return %arg0, %arg1 : i32, i32
  }
}

module attributes {stable_mosaic.version = 11 : i64} {
  func.func @_linear_nk1_kernel(%arg0: i32, %arg1: i32, %arg2: memref<256x128xbf16, #tpu.memory_space<vmem>>, %arg3: memref<128x384xbf16, #tpu.memory_space<vmem>>, %arg4: memref<1x384xf32, #tpu.memory_space<vmem>>, %arg5: memref<1x128xf32, #tpu.memory_space<vmem>>, %arg6: memref<1x128xf32, #tpu.memory_space<vmem>>, %arg7: memref<256x384xbf16, #tpu.memory_space<vmem>>, %arg8: memref<256x128xbf16, #tpu.memory_space<vmem>>) attributes {dimension_semantics = [#tpu.dimension_semantics<parallel>, #tpu.dimension_semantics<arbitrary>], iteration_bounds = array<i64: 1, 1>, scalar_prefetch = 0 : i64, scratch_operands = 1 : i64, tpu.core_type = #tpu.core_type<tc>, window_params = [{transform_indices = @transform_0, window_bounds = array<i64: 256, 128>}, {transform_indices = @transform_1, window_bounds = array<i64: 128, 384>}, {transform_indices = @transform_2, window_bounds = array<i64: 1, 384>}, {pipeline_mode = #tpu.pipeline_mode<synchronous>, transform_indices = @transform_3, window_bounds = array<i64: 1, 128>}, {pipeline_mode = #tpu.pipeline_mode<synchronous>, transform_indices = @transform_4, window_bounds = array<i64: 1, 128>}, {transform_indices = @transform_5, window_bounds = array<i64: 256, 384>}]} {
    %c0_i32 = arith.constant 0 : i32
    %0 = arith.cmpi eq, %arg1, %c0_i32 : i32
    %1 = arith.extui %0 : i1 to i32
    %c0_i32_0 = arith.constant 0 : i32
    %2 = arith.cmpi ne, %1, %c0_i32_0 : i32
    scf.if %2 {
      %c0_8 = arith.constant 0 : index
      %c0_9 = arith.constant 0 : index
      %11 = vector.load %arg2[%c0_8, %c0_9] : memref<256x128xbf16, #tpu.memory_space<vmem>>, vector<256x128xbf16>
      %12 = arith.extf %11 : vector<256x128xbf16> to vector<256x128xf32>
      %13 = tpu.iota {dimensions = array<i32: 1>} : vector<256x128xi32>
      %c32_i32 = arith.constant 32 : i32
      %14 = vector.broadcast %c32_i32 : i32 to vector<256x128xi32>
      %15 = arith.cmpi slt, %13, %14 : vector<256x128xi32>
      %16 = arith.extui %15 : vector<256x128xi1> to vector<256x128xi32>
      %17 = arith.sitofp %16 : vector<256x128xi32> to vector<256x128xf32>
      %18 = arith.mulf %12, %17 : vector<256x128xf32>
      %cst_10 = arith.constant dense<0.000000e+00> : vector<256xf32>
      %19 = vector.multi_reduction <add>, %18, %cst_10 [1] : vector<256x128xf32> to vector<256xf32>
      %20 = vector.shape_cast %19 : vector<256xf32> to vector<256x1xf32>
      %cst_11 = arith.constant 3.125000e-02 : f32
      %21 = vector.broadcast %cst_11 : f32 to vector<256x1xf32>
      %22 = arith.mulf %20, %21 : vector<256x1xf32>
      %23 = vector.broadcast %22 : vector<256x1xf32> to vector<256x128xf32>
      %24 = arith.subf %12, %23 : vector<256x128xf32>
      %25 = arith.mulf %24, %17 : vector<256x128xf32>
      %26 = arith.mulf %25, %25 : vector<256x128xf32>
      %cst_12 = arith.constant dense<0.000000e+00> : vector<256xf32>
      %27 = vector.multi_reduction <add>, %26, %cst_12 [1] : vector<256x128xf32> to vector<256xf32>
      %28 = vector.shape_cast %27 : vector<256xf32> to vector<256x1xf32>
      %cst_13 = arith.constant 3.125000e-02 : f32
      %29 = vector.broadcast %cst_13 : f32 to vector<256x1xf32>
      %30 = arith.mulf %28, %29 : vector<256x1xf32>
      %cst_14 = arith.constant 9.99999997E-7 : f32
      %31 = vector.broadcast %cst_14 : f32 to vector<256x1xf32>
      %32 = arith.addf %30, %31 : vector<256x1xf32>
      %33 = math.rsqrt %32 : vector<256x1xf32>
      %34 = vector.broadcast %33 : vector<256x1xf32> to vector<256x128xf32>
      %35 = arith.mulf %25, %34 : vector<256x128xf32>
      %c0_15 = arith.constant 0 : index
      %c0_16 = arith.constant 0 : index
      %36 = vector.load %arg5[%c0_15, %c0_16] : memref<1x128xf32, #tpu.memory_space<vmem>>, vector<1x128xf32>
      %37 = vector.broadcast %36 : vector<1x128xf32> to vector<256x128xf32>
      %38 = arith.mulf %35, %37 : vector<256x128xf32>
      %c0_17 = arith.constant 0 : index
      %c0_18 = arith.constant 0 : index
      %39 = vector.load %arg6[%c0_17, %c0_18] : memref<1x128xf32, #tpu.memory_space<vmem>>, vector<1x128xf32>
      %40 = vector.broadcast %39 : vector<1x128xf32> to vector<256x128xf32>
      %41 = arith.addf %38, %40 : vector<256x128xf32>
      %42 = arith.truncf %41 : vector<256x128xf32> to vector<256x128xbf16>
      %c0_19 = arith.constant 0 : index
      %c0_20 = arith.constant 0 : index
      %43 = vector.load %arg8[%c0_19, %c0_20] : memref<256x128xbf16, #tpu.memory_space<vmem>>, vector<256x128xbf16>
      tpu.vector_store %arg8[%c0_19, %c0_20], %42 {strides = array<i32>} : memref<256x128xbf16, #tpu.memory_space<vmem>>, vector<256x128xbf16>,
    } else {
    }
    %c0 = arith.constant 0 : index
    %c0_1 = arith.constant 0 : index
    %3 = vector.load %arg8[%c0, %c0_1] : memref<256x128xbf16, #tpu.memory_space<vmem>>, vector<256x128xbf16>
    %c0_2 = arith.constant 0 : index
    %c0_3 = arith.constant 0 : index
    %4 = vector.load %arg3[%c0_2, %c0_3] : memref<128x384xbf16, #tpu.memory_space<vmem>>, vector<128x384xbf16>
    %cst = arith.constant dense<0.000000e+00> : vector<256x384xf32>
    %5 = tpu.matmul %3, %4, %cst {dimension_numbers = #tpu.dot_dimension_numbers<[1], [0], [0], [1], [0, 0, 1, 1], [], []>} : vector<256x128xbf16>, vector<128x384xbf16>, vector<256x384xf32> -> vector<256x384xf32>
    %c0_4 = arith.constant 0 : index
    %c0_5 = arith.constant 0 : index
    %6 = vector.load %arg4[%c0_4, %c0_5] : memref<1x384xf32, #tpu.memory_space<vmem>>, vector<1x384xf32>
    %7 = vector.broadcast %6 : vector<1x384xf32> to vector<256x384xf32>
    %8 = arith.addf %5, %7 : vector<256x384xf32>
    %9 = arith.truncf %8 : vector<256x384xf32> to vector<256x384xbf16>
    %c0_6 = arith.constant 0 : index
    %c0_7 = arith.constant 0 : index
    %10 = vector.load %arg7[%c0_6, %c0_7] : memref<256x384xbf16, #tpu.memory_space<vmem>>, vector<256x384xbf16>
    tpu.vector_store %arg7[%c0_6, %c0_7], %9 {strides = array<i32>} : memref<256x384xbf16, #tpu.memory_space<vmem>>, vector<256x384xbf16>,
    return
  }
  func.func @transform_0(%arg0: i32, %arg1: i32) -> (i32, i32) {
    %c0_i32 = arith.constant 0 : i32
    %c0_i32_0 = arith.constant 0 : i32
    return %arg0, %c0_i32 : i32, i32
  }
  func.func @transform_1(%arg0: i32, %arg1: i32) -> (i32, i32) {
    %c0_i32 = arith.constant 0 : i32
    %c0_i32_0 = arith.constant 0 : i32
    return %c0_i32, %arg1 : i32, i32
  }
  func.func @transform_2(%arg0: i32, %arg1: i32) -> (i32, i32) {
    %c0_i32 = arith.constant 0 : i32
    %c0_i32_0 = arith.constant 0 : i32
    return %c0_i32, %arg1 : i32, i32
  }
  func.func @transform_3(%arg0: i32, %arg1: i32) -> (i32, i32) {
    %c0_i32 = arith.constant 0 : i32
    %c0_i32_0 = arith.constant 0 : i32
    %c0_i32_1 = arith.constant 0 : i32
    return %c0_i32, %c0_i32_0 : i32, i32
  }
  func.func @transform_4(%arg0: i32, %arg1: i32) -> (i32, i32) {
    %c0_i32 = arith.constant 0 : i32
    %c0_i32_0 = arith.constant 0 : i32
    %c0_i32_1 = arith.constant 0 : i32
    return %c0_i32, %c0_i32_0 : i32, i32
  }
  func.func @transform_5(%arg0: i32, %arg1: i32) -> (i32, i32) {
    %c0_i32 = arith.constant 0 : i32
    return %arg0, %arg1 : i32, i32
  }
}

module attributes {stable_mosaic.version = 11 : i64} {
  func.func @_attn_kernel(%arg0: i32, %arg1: i32, %arg2: memref<1x128x128xbf16, #tpu.memory_space<vmem>>, %arg3: memref<1x128x128xbf16, #tpu.memory_space<vmem>>, %arg4: memref<1x128x128xbf16, #tpu.memory_space<vmem>>, %arg5: memref<1x128x128xbf16, #tpu.memory_space<vmem>>) attributes {dimension_semantics = [#tpu.dimension_semantics<parallel>, #tpu.dimension_semantics<parallel>], iteration_bounds = array<i64: 2, 1>, scalar_prefetch = 0 : i64, scratch_operands = 0 : i64, tpu.core_type = #tpu.core_type<tc>, window_params = [{transform_indices = @transform_0, window_bounds = array<i64: 1, 128, 128>}, {transform_indices = @transform_1, window_bounds = array<i64: 1, 128, 128>}, {transform_indices = @transform_2, window_bounds = array<i64: 1, 128, 128>}, {transform_indices = @transform_3, window_bounds = array<i64: 1, 128, 128>}]} {
    %0 = tpu.iota {dimensions = array<i32: 1>} : vector<128x128xi32>
    %c5_i32 = arith.constant 5 : i32
    %1 = vector.broadcast %c5_i32 : i32 to vector<128x128xi32>
    %2 = arith.cmpi slt, %0, %1 : vector<128x128xi32>
    %c0 = arith.constant 0 : index
    %c0_0 = arith.constant 0 : index
    %c0_1 = arith.constant 0 : index
    %3 = vector.load %arg2[%c0, %c0_0, %c0_1] : memref<1x128x128xbf16, #tpu.memory_space<vmem>>, vector<1x128x16xbf16>
    %4 = vector.shape_cast %3 : vector<1x128x16xbf16> to vector<128x16xbf16>
    %c0_2 = arith.constant 0 : index
    %c0_3 = arith.constant 0 : index
    %c0_4 = arith.constant 0 : index
    %5 = vector.load %arg3[%c0_2, %c0_3, %c0_4] : memref<1x128x128xbf16, #tpu.memory_space<vmem>>, vector<1x128x16xbf16>
    %6 = vector.shape_cast %5 : vector<1x128x16xbf16> to vector<128x16xbf16>
    %c0_5 = arith.constant 0 : index
    %c0_6 = arith.constant 0 : index
    %c0_7 = arith.constant 0 : index
    %7 = vector.load %arg4[%c0_5, %c0_6, %c0_7] : memref<1x128x128xbf16, #tpu.memory_space<vmem>>, vector<1x128x16xbf16>
    %8 = vector.shape_cast %7 : vector<1x128x16xbf16> to vector<128x16xbf16>
    %cst = arith.constant dense<0.000000e+00> : vector<128x128xf32>
    %9 = tpu.matmul %4, %6, %cst {dimension_numbers = #tpu.dot_dimension_numbers<[1], [1], [0], [0], [0, 0, 1, 0], [], []>} : vector<128x16xbf16>, vector<128x16xbf16>, vector<128x128xf32> -> vector<128x128xf32>
    %cst_8 = arith.constant 2.500000e-01 : f32
    %10 = vector.broadcast %cst_8 : f32 to vector<128x128xf32>
    %11 = arith.mulf %9, %10 : vector<128x128xf32>
    %cst_9 = arith.constant -1.000000e+30 : f32
    %12 = vector.broadcast %cst_9 : f32 to vector<128x128xf32>
    %13 = arith.select %2, %11, %12 : vector<128x128xi1>, vector<128x128xf32>
    %cst_10 = arith.constant dense<0xFF800000> : vector<128xf32>
    %14 = vector.multi_reduction <maximumf>, %13, %cst_10 [1] : vector<128x128xf32> to vector<128xf32>
    %15 = vector.shape_cast %14 : vector<128xf32> to vector<128x1xf32>
    %16 = vector.broadcast %15 : vector<128x1xf32> to vector<128x128xf32>
    %17 = arith.subf %13, %16 : vector<128x128xf32>
    %18 = math.exp %17 : vector<128x128xf32>
    %cst_11 = arith.constant dense<0.000000e+00> : vector<128xf32>
    %19 = vector.multi_reduction <add>, %18, %cst_11 [1] : vector<128x128xf32> to vector<128xf32>
    %20 = vector.shape_cast %19 : vector<128xf32> to vector<128x1xf32>
    %21 = vector.broadcast %20 : vector<128x1xf32> to vector<128x128xf32>
    %22 = arith.divf %18, %21 : vector<128x128xf32>
    %23 = arith.truncf %22 : vector<128x128xf32> to vector<128x128xbf16>
    %cst_12 = arith.constant dense<0.000000e+00> : vector<128x16xf32>
    %24 = tpu.matmul %23, %8, %cst_12 {dimension_numbers = #tpu.dot_dimension_numbers<[1], [0], [0], [1], [0, 0, 1, 1], [], []>} : vector<128x128xbf16>, vector<128x16xbf16>, vector<128x16xf32> -> vector<128x16xf32>
    %c0_13 = arith.constant 0 : index
    %c0_14 = arith.constant 0 : index
    %c16 = arith.constant 16 : index
    %25 = vector.load %arg2[%c0_13, %c0_14, %c16] : memref<1x128x128xbf16, #tpu.memory_space<vmem>>, vector<1x128x16xbf16>
    %26 = vector.shape_cast %25 : vector<1x128x16xbf16> to vector<128x16xbf16>
    %c0_15 = arith.constant 0 : index
    %c0_16 = arith.constant 0 : index
    %c16_17 = arith.constant 16 : index
    %27 = vector.load %arg3[%c0_15, %c0_16, %c16_17] : memref<1x128x128xbf16, #tpu.memory_space<vmem>>, vector<1x128x16xbf16>
    %28 = vector.shape_cast %27 : vector<1x128x16xbf16> to vector<128x16xbf16>
    %c0_18 = arith.constant 0 : index
    %c0_19 = arith.constant 0 : index
    %c16_20 = arith.constant 16 : index
    %29 = vector.load %arg4[%c0_18, %c0_19, %c16_20] : memref<1x128x128xbf16, #tpu.memory_space<vmem>>, vector<1x128x16xbf16>
    %30 = vector.shape_cast %29 : vector<1x128x16xbf16> to vector<128x16xbf16>
    %cst_21 = arith.constant dense<0.000000e+00> : vector<128x128xf32>
    %31 = tpu.matmul %26, %28, %cst_21 {dimension_numbers = #tpu.dot_dimension_numbers<[1], [1], [0], [0], [0, 0, 1, 0], [], []>} : vector<128x16xbf16>, vector<128x16xbf16>, vector<128x128xf32> -> vector<128x128xf32>
    %cst_22 = arith.constant 2.500000e-01 : f32
    %32 = vector.broadcast %cst_22 : f32 to vector<128x128xf32>
    %33 = arith.mulf %31, %32 : vector<128x128xf32>
    %cst_23 = arith.constant -1.000000e+30 : f32
    %34 = vector.broadcast %cst_23 : f32 to vector<128x128xf32>
    %35 = arith.select %2, %33, %34 : vector<128x128xi1>, vector<128x128xf32>
    %cst_24 = arith.constant dense<0xFF800000> : vector<128xf32>
    %36 = vector.multi_reduction <maximumf>, %35, %cst_24 [1] : vector<128x128xf32> to vector<128xf32>
    %37 = vector.shape_cast %36 : vector<128xf32> to vector<128x1xf32>
    %38 = vector.broadcast %37 : vector<128x1xf32> to vector<128x128xf32>
    %39 = arith.subf %35, %38 : vector<128x128xf32>
    %40 = math.exp %39 : vector<128x128xf32>
    %cst_25 = arith.constant dense<0.000000e+00> : vector<128xf32>
    %41 = vector.multi_reduction <add>, %40, %cst_25 [1] : vector<128x128xf32> to vector<128xf32>
    %42 = vector.shape_cast %41 : vector<128xf32> to vector<128x1xf32>
    %43 = vector.broadcast %42 : vector<128x1xf32> to vector<128x128xf32>
    %44 = arith.divf %40, %43 : vector<128x128xf32>
    %45 = arith.truncf %44 : vector<128x128xf32> to vector<128x128xbf16>
    %cst_26 = arith.constant dense<0.000000e+00> : vector<128x16xf32>
    %46 = tpu.matmul %45, %30, %cst_26 {dimension_numbers = #tpu.dot_dimension_numbers<[1], [0], [0], [1], [0, 0, 1, 1], [], []>} : vector<128x128xbf16>, vector<128x16xbf16>, vector<128x16xf32> -> vector<128x16xf32>
    %cst_27 = arith.constant 0.000000e+00 : f32
    %47 = vector.broadcast %cst_27 : f32 to vector<128x96xf32>
    %48 = tpu.concatenate %24, %46, %47 in 1 : vector<128x16xf32>, vector<128x16xf32>, vector<128x96xf32> -> vector<128x128xf32>
    %49 = arith.truncf %48 : vector<128x128xf32> to vector<128x128xbf16>
    %c0_28 = arith.constant 0 : index
    %c0_29 = arith.constant 0 : index
    %c0_30 = arith.constant 0 : index
    %50 = vector.load %arg5[%c0_28, %c0_29, %c0_30] : memref<1x128x128xbf16, #tpu.memory_space<vmem>>, vector<1x128x128xbf16>
    %51 = vector.shape_cast %50 : vector<1x128x128xbf16> to vector<128x128xbf16>
    %52 = vector.shape_cast %49 : vector<128x128xbf16> to vector<1x128x128xbf16>
    tpu.vector_store %arg5[%c0_28, %c0_29, %c0_30], %52 {strides = array<i32>} : memref<1x128x128xbf16, #tpu.memory_space<vmem>>, vector<1x128x128xbf16>,
    return
  }
  func.func @transform_0(%arg0: i32, %arg1: i32) -> (i32, i32, i32) {
    %c0_i32 = arith.constant 0 : i32
    %c0_i32_0 = arith.constant 0 : i32
    return %arg0, %arg1, %c0_i32 : i32, i32, i32
  }
  func.func @transform_1(%arg0: i32, %arg1: i32) -> (i32, i32, i32) {
    %c0_i32 = arith.constant 0 : i32
    %c1_i32 = arith.constant 1 : i32
    %c0_i32_0 = arith.constant 0 : i32
    return %arg0, %c0_i32, %c1_i32 : i32, i32, i32
  }
  func.func @transform_2(%arg0: i32, %arg1: i32) -> (i32, i32, i32) {
    %c0_i32 = arith.constant 0 : i32
    %c2_i32 = arith.constant 2 : i32
    %c0_i32_0 = arith.constant 0 : i32
    return %arg0, %c0_i32, %c2_i32 : i32, i32, i32
  }
  func.func @transform_3(%arg0: i32, %arg1: i32) -> (i32, i32, i32) {
    %c0_i32 = arith.constant 0 : i32
    %c0_i32_0 = arith.constant 0 : i32
    return %arg0, %arg1, %c0_i32 : i32, i32, i32
  }
}

module attributes {stable_mosaic.version = 11 : i64} {
  func.func @_linear_nk1_kernel(%arg0: i32, %arg1: i32, %arg2: memref<256x128xbf16, #tpu.memory_space<vmem>>, %arg3: memref<128x128xbf16, #tpu.memory_space<vmem>>, %arg4: memref<1x128xf32, #tpu.memory_space<vmem>>, %arg5: memref<256x128xbf16, #tpu.memory_space<vmem>>, %arg6: memref<1x128xf32, #tpu.memory_space<vmem>>, %arg7: memref<256x128xbf16, #tpu.memory_space<vmem>>) attributes {dimension_semantics = [#tpu.dimension_semantics<parallel>, #tpu.dimension_semantics<parallel>], iteration_bounds = array<i64: 1, 1>, scalar_prefetch = 0 : i64, scratch_operands = 0 : i64, tpu.core_type = #tpu.core_type<tc>, window_params = [{transform_indices = @transform_0, window_bounds = array<i64: 256, 128>}, {transform_indices = @transform_1, window_bounds = array<i64: 128, 128>}, {transform_indices = @transform_2, window_bounds = array<i64: 1, 128>}, {transform_indices = @transform_3, window_bounds = array<i64: 256, 128>}, {transform_indices = @transform_4, window_bounds = array<i64: 1, 128>}, {transform_indices = @transform_5, window_bounds = array<i64: 256, 128>}]} {
    %c0 = arith.constant 0 : index
    %c0_0 = arith.constant 0 : index
    %0 = vector.load %arg2[%c0, %c0_0] : memref<256x128xbf16, #tpu.memory_space<vmem>>, vector<256x128xbf16>
    %c0_1 = arith.constant 0 : index
    %c0_2 = arith.constant 0 : index
    %1 = vector.load %arg3[%c0_1, %c0_2] : memref<128x128xbf16, #tpu.memory_space<vmem>>, vector<128x128xbf16>
    %cst = arith.constant dense<0.000000e+00> : vector<256x128xf32>
    %2 = tpu.matmul %0, %1, %cst {dimension_numbers = #tpu.dot_dimension_numbers<[1], [0], [0], [1], [0, 0, 1, 1], [], []>} : vector<256x128xbf16>, vector<128x128xbf16>, vector<256x128xf32> -> vector<256x128xf32>
    %c0_3 = arith.constant 0 : index
    %c0_4 = arith.constant 0 : index
    %3 = vector.load %arg4[%c0_3, %c0_4] : memref<1x128xf32, #tpu.memory_space<vmem>>, vector<1x128xf32>
    %4 = vector.broadcast %3 : vector<1x128xf32> to vector<256x128xf32>
    %5 = arith.addf %2, %4 : vector<256x128xf32>
    %c0_5 = arith.constant 0 : index
    %c0_6 = arith.constant 0 : index
    %6 = vector.load %arg5[%c0_5, %c0_6] : memref<256x128xbf16, #tpu.memory_space<vmem>>, vector<256x128xbf16>
    %7 = arith.extf %6 : vector<256x128xbf16> to vector<256x128xf32>
    %c0_7 = arith.constant 0 : index
    %c0_8 = arith.constant 0 : index
    %8 = vector.load %arg6[%c0_7, %c0_8] : memref<1x128xf32, #tpu.memory_space<vmem>>, vector<1x128xf32>
    %9 = vector.broadcast %8 : vector<1x128xf32> to vector<256x128xf32>
    %10 = arith.mulf %9, %5 : vector<256x128xf32>
    %11 = arith.addf %7, %10 : vector<256x128xf32>
    %12 = arith.truncf %11 : vector<256x128xf32> to vector<256x128xbf16>
    %c0_9 = arith.constant 0 : index
    %c0_10 = arith.constant 0 : index
    %13 = vector.load %arg7[%c0_9, %c0_10] : memref<256x128xbf16, #tpu.memory_space<vmem>>, vector<256x128xbf16>
    tpu.vector_store %arg7[%c0_9, %c0_10], %12 {strides = array<i32>} : memref<256x128xbf16, #tpu.memory_space<vmem>>, vector<256x128xbf16>,
    return
  }
  func.func @transform_0(%arg0: i32, %arg1: i32) -> (i32, i32) {
    %c0_i32 = arith.constant 0 : i32
    %c0_i32_0 = arith.constant 0 : i32
    return %arg0, %c0_i32 : i32, i32
  }
  func.func @transform_1(%arg0: i32, %arg1: i32) -> (i32, i32) {
    %c0_i32 = arith.constant 0 : i32
    %c0_i32_0 = arith.constant 0 : i32
    return %c0_i32, %arg1 : i32, i32
  }
  func.func @transform_2(%arg0: i32, %arg1: i32) -> (i32, i32) {
    %c0_i32 = arith.constant 0 : i32
    %c0_i32_0 = arith.constant 0 : i32
    return %c0_i32, %arg1 : i32, i32
  }
  func.func @transform_3(%arg0: i32, %arg1: i32) -> (i32, i32) {
    %c0_i32 = arith.constant 0 : i32
    return %arg0, %arg1 : i32, i32
  }
  func.func @transform_4(%arg0: i32, %arg1: i32) -> (i32, i32) {
    %c0_i32 = arith.constant 0 : i32
    %c0_i32_0 = arith.constant 0 : i32
    return %c0_i32, %arg1 : i32, i32
  }
  func.func @transform_5(%arg0: i32, %arg1: i32) -> (i32, i32) {
    %c0_i32 = arith.constant 0 : i32
    return %arg0, %arg1 : i32, i32
  }
}

module attributes {stable_mosaic.version = 11 : i64} {
  func.func @_linear_nk1_kernel(%arg0: i32, %arg1: i32, %arg2: memref<256x128xbf16, #tpu.memory_space<vmem>>, %arg3: memref<128x128xbf16, #tpu.memory_space<vmem>>, %arg4: memref<1x128xf32, #tpu.memory_space<vmem>>, %arg5: memref<1x128xf32, #tpu.memory_space<vmem>>, %arg6: memref<1x128xf32, #tpu.memory_space<vmem>>, %arg7: memref<256x128xbf16, #tpu.memory_space<vmem>>, %arg8: memref<256x128xbf16, #tpu.memory_space<vmem>>) attributes {dimension_semantics = [#tpu.dimension_semantics<parallel>, #tpu.dimension_semantics<arbitrary>], iteration_bounds = array<i64: 1, 1>, scalar_prefetch = 0 : i64, scratch_operands = 1 : i64, tpu.core_type = #tpu.core_type<tc>, window_params = [{transform_indices = @transform_0, window_bounds = array<i64: 256, 128>}, {transform_indices = @transform_1, window_bounds = array<i64: 128, 128>}, {transform_indices = @transform_2, window_bounds = array<i64: 1, 128>}, {pipeline_mode = #tpu.pipeline_mode<synchronous>, transform_indices = @transform_3, window_bounds = array<i64: 1, 128>}, {pipeline_mode = #tpu.pipeline_mode<synchronous>, transform_indices = @transform_4, window_bounds = array<i64: 1, 128>}, {transform_indices = @transform_5, window_bounds = array<i64: 256, 128>}]} {
    %c0_i32 = arith.constant 0 : i32
    %0 = arith.cmpi eq, %arg1, %c0_i32 : i32
    %1 = arith.extui %0 : i1 to i32
    %c0_i32_0 = arith.constant 0 : i32
    %2 = arith.cmpi ne, %1, %c0_i32_0 : i32
    scf.if %2 {
      %c0_12 = arith.constant 0 : index
      %c0_13 = arith.constant 0 : index
      %24 = vector.load %arg2[%c0_12, %c0_13] : memref<256x128xbf16, #tpu.memory_space<vmem>>, vector<256x128xbf16>
      %25 = arith.extf %24 : vector<256x128xbf16> to vector<256x128xf32>
      %26 = tpu.iota {dimensions = array<i32: 1>} : vector<256x128xi32>
      %c32_i32 = arith.constant 32 : i32
      %27 = vector.broadcast %c32_i32 : i32 to vector<256x128xi32>
      %28 = arith.cmpi slt, %26, %27 : vector<256x128xi32>
      %29 = arith.extui %28 : vector<256x128xi1> to vector<256x128xi32>
      %30 = arith.sitofp %29 : vector<256x128xi32> to vector<256x128xf32>
      %31 = arith.mulf %25, %30 : vector<256x128xf32>
      %cst_14 = arith.constant dense<0.000000e+00> : vector<256xf32>
      %32 = vector.multi_reduction <add>, %31, %cst_14 [1] : vector<256x128xf32> to vector<256xf32>
      %33 = vector.shape_cast %32 : vector<256xf32> to vector<256x1xf32>
      %cst_15 = arith.constant 3.125000e-02 : f32
      %34 = vector.broadcast %cst_15 : f32 to vector<256x1xf32>
      %35 = arith.mulf %33, %34 : vector<256x1xf32>
      %36 = vector.broadcast %35 : vector<256x1xf32> to vector<256x128xf32>
      %37 = arith.subf %25, %36 : vector<256x128xf32>
      %38 = arith.mulf %37, %30 : vector<256x128xf32>
      %39 = arith.mulf %38, %38 : vector<256x128xf32>
      %cst_16 = arith.constant dense<0.000000e+00> : vector<256xf32>
      %40 = vector.multi_reduction <add>, %39, %cst_16 [1] : vector<256x128xf32> to vector<256xf32>
      %41 = vector.shape_cast %40 : vector<256xf32> to vector<256x1xf32>
      %cst_17 = arith.constant 3.125000e-02 : f32
      %42 = vector.broadcast %cst_17 : f32 to vector<256x1xf32>
      %43 = arith.mulf %41, %42 : vector<256x1xf32>
      %cst_18 = arith.constant 9.99999997E-7 : f32
      %44 = vector.broadcast %cst_18 : f32 to vector<256x1xf32>
      %45 = arith.addf %43, %44 : vector<256x1xf32>
      %46 = math.rsqrt %45 : vector<256x1xf32>
      %47 = vector.broadcast %46 : vector<256x1xf32> to vector<256x128xf32>
      %48 = arith.mulf %38, %47 : vector<256x128xf32>
      %c0_19 = arith.constant 0 : index
      %c0_20 = arith.constant 0 : index
      %49 = vector.load %arg5[%c0_19, %c0_20] : memref<1x128xf32, #tpu.memory_space<vmem>>, vector<1x128xf32>
      %50 = vector.broadcast %49 : vector<1x128xf32> to vector<256x128xf32>
      %51 = arith.mulf %48, %50 : vector<256x128xf32>
      %c0_21 = arith.constant 0 : index
      %c0_22 = arith.constant 0 : index
      %52 = vector.load %arg6[%c0_21, %c0_22] : memref<1x128xf32, #tpu.memory_space<vmem>>, vector<1x128xf32>
      %53 = vector.broadcast %52 : vector<1x128xf32> to vector<256x128xf32>
      %54 = arith.addf %51, %53 : vector<256x128xf32>
      %55 = arith.truncf %54 : vector<256x128xf32> to vector<256x128xbf16>
      %c0_23 = arith.constant 0 : index
      %c0_24 = arith.constant 0 : index
      %56 = vector.load %arg8[%c0_23, %c0_24] : memref<256x128xbf16, #tpu.memory_space<vmem>>, vector<256x128xbf16>
      tpu.vector_store %arg8[%c0_23, %c0_24], %55 {strides = array<i32>} : memref<256x128xbf16, #tpu.memory_space<vmem>>, vector<256x128xbf16>,
    } else {
    }
    %c0 = arith.constant 0 : index
    %c0_1 = arith.constant 0 : index
    %3 = vector.load %arg8[%c0, %c0_1] : memref<256x128xbf16, #tpu.memory_space<vmem>>, vector<256x128xbf16>
    %c0_2 = arith.constant 0 : index
    %c0_3 = arith.constant 0 : index
    %4 = vector.load %arg3[%c0_2, %c0_3] : memref<128x128xbf16, #tpu.memory_space<vmem>>, vector<128x128xbf16>
    %cst = arith.constant dense<0.000000e+00> : vector<256x128xf32>
    %5 = tpu.matmul %3, %4, %cst {dimension_numbers = #tpu.dot_dimension_numbers<[1], [0], [0], [1], [0, 0, 1, 1], [], []>} : vector<256x128xbf16>, vector<128x128xbf16>, vector<256x128xf32> -> vector<256x128xf32>
    %c0_4 = arith.constant 0 : index
    %c0_5 = arith.constant 0 : index
    %6 = vector.load %arg4[%c0_4, %c0_5] : memref<1x128xf32, #tpu.memory_space<vmem>>, vector<1x128xf32>
    %7 = vector.broadcast %6 : vector<1x128xf32> to vector<256x128xf32>
    %8 = arith.addf %5, %7 : vector<256x128xf32>
    %cst_6 = arith.constant 5.000000e-01 : f32
    %9 = vector.broadcast %cst_6 : f32 to vector<256x128xf32>
    %10 = arith.mulf %9, %8 : vector<256x128xf32>
    %cst_7 = arith.constant 4.471500e-02 : f32
    %11 = vector.broadcast %cst_7 : f32 to vector<256x128xf32>
    %12 = arith.mulf %11, %8 : vector<256x128xf32>
    %13 = arith.mulf %12, %8 : vector<256x128xf32>
    %14 = arith.mulf %13, %8 : vector<256x128xf32>
    %15 = arith.addf %8, %14 : vector<256x128xf32>
    %cst_8 = arith.constant 0.797884583 : f32
    %16 = vector.broadcast %cst_8 : f32 to vector<256x128xf32>
    %17 = arith.mulf %16, %15 : vector<256x128xf32>
    %18 = math.tanh %17 : vector<256x128xf32>
    %cst_9 = arith.constant 1.000000e+00 : f32
    %19 = vector.broadcast %cst_9 : f32 to vector<256x128xf32>
    %20 = arith.addf %19, %18 : vector<256x128xf32>
    %21 = arith.mulf %10, %20 : vector<256x128xf32>
    %22 = arith.truncf %21 : vector<256x128xf32> to vector<256x128xbf16>
    %c0_10 = arith.constant 0 : index
    %c0_11 = arith.constant 0 : index
    %23 = vector.load %arg7[%c0_10, %c0_11] : memref<256x128xbf16, #tpu.memory_space<vmem>>, vector<256x128xbf16>
    tpu.vector_store %arg7[%c0_10, %c0_11], %22 {strides = array<i32>} : memref<256x128xbf16, #tpu.memory_space<vmem>>, vector<256x128xbf16>,
    return
  }
  func.func @transform_0(%arg0: i32, %arg1: i32) -> (i32, i32) {
    %c0_i32 = arith.constant 0 : i32
    %c0_i32_0 = arith.constant 0 : i32
    return %arg0, %c0_i32 : i32, i32
  }
  func.func @transform_1(%arg0: i32, %arg1: i32) -> (i32, i32) {
    %c0_i32 = arith.constant 0 : i32
    %c0_i32_0 = arith.constant 0 : i32
    return %c0_i32, %arg1 : i32, i32
  }
  func.func @transform_2(%arg0: i32, %arg1: i32) -> (i32, i32) {
    %c0_i32 = arith.constant 0 : i32
    %c0_i32_0 = arith.constant 0 : i32
    return %c0_i32, %arg1 : i32, i32
  }
  func.func @transform_3(%arg0: i32, %arg1: i32) -> (i32, i32) {
    %c0_i32 = arith.constant 0 : i32
    %c0_i32_0 = arith.constant 0 : i32
    %c0_i32_1 = arith.constant 0 : i32
    return %c0_i32, %c0_i32_0 : i32, i32
  }
  func.func @transform_4(%arg0: i32, %arg1: i32) -> (i32, i32) {
    %c0_i32 = arith.constant 0 : i32
    %c0_i32_0 = arith.constant 0 : i32
    %c0_i32_1 = arith.constant 0 : i32
    return %c0_i32, %c0_i32_0 : i32, i32
  }
  func.func @transform_5(%arg0: i32, %arg1: i32) -> (i32, i32) {
    %c0_i32 = arith.constant 0 : i32
    return %arg0, %arg1 : i32, i32
  }
}

module attributes {stable_mosaic.version = 11 : i64} {
  func.func @_linear_nk1_kernel(%arg0: i32, %arg1: i32, %arg2: memref<256x128xbf16, #tpu.memory_space<vmem>>, %arg3: memref<128x128xbf16, #tpu.memory_space<vmem>>, %arg4: memref<1x128xf32, #tpu.memory_space<vmem>>, %arg5: memref<256x128xbf16, #tpu.memory_space<vmem>>, %arg6: memref<1x128xf32, #tpu.memory_space<vmem>>, %arg7: memref<256x128xbf16, #tpu.memory_space<vmem>>) attributes {dimension_semantics = [#tpu.dimension_semantics<parallel>, #tpu.dimension_semantics<parallel>], iteration_bounds = array<i64: 1, 1>, scalar_prefetch = 0 : i64, scratch_operands = 0 : i64, tpu.core_type = #tpu.core_type<tc>, window_params = [{transform_indices = @transform_0, window_bounds = array<i64: 256, 128>}, {transform_indices = @transform_1, window_bounds = array<i64: 128, 128>}, {transform_indices = @transform_2, window_bounds = array<i64: 1, 128>}, {transform_indices = @transform_3, window_bounds = array<i64: 256, 128>}, {transform_indices = @transform_4, window_bounds = array<i64: 1, 128>}, {transform_indices = @transform_5, window_bounds = array<i64: 256, 128>}]} {
    %c0 = arith.constant 0 : index
    %c0_0 = arith.constant 0 : index
    %0 = vector.load %arg2[%c0, %c0_0] : memref<256x128xbf16, #tpu.memory_space<vmem>>, vector<256x128xbf16>
    %c0_1 = arith.constant 0 : index
    %c0_2 = arith.constant 0 : index
    %1 = vector.load %arg3[%c0_1, %c0_2] : memref<128x128xbf16, #tpu.memory_space<vmem>>, vector<128x128xbf16>
    %cst = arith.constant dense<0.000000e+00> : vector<256x128xf32>
    %2 = tpu.matmul %0, %1, %cst {dimension_numbers = #tpu.dot_dimension_numbers<[1], [0], [0], [1], [0, 0, 1, 1], [], []>} : vector<256x128xbf16>, vector<128x128xbf16>, vector<256x128xf32> -> vector<256x128xf32>
    %c0_3 = arith.constant 0 : index
    %c0_4 = arith.constant 0 : index
    %3 = vector.load %arg4[%c0_3, %c0_4] : memref<1x128xf32, #tpu.memory_space<vmem>>, vector<1x128xf32>
    %4 = vector.broadcast %3 : vector<1x128xf32> to vector<256x128xf32>
    %5 = arith.addf %2, %4 : vector<256x128xf32>
    %c0_5 = arith.constant 0 : index
    %c0_6 = arith.constant 0 : index
    %6 = vector.load %arg5[%c0_5, %c0_6] : memref<256x128xbf16, #tpu.memory_space<vmem>>, vector<256x128xbf16>
    %7 = arith.extf %6 : vector<256x128xbf16> to vector<256x128xf32>
    %c0_7 = arith.constant 0 : index
    %c0_8 = arith.constant 0 : index
    %8 = vector.load %arg6[%c0_7, %c0_8] : memref<1x128xf32, #tpu.memory_space<vmem>>, vector<1x128xf32>
    %9 = vector.broadcast %8 : vector<1x128xf32> to vector<256x128xf32>
    %10 = arith.mulf %9, %5 : vector<256x128xf32>
    %11 = arith.addf %7, %10 : vector<256x128xf32>
    %12 = arith.truncf %11 : vector<256x128xf32> to vector<256x128xbf16>
    %c0_9 = arith.constant 0 : index
    %c0_10 = arith.constant 0 : index
    %13 = vector.load %arg7[%c0_9, %c0_10] : memref<256x128xbf16, #tpu.memory_space<vmem>>, vector<256x128xbf16>
    tpu.vector_store %arg7[%c0_9, %c0_10], %12 {strides = array<i32>} : memref<256x128xbf16, #tpu.memory_space<vmem>>, vector<256x128xbf16>,
    return
  }
  func.func @transform_0(%arg0: i32, %arg1: i32) -> (i32, i32) {
    %c0_i32 = arith.constant 0 : i32
    %c0_i32_0 = arith.constant 0 : i32
    return %arg0, %c0_i32 : i32, i32
  }
  func.func @transform_1(%arg0: i32, %arg1: i32) -> (i32, i32) {
    %c0_i32 = arith.constant 0 : i32
    %c0_i32_0 = arith.constant 0 : i32
    return %c0_i32, %arg1 : i32, i32
  }
  func.func @transform_2(%arg0: i32, %arg1: i32) -> (i32, i32) {
    %c0_i32 = arith.constant 0 : i32
    %c0_i32_0 = arith.constant 0 : i32
    return %c0_i32, %arg1 : i32, i32
  }
  func.func @transform_3(%arg0: i32, %arg1: i32) -> (i32, i32) {
    %c0_i32 = arith.constant 0 : i32
    return %arg0, %arg1 : i32, i32
  }
  func.func @transform_4(%arg0: i32, %arg1: i32) -> (i32, i32) {
    %c0_i32 = arith.constant 0 : i32
    %c0_i32_0 = arith.constant 0 : i32
    return %c0_i32, %arg1 : i32, i32
  }
  func.func @transform_5(%arg0: i32, %arg1: i32) -> (i32, i32) {
    %c0_i32 = arith.constant 0 : i32
    return %arg0, %arg1 : i32, i32
  }
}

module attributes {stable_mosaic.version = 11 : i64} {
  func.func @_linear_nk1_kernel(%arg0: i32, %arg1: i32, %arg2: memref<256x128xbf16, #tpu.memory_space<vmem>>, %arg3: memref<128x128xbf16, #tpu.memory_space<vmem>>, %arg4: memref<1x128xf32, #tpu.memory_space<vmem>>, %arg5: memref<1x128xf32, #tpu.memory_space<vmem>>, %arg6: memref<1x128xf32, #tpu.memory_space<vmem>>, %arg7: memref<256x128xbf16, #tpu.memory_space<vmem>>, %arg8: memref<256x128xbf16, #tpu.memory_space<vmem>>) attributes {dimension_semantics = [#tpu.dimension_semantics<parallel>, #tpu.dimension_semantics<arbitrary>], iteration_bounds = array<i64: 1, 1>, scalar_prefetch = 0 : i64, scratch_operands = 1 : i64, tpu.core_type = #tpu.core_type<tc>, window_params = [{transform_indices = @transform_0, window_bounds = array<i64: 256, 128>}, {transform_indices = @transform_1, window_bounds = array<i64: 128, 128>}, {transform_indices = @transform_2, window_bounds = array<i64: 1, 128>}, {pipeline_mode = #tpu.pipeline_mode<synchronous>, transform_indices = @transform_3, window_bounds = array<i64: 1, 128>}, {pipeline_mode = #tpu.pipeline_mode<synchronous>, transform_indices = @transform_4, window_bounds = array<i64: 1, 128>}, {transform_indices = @transform_5, window_bounds = array<i64: 256, 128>}]} {
    %c0_i32 = arith.constant 0 : i32
    %0 = arith.cmpi eq, %arg1, %c0_i32 : i32
    %1 = arith.extui %0 : i1 to i32
    %c0_i32_0 = arith.constant 0 : i32
    %2 = arith.cmpi ne, %1, %c0_i32_0 : i32
    scf.if %2 {
      %c0_12 = arith.constant 0 : index
      %c0_13 = arith.constant 0 : index
      %24 = vector.load %arg2[%c0_12, %c0_13] : memref<256x128xbf16, #tpu.memory_space<vmem>>, vector<256x128xbf16>
      %25 = arith.extf %24 : vector<256x128xbf16> to vector<256x128xf32>
      %26 = tpu.iota {dimensions = array<i32: 1>} : vector<256x128xi32>
      %c32_i32 = arith.constant 32 : i32
      %27 = vector.broadcast %c32_i32 : i32 to vector<256x128xi32>
      %28 = arith.cmpi slt, %26, %27 : vector<256x128xi32>
      %29 = arith.extui %28 : vector<256x128xi1> to vector<256x128xi32>
      %30 = arith.sitofp %29 : vector<256x128xi32> to vector<256x128xf32>
      %31 = arith.mulf %25, %30 : vector<256x128xf32>
      %cst_14 = arith.constant dense<0.000000e+00> : vector<256xf32>
      %32 = vector.multi_reduction <add>, %31, %cst_14 [1] : vector<256x128xf32> to vector<256xf32>
      %33 = vector.shape_cast %32 : vector<256xf32> to vector<256x1xf32>
      %cst_15 = arith.constant 3.125000e-02 : f32
      %34 = vector.broadcast %cst_15 : f32 to vector<256x1xf32>
      %35 = arith.mulf %33, %34 : vector<256x1xf32>
      %36 = vector.broadcast %35 : vector<256x1xf32> to vector<256x128xf32>
      %37 = arith.subf %25, %36 : vector<256x128xf32>
      %38 = arith.mulf %37, %30 : vector<256x128xf32>
      %39 = arith.mulf %38, %38 : vector<256x128xf32>
      %cst_16 = arith.constant dense<0.000000e+00> : vector<256xf32>
      %40 = vector.multi_reduction <add>, %39, %cst_16 [1] : vector<256x128xf32> to vector<256xf32>
      %41 = vector.shape_cast %40 : vector<256xf32> to vector<256x1xf32>
      %cst_17 = arith.constant 3.125000e-02 : f32
      %42 = vector.broadcast %cst_17 : f32 to vector<256x1xf32>
      %43 = arith.mulf %41, %42 : vector<256x1xf32>
      %cst_18 = arith.constant 9.99999997E-7 : f32
      %44 = vector.broadcast %cst_18 : f32 to vector<256x1xf32>
      %45 = arith.addf %43, %44 : vector<256x1xf32>
      %46 = math.rsqrt %45 : vector<256x1xf32>
      %47 = vector.broadcast %46 : vector<256x1xf32> to vector<256x128xf32>
      %48 = arith.mulf %38, %47 : vector<256x128xf32>
      %c0_19 = arith.constant 0 : index
      %c0_20 = arith.constant 0 : index
      %49 = vector.load %arg5[%c0_19, %c0_20] : memref<1x128xf32, #tpu.memory_space<vmem>>, vector<1x128xf32>
      %50 = vector.broadcast %49 : vector<1x128xf32> to vector<256x128xf32>
      %51 = arith.mulf %48, %50 : vector<256x128xf32>
      %c0_21 = arith.constant 0 : index
      %c0_22 = arith.constant 0 : index
      %52 = vector.load %arg6[%c0_21, %c0_22] : memref<1x128xf32, #tpu.memory_space<vmem>>, vector<1x128xf32>
      %53 = vector.broadcast %52 : vector<1x128xf32> to vector<256x128xf32>
      %54 = arith.addf %51, %53 : vector<256x128xf32>
      %55 = arith.truncf %54 : vector<256x128xf32> to vector<256x128xbf16>
      %c0_23 = arith.constant 0 : index
      %c0_24 = arith.constant 0 : index
      %56 = vector.load %arg8[%c0_23, %c0_24] : memref<256x128xbf16, #tpu.memory_space<vmem>>, vector<256x128xbf16>
      tpu.vector_store %arg8[%c0_23, %c0_24], %55 {strides = array<i32>} : memref<256x128xbf16, #tpu.memory_space<vmem>>, vector<256x128xbf16>,
    } else {
    }
    %c0 = arith.constant 0 : index
    %c0_1 = arith.constant 0 : index
    %3 = vector.load %arg8[%c0, %c0_1] : memref<256x128xbf16, #tpu.memory_space<vmem>>, vector<256x128xbf16>
    %c0_2 = arith.constant 0 : index
    %c0_3 = arith.constant 0 : index
    %4 = vector.load %arg3[%c0_2, %c0_3] : memref<128x128xbf16, #tpu.memory_space<vmem>>, vector<128x128xbf16>
    %cst = arith.constant dense<0.000000e+00> : vector<256x128xf32>
    %5 = tpu.matmul %3, %4, %cst {dimension_numbers = #tpu.dot_dimension_numbers<[1], [0], [0], [1], [0, 0, 1, 1], [], []>} : vector<256x128xbf16>, vector<128x128xbf16>, vector<256x128xf32> -> vector<256x128xf32>
    %c0_4 = arith.constant 0 : index
    %c0_5 = arith.constant 0 : index
    %6 = vector.load %arg4[%c0_4, %c0_5] : memref<1x128xf32, #tpu.memory_space<vmem>>, vector<1x128xf32>
    %7 = vector.broadcast %6 : vector<1x128xf32> to vector<256x128xf32>
    %8 = arith.addf %5, %7 : vector<256x128xf32>
    %cst_6 = arith.constant 5.000000e-01 : f32
    %9 = vector.broadcast %cst_6 : f32 to vector<256x128xf32>
    %10 = arith.mulf %9, %8 : vector<256x128xf32>
    %cst_7 = arith.constant 4.471500e-02 : f32
    %11 = vector.broadcast %cst_7 : f32 to vector<256x128xf32>
    %12 = arith.mulf %11, %8 : vector<256x128xf32>
    %13 = arith.mulf %12, %8 : vector<256x128xf32>
    %14 = arith.mulf %13, %8 : vector<256x128xf32>
    %15 = arith.addf %8, %14 : vector<256x128xf32>
    %cst_8 = arith.constant 0.797884583 : f32
    %16 = vector.broadcast %cst_8 : f32 to vector<256x128xf32>
    %17 = arith.mulf %16, %15 : vector<256x128xf32>
    %18 = math.tanh %17 : vector<256x128xf32>
    %cst_9 = arith.constant 1.000000e+00 : f32
    %19 = vector.broadcast %cst_9 : f32 to vector<256x128xf32>
    %20 = arith.addf %19, %18 : vector<256x128xf32>
    %21 = arith.mulf %10, %20 : vector<256x128xf32>
    %22 = arith.truncf %21 : vector<256x128xf32> to vector<256x128xbf16>
    %c0_10 = arith.constant 0 : index
    %c0_11 = arith.constant 0 : index
    %23 = vector.load %arg7[%c0_10, %c0_11] : memref<256x128xbf16, #tpu.memory_space<vmem>>, vector<256x128xbf16>
    tpu.vector_store %arg7[%c0_10, %c0_11], %22 {strides = array<i32>} : memref<256x128xbf16, #tpu.memory_space<vmem>>, vector<256x128xbf16>,
    return
  }
  func.func @transform_0(%arg0: i32, %arg1: i32) -> (i32, i32) {
    %c0_i32 = arith.constant 0 : i32
    %c0_i32_0 = arith.constant 0 : i32
    return %arg0, %c0_i32 : i32, i32
  }
  func.func @transform_1(%arg0: i32, %arg1: i32) -> (i32, i32) {
    %c0_i32 = arith.constant 0 : i32
    %c0_i32_0 = arith.constant 0 : i32
    return %c0_i32, %arg1 : i32, i32
  }
  func.func @transform_2(%arg0: i32, %arg1: i32) -> (i32, i32) {
    %c0_i32 = arith.constant 0 : i32
    %c0_i32_0 = arith.constant 0 : i32
    return %c0_i32, %arg1 : i32, i32
  }
  func.func @transform_3(%arg0: i32, %arg1: i32) -> (i32, i32) {
    %c0_i32 = arith.constant 0 : i32
    %c0_i32_0 = arith.constant 0 : i32
    %c0_i32_1 = arith.constant 0 : i32
    return %c0_i32, %c0_i32_0 : i32, i32
  }
  func.func @transform_4(%arg0: i32, %arg1: i32) -> (i32, i32) {
    %c0_i32 = arith.constant 0 : i32
    %c0_i32_0 = arith.constant 0 : i32
    %c0_i32_1 = arith.constant 0 : i32
    return %c0_i32, %c0_i32_0 : i32, i32
  }
  func.func @transform_5(%arg0: i32, %arg1: i32) -> (i32, i32) {
    %c0_i32 = arith.constant 0 : i32
    return %arg0, %arg1 : i32, i32
  }
}

module attributes {stable_mosaic.version = 11 : i64} {
  func.func @_layernorm_kernel(%arg0: i32, %arg1: memref<8x128xbf16, #tpu.memory_space<vmem>>, %arg2: memref<1x128xf32, #tpu.memory_space<vmem>>, %arg3: memref<1x128xf32, #tpu.memory_space<vmem>>, %arg4: memref<8x128xf32, #tpu.memory_space<vmem>>) attributes {dimension_semantics = [#tpu.dimension_semantics<arbitrary>], iteration_bounds = array<i64: 1>, scalar_prefetch = 0 : i64, scratch_operands = 0 : i64, tpu.core_type = #tpu.core_type<tc>, window_params = [{pipeline_mode = #tpu.pipeline_mode<synchronous>, transform_indices = @transform_0, window_bounds = array<i64: 8, 128>}, {pipeline_mode = #tpu.pipeline_mode<synchronous>, transform_indices = @transform_1, window_bounds = array<i64: 1, 128>}, {pipeline_mode = #tpu.pipeline_mode<synchronous>, transform_indices = @transform_2, window_bounds = array<i64: 1, 128>}, {pipeline_mode = #tpu.pipeline_mode<synchronous>, transform_indices = @transform_3, window_bounds = array<i64: 8, 128>}]} {
    %c0 = arith.constant 0 : index
    %c0_0 = arith.constant 0 : index
    %0 = vector.load %arg1[%c0, %c0_0] : memref<8x128xbf16, #tpu.memory_space<vmem>>, vector<8x128xbf16>
    %1 = arith.extf %0 : vector<8x128xbf16> to vector<8x128xf32>
    %2 = tpu.iota {dimensions = array<i32: 1>} : vector<8x128xi32>
    %c32_i32 = arith.constant 32 : i32
    %3 = vector.broadcast %c32_i32 : i32 to vector<8x128xi32>
    %4 = arith.cmpi slt, %2, %3 : vector<8x128xi32>
    %5 = arith.extui %4 : vector<8x128xi1> to vector<8x128xi32>
    %6 = arith.sitofp %5 : vector<8x128xi32> to vector<8x128xf32>
    %7 = arith.mulf %1, %6 : vector<8x128xf32>
    %cst = arith.constant dense<0.000000e+00> : vector<8xf32>
    %8 = vector.multi_reduction <add>, %7, %cst [1] : vector<8x128xf32> to vector<8xf32>
    %9 = vector.shape_cast %8 : vector<8xf32> to vector<8x1xf32>
    %cst_1 = arith.constant 3.125000e-02 : f32
    %10 = vector.broadcast %cst_1 : f32 to vector<8x1xf32>
    %11 = arith.mulf %9, %10 : vector<8x1xf32>
    %12 = vector.broadcast %11 : vector<8x1xf32> to vector<8x128xf32>
    %13 = arith.subf %1, %12 : vector<8x128xf32>
    %14 = arith.mulf %13, %6 : vector<8x128xf32>
    %15 = arith.mulf %14, %14 : vector<8x128xf32>
    %cst_2 = arith.constant dense<0.000000e+00> : vector<8xf32>
    %16 = vector.multi_reduction <add>, %15, %cst_2 [1] : vector<8x128xf32> to vector<8xf32>
    %17 = vector.shape_cast %16 : vector<8xf32> to vector<8x1xf32>
    %cst_3 = arith.constant 3.125000e-02 : f32
    %18 = vector.broadcast %cst_3 : f32 to vector<8x1xf32>
    %19 = arith.mulf %17, %18 : vector<8x1xf32>
    %cst_4 = arith.constant 9.99999997E-7 : f32
    %20 = vector.broadcast %cst_4 : f32 to vector<8x1xf32>
    %21 = arith.addf %19, %20 : vector<8x1xf32>
    %22 = math.rsqrt %21 : vector<8x1xf32>
    %23 = vector.broadcast %22 : vector<8x1xf32> to vector<8x128xf32>
    %24 = arith.mulf %14, %23 : vector<8x128xf32>
    %c0_5 = arith.constant 0 : index
    %c0_6 = arith.constant 0 : index
    %25 = vector.load %arg2[%c0_5, %c0_6] : memref<1x128xf32, #tpu.memory_space<vmem>>, vector<1x128xf32>
    %26 = vector.broadcast %25 : vector<1x128xf32> to vector<8x128xf32>
    %27 = arith.mulf %24, %26 : vector<8x128xf32>
    %c0_7 = arith.constant 0 : index
    %c0_8 = arith.constant 0 : index
    %28 = vector.load %arg3[%c0_7, %c0_8] : memref<1x128xf32, #tpu.memory_space<vmem>>, vector<1x128xf32>
    %29 = vector.broadcast %28 : vector<1x128xf32> to vector<8x128xf32>
    %30 = arith.addf %27, %29 : vector<8x128xf32>
    %c0_9 = arith.constant 0 : index
    %c0_10 = arith.constant 0 : index
    %31 = vector.load %arg4[%c0_9, %c0_10] : memref<8x128xf32, #tpu.memory_space<vmem>>, vector<8x128xf32>
    tpu.vector_store %arg4[%c0_9, %c0_10], %30 {strides = array<i32>} : memref<8x128xf32, #tpu.memory_space<vmem>>, vector<8x128xf32>,
    return
  }
  func.func @transform_0(%arg0: i32) -> (i32, i32) {
    %c0_i32 = arith.constant 0 : i32
    %c0_i32_0 = arith.constant 0 : i32
    %c0_i32_1 = arith.constant 0 : i32
    return %c0_i32, %c0_i32_0 : i32, i32
  }
  func.func @transform_1(%arg0: i32) -> (i32, i32) {
    %c0_i32 = arith.constant 0 : i32
    %c0_i32_0 = arith.constant 0 : i32
    %c0_i32_1 = arith.constant 0 : i32
    return %c0_i32, %c0_i32_0 : i32, i32
  }
  func.func @transform_2(%arg0: i32) -> (i32, i32) {
    %c0_i32 = arith.constant 0 : i32
    %c0_i32_0 = arith.constant 0 : i32
    %c0_i32_1 = arith.constant 0 : i32
    return %c0_i32, %c0_i32_0 : i32, i32
  }
  func.func @transform_3(%arg0: i32) -> (i32, i32) {
    %c0_i32 = arith.constant 0 : i32
    %c0_i32_0 = arith.constant 0 : i32
    %c0_i32_1 = arith.constant 0 : i32
    return %c0_i32, %c0_i32_0 : i32, i32
  }
}

</mosaic_0001>

<bundles_post_ra>
// kernel: dino_forward.12
= control target key start
LH: loop header
LB: loop body
LE: loop exit
PB: predicated region body
PF: predicated region fallthrough
CT: control target
= control target key end

     0   :  { %s581_s12 = smov 0   ;;  %s583_s13 = smov 0   ;;  %s627_s0 = inlined_call_operand.vmem [shape: bf16[8,256], index: 0, kind: input, shape index: {}]   ;;  %s628_s1 = inlined_call_operand.vmem [shape: bf16[256,128], index: 1, kind: input, shape index: {}]   ;;  %s629_s2 = inlined_call_operand.vmem [shape: f32[1,128], index: 2, kind: input, shape index: {}]   ;;  %s630_s3 = inlined_call_operand.vmem [shape: bf16[8,128], index: 3, kind: output, shape index: {}]  }
   0x1   :  { %s585_s14 = smov 0  }
   0x2 LB: > { %s25_s15 = sadd.s32 1, %s554_s13  ;;  %p461_p0 = scmp.ge.s32.totalorder %s558_s14, 1  ;;  %s558_s14 = sphi %s585_s14, %s13_s14   ;;  %s554_s13 = sphi %s583_s13, %s632_s13   ;;  %s550_s12 = sphi %s581_s12, %s631_s12  }
   0x3   : > { %p26_p1 = scmp.ge.s32.totalorder %s25_s15, 2  ;;  %p187_p2 = scmp.lt.s32.totalorder %s558_s14, 3 }
   0x5   : > { %s634_s15 = smov (%p26_p1, %s25_s15), 0  ;;  %p188_p3 = pnand %p461_p0, %p187_p2 }
   0x6   : > { %p229_p4 = scmp.lt.s32.totalorder (!%p188_p3), %s550_s12, 1  ;;  %s463_s16 = sshll.u32 (!%p188_p3), %s550_s12, 4 }
   0x7   : > { %191 = sbr.rel (%p188_p3) target bundleno = 193 (0xc1), region = 32  ;;  %p236_p5 = scmp.lt.s32.totalorder (!%p188_p3), %s463_s16, 31 }
   0x8   : > { %p465_p6 = scmp.ne.s32.totalorder (!%p188_p3), %s550_s12, 0 }
   0xc   : > { %s230_s17 = scalar_select %p229_p4, %s550_s12, 1 }
   0xd   : > { %s636_s16 = smov (!%p236_p5, %s463_s16), 31  ;;  %257 = sbr.rel (%p465_p6) target bundleno = 20 (0x14), region = 36 }
   0xe   : > { %s462_s18 = sshll.u32 %s230_s17, 2  ;;  %s464_s22 = sshll.u32 %s636_s16, 2 }
   0xf   : > { %s234_s21 = scalar_lea.vmem %s627_s0, %s462_s18  ;;  %s242_s25 = scalar_lea.vmem %s628_s1, %s464_s22 }
  0x12   : > { %v560_v0 = vmov 0.0  }
  0x13   : > { %258 = vst [vmem:[#allocation2] sm:$0xff] %v560_v0 }
  0x14 PF: > { %v509_v1 = vld [vmem:[%s242_s25 + $0x38] sm:$0xff]  ;;  %v508_v2 = vld [vmem:[%s242_s25 + $0x30] sm:$0xff]  ;;  %v507_v3 = vld [vmem:[%s242_s25 + $0x28] sm:$0xff]  ;;  %p498_p7 = scmp.ne.s32.totalorder %s550_s12, 1 }
  0x15   : > { %325 = vmatpush.bf16.msra.mxu0 %v509_v1  ;;  %v506_v4 = vld [vmem:[%s242_s25 + $0x20] sm:$0xff]  ;;  %v505_v5 = vld [vmem:[%s242_s25 + $0x18] sm:$0xff]  ;;  %v504_v6 = vld [vmem:[%s242_s25 + $0x10] sm:$0xff] }
  0x16   : > { %v503_v7 = vld [vmem:[%s242_s25 + $0x8] sm:$0xff]  ;;  %v502_v8 = vld [vmem:[%s242_s25] sm:$0xff] }
  0x17   : > { %v260_v9 = vld [vmem:[%s234_s21] sm:$0xf] }
  0x19   : > { %326 = vmatpush.bf16.msra.mxu0 %v508_v2 }
  0x1a   : > { %v259_v10 = vld [vmem:[#allocation2] sm:$0xff] }
  0x1d   : > { %327 = vmatpush.bf16.msra.mxu0 %v507_v3 }
  0x21   : > { %328 = vmatpush.bf16.msra.mxu0 %v506_v4 }
  0x25   : > { %329 = vmatpush.bf16.msra.mxu0 %v505_v5 }
  0x29   : > { %330 = vmatpush.bf16.msra.mxu0 %v504_v6 }
  0x2d   : > { %331 = vmatpush.bf16.msra.mxu0 %v503_v7 }
  0x31   : > { %332 = vmatpush.bf16.msra.mxu0 %v502_v8 }
  0x34   : > { %333 = vmatmul.bf16.vlgmr.msra.gmra.mxu0 %v260_v9 }
  0xb1   : > { %v334_v11 = vpop.f32.mrf.mxu0 }
  0xb2   : > { %v338_v12 = vadd.f32 %v334_v11, %v259_v10 }
  0xb4   : > { %339 = vst [vmem:[#allocation2] sm:$0xff] %v338_v12 }
  0xb5   : > { %343 = sbr.rel (%p498_p7) target bundleno = 193 (0xc1), region = 40 }
  0xb9   : > { %v336_v13 = vpop.f32.mrf.mxu0 }
  0xba   : > { %v535_v15 = vld [vmem:[%s629_s2] ss:$0 sm:$0xff] }
  0xbb   : > { %v344_v14 = vld [vmem:[#allocation2] sm:$0xff] }
  0xbc   : > { %v349_v16 = vadd.f32 %v535_v15, %v344_v14 }
  0xbe   : > { %v350_v17 = vpack.c.bf16 %v349_v16, %v349_v16 }
  0xc0   : > { %351 = vst [vmem:[%s630_s3] sm:$0xf] %v350_v17 }
  0xc1 PF: > { %s13_s14 = sadd.s32 1, %s558_s14   ;;  %s631_s12 = smov %s554_s13 }
  0xc2   : > { %p10_p8 = scmp.ge.s32.totalorder %s13_s14, 4   ;;  %s632_s13 = smov %s634_s15 }
  0xc4   :  { %12 = sbr.rel (!%p10_p8) target bundleno = 2 (0x2), region = 76 }

// kernel: dino_forward.15
= control target key start
LH: loop header
LB: loop body
LE: loop exit
PB: predicated region body
PF: predicated region fallthrough
CT: control target
= control target key end

     0   :  { %s1097_s1 = inlined_call_operand.vmem [shape: bf16[128,128], index: 1, kind: input, shape index: {}]   ;;  %s1098_s2 = inlined_call_operand.vmem [shape: f32[1,128], index: 2, kind: input, shape index: {}]   ;;  %s1099_s4 = inlined_call_operand.vmem [shape: f32[1,128], index: 4, kind: input, shape index: {}]   ;;  %s1100_s0 = inlined_call_operand.vmem [shape: bf16[256,128], index: 0, kind: input, shape index: {}]   ;;  %s1101_s3 = inlined_call_operand.vmem [shape: bf16[256,128], index: 3, kind: input, shape index: {}, may-alias: {3,5}]   ;;  %s1102_s5 = inlined_call_operand.vmem [shape: bf16[256,128], index: 5, kind: output, shape index: {}, may-alias: {3,5}]  }
   0x1   :  { %v624_v0 = vld [vmem:[%s1097_s1 + $0x38] sm:$0xff]  ;;  %v623_v1 = vld [vmem:[%s1097_s1 + $0x30] sm:$0xff]  ;;  %v622_v2 = vld [vmem:[%s1097_s1 + $0x28] sm:$0xff] }
   0x2   :  { %216 = vmatpush.bf16.msra.mxu0 %v624_v0  ;;  %799 = vmatpush.bf16.msra.mxu1 %v624_v0  ;;  %v621_v3 = vld [vmem:[%s1097_s1 + $0x20] sm:$0xff]  ;;  %v620_v4 = vld [vmem:[%s1097_s1 + $0x18] sm:$0xff]  ;;  %v619_v5 = vld [vmem:[%s1097_s1 + $0x10] sm:$0xff] }
   0x3   :  { %800 = vmatpush.bf16.msra.mxu2 %v624_v0  ;;  %801 = vmatpush.bf16.msra.mxu3 %v624_v0  ;;  %v618_v6 = vld [vmem:[%s1097_s1 + $0x8] sm:$0xff]  ;;  %v617_v7 = vld [vmem:[%s1097_s1] sm:$0xff]  ;;  %v603_v16 = vld [vmem:[%s1100_s0 + $0x10] sm:$0xff] }
   0x4   :  { %v601_v8 = vld [vmem:[%s1100_s0] sm:$0xff]  ;;  %v602_v12 = vld [vmem:[%s1100_s0 + $0x8] sm:$0xff]  ;;  %v607_v17 = vld [vmem:[%s1100_s0 + $0x30] sm:$0xff] }
   0x5   :  { %v605_v9 = vld [vmem:[%s1100_s0 + $0x20] sm:$0xff]  ;;  %v606_v13 = vld [vmem:[%s1100_s0 + $0x28] sm:$0xff]  ;;  %v611_v18 = vld [vmem:[%s1100_s0 + $0x50] sm:$0xff] }
   0x6   :  { %217 = vmatpush.bf16.msra.mxu0 %v623_v1  ;;  %802 = vmatpush.bf16.msra.mxu1 %v623_v1  ;;  %v609_v10 = vld [vmem:[%s1100_s0 + $0x40] sm:$0xff]  ;;  %v610_v14 = vld [vmem:[%s1100_s0 + $0x48] sm:$0xff]  ;;  %v615_v19 = vld [vmem:[%s1100_s0 + $0x70] sm:$0xff] }
   0x7   :  { %803 = vmatpush.bf16.msra.mxu2 %v623_v1  ;;  %804 = vmatpush.bf16.msra.mxu3 %v623_v1  ;;  %v613_v11 = vld [vmem:[%s1100_s0 + $0x60] sm:$0xff]  ;;  %v614_v15 = vld [vmem:[%s1100_s0 + $0x68] sm:$0xff]  ;;  %v604_v20 = vld [vmem:[%s1100_s0 + $0x18] sm:$0xff] }
   0x8   :  { %v608_v21 = vld [vmem:[%s1100_s0 + $0x38] sm:$0xff]  ;;  %v930_v26 = vld [vmem:[%s1098_s2] ss:$0 sm:$0xff] }
   0x9   :  { %v612_v22 = vld [vmem:[%s1100_s0 + $0x58] sm:$0xff]  ;;  %v626_v28 = vld [vmem:[%s1101_s3] sm:$0xff]  }
   0xa   :  { %218 = vmatpush.bf16.msra.mxu0 %v622_v2  ;;  %805 = vmatpush.bf16.msra.mxu1 %v622_v2  ;;  %v616_v23 = vld [vmem:[%s1100_s0 + $0x78] sm:$0xff]  ;;  %v939_v29 = vld [vmem:[%s1099_s4] ss:$0 sm:$0xff]  ;;  %v627_v34 = vunpack.c.l.bf16 %v626_v28  ;;  %v628_v37 = vunpack.c.h.bf16 %v626_v28 }
   0xb   :  { %806 = vmatpush.bf16.msra.mxu2 %v622_v2  ;;  %807 = vmatpush.bf16.msra.mxu3 %v622_v2  ;;  %v772_v31 = vld [vmem:[%s1101_s3 + $0x20] sm:$0xff]  }
   0xc   :  { %v643_v35 = vunpack.c.l.bf16 %v772_v31  ;;  %v644_v39 = vunpack.c.h.bf16 %v772_v31  ;;  %v776_v44 = vld [vmem:[%s1101_s3 + $0x40] sm:$0xff]  }
   0xd   :  { %v780_v45 = vld [vmem:[%s1101_s3 + $0x60] sm:$0xff]   ;;  %v659_v54 = vunpack.c.l.bf16 %v776_v44  ;;  %v660_v59 = vunpack.c.h.bf16 %v776_v44 }
   0xe   :  { %219 = vmatpush.bf16.msra.mxu0 %v621_v3  ;;  %808 = vmatpush.bf16.msra.mxu1 %v621_v3  ;;  %v675_v55 = vunpack.c.l.bf16 %v780_v45  ;;  %v676_v61 = vunpack.c.h.bf16 %v780_v45 }
   0xf   :  { %809 = vmatpush.bf16.msra.mxu2 %v621_v3  ;;  %810 = vmatpush.bf16.msra.mxu3 %v621_v3 }
  0x12   :  { %220 = vmatpush.bf16.msra.mxu0 %v620_v4  ;;  %811 = vmatpush.bf16.msra.mxu1 %v620_v4 }
  0x13   :  { %812 = vmatpush.bf16.msra.mxu2 %v620_v4  ;;  %813 = vmatpush.bf16.msra.mxu3 %v620_v4 }
  0x16   :  { %221 = vmatpush.bf16.msra.mxu0 %v619_v5  ;;  %814 = vmatpush.bf16.msra.mxu1 %v619_v5 }
  0x17   :  { %815 = vmatpush.bf16.msra.mxu2 %v619_v5  ;;  %816 = vmatpush.bf16.msra.mxu3 %v619_v5 }
  0x1a   :  { %222 = vmatpush.bf16.msra.mxu0 %v618_v6  ;;  %817 = vmatpush.bf16.msra.mxu1 %v618_v6 }
  0x1b   :  { %818 = vmatpush.bf16.msra.mxu2 %v618_v6  ;;  %819 = vmatpush.bf16.msra.mxu3 %v618_v6 }
  0x1e   :  { %223 = vmatpush.bf16.msra.mxu0 %v617_v7  ;;  %820 = vmatpush.bf16.msra.mxu1 %v617_v7 }
  0x1f   :  { %821 = vmatpush.bf16.msra.mxu2 %v617_v7  ;;  %822 = vmatpush.bf16.msra.mxu3 %v617_v7 }
  0x21   :  { %224 = vmatmul.bf16.vlgmr.msra.gmra.mxu0 %v601_v8  ;;  %244 = vmatmul.bf16.vlgmr.msra.gmra.mxu1 %v605_v9 }
  0x22   :  { %264 = vmatmul.bf16.vlgmr.msra.gmra.mxu2 %v609_v10  ;;  %284 = vmatmul.bf16.vlgmr.msra.gmra.mxu3 %v613_v11 }
  0x31   :  { %229 = vmatmul.bf16.gmra.mxu0 %v602_v12  ;;  %249 = vmatmul.bf16.gmra.mxu1 %v606_v13 }
  0x32   :  { %269 = vmatmul.bf16.gmra.mxu2 %v610_v14  ;;  %289 = vmatmul.bf16.gmra.mxu3 %v614_v15 }
  0x41   :  { %234 = vmatmul.bf16.gmra.mxu0 %v603_v16  ;;  %254 = vmatmul.bf16.gmra.mxu1 %v607_v17 }
  0x42   :  { %274 = vmatmul.bf16.gmra.mxu2 %v611_v18  ;;  %294 = vmatmul.bf16.gmra.mxu3 %v615_v19 }
  0x51   :  { %239 = vmatmul.bf16.gmra.mxu0 %v604_v20  ;;  %259 = vmatmul.bf16.gmra.mxu1 %v608_v21 }
  0x52   :  { %279 = vmatmul.bf16.gmra.mxu2 %v612_v22  ;;  %299 = vmatmul.bf16.gmra.mxu3 %v616_v23 }
  0x9e   :  { %v225_v24 = vpop.f32.mrf.mxu0  ;;  %v245_v25 = vpop.f32.mrf.mxu1 }
  0x9f   :  { %v226_v27 = vadd.f32 %v930_v26, %v225_v24  ;;  %v246_v30 = vadd.f32 %v930_v26, %v245_v25 }
  0xa1   :  { %v373_v40 = vmul.f32 %v939_v29, %v226_v27  ;;  %v381_v41 = vmul.f32 %v939_v29, %v246_v30 }
  0xa3   :  { %v405_v50 = vadd.f32 %v627_v34, %v373_v40  ;;  %v413_v51 = vadd.f32 %v643_v35, %v381_v41 }
  0xa5   :  { %v265_v32 = vpop.f32.mrf.mxu2  ;;  %v285_v33 = vpop.f32.mrf.mxu3 }
  0xa6   :  { %v227_v36 = vpop.f32.mrf.mxu0  ;;  %v247_v38 = vpop.f32.mrf.mxu1  ;;  %v266_v48 = vadd.f32 %v930_v26, %v265_v32  ;;  %v286_v49 = vadd.f32 %v930_v26, %v285_v33 }
  0xa7   :  { %v228_v42 = vadd.f32 %v930_v26, %v227_v36  ;;  %v248_v43 = vadd.f32 %v930_v26, %v247_v38 }
  0xa8   :  { %v389_v62 = vmul.f32 %v939_v29, %v266_v48  ;;  %v397_v63 = vmul.f32 %v939_v29, %v286_v49 }
  0xa9   :  { %v374_v46 = vmul.f32 %v939_v29, %v228_v42  ;;  %v382_v47 = vmul.f32 %v939_v29, %v248_v43 }
  0xaa   :  { %v421_v6 = vadd.f32 %v659_v54, %v389_v62  ;;  %v429_v7 = vadd.f32 %v675_v55, %v397_v63 }
  0xab   :  { %v406_v52 = vadd.f32 %v628_v37, %v374_v46  ;;  %v414_v53 = vadd.f32 %v644_v39, %v382_v47 }
  0xad   :  { %v692_v56 = vpack.c.bf16 %v406_v52, %v405_v50  ;;  %v712_v57 = vpack.c.bf16 %v414_v53, %v413_v51  ;;  %v267_v58 = vpop.f32.mrf.mxu2  ;;  %v287_v60 = vpop.f32.mrf.mxu3 }
  0xae   :  { %v268_v0 = vadd.f32 %v930_v26, %v267_v58  ;;  %v288_v1 = vadd.f32 %v930_v26, %v287_v60  ;;  %v230_v2 = vpop.f32.mrf.mxu0  ;;  %v250_v3 = vpop.f32.mrf.mxu1 }
  0xaf   :  { %693 = vst [vmem:[%s1102_s5] sm:$0xff] %v692_v56   ;;  %v231_v10 = vadd.f32 %v930_v26, %v230_v2  ;;  %v251_v12 = vadd.f32 %v930_v26, %v250_v3 }
  0xb0   :  { %787 = vst [vmem:[%s1102_s5 + $0x20] sm:$0xff] %v712_v57   ;;  %v390_v4 = vmul.f32 %v939_v29, %v268_v0  ;;  %v398_v5 = vmul.f32 %v939_v29, %v288_v1 }
  0xb1   :  { %v375_v24 = vmul.f32 %v939_v29, %v231_v10  ;;  %v383_v25 = vmul.f32 %v939_v29, %v251_v12 }
  0xb2   :  { %v422_v8 = vadd.f32 %v660_v59, %v390_v4  ;;  %v430_v9 = vadd.f32 %v676_v61, %v398_v5 }
  0xb4   :  { %v732_v14 = vpack.c.bf16 %v422_v8, %v421_v6  ;;  %v752_v15 = vpack.c.bf16 %v430_v9, %v429_v7 }
  0xb5   :  { %v270_v16 = vpop.f32.mrf.mxu2  ;;  %v290_v17 = vpop.f32.mrf.mxu3 }
  0xb6   :  { %v232_v20 = vpop.f32.mrf.mxu0  ;;  %v252_v22 = vpop.f32.mrf.mxu1  ;;  %v271_v34 = vadd.f32 %v930_v26, %v270_v16  ;;  %v291_v35 = vadd.f32 %v930_v26, %v290_v17 }
  0xb7   :  { %v769_v11 = vld [vmem:[%s1101_s3 + $0x8] sm:$0xff]   ;;  %v233_v27 = vadd.f32 %v930_v26, %v232_v20  ;;  %v253_v28 = vadd.f32 %v930_v26, %v252_v22 }
  0xb8   :  { %v773_v13 = vld [vmem:[%s1101_s3 + $0x28] sm:$0xff]   ;;  %v631_v18 = vunpack.c.l.bf16 %v769_v11  ;;  %v632_v21 = vunpack.c.h.bf16 %v769_v11  ;;  %v391_v48 = vmul.f32 %v939_v29, %v271_v34  ;;  %v399_v49 = vmul.f32 %v939_v29, %v291_v35 }
  0xb9   :  { %791 = vst [vmem:[%s1102_s5 + $0x40] sm:$0xff] %v732_v14   ;;  %v647_v19 = vunpack.c.l.bf16 %v773_v13  ;;  %v648_v23 = vunpack.c.h.bf16 %v773_v13  ;;  %v376_v32 = vmul.f32 %v939_v29, %v233_v27  ;;  %v384_v33 = vmul.f32 %v939_v29, %v253_v28 }
  0xba   :  { %795 = vst [vmem:[%s1102_s5 + $0x60] sm:$0xff] %v752_v15   ;;  %v407_v36 = vadd.f32 %v631_v18, %v375_v24 }
  0xbb   :  { %v415_v37 = vadd.f32 %v647_v19, %v383_v25  ;;  %v408_v38 = vadd.f32 %v632_v21, %v376_v32  ;;  %v416_v39 = vadd.f32 %v648_v23, %v384_v33 }
  0xbd   :  { %v697_v42 = vpack.c.bf16 %v408_v38, %v407_v36  ;;  %v717_v43 = vpack.c.bf16 %v416_v39, %v415_v37  ;;  %v272_v44 = vpop.f32.mrf.mxu2  ;;  %v292_v46 = vpop.f32.mrf.mxu3 }
  0xbe   :  { %v273_v50 = vadd.f32 %v930_v26, %v272_v44  ;;  %v293_v51 = vadd.f32 %v930_v26, %v292_v46  ;;  %v235_v52 = vpop.f32.mrf.mxu0  ;;  %v255_v53 = vpop.f32.mrf.mxu1 }
  0xbf   :  { %v236_v60 = vadd.f32 %v930_v26, %v235_v52  ;;  %v256_v62 = vadd.f32 %v930_v26, %v255_v53 }
  0xc0   :  { %v392_v54 = vmul.f32 %v939_v29, %v273_v50  ;;  %v400_v55 = vmul.f32 %v939_v29, %v293_v51 }
  0xc1   :  { %v777_v30 = vld [vmem:[%s1101_s3 + $0x48] sm:$0xff]   ;;  %v377_v10 = vmul.f32 %v939_v29, %v236_v60  ;;  %v385_v11 = vmul.f32 %v939_v29, %v256_v62 }
  0xc2   :  { %v781_v31 = vld [vmem:[%s1101_s3 + $0x68] sm:$0xff]   ;;  %v663_v40 = vunpack.c.l.bf16 %v777_v30  ;;  %v664_v45 = vunpack.c.h.bf16 %v777_v30 }
  0xc3   :  { %v679_v41 = vunpack.c.l.bf16 %v781_v31  ;;  %v680_v47 = vunpack.c.h.bf16 %v781_v31  ;;  %784 = vst [vmem:[%s1102_s5 + $0x8] sm:$0xff] %v697_v42  }
  0xc4   :  { %788 = vst [vmem:[%s1102_s5 + $0x28] sm:$0xff] %v717_v43   ;;  %v423_v56 = vadd.f32 %v663_v40, %v391_v48  ;;  %v424_v58 = vadd.f32 %v664_v45, %v392_v54 }
  0xc5   :  { %v431_v57 = vadd.f32 %v679_v41, %v399_v49  ;;  %v432_v59 = vadd.f32 %v680_v47, %v400_v55  ;;  %v275_v2 = vpop.f32.mrf.mxu2  ;;  %v295_v3 = vpop.f32.mrf.mxu3 }
  0xc6   :  { %v737_v0 = vpack.c.bf16 %v424_v58, %v423_v56  ;;  %v237_v6 = vpop.f32.mrf.mxu0  ;;  %v257_v8 = vpop.f32.mrf.mxu1  ;;  %v276_v18 = vadd.f32 %v930_v26, %v275_v2  ;;  %v296_v19 = vadd.f32 %v930_v26, %v295_v3 }
  0xc7   :  { %v757_v1 = vpack.c.bf16 %v432_v59, %v431_v57  ;;  %v238_v12 = vadd.f32 %v930_v26, %v237_v6  ;;  %v258_v13 = vadd.f32 %v930_v26, %v257_v8 }
  0xc8   :  { %v393_v34 = vmul.f32 %v939_v29, %v276_v18  ;;  %v401_v35 = vmul.f32 %v939_v29, %v296_v19 }
  0xc9   :  { %v378_v16 = vmul.f32 %v939_v29, %v238_v12  ;;  %v386_v17 = vmul.f32 %v939_v29, %v258_v13 }
  0xcb   :  { %v770_v61 = vld [vmem:[%s1101_s3 + $0x10] sm:$0xff]  }
  0xcc   :  { %v774_v63 = vld [vmem:[%s1101_s3 + $0x30] sm:$0xff]   ;;  %v635_v4 = vunpack.c.l.bf16 %v770_v61  ;;  %v636_v7 = vunpack.c.h.bf16 %v770_v61 }
  0xcd   :  { %792 = vst [vmem:[%s1102_s5 + $0x48] sm:$0xff] %v737_v0   ;;  %v651_v5 = vunpack.c.l.bf16 %v774_v63  ;;  %v652_v9 = vunpack.c.h.bf16 %v774_v63  ;;  %v277_v30 = vpop.f32.mrf.mxu2  ;;  %v297_v32 = vpop.f32.mrf.mxu3 }
  0xce   :  { %796 = vst [vmem:[%s1102_s5 + $0x68] sm:$0xff] %v757_v1   ;;  %v409_v20 = vadd.f32 %v635_v4, %v377_v10  ;;  %v410_v22 = vadd.f32 %v636_v7, %v378_v16  ;;  %v278_v36 = vadd.f32 %v930_v26, %v277_v30  ;;  %v298_v37 = vadd.f32 %v930_v26, %v297_v32  ;;  %v240_v38 = vpop.f32.mrf.mxu0  ;;  %v260_v39 = vpop.f32.mrf.mxu1 }
  0xcf   :  { %v417_v21 = vadd.f32 %v651_v5, %v385_v11  ;;  %v418_v23 = vadd.f32 %v652_v9, %v386_v17  ;;  %v241_v46 = vadd.f32 %v930_v26, %v240_v38  ;;  %v261_v48 = vadd.f32 %v930_v26, %v260_v39 }
  0xd0   :  { %v702_v27 = vpack.c.bf16 %v410_v22, %v409_v20  ;;  %v394_v40 = vmul.f32 %v939_v29, %v278_v36  ;;  %v402_v41 = vmul.f32 %v939_v29, %v298_v37 }
  0xd1   :  { %v722_v28 = vpack.c.bf16 %v418_v23, %v417_v21  ;;  %v379_v60 = vmul.f32 %v939_v29, %v241_v46  ;;  %v387_v61 = vmul.f32 %v939_v29, %v261_v48 }
  0xd5   :  { %v778_v14 = vld [vmem:[%s1101_s3 + $0x50] sm:$0xff]   ;;  %v280_v52 = vpop.f32.mrf.mxu2  ;;  %v300_v53 = vpop.f32.mrf.mxu3 }
  0xd6   :  { %v782_v15 = vld [vmem:[%s1101_s3 + $0x70] sm:$0xff]   ;;  %v667_v24 = vunpack.c.l.bf16 %v778_v14  ;;  %v668_v31 = vunpack.c.h.bf16 %v778_v14  ;;  %v242_v56 = vpop.f32.mrf.mxu0  ;;  %v262_v58 = vpop.f32.mrf.mxu1  ;;  %v281_v4 = vadd.f32 %v930_v26, %v280_v52  ;;  %v301_v5 = vadd.f32 %v930_v26, %v300_v53 }
  0xd7   :  { %v683_v25 = vunpack.c.l.bf16 %v782_v15  ;;  %v684_v33 = vunpack.c.h.bf16 %v782_v15  ;;  %785 = vst [vmem:[%s1102_s5 + $0x10] sm:$0xff] %v702_v27   ;;  %v243_v62 = vadd.f32 %v930_v26, %v242_v56  ;;  %v263_v63 = vadd.f32 %v930_v26, %v262_v58 }
  0xd8   :  { %789 = vst [vmem:[%s1102_s5 + $0x30] sm:$0xff] %v722_v28   ;;  %v425_v42 = vadd.f32 %v667_v24, %v393_v34  ;;  %v426_v44 = vadd.f32 %v668_v31, %v394_v40  ;;  %v395_v18 = vmul.f32 %v939_v29, %v281_v4  ;;  %v403_v19 = vmul.f32 %v939_v29, %v301_v5 }
  0xd9   :  { %v433_v43 = vadd.f32 %v683_v25, %v401_v35  ;;  %v434_v45 = vadd.f32 %v684_v33, %v402_v41  ;;  %v380_v2 = vmul.f32 %v939_v29, %v243_v62  ;;  %v388_v3 = vmul.f32 %v939_v29, %v263_v63 }
  0xda   :  { %v742_v50 = vpack.c.bf16 %v426_v44, %v425_v42 }
  0xdb   :  { %v762_v51 = vpack.c.bf16 %v434_v45, %v433_v43 }
  0xdd   :  { %v282_v14 = vpop.f32.mrf.mxu2  ;;  %v302_v16 = vpop.f32.mrf.mxu3 }
  0xde   :  { %v283_v20 = vadd.f32 %v930_v26, %v282_v14  ;;  %v303_v21 = vadd.f32 %v930_v26, %v302_v16 }
  0xdf   :  { %v771_v47 = vld [vmem:[%s1101_s3 + $0x18] sm:$0xff]  }
  0xe0   :  { %v775_v49 = vld [vmem:[%s1101_s3 + $0x38] sm:$0xff]   ;;  %v639_v54 = vunpack.c.l.bf16 %v771_v47  ;;  %v640_v57 = vunpack.c.h.bf16 %v771_v47  ;;  %v396_v22 = vmul.f32 %v939_v29, %v283_v20  ;;  %v404_v23 = vmul.f32 %v939_v29, %v303_v21 }
  0xe1   :  { %793 = vst [vmem:[%s1102_s5 + $0x50] sm:$0xff] %v742_v50   ;;  %v655_v55 = vunpack.c.l.bf16 %v775_v49  ;;  %v656_v59 = vunpack.c.h.bf16 %v775_v49 }
  0xe2   :  { %797 = vst [vmem:[%s1102_s5 + $0x70] sm:$0xff] %v762_v51   ;;  %v411_v6 = vadd.f32 %v639_v54, %v379_v60  ;;  %v412_v8 = vadd.f32 %v640_v57, %v380_v2 }
  0xe3   :  { %v419_v7 = vadd.f32 %v655_v55, %v387_v61  ;;  %v420_v9 = vadd.f32 %v656_v59, %v388_v3 }
  0xe4   :  { %v707_v12 = vpack.c.bf16 %v412_v8, %v411_v6 }
  0xe5   :  { %v727_v13 = vpack.c.bf16 %v420_v9, %v419_v7 }
  0xe9   :  { %v779_v0 = vld [vmem:[%s1101_s3 + $0x58] sm:$0xff]  }
  0xea   :  { %v783_v1 = vld [vmem:[%s1101_s3 + $0x78] sm:$0xff]   ;;  %v671_v10 = vunpack.c.l.bf16 %v779_v0  ;;  %v672_v15 = vunpack.c.h.bf16 %v779_v0 }
  0xeb   :  { %v687_v11 = vunpack.c.l.bf16 %v783_v1  ;;  %v688_v17 = vunpack.c.h.bf16 %v783_v1  ;;  %786 = vst [vmem:[%s1102_s5 + $0x18] sm:$0xff] %v707_v12  }
  0xec   :  { %790 = vst [vmem:[%s1102_s5 + $0x38] sm:$0xff] %v727_v13   ;;  %v427_v24 = vadd.f32 %v671_v10, %v395_v18  ;;  %v428_v27 = vadd.f32 %v672_v15, %v396_v22 }
  0xed   :  { %v435_v25 = vadd.f32 %v687_v11, %v403_v19  ;;  %v436_v28 = vadd.f32 %v688_v17, %v404_v23 }
  0xee   :  { %v747_v30 = vpack.c.bf16 %v428_v27, %v427_v24 }
  0xef   :  { %v767_v31 = vpack.c.bf16 %v436_v28, %v435_v25 }
  0xf0   :  { %794 = vst [vmem:[%s1102_s5 + $0x58] sm:$0xff] %v747_v30  }
  0xf1   :  { %798 = vst [vmem:[%s1102_s5 + $0x78] sm:$0xff] %v767_v31  }

// kernel: dino_forward.14
= control target key start
LH: loop header
LB: loop body
LE: loop exit
PB: predicated region body
PF: predicated region fallthrough
CT: control target
= control target key end

     0   :  { %s2632_s12 = smov 0   ;;  %s2634_s13 = smov 0   ;;  %s3534_s0 = inlined_call_operand.vmem [shape: bf16[2,128,384], index: 0, kind: input, shape index: {}, may-alias: {0,1,2}]   ;;  %s3535_s1 = inlined_call_operand.vmem [shape: bf16[2,128,384], index: 1, kind: input, shape index: {}, may-alias: {0,1,2}]   ;;  %s3536_s2 = inlined_call_operand.vmem [shape: bf16[2,128,384], index: 2, kind: input, shape index: {}, may-alias: {0,1,2}]   ;;  %s3537_s3 = inlined_call_operand.vmem [shape: bf16[2,128,128], index: 3, kind: output, shape index: {}]  }
   0x1   :  { %s2636_s14 = smov 0   ;;  %s2638_s15 = smov 0  }
   0x2   :  { %s2640_s16 = smov 0  }
   0x3 LB: > { %s25_s17 = sadd.s32 1, %s2604_s15  ;;  %p41_p1 = scmp.ne.s32.totalorder %s2596_s13, %s2592_s12  ;;  %s2608_s16 = sphi %s2640_s16, %s13_s16   ;;  %s2604_s15 = sphi %s2638_s15, %s3568_s15   ;;  %s2600_s14 = sphi %s2636_s14, %s3567_s14   ;;  %s2596_s13 = sphi %s2634_s13, %s3566_s13   ;;  %s2592_s12 = sphi %s2632_s12, %s3565_s12  }
   0x4   : > { %p27_p0 = scmp.ge.s32.totalorder %s25_s17, 2  ;;  %p42_p2 = scmp.eq.s32.totalorder %s2608_s16, 0 }
   0x5   : > { %s34_s20 = sadd.s32 1, %s2596_s13  ;;  %p2128_p5 = scmp.ge.s32.totalorder %s2608_s16, 2 }
   0x6   : > { %s3570_s17 = smov (%p27_p0, %s25_s17), 0  ;;  %p2663_p3 = por %p42_p2, %p41_p1 }
   0x7   : > { %s29_s19 = ssub.s32 %s2604_s15, %s3570_s17  ;;  %147 = sbr.rel (%p2128_p5) target bundleno = 75 (0x4b), region = 16 }
   0x8   : > { %p32_p4 = scmp.eq.s32.totalorder %s29_s19, 0 }
   0xa   : > { %s2671_s21 = scalar_select %p32_p4, %s2596_s13, %s34_s20  }
   0xc   : > { %150 = sbr.rel (!%p2663_p3) target bundleno = 33 (0x21), region = 20  ;;  %s152_s22 = sand.u32 (%p2663_p3), 1, %s2596_s13  }
   0xd   : > { %s2359_s23 = smul.u32 (%p2663_p3), 192, %s2604_s15  ;;  %s2129_s24 = sshll.u32 (%p2663_p3), %s152_s22, 6 }
   0xe   : > { %s154_s28 = scalar_lea.vmem (%p2663_p3), [#allocation2], %s2129_s24 }
   0xf   : > { %s2681_s27 = scalar_lea.vmem (%p2663_p3), %s3534_s0, %s2359_s23 }
  0x10   : > { %v177_v0 = vld [vmem:[%s2681_s27] sm:$0xf] (%p2663_p3)  ;;  %v179_v1 = vld [vmem:[%s2681_s27 + $0xc] sm:$0xf] (%p2663_p3)  ;;  %v181_v2 = vld [vmem:[%s2681_s27 + $0x18] sm:$0xf] (%p2663_p3) }
  0x11   : > { %178 = vst [vmem:[%s154_s28] sm:$0xf] %v177_v0  ;;  %v183_v3 = vld [vmem:[%s2681_s27 + $0x24] sm:$0xf]  ;;  %v185_v4 = vld [vmem:[%s2681_s27 + $0x30] sm:$0xf] }
  0x12   : > { %180 = vst [vmem:[%s154_s28 + $0x4] sm:$0xf] %v179_v1  ;;  %v187_v5 = vld [vmem:[%s2681_s27 + $0x3c] sm:$0xf]  ;;  %v189_v6 = vld [vmem:[%s2681_s27 + $0x48] sm:$0xf] }
  0x13   : > { %182 = vst [vmem:[%s154_s28 + $0x8] sm:$0xf] %v181_v2  ;;  %v191_v7 = vld [vmem:[%s2681_s27 + $0x54] sm:$0xf]  ;;  %v193_v8 = vld [vmem:[%s2681_s27 + $0x60] sm:$0xf] }
  0x14   : > { %184 = vst [vmem:[%s154_s28 + $0xc] sm:$0xf] %v183_v3  ;;  %v195_v9 = vld [vmem:[%s2681_s27 + $0x6c] sm:$0xf]  ;;  %v197_v10 = vld [vmem:[%s2681_s27 + $0x78] sm:$0xf] }
  0x15   : > { %186 = vst [vmem:[%s154_s28 + $0x10] sm:$0xf] %v185_v4  ;;  %v199_v11 = vld [vmem:[%s2681_s27 + $0x84] sm:$0xf]  ;;  %v201_v12 = vld [vmem:[%s2681_s27 + $0x90] sm:$0xf] }
  0x16   : > { %188 = vst [vmem:[%s154_s28 + $0x14] sm:$0xf] %v187_v5  ;;  %v203_v13 = vld [vmem:[%s2681_s27 + $0x9c] sm:$0xf]  ;;  %v205_v14 = vld [vmem:[%s2681_s27 + $0xa8] sm:$0xf] }
  0x17   : > { %190 = vst [vmem:[%s154_s28 + $0x18] sm:$0xf] %v189_v6  ;;  %v207_v15 = vld [vmem:[%s2681_s27 + $0xb4] sm:$0xf] }
  0x18   : > { %192 = vst [vmem:[%s154_s28 + $0x1c] sm:$0xf] %v191_v7 }
  0x19   : > { %194 = vst [vmem:[%s154_s28 + $0x20] sm:$0xf] %v193_v8 }
  0x1a   : > { %196 = vst [vmem:[%s154_s28 + $0x24] sm:$0xf] %v195_v9 }
  0x1b   : > { %198 = vst [vmem:[%s154_s28 + $0x28] sm:$0xf] %v197_v10 }
  0x1c   : > { %200 = vst [vmem:[%s154_s28 + $0x2c] sm:$0xf] %v199_v11 }
  0x1d   : > { %202 = vst [vmem:[%s154_s28 + $0x30] sm:$0xf] %v201_v12 }
  0x1e   : > { %204 = vst [vmem:[%s154_s28 + $0x34] sm:$0xf] %v203_v13 }
  0x1f   : > { %206 = vst [vmem:[%s154_s28 + $0x38] sm:$0xf] %v205_v14 }
  0x20   : > { %208 = vst [vmem:[%s154_s28 + $0x3c] sm:$0xf] %v207_v15 }
  0x21 PF: > { %264 = sbr.rel (!%p2663_p3) target bundleno = 54 (0x36), region = 61  ;;  %s266_s29 = sand.u32 (%p2663_p3), 1, %s2596_s13  }
  0x22   : > { %s2132_s30 = smul.u32 (%p2663_p3), 192, %s2604_s15  ;;  %s2131_s4 = sshll.u32 (%p2663_p3), %s266_s29, 6 }
  0x23   : > { %s268_s8 = scalar_lea.vmem (%p2663_p3), [#allocation3], %s2131_s4 }
  0x24   : > { %s2706_s7 = scalar_lea.vmem (%p2663_p3), %s3535_s1, %s2132_s30 }
  0x25   : > { %v2133_v16 = vld [vmem:[%s2706_s7 + $0x4] sm:$0xf] (%p2663_p3)  ;;  %v2134_v17 = vld [vmem:[%s2706_s7 + $0x10] sm:$0xf] (%p2663_p3)  ;;  %v2135_v18 = vld [vmem:[%s2706_s7 + $0x1c] sm:$0xf] (%p2663_p3) }
  0x26   : > { %290 = vst [vmem:[%s268_s8] sm:$0xf] %v2133_v16  ;;  %v2136_v19 = vld [vmem:[%s2706_s7 + $0x28] sm:$0xf]  ;;  %v2137_v20 = vld [vmem:[%s2706_s7 + $0x34] sm:$0xf] }
  0x27   : > { %292 = vst [vmem:[%s268_s8 + $0x4] sm:$0xf] %v2134_v17  ;;  %v2138_v21 = vld [vmem:[%s2706_s7 + $0x40] sm:$0xf]  ;;  %v2139_v22 = vld [vmem:[%s2706_s7 + $0x4c] sm:$0xf] }
  0x28   : > { %294 = vst [vmem:[%s268_s8 + $0x8] sm:$0xf] %v2135_v18  ;;  %v2140_v23 = vld [vmem:[%s2706_s7 + $0x58] sm:$0xf]  ;;  %v2141_v24 = vld [vmem:[%s2706_s7 + $0x64] sm:$0xf] }
  0x29   : > { %296 = vst [vmem:[%s268_s8 + $0xc] sm:$0xf] %v2136_v19  ;;  %v2142_v25 = vld [vmem:[%s2706_s7 + $0x70] sm:$0xf]  ;;  %v2143_v26 = vld [vmem:[%s2706_s7 + $0x7c] sm:$0xf] }
  0x2a   : > { %298 = vst [vmem:[%s268_s8 + $0x10] sm:$0xf] %v2137_v20  ;;  %v2144_v27 = vld [vmem:[%s2706_s7 + $0x88] sm:$0xf]  ;;  %v2145_v28 = vld [vmem:[%s2706_s7 + $0x94] sm:$0xf] }
  0x2b   : > { %300 = vst [vmem:[%s268_s8 + $0x14] sm:$0xf] %v2138_v21  ;;  %v2146_v29 = vld [vmem:[%s2706_s7 + $0xa0] sm:$0xf]  ;;  %v2147_v30 = vld [vmem:[%s2706_s7 + $0xac] sm:$0xf] }
  0x2c   : > { %302 = vst [vmem:[%s268_s8 + $0x18] sm:$0xf] %v2139_v22  ;;  %v2148_v31 = vld [vmem:[%s2706_s7 + $0xb8] sm:$0xf] }
  0x2d   : > { %304 = vst [vmem:[%s268_s8 + $0x1c] sm:$0xf] %v2140_v23 }
  0x2e   : > { %306 = vst [vmem:[%s268_s8 + $0x20] sm:$0xf] %v2141_v24 }
  0x2f   : > { %308 = vst [vmem:[%s268_s8 + $0x24] sm:$0xf] %v2142_v25 }
  0x30   : > { %310 = vst [vmem:[%s268_s8 + $0x28] sm:$0xf] %v2143_v26 }
  0x31   : > { %312 = vst [vmem:[%s268_s8 + $0x2c] sm:$0xf] %v2144_v27 }
  0x32   : > { %314 = vst [vmem:[%s268_s8 + $0x30] sm:$0xf] %v2145_v28 }
  0x33   : > { %316 = vst [vmem:[%s268_s8 + $0x34] sm:$0xf] %v2146_v29 }
  0x34   : > { %318 = vst [vmem:[%s268_s8 + $0x38] sm:$0xf] %v2147_v30 }
  0x35   : > { %320 = vst [vmem:[%s268_s8 + $0x3c] sm:$0xf] %v2148_v31 }
  0x36 PF: > { %376 = sbr.rel (!%p2663_p3) target bundleno = 75 (0x4b), region = 102  ;;  %s378_s9 = sand.u32 (%p2663_p3), 1, %s2596_s13  }
  0x37   : > { %s2150_s10 = smul.u32 (%p2663_p3), 192, %s2604_s15  ;;  %s2149_s11 = sshll.u32 (%p2663_p3), %s378_s9, 6 }
  0x38   : > { %s380_s18 = scalar_lea.vmem (%p2663_p3), [#allocation4], %s2149_s11 }
  0x39   : > { %s2731_s22 = scalar_lea.vmem (%p2663_p3), %s3536_s2, %s2150_s10 }
  0x3a   : > { %v2151_v32 = vld [vmem:[%s2731_s22 + $0x8] sm:$0xf] (%p2663_p3)  ;;  %v2152_v33 = vld [vmem:[%s2731_s22 + $0x14] sm:$0xf] (%p2663_p3)  ;;  %v2153_v34 = vld [vmem:[%s2731_s22 + $0x20] sm:$0xf] (%p2663_p3) }
  0x3b   : > { %402 = vst [vmem:[%s380_s18] sm:$0xf] %v2151_v32  ;;  %v2154_v35 = vld [vmem:[%s2731_s22 + $0x2c] sm:$0xf]  ;;  %v2155_v36 = vld [vmem:[%s2731_s22 + $0x38] sm:$0xf] }
  0x3c   : > { %404 = vst [vmem:[%s380_s18 + $0x4] sm:$0xf] %v2152_v33  ;;  %v2156_v37 = vld [vmem:[%s2731_s22 + $0x44] sm:$0xf]  ;;  %v2157_v38 = vld [vmem:[%s2731_s22 + $0x50] sm:$0xf] }
  0x3d   : > { %406 = vst [vmem:[%s380_s18 + $0x8] sm:$0xf] %v2153_v34  ;;  %v2158_v39 = vld [vmem:[%s2731_s22 + $0x5c] sm:$0xf]  ;;  %v2159_v40 = vld [vmem:[%s2731_s22 + $0x68] sm:$0xf] }
  0x3e   : > { %408 = vst [vmem:[%s380_s18 + $0xc] sm:$0xf] %v2154_v35  ;;  %v2160_v41 = vld [vmem:[%s2731_s22 + $0x74] sm:$0xf]  ;;  %v2161_v42 = vld [vmem:[%s2731_s22 + $0x80] sm:$0xf] }
  0x3f   : > { %410 = vst [vmem:[%s380_s18 + $0x10] sm:$0xf] %v2155_v36  ;;  %v2162_v43 = vld [vmem:[%s2731_s22 + $0x8c] sm:$0xf]  ;;  %v2163_v44 = vld [vmem:[%s2731_s22 + $0x98] sm:$0xf] }
  0x40   : > { %412 = vst [vmem:[%s380_s18 + $0x14] sm:$0xf] %v2156_v37  ;;  %v2164_v45 = vld [vmem:[%s2731_s22 + $0xa4] sm:$0xf]  ;;  %v2165_v46 = vld [vmem:[%s2731_s22 + $0xb0] sm:$0xf] }
  0x41   : > { %414 = vst [vmem:[%s380_s18 + $0x18] sm:$0xf] %v2157_v38  ;;  %v2166_v47 = vld [vmem:[%s2731_s22 + $0xbc] sm:$0xf] }
  0x42   : > { %416 = vst [vmem:[%s380_s18 + $0x1c] sm:$0xf] %v2158_v39 }
  0x43   : > { %418 = vst [vmem:[%s380_s18 + $0x20] sm:$0xf] %v2159_v40 }
  0x44   : > { %420 = vst [vmem:[%s380_s18 + $0x24] sm:$0xf] %v2160_v41 }
  0x45   : > { %422 = vst [vmem:[%s380_s18 + $0x28] sm:$0xf] %v2161_v42 }
  0x46   : > { %424 = vst [vmem:[%s380_s18 + $0x2c] sm:$0xf] %v2162_v43 }
  0x47   : > { %426 = vst [vmem:[%s380_s18 + $0x30] sm:$0xf] %v2163_v44 }
  0x48   : > { %428 = vst [vmem:[%s380_s18 + $0x34] sm:$0xf] %v2164_v45 }
  0x49   : > { %430 = vst [vmem:[%s380_s18 + $0x38] sm:$0xf] %v2165_v46 }
  0x4a   : > { %432 = vst [vmem:[%s380_s18 + $0x3c] sm:$0xf] %v2166_v47 }
  0x4b PF: > { %p2167_p6 = scmp.ge.s32.totalorder %s2608_s16, 1  ;;  %p487_p7 = scmp.lt.s32.totalorder %s2608_s16, 3 }
  0x4d   : > { %p488_p8 = pnand %p2167_p6, %p487_p7 }
  0x4e   : > { %s494_s23 = sand.u32 (!%p488_p8), 1, %s2592_s12   ;;  %s2610_s26 = smov (!%p488_p8), 112  }
  0x4f   : > { %491 = sbr.rel (%p488_p8) target bundleno = 1169 (0x491), region = 143  ;;  %s2752_s24 = sshll.u32 (!%p488_p8), %s494_s23, 6 }
  0x50   : > { %s503_s25 = scalar_lea.vmem (!%p488_p8), [#allocation3], %s2752_s24  ;;  %s2768_s12 = scalar_lea.vmem (!%p488_p8), [#allocation2], %s2752_s24 }
  0x51   : > { %s2790_s27 = scalar_lea.vmem (!%p488_p8), [#allocation4], %s2752_s24  ;;  %s2611_s28 = smov (!%p488_p8), 16  }
  0x52   : > { %p545_p9 = scmp.lt.s32.totalorder (!%p488_p8), %s2600_s14, 1 }
  0x54   : > { %vm685_vm0 = vcmask 130048   ;;  %v2303_v48 = vld [vmem:[%s503_s25 + $0x38] sm:$0xff]  ;;  %v2301_v49 = vld [vmem:[%s503_s25 + $0x28] sm:$0xff]  ;;  %v2302_v52 = vld [vmem:[%s503_s25 + $0x30] sm:$0xff]  ;;  %v554_v31 = vlaneseq  ;;  %s3572_s14 = smov (!%p545_p9, %s2600_s14), 1 }
  0x55   : > { %v2299_v50 = vld [vmem:[%s503_s25 + $0x18] sm:$0xff]  ;;  %1302 = vrot.lane.b32.xlu0 %v2303_v48, %s2610_s26  ;;  %v732_v51 = vsel %vm685_vm0, %v2303_v48, 0  ;;  %1298 = vrot.lane.b32.xlu1 %v2301_v49, %s2610_s26  ;;  %v2300_v53 = vld [vmem:[%s503_s25 + $0x20] sm:$0xff]  ;;  %v729_v54 = vsel %vm685_vm0, %v2302_v52, 0  ;;  %v726_v57 = vsel %vm685_vm0, %v2301_v49, 0  ;;  %s2287_s29 = sshll.u32 %s3572_s14, 6 }
  0x56   : > { %734 = vmatpush.bf16.xpose.msra.mxu0 %v732_v51  ;;  %1294 = vrot.lane.b32.xlu2 %v2299_v50, %s2610_s26  ;;  %v2298_v55 = vld [vmem:[%s503_s25 + $0x10] sm:$0xff]  ;;  %v2297_v56 = vld [vmem:[%s503_s25 + $0x8] sm:$0xff]  ;;  %v2296_v58 = vld [vmem:[%s503_s25] sm:$0xff]  ;;  %v723_v59 = vsel %vm685_vm0, %v2300_v53, 0  ;;  %v720_v61 = vsel %vm685_vm0, %v2299_v50, 0  ;;  %v2822_v32 = vand.u32 127, %v554_v31  ;;  %s3436_s5 = scalar_lea.vmem %s3537_s3, %s2287_s29 }
  0x57   : > { %v2288_v60 = vld [vmem:[%s2768_s12] sm:$0xff]  ;;  %v2289_v62 = vld [vmem:[%s2768_s12 + $0x8] sm:$0xff]  ;;  %v717_v63 = vsel %vm685_vm0, %v2298_v55, 0  ;;  %v714_v0 = vsel %vm685_vm0, %v2297_v56, 0  ;;  %v2290_v1 = vld [vmem:[%s2768_s12 + $0x10] sm:$0xff]  ;;  %v711_v2 = vsel %vm685_vm0, %v2296_v58, 0 }
  0x58   : > { %v2292_v3 = vld [vmem:[%s2768_s12 + $0x20] sm:$0xff]  ;;  %v2293_v4 = vld [vmem:[%s2768_s12 + $0x28] sm:$0xff]  ;;  %v2291_v5 = vld [vmem:[%s2768_s12 + $0x18] sm:$0xff]  ;;  %vm556_vm1 = vcmp.lt.s32.totalorder %v2822_v32, 5 }
  0x59   : > { %v2310_v6 = vld [vmem:[%s2790_s27 + $0x30] sm:$0xff]  ;;  %v2307_v10 = vld [vmem:[%s2790_s27 + $0x18] sm:$0xff]  ;;  %v2309_v12 = vld [vmem:[%s2790_s27 + $0x28] sm:$0xff] }
  0x5a   : > { %v2294_v7 = vld [vmem:[%s2768_s12 + $0x30] sm:$0xff]  ;;  %v2295_v11 = vld [vmem:[%s2768_s12 + $0x38] sm:$0xff]  ;;  %v2308_v19 = vld [vmem:[%s2790_s27 + $0x20] sm:$0xff] }
  0x5b   : > { %v2311_v16 = vld [vmem:[%s2790_s27 + $0x38] sm:$0xff]  ;;  %v2306_v17 = vld [vmem:[%s2790_s27 + $0x10] sm:$0xff] }
  0x5c   : > { %1223 = vmatpush.bf16.msra.mxu1 %v2311_v16 }
  0x5d   : > { %1300 = vrot.lane.b32.xlu0 %v2302_v52, %s2610_s26  ;;  %1296 = vrot.lane.b32.xlu1 %v2300_v53, %s2610_s26 }
  0x5e   : > { %735 = vmatpush.bf16.xpose.msra.mxu0 %v729_v54  ;;  %1292 = vrot.lane.b32.xlu2 %v2298_v55, %s2610_s26 }
  0x60   : > { %1224 = vmatpush.bf16.msra.mxu1 %v2310_v6 }
  0x64   : > { %1225 = vmatpush.bf16.msra.mxu1 %v2309_v12 }
  0x65   : > { %1290 = vrot.lane.b32.xlu0 %v2297_v56, %s2610_s26  ;;  %1288 = vrot.lane.b32.xlu1 %v2296_v58, %s2610_s26 }
  0x66   : > { %736 = vmatpush.bf16.xpose.msra.mxu0 %v726_v57  ;;  %1272 = vrot.lane.b32.xlu2 %v2288_v60, %s2610_s26 }
  0x68   : > { %1226 = vmatpush.bf16.msra.mxu1 %v2308_v19 }
  0x6c   : > { %1227 = vmatpush.bf16.msra.mxu1 %v2307_v10 }
  0x6d   : > { %1274 = vrot.lane.b32.xlu0 %v2289_v62, %s2610_s26  ;;  %1276 = vrot.lane.b32.xlu1 %v2290_v1, %s2610_s26 }
  0x6e   : > { %737 = vmatpush.bf16.xpose.msra.mxu0 %v723_v59  ;;  %1278 = vrot.lane.b32.xlu2 %v2291_v5, %s2610_s26 }
  0x70   : > { %1228 = vmatpush.bf16.msra.mxu1 %v2306_v17 }
  0x75   : > { %1280 = vrot.lane.b32.xlu0 %v2292_v3, %s2610_s26  ;;  %1282 = vrot.lane.b32.xlu1 %v2293_v4, %s2610_s26 }
  0x76   : > { %738 = vmatpush.bf16.xpose.msra.mxu0 %v720_v61  ;;  %1284 = vrot.lane.b32.xlu2 %v2294_v7, %s2610_s26 }
  0x7d   : > { %1805 = vrot.lane.b32.xlu1 %v2310_v6, %s2610_s26  ;;  %1286 = vrot.lane.b32.xlu0 %v2295_v11, %s2610_s26 }
  0x7e   : > { %739 = vmatpush.bf16.xpose.msra.mxu0 %v717_v63  ;;  %1803 = vrot.lane.b32.xlu2 %v2309_v12, %s2610_s26  ;;  %v2305_v12 = vld [vmem:[%s2790_s27 + $0x8] sm:$0xff] }
  0x7f   : > { %1229 = vmatpush.bf16.msra.mxu1 %v2305_v12 }
  0x85   : > { %1799 = vrot.lane.b32.xlu1 %v2307_v10, %s2610_s26  ;;  %1807 = vrot.lane.b32.xlu0 %v2311_v16, %s2610_s26 }
  0x86   : > { %740 = vmatpush.bf16.xpose.msra.mxu0 %v714_v0  ;;  %1797 = vrot.lane.b32.xlu2 %v2306_v17, %s2610_s26 }
  0x8d   : > { %1801 = vrot.lane.b32.xlu0 %v2308_v19, %s2610_s26 }
  0x8e   : > { %741 = vmatpush.bf16.xpose.msra.mxu0 %v711_v2 }
  0x95   : > { %2237 = vmatmul.msk.bf16.vlgmr.msra.gmra.mxu0 %vm685_vm0, %v2288_v60 }
  0xa5   : > { %2238 = vmatmul.msk.bf16.gmra.mxu0 %vm685_vm0, %v2289_v62 }
  0xb0   : > { %v1295_v22 = vpop.permute.xlu2 %1294 }
  0xb1   : > { %v1338_v23 = vsel %vm685_vm0, %v1295_v22, 0 }
  0xb5   : > { %2239 = vmatmul.msk.bf16.gmra.mxu0 %vm685_vm0, %v2290_v1 }
  0xb8   : > { %v1293_v24 = vpop.permute.xlu2 %1292 }
  0xb9   : > { %v1335_v25 = vsel %vm685_vm0, %v1293_v24, 0 }
  0xc0   : > { %v1273_v30 = vpop.permute.xlu2 %1272 }
  0xc5   : > { %2240 = vmatmul.msk.bf16.gmra.mxu0 %vm685_vm0, %v2291_v5 }
  0xc7   : > { %v1303_v8 = vpop.permute.xlu0 %1302  ;;  %v1299_v15 = vpop.permute.xlu1 %1298 }
  0xc8   : > { %v1350_v9 = vsel %vm685_vm0, %v1303_v8, 0  ;;  %v1344_v18 = vsel %vm685_vm0, %v1299_v15, 0  ;;  %v1279_v47 = vpop.permute.xlu2 %1278 }
  0xc9   : > { %1352 = vmatpush.bf16.xpose.msra.mxu2 %v1350_v9 }
  0xcf   : > { %v1301_v13 = vpop.permute.xlu0 %1300  ;;  %v1297_v20 = vpop.permute.xlu1 %1296 }
  0xd0   : > { %v1347_v14 = vsel %vm685_vm0, %v1301_v13, 0  ;;  %v1341_v21 = vsel %vm685_vm0, %v1297_v20, 0  ;;  %v1285_v51 = vpop.permute.xlu2 %1284 }
  0xd1   : > { %1353 = vmatpush.bf16.xpose.msra.mxu2 %v1347_v14 }
  0xd5   : > { %2241 = vmatmul.msk.bf16.gmra.mxu0 %vm685_vm0, %v2292_v3 }
  0xd7   : > { %v1291_v26 = vpop.permute.xlu0 %1290  ;;  %v1289_v28 = vpop.permute.xlu1 %1288 }
  0xd8   : > { %v1332_v27 = vsel %vm685_vm0, %v1291_v26, 0  ;;  %v1329_v29 = vsel %vm685_vm0, %v1289_v28, 0  ;;  %v1804_v54 = vpop.permute.xlu2 %1803 }
  0xd9   : > { %1354 = vmatpush.bf16.xpose.msra.mxu2 %v1344_v18 }
  0xdf   : > { %v1275_v36 = vpop.permute.xlu0 %1274  ;;  %v1277_v43 = vpop.permute.xlu1 %1276 }
  0xe0   : > { %v1798_v57 = vpop.permute.xlu2 %1797 }
  0xe1   : > { %1355 = vmatpush.bf16.xpose.msra.mxu2 %v1341_v21 }
  0xe5   : > { %2242 = vmatmul.msk.bf16.gmra.mxu0 %vm685_vm0, %v2293_v4 }
  0xe7   : > { %v1281_v48 = vpop.permute.xlu0 %1280  ;;  %v1283_v50 = vpop.permute.xlu1 %1282 }
  0xe9   : > { %1356 = vmatpush.bf16.xpose.msra.mxu2 %v1338_v23 }
  0xef   : > { %v1287_v49 = vpop.permute.xlu0 %1286  ;;  %v1806_v53 = vpop.permute.xlu1 %1805 }
  0xf1   : > { %1357 = vmatpush.bf16.xpose.msra.mxu2 %v1335_v25 }
  0xf5   : > { %2243 = vmatmul.msk.bf16.gmra.mxu0 %vm685_vm0, %v2294_v7 }
  0xf7   : > { %v1808_v52 = vpop.permute.xlu0 %1807  ;;  %v1800_v56 = vpop.permute.xlu1 %1799 }
  0xf8   : > { %1817 = vmatpush.bf16.msra.mxu3 %v1808_v52 }
  0xf9   : > { %1358 = vmatpush.bf16.xpose.msra.mxu2 %v1332_v27 }
  0xfc   : > { %1818 = vmatpush.bf16.msra.mxu3 %v1806_v53 }
  0xff   : > { %v1802_v55 = vpop.permute.xlu0 %1801 }
 0x100   : > { %1819 = vmatpush.bf16.msra.mxu3 %v1804_v54 }
 0x101   : > { %1359 = vmatpush.bf16.xpose.msra.mxu2 %v1329_v29 }
 0x104   : > { %1820 = vmatpush.bf16.msra.mxu3 %v1802_v55 }
 0x105   : > { %2244 = vmatmul.msk.bf16.gmra.mxu0 %vm685_vm0, %v2295_v11 }
 0x108   : > { %2277 = vmatmul.msk.bf16.vlgmr.msra.gmra.mxu2 %vm685_vm0, %v1273_v30  ;;  %1821 = vmatpush.bf16.msra.mxu3 %v1800_v56 }
 0x10c   : > { %1822 = vmatpush.bf16.msra.mxu3 %v1798_v57 }
 0x112   : > { %v743_v33 = vpop.f32.mrf.mxu0 }
 0x113   : > { %v783_v34 = vmul.f32 0.25, %v743_v33 }
 0x115   : > { %v2827_v35 = vsel %vm556_vm1, %v783_v34, -1e+30 }
 0x116   : > { %815 = vmax.xlane.f32.xlu1 %v2827_v35 }
 0x118   : > { %2278 = vmatmul.msk.bf16.gmra.mxu2 %vm685_vm0, %v1275_v36 }
 0x11a   : > { %v745_v37 = vpop.f32.mrf.mxu0 }
 0x11b   : > { %v784_v38 = vmul.f32 0.25, %v745_v37 }
 0x11d   : > { %v2833_v39 = vsel %vm556_vm1, %v784_v38, -1e+30 }
 0x11e   : > { %817 = vmax.xlane.f32.xlu2 %v2833_v39 }
 0x122   : > { %v748_v40 = vpop.f32.mrf.mxu0 }
 0x123   : > { %v785_v41 = vmul.f32 0.25, %v748_v40 }
 0x125   : > { %v2838_v42 = vsel %vm556_vm1, %v785_v41, -1e+30 }
 0x126   : > { %819 = vmax.xlane.f32.xlu0 %v2838_v42 }
 0x128   : > { %2279 = vmatmul.msk.bf16.gmra.mxu2 %vm685_vm0, %v1277_v43 }
 0x12a   : > { %v750_v44 = vpop.f32.mrf.mxu0 }
 0x12b   : > { %v786_v45 = vmul.f32 0.25, %v750_v44 }
 0x12d   : > { %v2844_v46 = vsel %vm556_vm1, %v786_v45, -1e+30 }
 0x12e   : > { %821 = vmax.xlane.f32.xlu2 %v2844_v46 }
 0x132   : > { %v753_v25 = vpop.f32.mrf.mxu0 }
 0x133   : > { %v787_v53 = vmul.f32 0.25, %v753_v25 }
 0x135   : > { %v2916_v56 = vsel %vm556_vm1, %v787_v53, -1e+30 }
 0x138   : > { %2280 = vmatmul.msk.bf16.gmra.mxu2 %vm685_vm0, %v1279_v47 }
 0x13a   : > { %v755_v26 = vpop.f32.mrf.mxu0 }
 0x142   : > { %v758_v27 = vpop.f32.mrf.mxu0 }
 0x148   : > { %2281 = vmatmul.msk.bf16.gmra.mxu2 %vm685_vm0, %v1281_v48 }
 0x14a   : > { %v760_v30 = vpop.f32.mrf.mxu0 }
 0x14b   : > { %v790_v31 = vmul.f32 0.25, %v760_v30 }
 0x14d   : > { %v2899_v36 = vsel %vm556_vm1, %v790_v31, -1e+30 }
 0x158   : > { %2282 = vmatmul.msk.bf16.gmra.mxu2 %vm685_vm0, %v1283_v50 }
 0x168   : > { %2283 = vmatmul.msk.bf16.gmra.mxu2 %vm685_vm0, %v1285_v51  ;;  %v2304_v51 = vld [vmem:[%s2790_s27] sm:$0xff] }
 0x169   : > { %1230 = vmatpush.bf16.msra.mxu1 %v2304_v51 }
 0x178   : > { %2284 = vmatmul.msk.bf16.gmra.mxu2 %vm685_vm0, %v1287_v49 }
 0x189   : > { %v816_v28 = vpop.xlane.xlu1 %815 }
 0x18b   : > { %v1361_v58 = vpop.f32.mrf.mxu2 }
 0x18c   : > { %v1401_v59 = vmul.f32 0.25, %v1361_v58 }
 0x18e   : > { %v1417_v60 = vsel %vm556_vm1, %v1401_v59, -1e+30 }
 0x18f   : > { %1433 = vmax.xlane.f32.xlu1 %v1417_v60 }
 0x191   : > { %v818_v29 = vpop.xlane.xlu2 %817 }
 0x192   : > { %v848_v59 = vsub.f32 %v2833_v39, %v818_v29 }
 0x193   : > { %v1363_v61 = vpop.f32.mrf.mxu2 }
 0x194   : > { %v1402_v62 = vmul.f32 0.25, %v1363_v61 }
 0x196   : > { %v1418_v63 = vsel %vm556_vm1, %v1402_v62, -1e+30  ;;  %v865_v62 = vmul.f32 1.442695, %v848_v59 }
 0x197   : > { %1435 = vmax.xlane.f32.xlu2 %v1418_v63 }
 0x199   : > { %v2902_v40 = vpop.xlane.xlu0 %819 }
 0x19b   : > { %v1366_v0 = vpop.f32.mrf.mxu2 }
 0x19c   : > { %v1403_v1 = vmul.f32 0.25, %v1366_v0 }
 0x19e   : > { %v1419_v2 = vsel %vm556_vm1, %v1403_v1, -1e+30 }
 0x19f   : > { %1437 = vmax.xlane.f32.xlu0 %v1419_v2 }
 0x1a1   : > { %v2895_v33 = vpop.xlane.xlu2 %821 }
 0x1a3   : > { %v1368_v3 = vpop.f32.mrf.mxu2 }
 0x1a4   : > { %v1404_v4 = vmul.f32 0.25, %v1368_v3 }
 0x1a6   : > { %v2860_v5 = vsel %vm556_vm1, %v1404_v4, -1e+30 }
 0x1a7   : > { %1439 = vmax.xlane.f32.xlu2 %v2860_v5 }
 0x1ab   : > { %v1371_v6 = vpop.f32.mrf.mxu2 }
 0x1ac   : > { %v1405_v7 = vmul.f32 0.25, %v1371_v6 }
 0x1ae   : > { %v2865_v8 = vsel %vm556_vm1, %v1405_v7, -1e+30  ;;  %v847_v7 = vsub.f32 %v2827_v35, %v816_v28 }
 0x1af   : > { %1441 = vmax.xlane.f32.xlu1 %v2865_v8 }
 0x1b3   : > { %v1373_v9 = vpop.f32.mrf.mxu2 }
 0x1b4   : > { %v1406_v10 = vmul.f32 0.25, %v1373_v9  ;;  %v789_v9 = vmul.f32 0.25, %v758_v27 }
 0x1b6   : > { %v2870_v11 = vsel %vm556_vm1, %v1406_v10, -1e+30  ;;  %v863_v10 = vmul.f32 1.442695, %v847_v7 }
 0x1b7   : > { %1443 = vmax.xlane.f32.xlu2 %v2870_v11 }
 0x1bb   : > { %v1376_v13 = vpop.f32.mrf.mxu2 }
 0x1bc   : > { %v1407_v14 = vmul.f32 0.25, %v1376_v13 }
 0x1be   : > { %v2876_v15 = vsel %vm556_vm1, %v1407_v14, -1e+30 }
 0x1bf   : > { %1445 = vmax.xlane.f32.xlu2 %v2876_v15 }
 0x1c3   : > { %v1378_v16 = vpop.f32.mrf.mxu2 }
 0x1c4   : > { %v1408_v17 = vmul.f32 0.25, %v1378_v16  ;;  %v763_v16 = vpop.f32.mrf.mxu0 }
 0x1c5   : > { %v791_v25 = vmul.f32 0.25, %v763_v16 }
 0x1c6   : > { %v2881_v18 = vsel %vm556_vm1, %v1408_v17, -1e+30 }
 0x1c7   : > { %1447 = vmax.xlane.f32.xlu0 %v2881_v18  ;;  %v2963_v28 = vsel %vm556_vm1, %v791_v25, -1e+30 }
 0x1cb   : > { %v1381_v19 = vpop.f32.mrf.mxu2 }
 0x1cc   : > { %v1409_v20 = vmul.f32 0.25, %v1381_v19 }
 0x1ce   : > { %v2886_v21 = vsel %vm556_vm1, %v1409_v20, -1e+30 }
 0x1cf   : > { %1449 = vmax.xlane.f32.xlu1 %v2886_v21 }
 0x1d3   : > { %v1383_v22 = vpop.f32.mrf.mxu2 }
 0x1d4   : > { %v1410_v23 = vmul.f32 0.25, %v1383_v22 }
 0x1d6   : > { %v2891_v24 = vsel %vm556_vm1, %v1410_v23, -1e+30  ;;  %v850_v23 = vsub.f32 %v2844_v46, %v2895_v33 }
 0x1d7   : > { %1451 = vmax.xlane.f32.xlu2 %v2891_v24 }
 0x1db   : > { %1795 = vrot.lane.b32.xlu0 %v2305_v12, %s2610_s26  ;;  %v2911_v52 = vpop.f32.mrf.mxu2  ;;  %v2943_v12 = vsel %vm556_vm1, %v789_v9, -1e+30 }
 0x1e3   : > { %v1388_v61 = vpop.f32.mrf.mxu2 }
 0x1e4   : > { %v1412_v1 = vmul.f32 0.25, %v1388_v61 }
 0x1e6   : > { %v2934_v4 = vsel %vm556_vm1, %v1412_v1, -1e+30 }
 0x1eb   : > { %v1391_v3 = vpop.f32.mrf.mxu2 }
 0x1ec   : > { %v1413_v33 = vmul.f32 0.25, %v1391_v3 }
 0x1f3   : > { %v1393_v13 = vpop.f32.mrf.mxu2 }
 0x1f4   : > { %v1414_v35 = vmul.f32 0.25, %v1393_v13 }
 0x1f6   : > { %v2953_v20 = vsel %vm556_vm1, %v1414_v35, -1e+30 }
 0x202   : > { %v1434_v34 = vpop.xlane.xlu1 %1433 }
 0x203   : > { %v1465_v37 = vsub.f32 %v1417_v60, %v1434_v34  ;;  %v788_v60 = vmul.f32 0.25, %v755_v26  ;;  %v869_v26 = vmul.f32 1.442695, %v850_v23 }
 0x205   : > { %v1481_v38 = vmul.f32 1.442695, %v1465_v37  ;;  %829 = vmax.xlane.f32.xlu0 %v2899_v36 }
 0x207   : > { %2442 = vpow2.f32 %v1481_v38 }
 0x20a   : > { %v1436_v41 = vpop.xlane.xlu2 %1435 }
 0x20b   : > { %v1466_v43 = vsub.f32 %v1418_v63, %v1436_v41  ;;  %v2925_v63 = vsel %vm556_vm1, %v788_v60, -1e+30 }
 0x20d   : > { %v2904_v44 = vpop.eup %2442  ;;  %v1483_v45 = vmul.f32 1.442695, %v1466_v43  ;;  %v2975_v43 = vsel %vm556_vm1, %v1413_v33, -1e+30 }
 0x20e   : > { %1513 = vadd.xlane.f32.xlu1 %v2904_v44 }
 0x20f   : > { %2444 = vpow2.f32 %v1483_v45  ;;  %v849_v45 = vsub.f32 %v2838_v42, %v2902_v40  ;;  %v1411_v42 = vmul.f32 0.25, %v2911_v52 }
 0x211   : > { %v2998_v59 = vsel %vm556_vm1, %v1411_v42, -1e+30 }
 0x212   : > { %v1438_v47 = vpop.xlane.xlu0 %1437 }
 0x213   : > { %v1467_v48 = vsub.f32 %v1419_v2, %v1438_v47 }
 0x215   : > { %v2907_v49 = vpop.eup %2444  ;;  %v1485_v50 = vmul.f32 1.442695, %v1467_v48  ;;  %v1396_v48 = vpop.f32.mrf.mxu2 }
 0x216   : > { %1515 = vadd.xlane.f32.xlu2 %v2907_v49  ;;  %v1415_v9 = vmul.f32 0.25, %v1396_v48 }
 0x217   : > { %2446 = vpow2.f32 %v1485_v50 }
 0x21a   : > { %v1440_v54 = vpop.xlane.xlu2 %1439 }
 0x21b   : > { %v1468_v55 = vsub.f32 %v2860_v5, %v1440_v54 }
 0x21d   : > { %v2918_v57 = vpop.eup %2446  ;;  %v1487_v58 = vmul.f32 1.442695, %v1468_v55  ;;  %v1398_v55 = vpop.f32.mrf.mxu2 }
 0x21e   : > { %1517 = vadd.xlane.f32.xlu1 %v2918_v57  ;;  %823 = vmax.xlane.f32.xlu2 %v2916_v56  ;;  %v1416_v60 = vmul.f32 0.25, %v1398_v55 }
 0x21f   : > { %2448 = vpow2.f32 %v1487_v58 }
 0x220   : > { %2450 = vpow2.f32 %v865_v62  ;;  %v3004_v52 = vsel %vm556_vm1, %v1416_v60, -1e+30 }
 0x225   : > { %v2927_v0 = vpop.eup %2448 }
 0x226   : > { %825 = vmax.xlane.f32.xlu2 %v2925_v63  ;;  %1519 = vadd.xlane.f32.xlu0 %v2927_v0  ;;  %v2936_v5 = vpop.eup %2450 }
 0x22a   : > { %v1444_v2 = vpop.xlane.xlu2 %1443 }
 0x22b   : > { %v1470_v39 = vsub.f32 %v2870_v11, %v1444_v2  ;;  %v1442_v11 = vpop.xlane.xlu1 %1441 }
 0x22c   : > { %v1469_v17 = vsub.f32 %v2865_v8, %v1442_v11  ;;  %v765_v8 = vpop.f32.mrf.mxu0  ;;  %v3023_v11 = vsel %vm556_vm1, %v1415_v9, -1e+30 }
 0x22d   : > { %v1491_v6 = vmul.f32 1.442695, %v1470_v39  ;;  %v792_v62 = vmul.f32 0.25, %v765_v8 }
 0x22e   : > { %1455 = vmax.xlane.f32.xlu2 %v2934_v4  ;;  %897 = vadd.xlane.f32.xlu0 %v2936_v5  ;;  %v1489_v19 = vmul.f32 1.442695, %v1469_v17 }
 0x22f   : > { %2452 = vpow2.f32 %v1491_v6  ;;  %v3009_v2 = vsel %vm556_vm1, %v792_v62, -1e+30 }
 0x230   : > { %2454 = vpow2.f32 %v863_v10 }
 0x231   : > { %2456 = vpow2.f32 %v1489_v19 }
 0x232   : > { %2458 = vpow2.f32 %v869_v26  ;;  %v1446_v58 = vpop.xlane.xlu2 %1445 }
 0x233   : > { %v1471_v61 = vsub.f32 %v2876_v15, %v1446_v58 }
 0x234   : > { %v768_v37 = vpop.f32.mrf.mxu0 }
 0x235   : > { %v2945_v14 = vpop.eup %2452  ;;  %v1493_v1 = vmul.f32 1.442695, %v1471_v61  ;;  %v793_v3 = vmul.f32 0.25, %v768_v37 }
 0x236   : > { %827 = vmax.xlane.f32.xlu2 %v2943_v12  ;;  %1523 = vadd.xlane.f32.xlu0 %v2945_v14  ;;  %v2955_v22 = vpop.eup %2454 }
 0x237   : > { %1793 = vrot.lane.b32.xlu1 %v2304_v51, %s2610_s26  ;;  %v2965_v30 = vpop.eup %2456  ;;  %v3014_v39 = vsel %vm556_vm1, %v793_v3, -1e+30 }
 0x238   : > { %v2971_v41 = vpop.eup %2458 }
 0x23a   : > { %v1448_v27 = vpop.xlane.xlu0 %1447 }
 0x23b   : > { %v1472_v31 = vsub.f32 %v2881_v18, %v1448_v27 }
 0x23c   : > { %v770_v50 = vpop.f32.mrf.mxu0 }
 0x23d   : > { %v1495_v34 = vmul.f32 1.442695, %v1472_v31  ;;  %v794_v53 = vmul.f32 0.25, %v770_v50 }
 0x23e   : > { %895 = vadd.xlane.f32.xlu2 %v2955_v22  ;;  %1459 = vmax.xlane.f32.xlu0 %v2953_v20 }
 0x23f   : > { %2460 = vpow2.f32 %v1495_v34  ;;  %v2989_v54 = vsel %vm556_vm1, %v794_v53, -1e+30 }
 0x242   : > { %v1450_v29 = vpop.xlane.xlu1 %1449 }
 0x243   : > { %v1473_v46 = vsub.f32 %v2886_v21, %v1450_v29  ;;  %v867_v21 = vmul.f32 1.442695, %v849_v45 }
 0x244   : > { %v773_v50 = vpop.f32.mrf.mxu0 }
 0x245   : > { %v1497_v38 = vmul.f32 1.442695, %v1473_v46  ;;  %v2981_v47 = vpop.eup %2460 }
 0x246   : > { %1521 = vadd.xlane.f32.xlu2 %v2965_v30  ;;  %831 = vmax.xlane.f32.xlu0 %v2963_v28 }
 0x247   : > { %2462 = vpow2.f32 %v1497_v38 }
 0x248   : > { %2464 = vpow2.f32 %v867_v21 }
 0x249   : > { %2466 = vpow2.f32 %v1493_v1 }
 0x24a   : > { %v1452_v15 = vpop.xlane.xlu2 %1451 }
 0x24b   : > { %v1474_v7 = vsub.f32 %v2891_v24, %v1452_v15 }
 0x24d   : > { %v1796_v18 = vpop.permute.xlu0 %1795  ;;  %v2983_v51 = vpop.eup %2462  ;;  %v1499_v10 = vmul.f32 1.442695, %v1474_v7 }
 0x24e   : > { %1457 = vmax.xlane.f32.xlu2 %v2975_v43  ;;  %901 = vadd.xlane.f32.xlu0 %v2971_v41  ;;  %v2992_v40 = vpop.eup %2464 }
 0x24f   : > { %1823 = vmatpush.bf16.msra.mxu3 %v1796_v18  ;;  %v3017_v6 = vpop.eup %2466  ;;  %2468 = vpow2.f32 %v1499_v10 }
 0x255   : > { %v3026_v13 = vpop.eup %2468 }
 0x256   : > { %1527 = vadd.xlane.f32.xlu2 %v2981_v47  ;;  %1529 = vadd.xlane.f32.xlu0 %v2983_v51 }
 0x25e   : > { %899 = vadd.xlane.f32.xlu2 %v2992_v40  ;;  %837 = vmax.xlane.f32.xlu0 %v2989_v54 }
 0x261   : > { %1453 = vmax.xlane.f32.xlu1 %v2998_v59 }
 0x266   : > { %1463 = vmax.xlane.f32.xlu2 %v3004_v52 }
 0x269   : > { %833 = vmax.xlane.f32.xlu1 %v3009_v2 }
 0x26e   : > { %835 = vmax.xlane.f32.xlu2 %v3014_v39 }
 0x271   : > { %1525 = vadd.xlane.f32.xlu1 %v3017_v6 }
 0x278   : > { %v830_v24 = vpop.xlane.xlu0 %829 }
 0x279   : > { %1461 = vmax.xlane.f32.xlu1 %v3023_v11 }
 0x281   : > { %1531 = vadd.xlane.f32.xlu1 %v3026_v13  ;;  %v1514_v16 = vpop.xlane.xlu1 %1513 }
 0x282   : > { %2470 = vrcp.f32 %v1514_v16  ;;  %v1556_v58 = vand.u32 2147483648, %v1514_v16  ;;  %vm1550_vm6 = vweird.f32 %v1514_v16  ;;  %v1554_v3 = vand.u32 2147483647, %v1514_v16 }
 0x284   : > { %vm1555_vm9 = vcmp.eq.f32.partialorder %v1554_v3, 8.507059e+37 }
 0x288   : > { %v2471_v35 = vpop.eup %2470 }
 0x289   : > { %v1516_v17 = vpop.xlane.xlu2 %1515  ;;  %v1546_v26 = vmul.f32 %v2471_v35, %v1514_v16  ;;  %vm1551_vm4 = vweird.f32 %v2471_v35  ;;  %v854_v16 = vsub.f32 %v2899_v36, %v830_v24 }
 0x28a   : > { %2472 = vrcp.f32 %v1516_v17  ;;  %v1571_v48 = vand.u32 2147483648, %v1516_v17  ;;  %vm1565_vm3 = vweird.f32 %v1516_v17  ;;  %v1569_v55 = vand.u32 2147483647, %v1516_v17  ;;  %vm3055_vm7 = vmor %vm1550_vm6, %vm1551_vm4 }
 0x28b   : > { %v1547_v46 = vsub.f32 1.0, %v1546_v26 }
 0x28c   : > { %v1572_v10 = vor.u32 1.1754944e-38, %v1571_v48  ;;  %vm1570_vm8 = vcmp.eq.f32.partialorder %v1569_v55, 8.507059e+37 }
 0x28d   : > { %v1548_v18 = vmul.f32 %v2471_v35, %v1547_v46  ;;  %v795_v46 = vmul.f32 0.25, %v773_v50 }
 0x28f   : > { %v1549_v42 = vadd.f32 %v2471_v35, %v1548_v18 }
 0x290   : > { %v2473_v19 = vpop.eup %2472 }
 0x291   : > { %v1561_v23 = vmul.f32 %v2473_v19, %v1516_v17  ;;  %v824_v25 = vpop.xlane.xlu2 %823  ;;  %v3030_v31 = vpop.xlane.xlu1 %1517  ;;  %vm1566_vm2 = vweird.f32 %v2473_v19 }
 0x292   : > { %v851_v8 = vsub.f32 %v2916_v56, %v824_v25  ;;  %vm3044_vm5 = vmor %vm1565_vm3, %vm1566_vm2  ;;  %v1586_v3 = vand.u32 2147483648, %v3030_v31  ;;  %vm1580_vm14 = vweird.f32 %v3030_v31  ;;  %v1584_v9 = vand.u32 2147483647, %v3030_v31 }
 0x293   : > { %v1562_v29 = vsub.f32 1.0, %v1561_v23  ;;  %v1553_v23 = vsel %vm3055_vm7, %v2471_v35, %v1549_v42 }
 0x294   : > { %v871_v27 = vmul.f32 1.442695, %v851_v8  ;;  %vm1585_vm3 = vcmp.eq.f32.partialorder %v1584_v9, 8.507059e+37 }
 0x295   : > { %v1563_v33 = vmul.f32 %v2473_v19, %v1562_v29 }
 0x296   : > { %2474 = vpow2.f32 %v871_v27 }
 0x297   : > { %2476 = vrcp.f32 %v3030_v31  ;;  %v1564_v21 = vadd.f32 %v2473_v19, %v1563_v33  ;;  %v877_v33 = vmul.f32 1.442695, %v854_v16 }
 0x299   : > { %v826_v34 = vpop.xlane.xlu2 %825  ;;  %v3033_v37 = vpop.xlane.xlu0 %1519  ;;  %v1568_v15 = vsel %vm3044_vm5, %v2473_v19, %v1564_v21  ;;  %v1557_v19 = vor.u32 1.1754944e-38, %v1556_v58 }
 0x29a   : > { %v852_v38 = vsub.f32 %v2925_v63, %v826_v34  ;;  %2478 = vrcp.f32 %v3033_v37  ;;  %v1573_v26 = vsel %vm1570_vm8, %v1572_v10, %v1568_v15  ;;  %v3069_v34 = vpop.f32.mrf.mxu0  ;;  %vm1595_vm11 = vweird.f32 %v3033_v37 }
 0x29b   : > { %v1558_v27 = vsel %vm1555_vm9, %v1557_v19, %v1553_v23  ;;  %v1574_v35 = vmul.f32 %v2907_v49, %v1573_v26  ;;  %v3081_v49 = vsel %vm556_vm1, %v795_v46, -1e+30 }
 0x29c   : > { %v3037_v45 = vpop.eup %2474  ;;  %v873_v56 = vmul.f32 1.442695, %v852_v38  ;;  %v1559_v18 = vmul.f32 %v2904_v44, %v1558_v27  ;;  %v1587_v27 = vor.u32 1.1754944e-38, %v1586_v3 }
 0x29d   : > { %903 = vadd.xlane.f32.xlu1 %v3037_v45  ;;  %v3040_v53 = vpop.eup %2476 }
 0x29e   : > { %2480 = vpow2.f32 %v873_v56  ;;  %v1576_v17 = vmul.f32 %v3040_v53, %v3030_v31  ;;  %v1785_v42 = vpack.c.bf16 %v1574_v35, %v1559_v18  ;;  %vm1581_vm12 = vweird.f32 %v3040_v53 }
 0x29f   : > { %vm3112_vm15 = vmor %vm1580_vm14, %vm1581_vm12 }
 0x2a0   : > { %v3042_v63 = vpop.eup %2478  ;;  %v1577_v29 = vsub.f32 1.0, %v1576_v17 }
 0x2a1   : > { %v1591_v61 = vmul.f32 %v3042_v63, %v3033_v37  ;;  %v1456_v62 = vpop.xlane.xlu2 %1455  ;;  %v3050_v1 = vpop.xlane.xlu0 %897  ;;  %vm1596_vm10 = vweird.f32 %v3042_v63 }
 0x2a2   : > { %v1476_v7 = vsub.f32 %v2934_v4, %v1456_v62  ;;  %2482 = vrcp.f32 %v3050_v1  ;;  %v1578_v50 = vmul.f32 %v3040_v53, %v1577_v29  ;;  %v1599_v62 = vand.u32 2147483647, %v3033_v37  ;;  %vm3098_vm13 = vmor %vm1595_vm11, %vm1596_vm10  ;;  %v778_v16 = vpop.f32.mrf.mxu0 }
 0x2a3   : > { %v1592_v4 = vsub.f32 1.0, %v1591_v61  ;;  %v797_v35 = vmul.f32 0.25, %v778_v16  ;;  %vm947_vm5 = vweird.f32 %v3050_v1 }
 0x2a4   : > { %v3063_v25 = vpop.eup %2480  ;;  %v1503_v8 = vmul.f32 1.442695, %v1476_v7  ;;  %v1579_v61 = vadd.f32 %v3040_v53, %v1578_v50  ;;  %vm1600_vm2 = vcmp.eq.f32.partialorder %v1599_v62, 8.507059e+37  ;;  %v951_v62 = vand.u32 2147483647, %v3050_v1 }
 0x2a5   : > { %905 = vadd.xlane.f32.xlu2 %v3063_v25  ;;  %v1593_v36 = vmul.f32 %v3042_v63, %v1592_v4  ;;  %v3136_v50 = vsel %vm556_vm1, %v797_v35, -1e+30 }
 0x2a6   : > { %2484 = vpow2.f32 %v1503_v8  ;;  %vm952_vm10 = vcmp.eq.f32.partialorder %v951_v62, 8.507059e+37 }
 0x2a7   : > { %2486 = vpow2.f32 %v877_v33  ;;  %v1594_v44 = vadd.f32 %v3042_v63, %v1593_v36 }
 0x2a8   : > { %v3076_v48 = vpop.eup %2482 }
 0x2a9   : > { %v1794_v24 = vpop.permute.xlu1 %1793  ;;  %v828_v38 = vpop.xlane.xlu2 %827  ;;  %v943_v60 = vmul.f32 %v3076_v48, %v3050_v1  ;;  %v1598_v10 = vsel %vm3098_vm13, %v3042_v63, %v1594_v44  ;;  %v1583_v63 = vsel %vm3112_vm15, %v3040_v53, %v1579_v61  ;;  %vm948_vm4 = vweird.f32 %v3076_v48 }
 0x2aa   : > { %v853_v56 = vsub.f32 %v2943_v12, %v828_v38  ;;  %v3074_v21 = vpop.xlane.xlu0 %1523  ;;  %1824 = vmatpush.bf16.msra.mxu3 %v1794_v24  ;;  %v1601_v12 = vand.u32 2147483648, %v3033_v37  ;;  %vm3149_vm7 = vmor %vm947_vm5, %vm948_vm4 }
 0x2ab   : > { %2488 = vrcp.f32 %v3074_v21  ;;  %v944_v23 = vsub.f32 1.0, %v943_v60  ;;  %vm1625_vm13 = vweird.f32 %v3074_v21 }
 0x2ac   : > { %v3083_v55 = vpop.eup %2484  ;;  %v875_v58 = vmul.f32 1.442695, %v853_v56  ;;  %v1602_v19 = vor.u32 1.1754944e-38, %v1601_v12 }
 0x2ad   : > { %1825 = vmatmul.bf16.vlgmr.msra.gmra.mxu3 %v1785_v42  ;;  %1535 = vadd.xlane.f32.xlu1 %v3083_v55  ;;  %v3109_v17 = vpop.eup %2486  ;;  %v945_v33 = vmul.f32 %v3076_v48, %v944_v23 }
 0x2ae   : > { %2490 = vpow2.f32 %v875_v58  ;;  %839 = vmax.xlane.f32.xlu2 %v3081_v49  ;;  %v1603_v29 = vsel %vm1600_vm2, %v1602_v19, %v1598_v10 }
 0x2af   : > { %v1604_v53 = vmul.f32 %v2927_v0, %v1603_v29  ;;  %v946_v44 = vadd.f32 %v3076_v48, %v945_v33  ;;  %v953_v0 = vand.u32 2147483648, %v3050_v1 }
 0x2b1   : > { %v3103_v7 = vpop.xlane.xlu2 %895  ;;  %v3116_v26 = vpop.eup %2488  ;;  %v950_v1 = vsel %vm3149_vm7, %v3076_v48, %v946_v44  ;;  %v954_v16 = vor.u32 1.1754944e-38, %v953_v0 }
 0x2b2   : > { %2492 = vrcp.f32 %v3103_v7  ;;  %v1460_v37 = vpop.xlane.xlu0 %1459  ;;  %v1621_v36 = vmul.f32 %v3116_v26, %v3074_v21  ;;  %v936_v10 = vand.u32 2147483647, %v3103_v7  ;;  %vm932_vm8 = vweird.f32 %v3103_v7 }
 0x2b3   : > { %v1478_v31 = vsub.f32 %v2953_v20, %v1460_v37  ;;  %v1588_v20 = vsel %vm1585_vm3, %v1587_v27, %v1583_v63  ;;  %v955_v29 = vsel %vm952_vm10, %v954_v16, %v950_v1  ;;  %vm1626_vm12 = vweird.f32 %v3116_v26 }
 0x2b4   : > { %v3122_v4 = vpop.eup %2490  ;;  %v1589_v56 = vmul.f32 %v2918_v57, %v1588_v20  ;;  %v1622_v42 = vsub.f32 1.0, %v1621_v36  ;;  %v938_v57 = vand.u32 2147483648, %v3103_v7  ;;  %vm937_vm11 = vcmp.eq.f32.partialorder %v936_v10, 8.507059e+37  ;;  %vm1627_vm15 = vmor %vm1625_vm13, %vm1626_vm12 }
 0x2b5   : > { %v1507_v46 = vmul.f32 1.442695, %v1478_v31  ;;  %907 = vadd.xlane.f32.xlu1 %v3122_v4  ;;  %v956_v20 = vmul.f32 %v2936_v5, %v955_v29 }
 0x2b6   : > { %909 = vadd.xlane.f32.xlu2 %v3109_v17  ;;  %v1786_v61 = vpack.c.bf16 %v1604_v53, %v1589_v56  ;;  %v939_v19 = vor.u32 1.1754944e-38, %v938_v57  ;;  %v1629_v53 = vand.u32 2147483647, %v3074_v21 }
 0x2b7   : > { %2494 = vpow2.f32 %v1507_v46 }
 0x2b8   : > { %v2493_v24 = vpop.eup %2492  ;;  %vm1630_vm4 = vcmp.eq.f32.partialorder %v1629_v53, 8.507059e+37 }
 0x2b9   : > { %v928_v38 = vmul.f32 %v2493_v24, %v3103_v7  ;;  %v3131_v18 = vpop.xlane.xlu2 %1521  ;;  %vm933_vm6 = vweird.f32 %v2493_v24  ;;  %v1631_v7 = vand.u32 2147483648, %v3074_v21 }
 0x2ba   : > { %2496 = vrcp.f32 %v3131_v18  ;;  %v832_v58 = vpop.xlane.xlu0 %831  ;;  %vm934_vm9 = vmor %vm932_vm8, %vm933_vm6  ;;  %v1616_v56 = vand.u32 2147483648, %v3131_v18  ;;  %vm1610_vm2 = vweird.f32 %v3131_v18 }
 0x2bb   : > { %v929_v12 = vsub.f32 1.0, %v928_v38  ;;  %v855_v60 = vsub.f32 %v2963_v28, %v832_v58  ;;  %v1623_v28 = vmul.f32 %v3116_v26, %v1622_v42  ;;  %v1614_v58 = vand.u32 2147483647, %v3131_v18 }
 0x2bc   : > { %v1632_v5 = vor.u32 1.1754944e-38, %v1631_v7 }
 0x2bd   : > { %v3146_v3 = vpop.eup %2494  ;;  %v930_v15 = vmul.f32 %v2493_v24, %v929_v12  ;;  %v879_v9 = vmul.f32 1.442695, %v855_v60  ;;  %1830 = vmatmul.bf16.gmra.mxu3 %v1786_v61  ;;  %v1624_v48 = vadd.f32 %v3116_v26, %v1623_v28  ;;  %v1617_v12 = vor.u32 1.1754944e-38, %v1616_v56 }
 0x2be   : > { %1539 = vadd.xlane.f32.xlu1 %v3146_v3  ;;  %843 = vmax.xlane.f32.xlu2 %v3136_v50  ;;  %vm1615_vm5 = vcmp.eq.f32.partialorder %v1614_v58, 8.507059e+37 }
 0x2bf   : > { %2498 = vpow2.f32 %v879_v9  ;;  %v931_v37 = vadd.f32 %v2493_v24, %v930_v15  ;;  %v1628_v44 = vsel %vm1627_vm15, %v3116_v26, %v1624_v48 }
 0x2c0   : > { %v2497_v8 = vpop.eup %2496  ;;  %v1633_v60 = vsel %vm1630_vm4, %v1632_v5, %v1628_v44 }
 0x2c1   : > { %v1606_v31 = vmul.f32 %v2497_v8, %v3131_v18  ;;  %v3161_v63 = vpop.xlane.xlu2 %1457  ;;  %v935_v27 = vsel %vm934_vm9, %v2493_v24, %v931_v37  ;;  %vm1611_vm14 = vweird.f32 %v2497_v8  ;;  %v1634_v15 = vmul.f32 %v2945_v14, %v1633_v60 }
 0x2c2   : > { %v3163_v46 = vpop.xlane.xlu0 %901  ;;  %v940_v35 = vsel %vm937_vm11, %v939_v19, %v935_v27  ;;  %vm1612_vm3 = vmor %vm1610_vm2, %vm1611_vm14  ;;  %v1477_v58 = vsub.f32 %v2975_v43, %v3161_v63 }
 0x2c3   : > { %v1607_v33 = vsub.f32 1.0, %v1606_v31  ;;  %2500 = vrcp.f32 %v3163_v46  ;;  %v941_v36 = vmul.f32 %v2955_v22, %v940_v35  ;;  %v983_v14 = vand.u32 2147483648, %v3163_v46 }
 0x2c4   : > { %vm977_vm7 = vweird.f32 %v3163_v46  ;;  %v981_v29 = vand.u32 2147483647, %v3163_v46 }
 0x2c5   : > { %v3173_v24 = vpop.eup %2498  ;;  %v1608_v38 = vmul.f32 %v2497_v8, %v1607_v33  ;;  %v1167_v42 = vpack.c.bf16 %v956_v20, %v941_v36 }
 0x2c6   : > { %911 = vadd.xlane.f32.xlu1 %v3173_v24  ;;  %vm982_vm11 = vcmp.eq.f32.partialorder %v981_v29, 8.507059e+37 }
 0x2c7   : > { %v1609_v22 = vadd.f32 %v2497_v8, %v1608_v38  ;;  %1231 = vmatmul.bf16.vlgmr.msra.gmra.mxu1 %v1167_v42  ;;  %v984_v38 = vor.u32 1.1754944e-38, %v983_v14 }
 0x2c9   : > { %v3180_v21 = vpop.xlane.xlu2 %1527  ;;  %v1613_v0 = vsel %vm1612_vm3, %v2497_v8, %v1609_v22  ;;  %v2501_v61 = vpop.eup %2500 }
 0x2ca   : > { %v1618_v57 = vsel %vm1615_vm5, %v1617_v12, %v1613_v0  ;;  %v973_v26 = vmul.f32 %v2501_v61, %v3163_v46  ;;  %vm978_vm6 = vweird.f32 %v2501_v61  ;;  %vm1655_vm15 = vweird.f32 %v3180_v21 }
 0x2cb   : > { %v1619_v62 = vmul.f32 %v2965_v30, %v1618_v57  ;;  %vm3191_vm8 = vmor %vm977_vm7, %vm978_vm6  ;;  %v3209_v57 = vpop.xlane.xlu0 %1529 }
 0x2cc   : > { %v974_v9 = vsub.f32 1.0, %v973_v26 }
 0x2cd   : > { %v1787_v18 = vpack.c.bf16 %v1634_v15, %v1619_v62  ;;  %v1505_v15 = vmul.f32 1.442695, %v1477_v58 }
 0x2ce   : > { %v975_v28 = vmul.f32 %v2501_v61, %v974_v9 }
 0x2cf   : > { %1835 = vmatmul.bf16.gmra.mxu3 %v1787_v18 }
 0x2d0   : > { %v976_v19 = vadd.f32 %v2501_v61, %v975_v28 }
 0x2d1   : > { %v900_v10 = vpop.xlane.xlu2 %899 }
 0x2d2   : > { %2502 = vrcp.f32 %v900_v10  ;;  %v968_v35 = vand.u32 2147483648, %v900_v10  ;;  %v966_v7 = vand.u32 2147483647, %v900_v10  ;;  %vm962_vm10 = vweird.f32 %v900_v10 }
 0x2d3   : > { %2504 = vrcp.f32 %v3180_v21 }
 0x2d4   : > { %v1454_v23 = vpop.xlane.xlu1 %1453  ;;  %vm967_vm13 = vcmp.eq.f32.partialorder %v966_v7, 8.507059e+37 }
 0x2d5   : > { %v1475_v1 = vsub.f32 %v2998_v59, %v1454_v23 }
 0x2d7   : > { %v1501_v37 = vmul.f32 1.442695, %v1475_v1 }
 0x2d8   : > { %v2503_v16 = vpop.eup %2502 }
 0x2d9   : > { %v958_v8 = vmul.f32 %v2503_v16, %v900_v10  ;;  %2506 = vpow2.f32 %v1501_v37  ;;  %v1464_v30 = vpop.xlane.xlu2 %1463  ;;  %v3195_v36 = vpop.eup %2504  ;;  %vm963_vm9 = vweird.f32 %v2503_v16 }
 0x2da   : > { %v1480_v31 = vsub.f32 %v3004_v52, %v1464_v30  ;;  %v980_v52 = vsel %vm3191_vm8, %v2501_v61, %v976_v19  ;;  %v1651_v44 = vmul.f32 %v3195_v36, %v3180_v21  ;;  %vm964_vm12 = vmor %vm962_vm10, %vm963_vm9  ;;  %v796_v61 = vmul.f32 0.25, %v3069_v34 }
 0x2db   : > { %v959_v27 = vsub.f32 1.0, %v958_v8  ;;  %v985_v22 = vsel %vm982_vm11, %v984_v38, %v980_v52  ;;  %vm1656_vm14 = vweird.f32 %v3195_v36  ;;  %v1659_v19 = vand.u32 2147483647, %v3180_v21 }
 0x2dc   : > { %v1511_v59 = vmul.f32 1.442695, %v1480_v31  ;;  %v834_v48 = vpop.xlane.xlu1 %833  ;;  %v986_v63 = vmul.f32 %v2971_v41, %v985_v22  ;;  %v1652_v26 = vsub.f32 1.0, %v1651_v44  ;;  %vm3239_vm2 = vmor %vm1655_vm15, %vm1656_vm14  ;;  %v838_v22 = vpop.xlane.xlu0 %837 }
 0x2dd   : > { %v960_v20 = vmul.f32 %v2503_v16, %v959_v27  ;;  %v856_v53 = vsub.f32 %v3009_v2, %v834_v48  ;;  %v969_v2 = vor.u32 1.1754944e-38, %v968_v35  ;;  %vm1660_vm5 = vcmp.eq.f32.partialorder %v1659_v19, 8.507059e+37 }
 0x2de   : > { %2508 = vpow2.f32 %v1511_v59  ;;  %v1653_v41 = vmul.f32 %v3195_v36, %v1652_v26  ;;  %v780_v59 = vpop.f32.mrf.mxu0 }
 0x2df   : > { %v3200_v46 = vpop.eup %2506  ;;  %v881_v56 = vmul.f32 1.442695, %v856_v53  ;;  %v961_v42 = vadd.f32 %v2503_v16, %v960_v20  ;;  %v798_v53 = vmul.f32 0.25, %v780_v59 }
 0x2e0   : > { %1533 = vadd.xlane.f32.xlu0 %v3200_v46  ;;  %v1654_v37 = vadd.f32 %v3195_v36, %v1653_v41 }
 0x2e1   : > { %2510 = vpow2.f32 %v881_v56  ;;  %v836_v5 = vpop.xlane.xlu2 %835  ;;  %v965_v0 = vsel %vm964_vm12, %v2503_v16, %v961_v42  ;;  %v1661_v16 = vand.u32 2147483648, %v3180_v21 }
 0x2e2   : > { %v857_v12 = vsub.f32 %v3014_v39, %v836_v5  ;;  %v970_v60 = vsel %vm967_vm13, %v969_v2, %v965_v0  ;;  %v1658_v21 = vsel %vm3239_vm2, %v3195_v36, %v1654_v37  ;;  %v3253_v5 = vsel %vm556_vm1, %v798_v53, -1e+30 }
 0x2e3   : > { %v971_v43 = vmul.f32 %v2992_v40, %v970_v60  ;;  %v3221_v40 = vsel %vm556_vm1, %v796_v61, -1e+30  ;;  %v1662_v33 = vor.u32 1.1754944e-38, %v1661_v16  ;;  %v858_v60 = vsub.f32 %v2989_v54, %v838_v22 }
 0x2e4   : > { %v3213_v62 = vpop.eup %2508  ;;  %v1526_v18 = vpop.xlane.xlu1 %1525  ;;  %v883_v9 = vmul.f32 1.442695, %v857_v12  ;;  %vm1670_vm1 = vweird.f32 %v3209_v57 }
 0x2e5   : > { %2512 = vrcp.f32 %v1526_v18  ;;  %1543 = vadd.xlane.f32.xlu1 %v3213_v62  ;;  %v1168_v10 = vpack.c.bf16 %v986_v63, %v971_v43  ;;  %v1646_v27 = vand.u32 2147483648, %v1526_v18  ;;  %v1644_v48 = vand.u32 2147483647, %v1526_v18 }
 0x2e6   : > { %2514 = vrcp.f32 %v3209_v57  ;;  %vm1640_vm4 = vweird.f32 %v1526_v18  ;;  %v1663_v38 = vsel %vm1660_vm5, %v1662_v33, %v1658_v21  ;;  %v885_v32 = vmul.f32 1.442695, %v858_v60 }
 0x2e7   : > { %v3217_v39 = vpop.eup %2510  ;;  %1236 = vmatmul.bf16.gmra.mxu1 %v1168_v10  ;;  %2516 = vpow2.f32 %v1505_v15  ;;  %v1647_v52 = vor.u32 1.1754944e-38, %v1646_v27  ;;  %vm1645_vm7 = vcmp.eq.f32.partialorder %v1644_v48, 8.507059e+37  ;;  %v1674_v15 = vand.u32 2147483647, %v3209_v57 }
 0x2e8   : > { %841 = vmax.xlane.f32.xlu0 %v3221_v40  ;;  %913 = vadd.xlane.f32.xlu2 %v3217_v39  ;;  %2518 = vpow2.f32 %v883_v9 }
 0x2e9   : > { %vm1675_vm12 = vcmp.eq.f32.partialorder %v1674_v15, 8.507059e+37 }
 0x2eb   : > { %v2513_v34 = vpop.eup %2512 }
 0x2ec   : > { %v3226_v23 = vpop.eup %2514  ;;  %v1636_v28 = vmul.f32 %v2513_v34, %v1526_v18  ;;  %v1462_v1 = vpop.xlane.xlu1 %1461  ;;  %vm1641_vm3 = vweird.f32 %v2513_v34 }
 0x2ed   : > { %v3231_v8 = vpop.eup %2516  ;;  %v1666_v31 = vmul.f32 %v3226_v23, %v3209_v57  ;;  %v1479_v7 = vsub.f32 %v3023_v11, %v1462_v1  ;;  %vm1642_vm6 = vmor %vm1640_vm4, %vm1641_vm3  ;;  %v1664_v11 = vmul.f32 %v2981_v47, %v1663_v38  ;;  %vm1671_vm8 = vweird.f32 %v3226_v23 }
 0x2ee   : > { %v1637_v30 = vsub.f32 1.0, %v1636_v28  ;;  %v3235_v14 = vpop.eup %2518  ;;  %v1676_v47 = vand.u32 2147483648, %v3209_v57  ;;  %vm1672_vm9 = vmor %vm1670_vm1, %vm1671_vm8 }
 0x2ef   : > { %v1667_v56 = vsub.f32 1.0, %v1666_v31  ;;  %v1509_v44 = vmul.f32 1.442695, %v1479_v7 }
 0x2f0   : > { %v1638_v35 = vmul.f32 %v2513_v34, %v1637_v30  ;;  %1537 = vadd.xlane.f32.xlu0 %v3231_v8  ;;  %915 = vadd.xlane.f32.xlu2 %v3235_v14  ;;  %v1677_v41 = vor.u32 1.1754944e-38, %v1676_v47 }
 0x2f1   : > { %v1668_v0 = vmul.f32 %v3226_v23, %v1667_v56 }
 0x2f2   : > { %v1639_v20 = vadd.f32 %v2513_v34, %v1638_v35 }
 0x2f3   : > { %v1669_v63 = vadd.f32 %v3226_v23, %v1668_v0 }
 0x2f4   : > { %v1532_v42 = vpop.xlane.xlu1 %1531  ;;  %v1643_v58 = vsel %vm1642_vm6, %v2513_v34, %v1639_v20 }
 0x2f5   : > { %2520 = vrcp.f32 %v1532_v42  ;;  %v1648_v2 = vsel %vm1645_vm7, %v1647_v52, %v1643_v58  ;;  %v1691_v18 = vand.u32 2147483648, %v1532_v42  ;;  %v1673_v9 = vsel %vm1672_vm9, %v3226_v23, %v1669_v63 }
 0x2f6   : > { %v1649_v36 = vmul.f32 %v3017_v6, %v1648_v2  ;;  %2522 = vpow2.f32 %v1509_v44  ;;  %v1689_v10 = vand.u32 2147483647, %v1532_v42  ;;  %vm1685_vm11 = vweird.f32 %v1532_v42 }
 0x2f7   : > { %2524 = vpow2.f32 %v885_v32  ;;  %v1678_v28 = vsel %vm1675_vm12, %v1677_v41, %v1673_v9  ;;  %v1692_v1 = vor.u32 1.1754944e-38, %v1691_v18 }
 0x2f8   : > { %845 = vmax.xlane.f32.xlu0 %v3253_v5  ;;  %v1788_v12 = vpack.c.bf16 %v1664_v11, %v1649_v36  ;;  %vm1690_vm14 = vcmp.eq.f32.partialorder %v1689_v10, 8.507059e+37  ;;  %v1679_v16 = vmul.f32 %v2983_v51, %v1678_v28 }
 0x2fa   : > { %1840 = vmatmul.bf16.gmra.mxu3 %v1788_v12 }
 0x2fb   : > { %v2521_v61 = vpop.eup %2520 }
 0x2fc   : > { %v1681_v43 = vmul.f32 %v2521_v61, %v1532_v42  ;;  %v3263_v26 = vpop.eup %2522  ;;  %vm1686_vm10 = vweird.f32 %v2521_v61 }
 0x2fd   : > { %vm1687_vm13 = vmor %vm1685_vm11, %vm1686_vm10  ;;  %v3269_v19 = vpop.eup %2524 }
 0x2fe   : > { %v1682_v6 = vsub.f32 1.0, %v1681_v43 }
 0x300   : > { %v1683_v54 = vmul.f32 %v2521_v61, %v1682_v6  ;;  %1541 = vadd.xlane.f32.xlu0 %v3263_v26 }
 0x302   : > { %v1684_v34 = vadd.f32 %v2521_v61, %v1683_v54 }
 0x304   : > { %v1688_v57 = vsel %vm1687_vm13, %v2521_v61, %v1684_v34 }
 0x305   : > { %v1693_v37 = vsel %vm1690_vm14, %v1692_v1, %v1688_v57 }
 0x306   : > { %v1694_v30 = vmul.f32 %v3026_v13, %v1693_v37 }
 0x308   : > { %917 = vadd.xlane.f32.xlu0 %v3269_v19  ;;  %v1789_v23 = vpack.c.bf16 %v1694_v30, %v1679_v16 }
 0x30a   : > { %1845 = vmatmul.bf16.gmra.mxu3 %v1789_v23 }
 0x310   : > { %v904_v31 = vpop.xlane.xlu1 %903 }
 0x311   : > { %2526 = vrcp.f32 %v904_v31  ;;  %v998_v20 = vand.u32 2147483648, %v904_v31  ;;  %vm992_vm2 = vweird.f32 %v904_v31  ;;  %v996_v56 = vand.u32 2147483647, %v904_v31 }
 0x313   : > { %v999_v22 = vor.u32 1.1754944e-38, %v998_v20  ;;  %vm997_vm6 = vcmp.eq.f32.partialorder %v996_v56, 8.507059e+37 }
 0x317   : > { %v2527_v27 = vpop.eup %2526 }
 0x318   : > { %v988_v29 = vmul.f32 %v2527_v27, %v904_v31  ;;  %v906_v35 = vpop.xlane.xlu2 %905  ;;  %vm993_vm15 = vweird.f32 %v2527_v27 }
 0x319   : > { %2528 = vrcp.f32 %v906_v35  ;;  %v1013_v38 = vand.u32 2147483648, %v906_v35  ;;  %vm994_vm3 = vmor %vm992_vm2, %vm993_vm15  ;;  %v1011_v44 = vand.u32 2147483647, %v906_v35  ;;  %vm1007_vm5 = vweird.f32 %v906_v35 }
 0x31a   : > { %v989_v59 = vsub.f32 1.0, %v988_v29 }
 0x31b   : > { %v1014_v11 = vor.u32 1.1754944e-38, %v1013_v38  ;;  %vm1012_vm8 = vcmp.eq.f32.partialorder %v1011_v44, 8.507059e+37 }
 0x31c   : > { %v990_v48 = vmul.f32 %v2527_v27, %v989_v59 }
 0x31e   : > { %v991_v13 = vadd.f32 %v2527_v27, %v990_v48 }
 0x31f   : > { %v2529_v21 = vpop.eup %2528 }
 0x320   : > { %v1003_v7 = vmul.f32 %v2529_v21, %v906_v35  ;;  %v3272_v33 = vpop.xlane.xlu1 %1535  ;;  %vm1008_vm4 = vweird.f32 %v2529_v21  ;;  %v995_v2 = vsel %vm994_vm3, %v2527_v27, %v991_v13 }
 0x321   : > { %v840_v51 = vpop.xlane.xlu2 %839  ;;  %vm1009_vm7 = vmor %vm1007_vm5, %vm1008_vm4  ;;  %v1000_v12 = vsel %vm997_vm6, %v999_v22, %v995_v2  ;;  %vm1715_vm3 = vweird.f32 %v3272_v33 }
 0x322   : > { %v1004_v53 = vsub.f32 1.0, %v1003_v7  ;;  %v859_v52 = vsub.f32 %v3081_v49, %v840_v51  ;;  %v1001_v43 = vmul.f32 %v3037_v45, %v1000_v12  ;;  %v1721_v12 = vand.u32 2147483648, %v3272_v33 }
 0x324   : > { %v1005_v42 = vmul.f32 %v2529_v21, %v1004_v53  ;;  %v887_v58 = vmul.f32 1.442695, %v859_v52 }
 0x326   : > { %2530 = vpow2.f32 %v887_v58  ;;  %v1006_v36 = vadd.f32 %v2529_v21, %v1005_v42 }
 0x328   : > { %v908_v0 = vpop.xlane.xlu1 %907  ;;  %v1010_v60 = vsel %vm1009_vm7, %v2529_v21, %v1006_v36 }
 0x329   : > { %2532 = vrcp.f32 %v908_v0  ;;  %v910_v49 = vpop.xlane.xlu2 %909  ;;  %v1015_v61 = vsel %vm1012_vm8, %v1014_v11, %v1010_v60  ;;  %v1028_v34 = vand.u32 2147483648, %v908_v0  ;;  %vm1022_vm10 = vweird.f32 %v908_v0 }
 0x32a   : > { %2534 = vrcp.f32 %v910_v49  ;;  %v1016_v63 = vmul.f32 %v3063_v25, %v1015_v61  ;;  %v1026_v25 = vand.u32 2147483647, %v908_v0  ;;  %v1043_v37 = vand.u32 2147483648, %v910_v49 }
 0x32b   : > { %v1041_v23 = vand.u32 2147483647, %v910_v49  ;;  %vm1037_vm11 = vweird.f32 %v910_v49  ;;  %v1029_v31 = vor.u32 1.1754944e-38, %v1028_v34 }
 0x32c   : > { %v3277_v47 = vpop.eup %2530  ;;  %v1169_v32 = vpack.c.bf16 %v1016_v63, %v1001_v43  ;;  %vm1027_vm13 = vcmp.eq.f32.partialorder %v1026_v25, 8.507059e+37  ;;  %v1044_v48 = vor.u32 1.1754944e-38, %v1043_v37 }
 0x32d   : > { %919 = vadd.xlane.f32.xlu1 %v3277_v47  ;;  %vm1042_vm15 = vcmp.eq.f32.partialorder %v1041_v23, 8.507059e+37 }
 0x32e   : > { %1241 = vmatmul.bf16.gmra.mxu1 %v1169_v32 }
 0x32f   : > { %v2533_v6 = vpop.eup %2532 }
 0x330   : > { %v2535_v15 = vpop.eup %2534  ;;  %v1018_v18 = vmul.f32 %v2533_v6, %v908_v0  ;;  %v3280_v54 = vpop.f32.mrf.mxu3  ;;  %vm1023_vm1 = vweird.f32 %v2533_v6 }
 0x331   : > { %v1033_v9 = vmul.f32 %v2535_v15, %v910_v49  ;;  %v844_v10 = vpop.xlane.xlu2 %843  ;;  %vm1038_vm9 = vweird.f32 %v2535_v15  ;;  %vm1024_vm12 = vmor %vm1022_vm10, %vm1023_vm1  ;;  %v3290_v53 = vpop.xlane.xlu1 %1539 }
 0x332   : > { %v1019_v41 = vsub.f32 1.0, %v1018_v18  ;;  %v861_v45 = vsub.f32 %v3136_v50, %v844_v10  ;;  %vm1039_vm14 = vmor %vm1037_vm11, %vm1038_vm9 }
 0x333   : > { %v1034_v28 = vsub.f32 1.0, %v1033_v9  ;;  %v1719_v9 = vand.u32 2147483647, %v3272_v33 }
 0x334   : > { %v1020_v1 = vmul.f32 %v2533_v6, %v1019_v41  ;;  %v891_v16 = vmul.f32 1.442695, %v861_v45 }
 0x335   : > { %v1035_v57 = vmul.f32 %v2535_v15, %v1034_v28  ;;  %vm1720_vm8 = vcmp.eq.f32.partialorder %v1719_v9, 8.507059e+37 }
 0x336   : > { %v1021_v30 = vadd.f32 %v2533_v6, %v1020_v1  ;;  %2536 = vpow2.f32 %v891_v16 }
 0x337   : > { %v1036_v27 = vadd.f32 %v2535_v15, %v1035_v57  ;;  %2538 = vrcp.f32 %v3272_v33 }
 0x338   : > { %v1025_v29 = vsel %vm1024_vm12, %v2533_v6, %v1021_v30  ;;  %v3283_v35 = vpop.f32.mrf.mxu3 }
 0x339   : > { %v1030_v50 = vsel %vm1027_vm13, %v1029_v31, %v1025_v29  ;;  %v1040_v59 = vsel %vm1039_vm14, %v2535_v15, %v1036_v27  ;;  %v3293_v38 = vpop.xlane.xlu1 %911  ;;  %vm1745_vm14 = vweird.f32 %v3290_v53 }
 0x33a   : > { %v1031_v21 = vmul.f32 %v3122_v4, %v1030_v50  ;;  %v1045_v7 = vsel %vm1042_vm15, %v1044_v48, %v1040_v59  ;;  %2540 = vrcp.f32 %v3293_v38  ;;  %vm1052_vm9 = vweird.f32 %v3293_v38 }
 0x33b   : > { %v1046_v51 = vmul.f32 %v3109_v17, %v1045_v7  ;;  %2542 = vrcp.f32 %v3290_v53  ;;  %v1058_v48 = vand.u32 2147483648, %v3293_v38 }
 0x33c   : > { %v3287_v13 = vpop.eup %2536 }
 0x33d   : > { %923 = vadd.xlane.f32.xlu0 %v3287_v13  ;;  %v1170_v20 = vpack.c.bf16 %v1046_v51, %v1031_v21  ;;  %v2539_v56 = vpop.eup %2538 }
 0x33e   : > { %v1711_v4 = vmul.f32 %v2539_v56, %v3272_v33  ;;  %vm1716_vm2 = vweird.f32 %v2539_v56 }
 0x33f   : > { %1246 = vmatmul.bf16.gmra.mxu1 %v1170_v20  ;;  %vm3314_vm5 = vmor %vm1715_vm3, %vm1716_vm2  ;;  %v1056_v20 = vand.u32 2147483647, %v3293_v38 }
 0x340   : > { %v1831_v52 = vpop.f32.mrf.mxu3  ;;  %v1712_v44 = vsub.f32 1.0, %v1711_v4  ;;  %v3299_v2 = vpop.eup %2540 }
 0x341   : > { %v1048_v36 = vmul.f32 %v3299_v2, %v3293_v38  ;;  %v3303_v11 = vpop.eup %2542  ;;  %vm1053_vm1 = vweird.f32 %v3299_v2  ;;  %vm1057_vm2 = vcmp.eq.f32.partialorder %v1056_v20, 8.507059e+37 }
 0x342   : > { %v1713_v22 = vmul.f32 %v2539_v56, %v1712_v44  ;;  %v1741_v6 = vmul.f32 %v3303_v11, %v3290_v53  ;;  %vm3348_vm11 = vmor %vm1052_vm9, %vm1053_vm1  ;;  %vm1746_vm13 = vweird.f32 %v3303_v11 }
 0x343   : > { %v1049_v61 = vsub.f32 1.0, %v1048_v36 }
 0x344   : > { %v1714_v32 = vadd.f32 %v2539_v56, %v1713_v22  ;;  %v1742_v1 = vsub.f32 1.0, %v1741_v6  ;;  %v1059_v22 = vor.u32 1.1754944e-38, %v1058_v48 }
 0x345   : > { %v1050_v34 = vmul.f32 %v3299_v2, %v1049_v61 }
 0x346   : > { %v1718_v45 = vsel %vm3314_vm5, %v2539_v56, %v1714_v32  ;;  %v1743_v59 = vmul.f32 %v3303_v11, %v1742_v1  ;;  %vm3374_vm5 = vmor %vm1745_vm14, %vm1746_vm13 }
 0x347   : > { %v1051_v50 = vadd.f32 %v3299_v2, %v1050_v34 }
 0x348   : > { %v1833_v42 = vpop.f32.mrf.mxu3 }
 0x349   : > { %v2407_v17 = vpack.i.bf16 %v1833_v42, %v1831_v52 }
 0x351   : > { %2408 = vrot.lane.b32.xlu0 %v2407_v17, %s2611_s28 }
 0x353   : > { %v1534_v58 = vpop.xlane.xlu0 %1533 }
 0x354   : > { %2544 = vrcp.f32 %v1534_v58  ;;  %v1706_v28 = vand.u32 2147483648, %v1534_v58  ;;  %vm1700_vm6 = vweird.f32 %v1534_v58  ;;  %v1704_v57 = vand.u32 2147483647, %v1534_v58 }
 0x356   : > { %v1707_v29 = vor.u32 1.1754944e-38, %v1706_v28  ;;  %vm1705_vm10 = vcmp.eq.f32.partialorder %v1704_v57, 8.507059e+37 }
 0x358   : > { %v3325_v16 = vpop.xlane.xlu1 %1543 }
 0x35a   : > { %v2545_v0 = vpop.eup %2544 }
 0x35b   : > { %v1696_v60 = vmul.f32 %v2545_v0, %v1534_v58  ;;  %v842_v49 = vpop.xlane.xlu0 %841  ;;  %v3307_v63 = vpop.xlane.xlu2 %913  ;;  %vm1701_vm4 = vweird.f32 %v2545_v0  ;;  %v1055_v58 = vsel %vm3348_vm11, %v3299_v2, %v1051_v50  ;;  %v1751_v2 = vand.u32 2147483648, %v3290_v53 }
 0x35c   : > { %v860_v43 = vsub.f32 %v3221_v40, %v842_v49  ;;  %2546 = vrcp.f32 %v3307_v63  ;;  %v1722_v40 = vor.u32 1.1754944e-38, %v1721_v12  ;;  %vm3321_vm7 = vmor %vm1700_vm6, %vm1701_vm4  ;;  %v1073_v52 = vand.u32 2147483648, %v3307_v63  ;;  %v3363_v12 = vpop.f32.mrf.mxu3 }
 0x35d   : > { %v1697_v15 = vsub.f32 1.0, %v1696_v60  ;;  %v1071_v38 = vand.u32 2147483647, %v3307_v63  ;;  %vm1067_vm15 = vweird.f32 %v3307_v63  ;;  %v1060_v61 = vsel %vm1057_vm2, %v1059_v22, %v1055_v58 }
 0x35e   : > { %v889_v18 = vmul.f32 1.442695, %v860_v43  ;;  %v1723_v31 = vsel %vm1720_vm8, %v1722_v40, %v1718_v45  ;;  %v1074_v43 = vor.u32 1.1754944e-38, %v1073_v52  ;;  %v1061_v34 = vmul.f32 %v3173_v24, %v1060_v61 }
 0x35f   : > { %v1698_v10 = vmul.f32 %v2545_v0, %v1697_v15  ;;  %v1724_v42 = vmul.f32 %v3083_v55, %v1723_v31  ;;  %vm1072_vm4 = vcmp.eq.f32.partialorder %v1071_v38, 8.507059e+37  ;;  %v1752_v57 = vor.u32 1.1754944e-38, %v1751_v2 }
 0x360   : > { %2548 = vpow2.f32 %v889_v18  ;;  %v1749_v18 = vand.u32 2147483647, %v3290_v53  ;;  %vm1775_vm11 = vweird.f32 %v3325_v16  ;;  %v1779_v38 = vand.u32 2147483647, %v3325_v16 }
 0x361   : > { %v1699_v25 = vadd.f32 %v2545_v0, %v1698_v10 }
 0x362   : > { %v2547_v37 = vpop.eup %2546  ;;  %vm1750_vm8 = vcmp.eq.f32.partialorder %v1749_v18, 8.507059e+37 }
 0x363   : > { %v3327_v30 = vpop.xlane.xlu0 %1537  ;;  %v1703_v23 = vsel %vm3321_vm7, %v2545_v0, %v1699_v25  ;;  %v1063_v27 = vmul.f32 %v2547_v37, %v3307_v63  ;;  %vm1068_vm12 = vweird.f32 %v2547_v37  ;;  %v3360_v36 = vpop.xlane.xlu2 %915 }
 0x364   : > { %2550 = vrcp.f32 %v3327_v30  ;;  %v1708_v51 = vsel %vm1705_vm10, %v1707_v29, %v1703_v23  ;;  %vm1069_vm3 = vmor %vm1067_vm15, %vm1068_vm12  ;;  %v1736_v41 = vand.u32 2147483648, %v3327_v30  ;;  %v1734_v53 = vand.u32 2147483647, %v3327_v30  ;;  %v3392_v29 = vpop.f32.mrf.mxu3 }
 0x365   : > { %2552 = vrcp.f32 %v3325_v16  ;;  %v1064_v7 = vsub.f32 1.0, %v1063_v27  ;;  %v1709_v56 = vmul.f32 %v3200_v46, %v1708_v51  ;;  %v1744_v46 = vadd.f32 %v3303_v11, %v1743_v59 }
 0x366   : > { %v3338_v21 = vpop.eup %2548  ;;  %2554 = vrcp.f32 %v3360_v36  ;;  %vm1730_vm7 = vweird.f32 %v3327_v30  ;;  %v1737_v33 = vor.u32 1.1754944e-38, %v1736_v41  ;;  %vm1735_vm9 = vcmp.eq.f32.partialorder %v1734_v53, 8.507059e+37 }
 0x367   : > { %921 = vadd.xlane.f32.xlu2 %v3338_v21  ;;  %v1065_v17 = vmul.f32 %v2547_v37, %v1064_v7  ;;  %v1790_v44 = vpack.c.bf16 %v1724_v42, %v1709_v56  ;;  %vm1780_vm15 = vcmp.eq.f32.partialorder %v1779_v38, 8.507059e+37 }
 0x369   : > { %v1066_v0 = vadd.f32 %v2547_v37, %v1065_v17  ;;  %1850 = vmatmul.bf16.gmra.mxu3 %v1790_v44 }
 0x36a   : > { %v2551_v55 = vpop.eup %2550 }
 0x36b   : > { %v1726_v60 = vmul.f32 %v2551_v55, %v3327_v30  ;;  %v846_v49 = vpop.xlane.xlu0 %845  ;;  %v3367_v32 = vpop.eup %2552  ;;  %v1070_v6 = vsel %vm1069_vm3, %v2547_v37, %v1066_v0  ;;  %vm1731_vm6 = vweird.f32 %v2551_v55 }
 0x36c   : > { %v862_v63 = vsub.f32 %v3253_v5, %v846_v49  ;;  %v1075_v10 = vsel %vm1072_vm4, %v1074_v43, %v1070_v6  ;;  %v1748_v5 = vsel %vm3374_vm5, %v3303_v11, %v1744_v46  ;;  %v1771_v45 = vmul.f32 %v3367_v32, %v3325_v16  ;;  %vm1732_vm1 = vmor %vm1730_vm7, %vm1731_vm6  ;;  %v3390_v37 = vpop.eup %2554 }
 0x36d   : > { %v1727_v9 = vsub.f32 1.0, %v1726_v60  ;;  %v1076_v28 = vmul.f32 %v3217_v39, %v1075_v10  ;;  %v1753_v24 = vsel %vm1750_vm8, %v1752_v57, %v1748_v5  ;;  %v1078_v48 = vmul.f32 %v3390_v37, %v3360_v36 }
 0x36e   : > { %v893_v40 = vmul.f32 1.442695, %v862_v63  ;;  %v1772_v39 = vsub.f32 1.0, %v1771_v45  ;;  %v1754_v30 = vmul.f32 %v3146_v3, %v1753_v24  ;;  %vm1776_vm10 = vweird.f32 %v3367_v32 }
 0x36f   : > { %v1728_v1 = vmul.f32 %v2551_v55, %v1727_v9  ;;  %v1171_v25 = vpack.c.bf16 %v1076_v28, %v1061_v34  ;;  %v1079_v52 = vsub.f32 1.0, %v1078_v48  ;;  %v1781_v3 = vand.u32 2147483648, %v3325_v16  ;;  %vm1777_vm12 = vmor %vm1775_vm11, %vm1776_vm10 }
 0x370   : > { %2556 = vpow2.f32 %v893_v40  ;;  %v1773_v7 = vmul.f32 %v3367_v32, %v1772_v39  ;;  %vm1083_vm3 = vweird.f32 %v3390_v37  ;;  %vm1082_vm5 = vweird.f32 %v3360_v36 }
 0x371   : > { %v1729_v11 = vadd.f32 %v2551_v55, %v1728_v1  ;;  %1251 = vmatmul.bf16.gmra.mxu1 %v1171_v25  ;;  %v1080_v44 = vmul.f32 %v3390_v37, %v1079_v52  ;;  %v1782_v2 = vor.u32 1.1754944e-38, %v1781_v3  ;;  %v1088_v63 = vand.u32 2147483648, %v3360_v36  ;;  %vm1084_vm6 = vmor %vm1082_vm5, %vm1083_vm3 }
 0x372   : > { %v1774_v4 = vadd.f32 %v3367_v32, %v1773_v7  ;;  %v1086_v10 = vand.u32 2147483647, %v3360_v36  ;;  %v2412_v24 = vpack.i.bf16 %v3392_v29, %v3363_v12  ;;  %vm1946_vm11 = vcmask 261120  }
 0x373   : > { %v1542_v23 = vpop.xlane.xlu0 %1541  ;;  %v1733_v31 = vsel %vm1732_vm1, %v2551_v55, %v1729_v11  ;;  %v1081_v16 = vadd.f32 %v3390_v37, %v1080_v44  ;;  %v1089_v1 = vor.u32 1.1754944e-38, %v1088_v63 }
 0x374   : > { %2558 = vrcp.f32 %v1542_v23  ;;  %v1738_v27 = vsel %vm1735_vm9, %v1737_v33, %v1733_v31  ;;  %v1766_v22 = vand.u32 2147483648, %v1542_v23  ;;  %v1764_v55 = vand.u32 2147483647, %v1542_v23  ;;  %v1232_v31 = vpop.f32.mrf.mxu1 }
 0x375   : > { %v1739_v50 = vmul.f32 %v3231_v8, %v1738_v27  ;;  %v2402_v8 = vpack.i.bf16 %v3283_v35, %v3280_v54  ;;  %v1778_v0 = vsel %vm1777_vm12, %v3367_v32, %v1774_v4  ;;  %vm1760_vm14 = vweird.f32 %v1542_v23 }
 0x376   : > { %v3396_v59 = vpop.eup %2556  ;;  %v1767_v60 = vor.u32 1.1754944e-38, %v1766_v22  ;;  %v1783_v49 = vsel %vm1780_vm15, %v1782_v2, %v1778_v0  ;;  %vm1765_vm4 = vcmp.eq.f32.partialorder %v1764_v55, 8.507059e+37  ;;  %v1085_v40 = vsel %vm1084_vm6, %v3390_v37, %v1081_v16 }
 0x377   : > { %925 = vadd.xlane.f32.xlu1 %v3396_v59  ;;  %v1791_v51 = vpack.c.bf16 %v1754_v30, %v1739_v50  ;;  %v1784_v9 = vmul.f32 %v3213_v62, %v1783_v49  ;;  %vm1087_vm1 = vcmp.eq.f32.partialorder %v1086_v10, 8.507059e+37 }
 0x379   : > { %1855 = vmatmul.bf16.gmra.mxu3 %v1791_v51 }
 0x37a   : > { %v2559_v20 = vpop.eup %2558 }
 0x37b   : > { %v1756_v56 = vmul.f32 %v2559_v20, %v1542_v23  ;;  %v918_v42 = vpop.xlane.xlu0 %917  ;;  %vm1761_vm13 = vweird.f32 %v2559_v20 }
 0x37c   : > { %2560 = vrcp.f32 %v918_v42  ;;  %vm1762_vm2 = vmor %vm1760_vm14, %vm1761_vm13  ;;  %v1103_v5 = vand.u32 2147483648, %v918_v42  ;;  %v1101_v45 = vand.u32 2147483647, %v918_v42  ;;  %vm1097_vm8 = vweird.f32 %v918_v42  ;;  %v1234_v27 = vpop.f32.mrf.mxu1 }
 0x37d   : > { %v1757_v17 = vsub.f32 1.0, %v1756_v56  ;;  %v1841_v58 = vpop.f32.mrf.mxu3 }
 0x37e   : > { %v1104_v62 = vor.u32 1.1754944e-38, %v1103_v5  ;;  %vm1102_vm10 = vcmp.eq.f32.partialorder %v1101_v45, 8.507059e+37 }
 0x37f   : > { %v1758_v46 = vmul.f32 %v2559_v20, %v1757_v17  ;;  %2403 = vrot.lane.b32.xlu2 %v2402_v8, %s2611_s28 }
 0x381   : > { %v1759_v54 = vadd.f32 %v2559_v20, %v1758_v46 }
 0x382   : > { %v2561_v35 = vpop.eup %2560 }
 0x383   : > { %v1093_v61 = vmul.f32 %v2561_v35, %v918_v42  ;;  %v1763_v43 = vsel %vm1762_vm2, %v2559_v20, %v1759_v54  ;;  %vm1098_vm7 = vweird.f32 %v2561_v35 }
 0x384   : > { %v1768_v32 = vsel %vm1765_vm4, %v1767_v60, %v1763_v43  ;;  %vm1099_vm9 = vmor %vm1097_vm8, %vm1098_vm7  ;;  %v1237_v50 = vpop.f32.mrf.mxu1 }
 0x385   : > { %v1094_v6 = vsub.f32 1.0, %v1093_v61  ;;  %v1843_v15 = vpop.f32.mrf.mxu3  ;;  %v1769_v18 = vmul.f32 %v3263_v26, %v1768_v32  ;;  %v1090_v26 = vsel %vm1087_vm1, %v1089_v1, %v1085_v40 }
 0x386   : > { %v2417_v41 = vpack.i.bf16 %v1843_v15, %v1841_v58  ;;  %v1091_v11 = vmul.f32 %v3235_v14, %v1090_v26 }
 0x387   : > { %v1095_v34 = vmul.f32 %v2561_v35, %v1094_v6  ;;  %v1792_v28 = vpack.c.bf16 %v1784_v9, %v1769_v18 }
 0x388   : > { %2418 = vrot.lane.b32.xlu0 %v2417_v41, %s2611_s28 }
 0x389   : > { %v1096_v53 = vadd.f32 %v2561_v35, %v1095_v34  ;;  %1860 = vmatmul.bf16.gmra.mxu3 %v1792_v28 }
 0x38b   : > { %v1100_v25 = vsel %vm1099_vm9, %v2561_v35, %v1096_v53 }
 0x38c   : > { %v1105_v36 = vsel %vm1102_vm10, %v1104_v62, %v1100_v25  ;;  %v1239_v14 = vpop.f32.mrf.mxu1 }
 0x38d   : > { %v1846_v57 = vpop.f32.mrf.mxu3  ;;  %v1106_v33 = vmul.f32 %v3269_v19, %v1105_v36 }
 0x38f   : > { %v1172_v37 = vpack.c.bf16 %v1106_v33, %v1091_v11 }
 0x390   : > { %2413 = vrot.lane.b32.xlu1 %v2412_v24, %s2611_s28 }
 0x391   : > { %1256 = vmatmul.bf16.gmra.mxu1 %v1172_v37 }
 0x395   : > { %v1848_v39 = vpop.f32.mrf.mxu3 }
 0x396   : > { %v2422_v23 = vpack.i.bf16 %v1848_v39, %v1846_v57 }
 0x398   : > { %2423 = vrot.lane.b32.xlu2 %v2422_v23, %s2611_s28 }
 0x3a0   : > { %v920_v51 = vpop.xlane.xlu1 %919 }
 0x3a1   : > { %2562 = vrcp.f32 %v920_v51  ;;  %vm1112_vm13 = vweird.f32 %v920_v51  ;;  %v1118_v54 = vand.u32 2147483648, %v920_v51  ;;  %v1116_v63 = vand.u32 2147483647, %v920_v51 }
 0x3a3   : > { %v1119_v34 = vor.u32 1.1754944e-38, %v1118_v54  ;;  %vm1117_vm3 = vcmp.eq.f32.partialorder %v1116_v63, 8.507059e+37 }
 0x3a7   : > { %v2563_v4 = vpop.eup %2562 }
 0x3a8   : > { %v1108_v8 = vmul.f32 %v2563_v4, %v920_v51  ;;  %vm1113_vm12 = vweird.f32 %v2563_v4 }
 0x3a9   : > { %vm3450_vm14 = vmor %vm1112_vm13, %vm1113_vm12 }
 0x3aa   : > { %v1109_v17 = vsub.f32 1.0, %v1108_v8 }
 0x3ab   : > { %v3440_v56 = vpop.f32.mrf.mxu1 }
 0x3ac   : > { %v1110_v38 = vmul.f32 %v2563_v4, %v1109_v17 }
 0x3ae   : > { %v1111_v46 = vadd.f32 %v2563_v4, %v1110_v38 }
 0x3b0   : > { %v3427_v30 = vpop.xlane.xlu0 %923  ;;  %v1115_v43 = vsel %vm3450_vm14, %v2563_v4, %v1111_v46 }
 0x3b1   : > { %2564 = vrcp.f32 %v3427_v30  ;;  %v1120_v1 = vsel %vm1117_vm3, %v1119_v34, %v1115_v43  ;;  %vm1142_vm7 = vweird.f32 %v3427_v30 }
 0x3b2   : > { %v1121_v36 = vmul.f32 %v3277_v47, %v1120_v1 }
 0x3b3   : > { %v3443_v3 = vpop.f32.mrf.mxu1 }
 0x3b7   : > { %v3448_v22 = vpop.eup %2564 }
 0x3b8   : > { %v1138_v16 = vmul.f32 %v3448_v22, %v3427_v30  ;;  %vm1143_vm6 = vweird.f32 %v3448_v22 }
 0x3b9   : > { %vm3472_vm8 = vmor %vm1142_vm7, %vm1143_vm6 }
 0x3ba   : > { %v1139_v45 = vsub.f32 1.0, %v1138_v16 }
 0x3bc   : > { %v3446_v44 = vpop.f32.mrf.mxu1  ;;  %v1140_v11 = vmul.f32 %v3448_v22, %v1139_v45 }
 0x3be   : > { %v1141_v23 = vadd.f32 %v3448_v22, %v1140_v11 }
 0x3c3   : > { %v2409_v19 = vpop.permute.xlu0 %2408 }
 0x3c4   : > { %v2411_v12 = vunpack.i.h.bf16 %v2409_v19  ;;  %v2410_v29 = vunpack.i.l.bf16 %v2409_v19  ;;  %v3462_v41 = vpop.f32.mrf.mxu1  ;;  %v1146_v19 = vand.u32 2147483647, %v3427_v30 }
 0x3c6   : > { %v1933_v48 = vsel %vm685_vm0, %v1239_v14, %v2411_v12  ;;  %v1932_v7 = vsel %vm685_vm0, %v1237_v50, %v2410_v29  ;;  %v1148_v50 = vand.u32 2147483648, %v3427_v30  ;;  %v1145_v29 = vsel %vm3472_vm8, %v3448_v22, %v1141_v23 }
 0x3c7   : > { %v1950_v20 = vsel %vm1946_vm11, %v1933_v48, 0.0  ;;  %v1949_v52 = vsel %vm1946_vm11, %v1932_v7, 0.0  ;;  %vm1147_vm10 = vcmp.eq.f32.partialorder %v1146_v19, 8.507059e+37 }
 0x3c8   : > { %v2320_v42 = vpack.c.bf16 %v1950_v20, %v1949_v52  ;;  %v1149_v8 = vor.u32 1.1754944e-38, %v1148_v50 }
 0x3ca   : > { %2352 = vst [vmem:[%s3436_s5 + $0x8] sm:$0xff] %v2320_v42   ;;  %v1150_v22 = vsel %vm1147_vm10, %v1149_v8, %v1145_v29 }
 0x3cb   : > { %v1151_v49 = vmul.f32 %v3287_v13, %v1150_v22 }
 0x3da   : > { %v922_v58 = vpop.xlane.xlu2 %921 }
 0x3db   : > { %2566 = vrcp.f32 %v922_v58  ;;  %v1133_v32 = vand.u32 2147483648, %v922_v58  ;;  %v1131_v18 = vand.u32 2147483647, %v922_v58  ;;  %vm1127_vm2 = vweird.f32 %v922_v58 }
 0x3dd   : > { %v1134_v53 = vor.u32 1.1754944e-38, %v1133_v32  ;;  %vm1132_vm5 = vcmp.eq.f32.partialorder %v1131_v18, 8.507059e+37 }
 0x3e1   : > { %v2567_v55 = vpop.eup %2566 }
 0x3e2   : > { %v1123_v0 = vmul.f32 %v2567_v55, %v922_v58  ;;  %v2404_v2 = vpop.permute.xlu2 %2403  ;;  %vm1128_vm15 = vweird.f32 %v2567_v55 }
 0x3e3   : > { %v2406_v35 = vunpack.i.h.bf16 %v2404_v2  ;;  %v2405_v60 = vunpack.i.l.bf16 %v2404_v2  ;;  %vm1129_vm4 = vmor %vm1127_vm2, %vm1128_vm15 }
 0x3e4   : > { %v1124_v61 = vsub.f32 1.0, %v1123_v0 }
 0x3e5   : > { %v1931_v6 = vsel %vm685_vm0, %v1234_v27, %v2406_v35  ;;  %v1930_v15 = vsel %vm685_vm0, %v1232_v31, %v2405_v60 }
 0x3e6   : > { %v1125_v9 = vmul.f32 %v2567_v55, %v1124_v61  ;;  %v1948_v10 = vsel %vm1946_vm11, %v1931_v6, 0.0  ;;  %v1947_v5 = vsel %vm1946_vm11, %v1930_v15, 0.0 }
 0x3e7   : > { %v2315_v40 = vpack.c.bf16 %v1948_v10, %v1947_v5 }
 0x3e8   : > { %v1126_v28 = vadd.f32 %v2567_v55, %v1125_v9 }
 0x3e9   : > { %2316 = vst [vmem:[%s3436_s5] sm:$0xff] %v2315_v40  }
 0x3ea   : > { %v926_v26 = vpop.xlane.xlu1 %925  ;;  %v1130_v62 = vsel %vm1129_vm4, %v2567_v55, %v1126_v28 }
 0x3eb   : > { %2568 = vrcp.f32 %v926_v26  ;;  %v1135_v25 = vsel %vm1132_vm5, %v1134_v53, %v1130_v62  ;;  %v1163_v12 = vand.u32 2147483648, %v926_v26  ;;  %v1161_v48 = vand.u32 2147483647, %v926_v26 }
 0x3ec   : > { %v1136_v57 = vmul.f32 %v3338_v21, %v1135_v25  ;;  %v1851_v33 = vpop.f32.mrf.mxu3  ;;  %vm1157_vm9 = vweird.f32 %v926_v26 }
 0x3ed   : > { %v1164_v46 = vor.u32 1.1754944e-38, %v1163_v12  ;;  %vm1162_vm13 = vcmp.eq.f32.partialorder %v1161_v48, 8.507059e+37 }
 0x3ee   : > { %v1173_v24 = vpack.c.bf16 %v1136_v57, %v1121_v36  ;;  %v1252_v37 = vpop.f32.mrf.mxu1 }
 0x3f0   : > { %1261 = vmatmul.bf16.gmra.mxu1 %v1173_v24 }
 0x3f1   : > { %v2569_v39 = vpop.eup %2568 }
 0x3f2   : > { %v1153_v31 = vmul.f32 %v2569_v39, %v926_v26  ;;  %v2424_v27 = vpop.permute.xlu2 %2423  ;;  %vm1158_vm1 = vweird.f32 %v2569_v39 }
 0x3f3   : > { %v2425_v47 = vunpack.i.l.bf16 %v2424_v27  ;;  %v2426_v51 = vunpack.i.h.bf16 %v2424_v27  ;;  %vm1159_vm12 = vmor %vm1157_vm9, %vm1158_vm1 }
 0x3f4   : > { %v1154_v14 = vsub.f32 1.0, %v1153_v31  ;;  %v1853_v20 = vpop.f32.mrf.mxu3 }
 0x3f5   : > { %v1938_v52 = vsel %vm685_vm0, %v1252_v37, %v2425_v47  ;;  %v2427_v42 = vpack.i.bf16 %v1853_v20, %v1851_v33 }
 0x3f6   : > { %v1155_v7 = vmul.f32 %v2569_v39, %v1154_v14  ;;  %v1254_v4 = vpop.f32.mrf.mxu1  ;;  %v1955_v58 = vsel %vm1946_vm11, %v1938_v52, 0.0 }
 0x3f7   : > { %v1939_v17 = vsel %vm685_vm0, %v1254_v4, %v2426_v51  ;;  %2428 = vrot.lane.b32.xlu0 %v2427_v42, %s2611_s28 }
 0x3f8   : > { %v1156_v30 = vadd.f32 %v2569_v39, %v1155_v7  ;;  %v1956_v38 = vsel %vm1946_vm11, %v1939_v17, 0.0 }
 0x3f9   : > { %v2335_v55 = vpack.c.bf16 %v1956_v38, %v1955_v58 }
 0x3fa   : > { %v2419_v0 = vpop.permute.xlu0 %2418  ;;  %v1160_v2 = vsel %vm1159_vm12, %v2569_v39, %v1156_v30 }
 0x3fb   : > { %v2421_v54 = vunpack.i.h.bf16 %v2419_v0  ;;  %v2420_v35 = vunpack.i.l.bf16 %v2419_v0  ;;  %v1165_v60 = vsel %vm1162_vm13, %v1164_v46, %v1160_v2  ;;  %2355 = vst [vmem:[%s3436_s5 + $0x20] sm:$0xff] %v2335_v55  }
 0x3fc   : > { %v1166_v16 = vmul.f32 %v3396_v59, %v1165_v60  ;;  %v1856_v6 = vpop.f32.mrf.mxu3 }
 0x3fd   : > { %v1937_v61 = vsel %vm685_vm0, %v3462_v41, %v2421_v54  ;;  %v1936_v43 = vsel %vm685_vm0, %v3446_v44, %v2420_v35 }
 0x3fe   : > { %v1954_v63 = vsel %vm1946_vm11, %v1937_v61, 0.0  ;;  %v1953_v32 = vsel %vm1946_vm11, %v1936_v43, 0.0  ;;  %v1174_v15 = vpack.c.bf16 %v1166_v16, %v1151_v49 }
 0x3ff   : > { %v2330_v18 = vpack.c.bf16 %v1954_v63, %v1953_v32 }
 0x400   : > { %1266 = vmatmul.bf16.gmra.mxu1 %v1174_v15 }
 0x401   : > { %2354 = vst [vmem:[%s3436_s5 + $0x18] sm:$0xff] %v2330_v18  }
 0x402   : > { %v2414_v9 = vpop.permute.xlu1 %2413 }
 0x403   : > { %v2416_v13 = vunpack.i.h.bf16 %v2414_v9  ;;  %v2415_v10 = vunpack.i.l.bf16 %v2414_v9 }
 0x404   : > { %v1858_v40 = vpop.f32.mrf.mxu3 }
 0x405   : > { %v1935_v59 = vsel %vm685_vm0, %v3443_v3, %v2416_v13  ;;  %v1934_v5 = vsel %vm685_vm0, %v3440_v56, %v2415_v10  ;;  %v2432_v28 = vpack.i.bf16 %v1858_v40, %v1856_v6 }
 0x406   : > { %v1952_v44 = vsel %vm1946_vm11, %v1935_v59, 0.0  ;;  %v1951_v41 = vsel %vm1946_vm11, %v1934_v5, 0.0 }
 0x407   : > { %v2325_v34 = vpack.c.bf16 %v1952_v44, %v1951_v41  ;;  %2433 = vrot.lane.b32.xlu2 %v2432_v28, %s2611_s28 }
 0x409   : > { %2353 = vst [vmem:[%s3436_s5 + $0x10] sm:$0xff] %v2325_v34  }
 0x40c   : > { %v1861_v45 = vpop.f32.mrf.mxu3 }
 0x40e   : > { %v1257_v3 = vpop.f32.mrf.mxu1 }
 0x414   : > { %v1863_v1 = vpop.f32.mrf.mxu3 }
 0x415   : > { %v2437_v53 = vpack.i.bf16 %v1863_v1, %v1861_v45 }
 0x416   : > { %v1259_v26 = vpop.f32.mrf.mxu1 }
 0x417   : > { %2438 = vrot.lane.b32.xlu1 %v2437_v53, %s2611_s28 }
 0x461   : > { %v2434_v33 = vpop.permute.xlu2 %2433 }
 0x462   : > { %v2435_v23 = vunpack.i.l.bf16 %v2434_v33  ;;  %v2436_v31 = vunpack.i.h.bf16 %v2434_v33 }
 0x469   : > { %v2429_v62 = vpop.permute.xlu0 %2428 }
 0x46a   : > { %v2431_v56 = vunpack.i.h.bf16 %v2429_v62  ;;  %v2430_v25 = vunpack.i.l.bf16 %v2429_v62 }
 0x46c   : > { %v1941_v57 = vsel %vm685_vm0, %v1259_v26, %v2431_v56  ;;  %v1940_v11 = vsel %vm685_vm0, %v1257_v3, %v2430_v25 }
 0x46d   : > { %v1262_v36 = vpop.f32.mrf.mxu1  ;;  %v1958_v24 = vsel %vm1946_vm11, %v1941_v57, 0.0  ;;  %v1957_v37 = vsel %vm1946_vm11, %v1940_v11, 0.0 }
 0x46e   : > { %v2340_v39 = vpack.c.bf16 %v1958_v24, %v1957_v37  ;;  %v1942_v27 = vsel %vm685_vm0, %v1262_v36, %v2435_v23 }
 0x46f   : > { %v1959_v14 = vsel %vm1946_vm11, %v1942_v27, 0.0 }
 0x470   : > { %2356 = vst [vmem:[%s3436_s5 + $0x28] sm:$0xff] %v2340_v39  }
 0x475   : > { %v1264_v50 = vpop.f32.mrf.mxu1 }
 0x476   : > { %v1943_v47 = vsel %vm685_vm0, %v1264_v50, %v2436_v31 }
 0x477   : > { %v1960_v21 = vsel %vm1946_vm11, %v1943_v47, 0.0 }
 0x478   : > { %v2345_v19 = vpack.c.bf16 %v1960_v21, %v1959_v14 }
 0x47a   : > { %2357 = vst [vmem:[%s3436_s5 + $0x30] sm:$0xff] %v2345_v19  }
 0x47d   : > { %v1267_v12 = vpop.f32.mrf.mxu1 }
 0x485   : > { %v1269_v51 = vpop.f32.mrf.mxu1 }
 0x489   : > { %v2439_v29 = vpop.permute.xlu1 %2438 }
 0x48a   : > { %v2441_v48 = vunpack.i.h.bf16 %v2439_v29  ;;  %v2440_v7 = vunpack.i.l.bf16 %v2439_v29 }
 0x48c   : > { %v1944_v20 = vsel %vm685_vm0, %v1267_v12, %v2440_v7  ;;  %v1945_v52 = vsel %vm685_vm0, %v1269_v51, %v2441_v48 }
 0x48d   : > { %v1961_v42 = vsel %vm1946_vm11, %v1944_v20, 0.0  ;;  %v1962_v4 = vsel %vm1946_vm11, %v1945_v52, 0.0 }
 0x48e   : > { %v2350_v8 = vpack.c.bf16 %v1962_v4, %v1961_v42 }
 0x490   : > { %2358 = vst [vmem:[%s3436_s5 + $0x38] sm:$0xff] %v2350_v8  }
 0x491 PF: > { %s13_s16 = sadd.s32 1, %s2608_s16   ;;  %s3565_s12 = smov %s2596_s13 }
 0x492   : > { %p10_p10 = scmp.ge.s32.totalorder %s13_s16, 4   ;;  %s3566_s13 = smov %s2671_s21 }
 0x493   : > { %s3567_s14 = smov %s2604_s15  ;;  %s3568_s15 = smov %s3570_s17 }
 0x494   :  { %12 = sbr.rel (!%p10_p10) target bundleno = 3 (0x3), region = 206 }

// kernel: dino_forward.13
= control target key start
LH: loop header
LB: loop body
LE: loop exit
PB: predicated region body
PF: predicated region fallthrough
CT: control target
= control target key end

     0   :  { %v88_v0 = vlaneseq  ;;  %v2096_v8 = vmov 0.0   ;;  %s3612_s0 = inlined_call_operand.vmem [shape: bf16[256,128], index: 0, kind: input, shape index: {}]   ;;  %s3613_s3 = inlined_call_operand.vmem [shape: f32[1,128], index: 3, kind: input, shape index: {}]   ;;  %s3614_s4 = inlined_call_operand.vmem [shape: f32[1,128], index: 4, kind: input, shape index: {}]   ;;  %s3615_s1 = inlined_call_operand.vmem [shape: bf16[128,384], index: 1, kind: input, shape index: {}]   ;;  %s3616_s2 = inlined_call_operand.vmem [shape: f32[1,384], index: 2, kind: input, shape index: {}]   ;;  %s3617_s5 = inlined_call_operand.vmem [shape: bf16[256,384], index: 5, kind: output, shape index: {}]  }
   0x1   :  { %v2130_v1 = vld [vmem:[%s3612_s0 + $0x60] sm:$0xff]   ;;  %v2140_v3 = vld [vmem:[%s3612_s0 + $0x8] sm:$0xff]   ;;  %v2176_v20 = vld [vmem:[%s3612_s0 + $0x10] sm:$0xff]  }
   0x2   :  { %v2135_v2 = vld [vmem:[%s3612_s0] sm:$0xff]   ;;  %v1879_v4 = vunpack.c.l.bf16 %v2130_v1  ;;  %v89_v5 = vand.u32 127, %v88_v0  ;;  %v1835_v7 = vunpack.c.l.bf16 %v2140_v3  ;;  %v1880_v13 = vunpack.c.h.bf16 %v2130_v1  ;;  %v2168_v18 = vld [vmem:[%s3612_s0 + $0x68] sm:$0xff]   ;;  %v2190_v26 = vld [vmem:[%s3612_s0 + $0x70] sm:$0xff]  }
   0x3   :  { %v1831_v6 = vunpack.c.l.bf16 %v2135_v2  ;;  %v1832_v14 = vunpack.c.h.bf16 %v2135_v2  ;;  %v1836_v15 = vunpack.c.h.bf16 %v2140_v3  ;;  %v1883_v21 = vunpack.c.l.bf16 %v2168_v18  ;;  %v2210_v34 = vld [vmem:[%s3612_s0 + $0x18] sm:$0xff]   ;;  %v2246_v53 = vld [vmem:[%s3612_s0 + $0x20] sm:$0xff]  }
   0x4   :  { %vm90_vm0 = vcmp.lt.s32.totalorder %v89_v5, 32  ;;  %v1884_v22 = vunpack.c.h.bf16 %v2168_v18  ;;  %v1839_v23 = vunpack.c.l.bf16 %v2176_v20  ;;  %v1887_v28 = vunpack.c.l.bf16 %v2190_v26  ;;  %v2215_v35 = vld [vmem:[%s3612_s0 + $0x78] sm:$0xff]  }
   0x5   :  { %v2145_v9 = vsel %vm90_vm0, 1.0, %v2096_v8  ;;  %v1840_v29 = vunpack.c.h.bf16 %v2176_v20  ;;  %v1888_v30 = vunpack.c.h.bf16 %v2190_v26  ;;  %v1843_v36 = vunpack.c.l.bf16 %v2210_v34 }
   0x6   :  { %v117_v10 = vmul.f32 %v1879_v4, %v2145_v9  ;;  %v93_v11 = vmul.f32 %v1831_v6, %v2145_v9  ;;  %v95_v12 = vmul.f32 %v1835_v7, %v2145_v9  ;;  %v118_v16 = vmul.f32 %v1880_v13, %v2145_v9 }
   0x7   :  { %v94_v17 = vmul.f32 %v1832_v14, %v2145_v9  ;;  %v96_v19 = vmul.f32 %v1836_v15, %v2145_v9  ;;  %v119_v24 = vmul.f32 %v1883_v21, %v2145_v9  ;;  %v120_v25 = vmul.f32 %v1884_v22, %v2145_v9 }
   0x8   :  { %173 = vadd.xlane.f32.xlu1 %v117_v10  ;;  %125 = vadd.xlane.f32.xlu0 %v93_v11  ;;  %v97_v27 = vmul.f32 %v1839_v23, %v2145_v9  ;;  %v121_v31 = vmul.f32 %v1887_v28, %v2145_v9  ;;  %v98_v32 = vmul.f32 %v1840_v29, %v2145_v9  ;;  %v1844_v37 = vunpack.c.h.bf16 %v2210_v34 }
   0x9   :  { %129 = vadd.xlane.f32.xlu2 %v95_v12  ;;  %v122_v33 = vmul.f32 %v1888_v30, %v2145_v9  ;;  %v1891_v38 = vunpack.c.l.bf16 %v2215_v35  ;;  %v99_v39 = vmul.f32 %v1843_v36, %v2145_v9  ;;  %v1892_v42 = vunpack.c.h.bf16 %v2215_v35 }
   0xa   :  { %v100_v40 = vmul.f32 %v1844_v37, %v2145_v9  ;;  %v1848_v61 = vunpack.c.h.bf16 %v2246_v53 }
   0xb   :  { %v123_v41 = vmul.f32 %v1891_v38, %v2145_v9  ;;  %v124_v43 = vmul.f32 %v1892_v42, %v2145_v9 }
   0xc   :  { %v102_v5 = vmul.f32 %v1848_v61, %v2145_v9 }
  0x10   :  { %175 = vadd.xlane.f32.xlu1 %v118_v16  ;;  %127 = vadd.xlane.f32.xlu0 %v94_v17  ;;  %v1847_v16 = vunpack.c.l.bf16 %v2246_v53  ;;  %v1697_v53 = vld [vmem:[%s3615_s1 + $0xc] sm:$0xf0] }
  0x11   :  { %131 = vadd.xlane.f32.xlu2 %v96_v19 }
  0x18   :  { %177 = vadd.xlane.f32.xlu0 %v119_v24  ;;  %179 = vadd.xlane.f32.xlu1 %v120_v25 }
  0x19   :  { %133 = vadd.xlane.f32.xlu2 %v97_v27 }
  0x20   :  { %181 = vadd.xlane.f32.xlu1 %v121_v31  ;;  %135 = vadd.xlane.f32.xlu0 %v98_v32  ;;  %v101_v32 = vmul.f32 %v1847_v16, %v2145_v9 }
  0x21   :  { %183 = vadd.xlane.f32.xlu2 %v122_v33 }
  0x28   :  { %137 = vadd.xlane.f32.xlu0 %v99_v39  ;;  %139 = vadd.xlane.f32.xlu1 %v100_v40 }
  0x29   :  { %185 = vadd.xlane.f32.xlu2 %v123_v41 }
  0x30   :  { %187 = vadd.xlane.f32.xlu0 %v124_v43 }
  0x7b   :  { %v174_v44 = vpop.xlane.xlu1 %173  ;;  %v126_v45 = vpop.xlane.xlu0 %125 }
  0x7c   :  { %v213_v46 = vmul.f32 0.03125, %v174_v44  ;;  %v189_v47 = vmul.f32 0.03125, %v126_v45  ;;  %v130_v48 = vpop.xlane.xlu2 %129 }
  0x7d   :  { %v191_v60 = vmul.f32 0.03125, %v130_v48 }
  0x7e   :  { %v245_v49 = vsub.f32 %v1879_v4, %v213_v46  ;;  %v221_v50 = vsub.f32 %v1831_v6, %v189_v47 }
  0x7f   :  { %v223_v4 = vsub.f32 %v1835_v7, %v191_v60 }
  0x80   :  { %v2238_v51 = vmul.f32 %v2145_v9, %v245_v49  ;;  %v2241_v52 = vmul.f32 %v2145_v9, %v221_v50 }
  0x82   :  { %v309_v54 = vmul.f32 %v2238_v51, %v2238_v51  ;;  %v285_v55 = vmul.f32 %v2241_v52, %v2241_v52 }
  0x83   :  { %v176_v56 = vpop.xlane.xlu1 %175  ;;  %v128_v57 = vpop.xlane.xlu0 %127 }
  0x84   :  { %v214_v58 = vmul.f32 0.03125, %v176_v56  ;;  %v190_v59 = vmul.f32 0.03125, %v128_v57  ;;  %365 = vadd.xlane.f32.xlu0 %v309_v54  ;;  %317 = vadd.xlane.f32.xlu1 %v285_v55  ;;  %v132_v62 = vpop.xlane.xlu2 %131 }
  0x86   :  { %v246_v63 = vsub.f32 %v1880_v13, %v214_v58  ;;  %v222_v0 = vsub.f32 %v1832_v14, %v190_v59  ;;  %v2273_v13 = vmul.f32 %v2145_v9, %v223_v4  ;;  %v192_v14 = vmul.f32 0.03125, %v132_v62 }
  0x88   :  { %v2263_v6 = vmul.f32 %v2145_v9, %v246_v63  ;;  %v2266_v8 = vmul.f32 %v2145_v9, %v222_v0  ;;  %v287_v25 = vmul.f32 %v2273_v13, %v2273_v13  ;;  %v224_v31 = vsub.f32 %v1836_v15, %v192_v14  ;;  %v2336_v63 = vld [vmem:[%s3612_s0 + $0x30] sm:$0xff]  }
  0x89   :  { %v3623_v20 = vunpack.c.h.bf16 %v2336_v63 }
  0x8a   :  { %v310_v1 = vmul.f32 %v2263_v6, %v2263_v6  ;;  %v286_v2 = vmul.f32 %v2266_v8, %v2266_v8  ;;  %v2302_v40 = vmul.f32 %v2145_v9, %v224_v31 }
  0x8b   :  { %v178_v10 = vpop.xlane.xlu0 %177  ;;  %v180_v11 = vpop.xlane.xlu1 %179 }
  0x8c   :  { %v215_v12 = vmul.f32 0.03125, %v178_v10  ;;  %143 = vadd.xlane.f32.xlu0 %v102_v5  ;;  %367 = vadd.xlane.f32.xlu1 %v310_v1  ;;  %v216_v7 = vmul.f32 0.03125, %v180_v11  ;;  %v134_v17 = vpop.xlane.xlu2 %133  ;;  %v288_v48 = vmul.f32 %v2302_v40, %v2302_v40 }
  0x8d   :  { %319 = vadd.xlane.f32.xlu2 %v286_v2  ;;  %v193_v39 = vmul.f32 0.03125, %v134_v17  ;;  %v106_v2 = vmul.f32 %v3623_v20, %v2145_v9  ;;  %v3622_v17 = vunpack.c.l.bf16 %v2336_v63 }
  0x8e   :  { %v247_v19 = vsub.f32 %v1883_v21, %v215_v12  ;;  %v248_v24 = vsub.f32 %v1884_v22, %v216_v7  ;;  %v2293_v21 = vld [vmem:[%s3612_s0 + $0x28] sm:$0xff]  }
  0x8f   :  { %v1852_v15 = vunpack.c.h.bf16 %v2293_v21  ;;  %v225_v45 = vsub.f32 %v1839_v23, %v193_v39  ;;  %v3624_v54 = vunpack.c.l.bf16 %v2293_v21  ;;  %v2396_v39 = vld [vmem:[%s3612_s0 + $0x40] sm:$0xff]  }
  0x90   :  { %v2283_v27 = vmul.f32 %v2145_v9, %v247_v19  ;;  %v2298_v3 = vmul.f32 %v2145_v9, %v248_v24 }
  0x91   :  { %v104_v47 = vmul.f32 %v1852_v15, %v2145_v9  ;;  %v2316_v50 = vmul.f32 %v2145_v9, %v225_v45  ;;  %v103_v60 = vmul.f32 %v3624_v54, %v2145_v9 }
  0x92   :  { %v311_v18 = vmul.f32 %v2283_v27, %v2283_v27  ;;  %v312_v46 = vmul.f32 %v2298_v3, %v2298_v3 }
  0x93   :  { %v182_v22 = vpop.xlane.xlu1 %181  ;;  %v136_v41 = vpop.xlane.xlu0 %135  ;;  %v289_v57 = vmul.f32 %v2316_v50, %v2316_v50 }
  0x94   :  { %321 = vadd.xlane.f32.xlu1 %v287_v25  ;;  %369 = vadd.xlane.f32.xlu0 %v311_v18  ;;  %v217_v33 = vmul.f32 0.03125, %v182_v22  ;;  %v184_v43 = vpop.xlane.xlu2 %183  ;;  %v194_v23 = vmul.f32 0.03125, %v136_v41  ;;  %v2377_v18 = vld [vmem:[%s3612_s0 + $0x38] sm:$0xff]   ;;  %v3618_v41 = vunpack.c.l.bf16 %v2396_v39 }
  0x95   :  { %141 = vadd.xlane.f32.xlu2 %v101_v32  ;;  %v218_v49 = vmul.f32 0.03125, %v184_v43  ;;  %v105_v32 = vmul.f32 %v3622_v17, %v2145_v9  ;;  %v3620_v35 = vunpack.c.h.bf16 %v2377_v18  ;;  %v3619_v43 = vunpack.c.l.bf16 %v2377_v18 }
  0x96   :  { %v249_v44 = vsub.f32 %v1887_v28, %v217_v33  ;;  %v226_v59 = vsub.f32 %v1840_v29, %v194_v23  ;;  %v1781_v23 = vld [vmem:[%s3615_s1 + $0xb4] sm:$0xf0] }
  0x97   :  { %v250_v56 = vsub.f32 %v1888_v30, %v218_v49  ;;  %v107_v45 = vmul.f32 %v3619_v43, %v2145_v9 }
  0x98   :  { %v2319_v28 = vmul.f32 %v2145_v9, %v249_v44  ;;  %v2343_v29 = vmul.f32 %v2145_v9, %v226_v59  ;;  %v109_v44 = vmul.f32 %v3618_v41, %v2145_v9  ;;  %v1767_v59 = vld [vmem:[%s3615_s1 + $0x90] sm:$0xf] }
  0x99   :  { %v2339_v0 = vmul.f32 %v2145_v9, %v250_v56  ;;  %v1828_v56 = vld [vmem:[%s3615_s1 + $0xb8] sm:$0xf0] }
  0x9a   :  { %v313_v58 = vmul.f32 %v2319_v28, %v2319_v28  ;;  %v290_v10 = vmul.f32 %v2343_v29, %v2343_v29 }
  0x9b   :  { %v138_v55 = vpop.xlane.xlu0 %137  ;;  %v314_v1 = vmul.f32 %v2339_v0, %v2339_v0  ;;  %v140_v12 = vpop.xlane.xlu1 %139 }
  0x9c   :  { %371 = vadd.xlane.f32.xlu1 %v312_v46  ;;  %147 = vadd.xlane.f32.xlu0 %v104_v47  ;;  %v186_v62 = vpop.xlane.xlu2 %185  ;;  %v195_v30 = vmul.f32 0.03125, %v138_v55  ;;  %v196_v14 = vmul.f32 0.03125, %v140_v12  ;;  %v1779_v46 = vld [vmem:[%s3615_s1 + $0xa8] sm:$0xf]  ;;  %v1827_v47 = vld [vmem:[%s3615_s1 + $0xb0] sm:$0xf0] }
  0x9d   :  { %323 = vadd.xlane.f32.xlu2 %v288_v48  ;;  %v219_v26 = vmul.f32 0.03125, %v186_v62  ;;  %v1826_v48 = vld [vmem:[%s3615_s1 + $0xac] sm:$0xf]  ;;  %v1780_v49 = vor.u32 %v1827_v47, %v1779_v46  ;;  %v1787_v55 = vld [vmem:[%s3615_s1 + $0xb0] sm:$0xf] }
  0x9e   :  { %v227_v5 = vsub.f32 %v1843_v36, %v195_v30  ;;  %v228_v31 = vsub.f32 %v1844_v37, %v196_v14  ;;  %v108_v37 = vmul.f32 %v3620_v35, %v2145_v9  ;;  %v1823_v62 = vld [vmem:[%s3615_s1 + $0x94] sm:$0xf]  ;;  %v1769_v30 = vld [vmem:[%s3615_s1 + $0x9c] sm:$0xf0]  ;;  %v1820_v12 = vld [vmem:[%s3615_s1 + $0x7c] sm:$0xf] }
  0x9f   :  { %v251_v4 = vsub.f32 %v1891_v38, %v219_v26  ;;  %1229 = vmatpush.bf16.msra.mxu0 %v1780_v49  ;;  %2003 = vmatpush.bf16.msra.mxu3 %v1780_v49  ;;  %v1757_v14 = vld [vmem:[%s3615_s1 + $0x84] sm:$0xf0]  ;;  %v1819_v46 = vld [vmem:[%s3615_s1 + $0x70] sm:$0xf0] }
  0xa0   :  { %v2360_v36 = vmul.f32 %v2145_v9, %v227_v5  ;;  %v2384_v34 = vmul.f32 %v2145_v9, %v228_v31  ;;  %v1825_v5 = vld [vmem:[%s3615_s1 + $0xa0] sm:$0xf0] }
  0xa1   :  { %v2357_v38 = vmul.f32 %v2145_v9, %v251_v4  ;;  %v1775_v4 = vld [vmem:[%s3615_s1 + $0x98] sm:$0xf] }
  0xa2   :  { %v291_v25 = vmul.f32 %v2360_v36, %v2360_v36  ;;  %v292_v33 = vmul.f32 %v2384_v34, %v2384_v34 }
  0xa3   :  { %v188_v11 = vpop.xlane.xlu0 %187  ;;  %v315_v24 = vmul.f32 %v2357_v38, %v2357_v38 }
  0xa4   :  { %325 = vadd.xlane.f32.xlu1 %v289_v57  ;;  %373 = vadd.xlane.f32.xlu0 %v313_v58  ;;  %v220_v7 = vmul.f32 0.03125, %v188_v11  ;;  %v2424_v57 = vor.u32 %v1826_v48, %v1781_v23  ;;  %v2426_v58 = vor.u32 %v1828_v56, %v1787_v55  ;;  %v1821_v11 = vld [vmem:[%s3615_s1 + $0x80] sm:$0xf0] }
  0xa5   :  { %145 = vadd.xlane.f32.xlu2 %v103_v60  ;;  %v1824_v60 = vld [vmem:[%s3615_s1 + $0x98] sm:$0xf0] }
  0xa6   :  { %v252_v19 = vsub.f32 %v1892_v42, %v220_v7  ;;  %1318 = vmatpush.bf16.msra.mxu1 %v2424_v57  ;;  %1407 = vmatpush.bf16.msra.mxu2 %v2426_v58  ;;  %v1768_v26 = vor.u32 %v1824_v60, %v1767_v59  ;;  %v1731_v59 = vld [vmem:[%s3615_s1 + $0x48] sm:$0xf]  ;;  %v1815_v60 = vld [vmem:[%s3615_s1 + $0x50] sm:$0xf0] }
  0xa8   :  { %v2381_v42 = vmul.f32 %v2145_v9, %v252_v19  ;;  %1230 = vmatpush.bf16.msra.mxu0 %v1768_v26  ;;  %2004 = vmatpush.bf16.msra.mxu3 %v1768_v26  ;;  %v1763_v19 = vld [vmem:[%s3615_s1 + $0x80] sm:$0xf]  ;;  %v1814_v26 = vld [vmem:[%s3615_s1 + $0x4c] sm:$0xf] }
  0xaa   :  { %v316_v22 = vmul.f32 %v2381_v42, %v2381_v42 }
  0xac   :  { %375 = vadd.xlane.f32.xlu1 %v314_v1  ;;  %151 = vadd.xlane.f32.xlu0 %v106_v2  ;;  %v2448_v1 = vor.u32 %v1823_v62, %v1769_v30  ;;  %v2450_v2 = vor.u32 %v1825_v5, %v1775_v4  ;;  %v1732_v62 = vor.u32 %v1815_v60, %v1731_v59  ;;  %v1733_v30 = vld [vmem:[%s3615_s1 + $0x54] sm:$0xf0]  ;;  %v1739_v4 = vld [vmem:[%s3615_s1 + $0x50] sm:$0xf] }
  0xad   :  { %327 = vadd.xlane.f32.xlu2 %v290_v10  ;;  %v1755_v10 = vld [vmem:[%s3615_s1 + $0x78] sm:$0xf] }
  0xae   :  { %1319 = vmatpush.bf16.msra.mxu1 %v2448_v1  ;;  %1408 = vmatpush.bf16.msra.mxu2 %v2450_v2  ;;  %v1756_v7 = vor.u32 %v1821_v11, %v1755_v10  ;;  %v2521_v11 = vor.u32 %v1814_v26, %v1733_v30 }
  0xb0   :  { %1231 = vmatpush.bf16.msra.mxu0 %v1756_v7  ;;  %2005 = vmatpush.bf16.msra.mxu3 %v1756_v7 }
  0xb4   :  { %377 = vadd.xlane.f32.xlu0 %v315_v24  ;;  %329 = vadd.xlane.f32.xlu1 %v291_v25  ;;  %v1822_v24 = vld [vmem:[%s3615_s1 + $0x88] sm:$0xf0]  ;;  %v2472_v25 = vor.u32 %v1820_v12, %v1757_v14  ;;  %v1816_v12 = vld [vmem:[%s3615_s1 + $0x58] sm:$0xf0]  ;;  %v1719_v14 = vld [vmem:[%s3615_s1 + $0x30] sm:$0xf] }
  0xb5   :  { %149 = vadd.xlane.f32.xlu2 %v105_v32  ;;  %v2474_v31 = vor.u32 %v1822_v24, %v1763_v19  ;;  %v1743_v32 = vld [vmem:[%s3615_s1 + $0x60] sm:$0xf]  ;;  %v2526_v7 = vor.u32 %v1816_v12, %v1739_v4  ;;  %v1812_v19 = vld [vmem:[%s3615_s1 + $0x38] sm:$0xf0]  ;;  %v1811_v24 = vld [vmem:[%s3615_s1 + $0x34] sm:$0xf] }
  0xb6   :  { %1320 = vmatpush.bf16.msra.mxu1 %v2472_v25 }
  0xb7   :  { %1409 = vmatpush.bf16.msra.mxu2 %v2474_v31 }
  0xbc   :  { %155 = vadd.xlane.f32.xlu0 %v108_v37  ;;  %379 = vadd.xlane.f32.xlu1 %v316_v22  ;;  %v1818_v37 = vld [vmem:[%s3615_s1 + $0x68] sm:$0xf0]  ;;  %v1817_v22 = vld [vmem:[%s3615_s1 + $0x64] sm:$0xf] }
  0xbd   :  { %331 = vadd.xlane.f32.xlu2 %v292_v33  ;;  %v1744_v33 = vor.u32 %v1818_v37, %v1743_v32  ;;  %v1720_v32 = vor.u32 %v1812_v19, %v1719_v14  ;;  %v1721_v37 = vld [vmem:[%s3615_s1 + $0x3c] sm:$0xf0]  ;;  %v1707_v19 = vld [vmem:[%s3615_s1 + $0x18] sm:$0xf] }
  0xbf   :  { %1232 = vmatpush.bf16.msra.mxu0 %v1744_v33  ;;  %2006 = vmatpush.bf16.msra.mxu3 %v1744_v33  ;;  %v1813_v33 = vld [vmem:[%s3615_s1 + $0x40] sm:$0xf0] }
  0xc3   :  { %1233 = vmatpush.bf16.msra.mxu0 %v1732_v62  ;;  %2007 = vmatpush.bf16.msra.mxu3 %v1732_v62 }
  0xc4   :  { %157 = vadd.xlane.f32.xlu0 %v109_v44  ;;  %v1745_v44 = vld [vmem:[%s3615_s1 + $0x6c] sm:$0xf0] }
  0xc5   :  { %153 = vadd.xlane.f32.xlu2 %v107_v45  ;;  %v1751_v45 = vld [vmem:[%s3615_s1 + $0x68] sm:$0xf]  ;;  %v2496_v47 = vor.u32 %v1817_v22, %v1745_v44  ;;  %v1727_v22 = vld [vmem:[%s3615_s1 + $0x38] sm:$0xf]  ;;  %v2550_v44 = vor.u32 %v1811_v24, %v1721_v37  ;;  %v3621_v37 = vunpack.c.h.bf16 %v2396_v39 }
  0xc6   :  { %v2498_v48 = vor.u32 %v1819_v46, %v1751_v45  ;;  %v2552_v45 = vor.u32 %v1813_v33, %v1727_v22  ;;  %v1808_v22 = vld [vmem:[%s3615_s1 + $0x1c] sm:$0xf]  ;;  %v1709_v33 = vld [vmem:[%s3615_s1 + $0x24] sm:$0xf0] }
  0xc7   :  { %1321 = vmatpush.bf16.msra.mxu1 %v2496_v47  ;;  %1234 = vmatpush.bf16.msra.mxu0 %v1720_v32 }
  0xc8   :  { %1410 = vmatpush.bf16.msra.mxu2 %v2498_v48  ;;  %2008 = vmatpush.bf16.msra.mxu3 %v1720_v32 }
  0xcb   :  { %1322 = vmatpush.bf16.msra.mxu1 %v2521_v11 }
  0xcc   :  { %1411 = vmatpush.bf16.msra.mxu2 %v2526_v7 }
  0xcf   :  { %1323 = vmatpush.bf16.msra.mxu1 %v2550_v44 }
  0xd0   :  { %1412 = vmatpush.bf16.msra.mxu2 %v2552_v45 }
  0xf7   :  { %v318_v49 = vpop.xlane.xlu1 %317  ;;  %v366_v23 = vpop.xlane.xlu0 %365 }
  0xf8   :  { %v381_v55 = vmul.f32 0.03125, %v318_v49  ;;  %v405_v56 = vmul.f32 0.03125, %v366_v23 }
  0xfa   :  { %v2517_v5 = vadd.f32 1e-06, %v381_v55  ;;  %v2519_v10 = vadd.f32 1e-06, %v405_v56 }
  0xfc   :  { %2030 = vrsqrt.f32 %v2517_v5  ;;  %vm691_vm1 = vweird.f32 %v2519_v10  ;;  %vm451_vm4 = vweird.f32 %v2517_v5 }
  0xfd   :  { %2032 = vrsqrt.f32 %v2519_v10 }
  0xff   :  { %v368_v46 = vpop.xlane.xlu1 %367  ;;  %v144_v49 = vpop.xlane.xlu0 %143 }
 0x100   :  { %v406_v23 = vmul.f32 0.03125, %v368_v46  ;;  %v320_v55 = vpop.xlane.xlu2 %319  ;;  %v198_v56 = vmul.f32 0.03125, %v144_v49 }
 0x101   :  { %v382_v59 = vmul.f32 0.03125, %v320_v55  ;;  %v1715_v55 = vld [vmem:[%s3615_s1 + $0x20] sm:$0xf] }
 0x102   :  { %v2556_v60 = vpop.eup %2030  ;;  %v2558_v62 = vadd.f32 1e-06, %v406_v23  ;;  %v230_v26 = vsub.f32 %v1848_v61, %v198_v56  ;;  %v1809_v61 = vld [vmem:[%s3615_s1 + $0x20] sm:$0xf0]  ;;  %v2590_v23 = vor.u32 %v1808_v22, %v1709_v33  ;;  %v1810_v56 = vld [vmem:[%s3615_s1 + $0x28] sm:$0xf0] }
 0x103   :  { %v2562_v30 = vpop.eup %2032  ;;  %v446_v4 = vmul.f32 %v2556_v60, %v2517_v5  ;;  %v2566_v12 = vadd.f32 1e-06, %v382_v59  ;;  %v1708_v49 = vor.u32 %v1809_v61, %v1707_v19  ;;  %vm452_vm3 = vweird.f32 %v2556_v60 }
 0x104   :  { %v686_v14 = vmul.f32 %v2562_v30, %v2519_v10  ;;  %2034 = vrsqrt.f32 %v2558_v62  ;;  %v2580_v32 = vmul.f32 %v2145_v9, %v230_v26  ;;  %vm692_vm2 = vweird.f32 %v2562_v30  ;;  %1324 = vmatpush.bf16.msra.mxu1 %v2590_v23  ;;  %vm453_vm6 = vmor %vm451_vm4, %vm452_vm3 }
 0x105   :  { %v447_v24 = vmul.f32 %v2556_v60, %v446_v4  ;;  %2036 = vrsqrt.f32 %v2566_v12  ;;  %1235 = vmatpush.bf16.msra.mxu0 %v1708_v49  ;;  %2009 = vmatpush.bf16.msra.mxu3 %v1708_v49  ;;  %v1806_v49 = vld [vmem:[%s3615_s1 + $0x8] sm:$0xf0]  ;;  %vm2642_vm5 = vmor %vm691_vm1, %vm692_vm2  ;;  %vm701_vm7 = vweird.f32 %v2558_v62  ;;  %vm461_vm9 = vweird.f32 %v2566_v12 }
 0x106   :  { %v687_v46 = vmul.f32 %v2562_v30, %v686_v14  ;;  %v294_v41 = vmul.f32 %v2580_v32, %v2580_v32  ;;  %v2601_v14 = vor.u32 %v1810_v56, %v1715_v55  ;;  %v2616_v55 = vld [vmem:[%s3612_s0 + $0x48] sm:$0xff]  }
 0x107   :  { %v448_v59 = vmul.f32 0.5, %v447_v24  ;;  %v322_v26 = vpop.xlane.xlu1 %321  ;;  %v370_v4 = vpop.xlane.xlu0 %369  ;;  %v1695_v24 = vld [vmem:[%s3615_s1] sm:$0xf] }
 0x108   :  { %v688_v19 = vmul.f32 0.5, %v687_v46  ;;  %v383_v61 = vmul.f32 0.03125, %v322_v26  ;;  %v142_v22 = vpop.xlane.xlu2 %141  ;;  %v407_v33 = vmul.f32 0.03125, %v370_v4  ;;  %335 = vadd.xlane.f32.xlu2 %v294_v41  ;;  %v2611_v46 = vmul.f32 %v3621_v37, %v2145_v9  ;;  %1413 = vmatpush.bf16.msra.mxu2 %v2601_v14  ;;  %v2634_v37 = vld [vmem:[%s3613_s3] ss:$0 sm:$0xff] }
 0x109   :  { %v449_v43 = vsub.f32 1.5, %v448_v59  ;;  %v197_v35 = vmul.f32 0.03125, %v142_v22  ;;  %v1696_v4 = vor.u32 %v1806_v49, %v1695_v24  ;;  %v1805_v24 = vld [vmem:[%s3615_s1 + $0x4] sm:$0xf] }
 0x10a   :  { %v2622_v56 = vpop.eup %2034  ;;  %v689_v59 = vsub.f32 1.5, %v688_v19  ;;  %v2624_v41 = vadd.f32 1e-06, %v383_v61  ;;  %v2626_v26 = vadd.f32 1e-06, %v407_v33  ;;  %v2678_v10 = vor.u32 %v1805_v24, %v1697_v53 }
 0x10b   :  { %v2629_v22 = vpop.eup %2036  ;;  %v450_v17 = vmul.f32 %v2556_v60, %v449_v43  ;;  %v696_v61 = vmul.f32 %v2622_v56, %v2558_v62  ;;  %v229_v33 = vsub.f32 %v1847_v16, %v197_v35  ;;  %1236 = vmatpush.bf16.msra.mxu0 %v1696_v4  ;;  %2010 = vmatpush.bf16.msra.mxu3 %v1696_v4  ;;  %vm702_vm8 = vweird.f32 %v2622_v56 }
 0x10c   :  { %v690_v43 = vmul.f32 %v2562_v30, %v689_v59  ;;  %v456_v5 = vmul.f32 %v2629_v22, %v2566_v12  ;;  %2038 = vrsqrt.f32 %v2624_v41  ;;  %1325 = vmatpush.bf16.msra.mxu1 %v2678_v10  ;;  %vm2697_vm10 = vmor %vm701_vm7, %vm702_vm8  ;;  %vm462_vm11 = vweird.f32 %v2629_v22 }
 0x10d   :  { %v454_v16 = vsel %vm453_vm6, %v2556_v60, %v450_v17  ;;  %v697_v35 = vmul.f32 %v2622_v56, %v696_v61  ;;  %2040 = vrsqrt.f32 %v2626_v26  ;;  %v2676_v54 = vmul.f32 %v2145_v9, %v229_v33  ;;  %vm463_vm14 = vmor %vm461_vm9, %vm462_vm11 }
 0x10e   :  { %v765_v49 = vmul.f32 %v454_v16, %v2241_v52  ;;  %v694_v59 = vsel %vm2642_vm5, %v2562_v30, %v690_v43  ;;  %v457_v4 = vmul.f32 %v2629_v22, %v456_v5  ;;  %v2683_v52 = vld [vmem:[%s3614_s4] ss:$0 sm:$0xff]  ;;  %vm471_vm12 = vweird.f32 %v2624_v41 }
 0x10f   :  { %2011 = vmatpush.bf16.msrb.mxu3 %v2424_v57  ;;  %v789_v17 = vmul.f32 %v694_v59, %v2238_v51  ;;  %v698_v60 = vmul.f32 0.5, %v697_v35  ;;  %v372_v61 = vpop.xlane.xlu1 %371  ;;  %v148_v20 = vpop.xlane.xlu0 %147  ;;  %v293_v33 = vmul.f32 %v2676_v54, %v2676_v54  ;;  %vm711_vm13 = vweird.f32 %v2626_v26 }
 0x110   :  { %v801_v57 = vmul.f32 %v2634_v37, %v765_v49  ;;  %v458_v30 = vmul.f32 0.5, %v457_v4  ;;  %v408_v19 = vmul.f32 0.03125, %v372_v61  ;;  %v324_v43 = vpop.xlane.xlu2 %323  ;;  %v200_v5 = vmul.f32 0.03125, %v148_v20 }
 0x111   :  { %v699_v51 = vsub.f32 1.5, %v698_v60  ;;  %v384_v16 = vmul.f32 0.03125, %v324_v43  ;;  %333 = vadd.xlane.f32.xlu1 %v293_v33 }
 0x112   :  { %v2691_v24 = vpop.eup %2038  ;;  %v459_v20 = vsub.f32 1.5, %v458_v30  ;;  %v2702_v35 = vadd.f32 1e-06, %v408_v19  ;;  %v232_v49 = vsub.f32 %v1852_v15, %v200_v5  ;;  %v837_v60 = vadd.f32 %v2683_v52, %v801_v57 }
 0x113   :  { %2012 = vmatpush.bf16.msrb.mxu3 %v2448_v1  ;;  %v2706_v59 = vpop.eup %2040  ;;  %v825_v1 = vmul.f32 %v2634_v37, %v789_v17  ;;  %v700_v4 = vmul.f32 %v2622_v56, %v699_v51  ;;  %v466_v62 = vmul.f32 %v2691_v24, %v2624_v41  ;;  %vm472_vm15 = vweird.f32 %v2691_v24 }
 0x114   :  { %v460_v61 = vmul.f32 %v2629_v22, %v459_v20  ;;  %v706_v15 = vmul.f32 %v2706_v59, %v2626_v26  ;;  %2042 = vrsqrt.f32 %v2702_v35  ;;  %v2728_v57 = vadd.f32 1e-06, %v384_v16  ;;  %vm473_vm2 = vmor %vm471_vm12, %vm472_vm15 }
 0x115   :  { %v704_v17 = vsel %vm2697_vm10, %v2622_v56, %v700_v4  ;;  %v467_v30 = vmul.f32 %v2691_v24, %v466_v62  ;;  %v2735_v56 = vmul.f32 %v2145_v9, %v232_v49  ;;  %vm712_vm0 = vweird.f32 %v2706_v59 }
 0x116   :  { %v790_v19 = vmul.f32 %v704_v17, %v2263_v6  ;;  %v464_v43 = vsel %vm463_vm14, %v2629_v22, %v460_v61  ;;  %v707_v5 = vmul.f32 %v2706_v59, %v706_v15  ;;  %2044 = vrsqrt.f32 %v2728_v57  ;;  %vm2757_vm1 = vmor %vm711_vm13, %vm712_vm0 }
 0x117   :  { %2013 = vmatpush.bf16.msrb.mxu3 %v2472_v25  ;;  %v766_v12 = vmul.f32 %v464_v43, %v2266_v8  ;;  %v468_v51 = vmul.f32 0.5, %v467_v30  ;;  %v326_v16 = vpop.xlane.xlu1 %325  ;;  %v374_v33 = vpop.xlane.xlu0 %373  ;;  %v296_v8 = vmul.f32 %v2735_v56, %v2735_v56  ;;  %v861_v15 = vadd.f32 %v2683_v52, %v825_v1 }
 0x118   :  { %v826_v25 = vmul.f32 %v2634_v37, %v790_v19  ;;  %v708_v53 = vmul.f32 0.5, %v707_v5  ;;  %v385_v6 = vmul.f32 0.03125, %v326_v16  ;;  %v146_v20 = vpop.xlane.xlu2 %145  ;;  %v409_v22 = vmul.f32 0.03125, %v374_v33 }
 0x119   :  { %v802_v4 = vmul.f32 %v2634_v37, %v766_v12  ;;  %v469_v62 = vsub.f32 1.5, %v468_v51  ;;  %v199_v49 = vmul.f32 0.03125, %v146_v20  ;;  %159 = vadd.xlane.f32.xlu1 %v2611_v46  ;;  %339 = vadd.xlane.f32.xlu0 %v296_v8  ;;  %v3631_v16 = vunpack.c.l.bf16 %v2616_v55 }
 0x11a   :  { %v2745_v61 = vpop.eup %2042  ;;  %v862_v17 = vadd.f32 %v2683_v52, %v826_v25  ;;  %v709_v30 = vsub.f32 1.5, %v708_v53  ;;  %v2749_v19 = vadd.f32 1e-06, %v385_v6  ;;  %v2763_v1 = vadd.f32 1e-06, %v409_v22 }
 0x11b   :  { %2014 = vmatpush.bf16.msrb.mxu3 %v2496_v47  ;;  %v838_v43 = vadd.f32 %v2683_v52, %v802_v4  ;;  %v470_v5 = vmul.f32 %v2691_v24, %v469_v62  ;;  %v716_v47 = vmul.f32 %v2745_v61, %v2702_v35  ;;  %v111_v33 = vmul.f32 %v3631_v16, %v2145_v9 }
 0x11c   :  { %v1956_v51 = vpack.c.bf16 %v862_v17, %v861_v15  ;;  %v710_v26 = vmul.f32 %v2706_v59, %v709_v30  ;;  %2046 = vrsqrt.f32 %v2749_v19  ;;  %v2775_v25 = vpop.eup %2044  ;;  %v3632_v20 = vunpack.c.l.bf16 %v2293_v21  ;;  %v1703_v30 = vld [vmem:[%s3615_s1 + $0x8] sm:$0xf] }
 0x11d   :  { %v1896_v53 = vpack.c.bf16 %v838_v43, %v837_v60  ;;  %v474_v46 = vsel %vm473_vm2, %v2691_v24, %v470_v5  ;;  %v717_v6 = vmul.f32 %v2745_v61, %v716_v47  ;;  %vm721_vm3 = vweird.f32 %v2702_v35 }
 0x11e   :  { %v231_v22 = vsub.f32 %v3632_v20, %v199_v49  ;;  %1999 = vst [vmem:[#allocation2 + $0x60] sm:$0xff] %v1956_v51   ;;  %v767_v41 = vmul.f32 %v474_v46, %v2273_v13  ;;  %v714_v4 = vsel %vm2757_vm1, %v2706_v59, %v710_v26  ;;  %v476_v60 = vmul.f32 %v2775_v25, %v2728_v57 }
 0x11f   :  { %2015 = vmatpush.bf16.msrb.mxu3 %v2521_v11  ;;  %1897 = vst [vmem:[#allocation2 + $0x30] sm:$0xff] %v1896_v53   ;;  %v791_v24 = vmul.f32 %v714_v4, %v2283_v27  ;;  %v718_v62 = vmul.f32 0.5, %v717_v6  ;;  %vm722_vm4 = vweird.f32 %v2745_v61  ;;  %2048 = vrsqrt.f32 %v2763_v1  ;;  %v376_v21 = vpop.xlane.xlu1 %375  ;;  %v152_v11 = vpop.xlane.xlu0 %151 }
 0x120   :  { %v803_v13 = vmul.f32 %v2634_v37, %v767_v41  ;;  %v477_v49 = vmul.f32 %v2775_v25, %v476_v60  ;;  %vm481_vm5 = vweird.f32 %v2728_v57  ;;  %v410_v59 = vmul.f32 0.03125, %v376_v21  ;;  %v328_v8 = vpop.xlane.xlu2 %327  ;;  %vm2809_vm7 = vmor %vm721_vm3, %vm722_vm4 }
 0x121   :  { %v719_v15 = vsub.f32 1.5, %v718_v62  ;;  %vm491_vm6 = vweird.f32 %v2749_v19  ;;  %v386_v17 = vmul.f32 0.03125, %v328_v8  ;;  %v2797_v27 = vmul.f32 %v2145_v9, %v231_v22  ;;  %161 = vadd.xlane.f32.xlu1 %v111_v33 }
 0x122   :  { %v2803_v43 = vpop.eup %2046  ;;  %v478_v12 = vmul.f32 0.5, %v477_v49  ;;  %vm482_vm8 = vweird.f32 %v2775_v25  ;;  %v2814_v47 = vadd.f32 1e-06, %v410_v59  ;;  %v202_v51 = vmul.f32 0.03125, %v152_v11 }
 0x123   :  { %2016 = vmatpush.bf16.msrb.mxu3 %v2550_v44  ;;  %v1807_v44 = vld [vmem:[%s3615_s1 + $0x10] sm:$0xf0]  ;;  %v827_v26 = vmul.f32 %v2634_v37, %v791_v24  ;;  %v720_v16 = vmul.f32 %v2745_v61, %v719_v15  ;;  %v486_v35 = vmul.f32 %v2803_v43, %v2749_v19  ;;  %vm731_vm9 = vweird.f32 %v2763_v1  ;;  %vm2853_vm10 = vmor %vm481_vm5, %vm482_vm8 }
 0x124   :  { %v2825_v53 = vadd.f32 %v2683_v52, %v803_v13  ;;  %v479_v46 = vsub.f32 1.5, %v478_v12  ;;  %2050 = vrsqrt.f32 %v2814_v47  ;;  %v2828_v6 = vadd.f32 1e-06, %v386_v17 }
 0x125   :  { %v2830_v20 = vpop.eup %2048  ;;  %v724_v22 = vsel %vm2809_vm7, %v2745_v61, %v720_v16  ;;  %v487_v41 = vmul.f32 %v2803_v43, %v486_v35  ;;  %v295_v4 = vmul.f32 %v2797_v27, %v2797_v27  ;;  %v2838_v33 = vor.u32 %v1807_v44, %v1703_v30  ;;  %v2840_v60 = vld [vmem:[#allocation2 + $0x60] sm:$0xff] }
 0x126   :  { %v792_v24 = vmul.f32 %v724_v22, %v2298_v3  ;;  %v480_v62 = vmul.f32 %v2775_v25, %v479_v46  ;;  %v726_v21 = vmul.f32 %v2830_v20, %v2763_v1  ;;  %v3635_v61 = vunpack.c.h.bf16 %v2336_v63  ;;  %v1789_v13 = vld [vmem:[#allocation2 + $0x30] sm:$0xff]  ;;  %1297 = vmatmul.bf16.vlgmr.msra.gmra.mxu3 %v2840_v60 }
 0x127   :  { %2017 = vmatpush.bf16.msrb.mxu3 %v2590_v23  ;;  %v488_v23 = vmul.f32 0.5, %v487_v41  ;;  %vm492_vm11 = vweird.f32 %v2803_v43  ;;  %2052 = vrsqrt.f32 %v2828_v6  ;;  %337 = vadd.xlane.f32.xlu2 %v295_v4  ;;  %v330_v3 = vpop.xlane.xlu1 %329  ;;  %v378_v59 = vpop.xlane.xlu0 %377  ;;  %v1868_v8 = vunpack.c.h.bf16 %v2616_v55 }
 0x128   :  { %v234_v11 = vsub.f32 %v3635_v61, %v202_v51  ;;  %1414 = vmatpush.bf16.msra.mxu2 %v2838_v33  ;;  %v828_v15 = vmul.f32 %v2634_v37, %v792_v24  ;;  %v484_v57 = vsel %vm2853_vm10, %v2775_v25, %v480_v62  ;;  %v727_v17 = vmul.f32 %v2830_v20, %v726_v21  ;;  %v150_v30 = vpop.xlane.xlu2 %149  ;;  %vm2878_vm13 = vmor %vm491_vm6, %vm492_vm11 }
 0x129   :  { %v387_v5 = vmul.f32 0.03125, %v330_v3  ;;  %1237 = vmatmul.bf16.vlgmr.msra.gmra.mxu0 %v1789_v13  ;;  %v863_v12 = vadd.f32 %v2683_v52, %v827_v26  ;;  %v768_v51 = vmul.f32 %v484_v57, %v2302_v40  ;;  %v489_v44 = vsub.f32 1.5, %v488_v23  ;;  %1326 = vmatmul.bf16.vlgmr.msra.gmra.mxu1 %v1789_v13 }
 0x12a   :  { %vm732_vm12 = vweird.f32 %v2830_v20  ;;  %v2871_v16 = vpop.eup %2050  ;;  %v864_v25 = vadd.f32 %v2683_v52, %v828_v15  ;;  %v728_v26 = vmul.f32 0.5, %v727_v17  ;;  %v411_v46 = vmul.f32 0.03125, %v378_v59 }
 0x12b   :  { %2018 = vmatpush.bf16.msrb.mxu3 %v2678_v10  ;;  %v2882_v40 = vadd.f32 1e-06, %v387_v5  ;;  %1415 = vmatmul.bf16.vlgmr.msra.gmra.mxu2 %v1789_v13  ;;  %v804_v10 = vmul.f32 %v2634_v37, %v768_v51  ;;  %v490_v22 = vmul.f32 %v2803_v43, %v489_v44  ;;  %v736_v41 = vmul.f32 %v2871_v16, %v2814_v47  ;;  %vm2904_vm15 = vmor %vm731_vm9, %vm732_vm12 }
 0x12c   :  { %v112_v19 = vmul.f32 %v1868_v8, %v2145_v9  ;;  %v1961_v4 = vpack.c.bf16 %v864_v25, %v863_v12  ;;  %v729_v24 = vsub.f32 1.5, %v728_v26  ;;  %vm741_vm14 = vweird.f32 %v2814_v47 }
 0x12d   :  { %2054 = vrsqrt.f32 %v2882_v40  ;;  %v2894_v62 = vpop.eup %2052  ;;  %v494_v21 = vsel %vm2878_vm13, %v2803_v43, %v490_v22  ;;  %v737_v13 = vmul.f32 %v2871_v16, %v736_v41  ;;  %v201_v49 = vmul.f32 0.03125, %v150_v30 }
 0x12e   :  { %2000 = vst [vmem:[#allocation2 + $0x70] sm:$0xff] %v1961_v4   ;;  %v769_v23 = vmul.f32 %v494_v21, %v2316_v50  ;;  %v730_v3 = vmul.f32 %v2830_v20, %v729_v24  ;;  %vm742_vm0 = vweird.f32 %v2871_v16  ;;  %v496_v43 = vmul.f32 %v2894_v62, %v2828_v6 }
 0x12f   :  { %2019 = vmatpush.bf16.msra.mxu3 %v2426_v58  ;;  %v840_v58 = vadd.f32 %v2683_v52, %v804_v10  ;;  %v738_v59 = vmul.f32 0.5, %v737_v13  ;;  %v2916_v15 = vadd.f32 1e-06, %v411_v46  ;;  %163 = vadd.xlane.f32.xlu2 %v112_v19  ;;  %v2919_v57 = vmul.f32 %v2145_v9, %v234_v11  ;;  %v380_v17 = vpop.xlane.xlu1 %379  ;;  %v156_v50 = vpop.xlane.xlu0 %155  ;;  %vm2936_vm2 = vmor %vm741_vm14, %vm742_vm0  ;;  %v2945_v46 = vld [vmem:[%s3612_s0 + $0x50] sm:$0xff]  }
 0x130   :  { %v734_v30 = vsel %vm2904_vm15, %v2830_v20, %v730_v3  ;;  %v497_v5 = vmul.f32 %v2894_v62, %v496_v43  ;;  %v332_v12 = vpop.xlane.xlu2 %331  ;;  %v412_v51 = vmul.f32 0.03125, %v380_v17  ;;  %vm501_vm1 = vweird.f32 %v2828_v6 }
 0x131   :  { %v1901_v1 = vpack.c.bf16 %v840_v58, %v2825_v53  ;;  %v3642_v53 = vunpack.c.l.bf16 %v2336_v63  ;;  %2056 = vrsqrt.f32 %v2916_v15  ;;  %v793_v25 = vmul.f32 %v734_v30, %v2319_v28 }
 0x132   :  { %v498_v35 = vmul.f32 0.5, %v497_v5  ;;  %v298_v26 = vmul.f32 %v2919_v57, %v2919_v57  ;;  %v388_v63 = vmul.f32 0.03125, %v332_v12  ;;  %v805_v28 = vmul.f32 %v2634_v37, %v769_v23 }
 0x133   :  { %2020 = vmatpush.bf16.msra.mxu3 %v2450_v2  ;;  %1988 = vst [vmem:[#allocation2] sm:$0xff] %v1901_v1   ;;  %v739_v2 = vsub.f32 1.5, %v738_v59  ;;  %v233_v44 = vsub.f32 %v3642_v53, %v201_v49  ;;  %v2929_v11 = vpop.eup %2054  ;;  %vm511_vm3 = vweird.f32 %v2882_v40  ;;  %vm502_vm4 = vweird.f32 %v2894_v62 }
 0x134   :  { %v506_v10 = vmul.f32 %v2929_v11, %v2882_v40  ;;  %v499_v22 = vsub.f32 1.5, %v498_v35  ;;  %343 = vadd.xlane.f32.xlu1 %v298_v26  ;;  %v2954_v41 = vadd.f32 1e-06, %v388_v63  ;;  %v2956_v19 = vadd.f32 1e-06, %v412_v51  ;;  %vm503_vm6 = vmor %vm501_vm1, %vm502_vm4 }
 0x135   :  { %v740_v47 = vmul.f32 %v2871_v16, %v739_v2  ;;  %vm751_vm5 = vweird.f32 %v2916_v15  ;;  %v1871_v24 = vunpack.c.l.bf16 %v2945_v46  ;;  %v2964_v58 = vld [vmem:[#allocation2 + $0x70] sm:$0xff]  ;;  %v829_v21 = vmul.f32 %v2634_v37, %v793_v25 }
 0x136   :  { %v507_v4 = vmul.f32 %v2929_v11, %v506_v10  ;;  %v500_v13 = vmul.f32 %v2894_v62, %v499_v22  ;;  %2058 = vrsqrt.f32 %v2954_v41  ;;  %v204_v3 = vmul.f32 0.03125, %v156_v50  ;;  %1302 = vmatmul.bf16.gmra.mxu3 %v2964_v58 }
 0x137   :  { %2021 = vmatpush.bf16.msra.mxu3 %v2474_v31  ;;  %v744_v31 = vsel %vm2936_vm2, %v2871_v16, %v740_v47  ;;  %v2971_v49 = vpop.eup %2056  ;;  %v841_v16 = vadd.f32 %v2683_v52, %v805_v28  ;;  %2060 = vrsqrt.f32 %v2956_v19  ;;  %vm512_vm7 = vweird.f32 %v2929_v11  ;;  %v158_v59 = vpop.xlane.xlu0 %157 }
 0x138   :  { %v794_v61 = vmul.f32 %v744_v31, %v2339_v0  ;;  %v508_v23 = vmul.f32 0.5, %v507_v4  ;;  %v504_v43 = vsel %vm503_vm6, %v2894_v62, %v500_v13  ;;  %v154_v1 = vpop.xlane.xlu2 %153  ;;  %v113_v50 = vmul.f32 %v1871_v24, %v2145_v9  ;;  %vm3008_vm9 = vmor %vm511_vm3, %vm512_vm7 }
 0x139   :  { %v770_v6 = vmul.f32 %v504_v43, %v2343_v29  ;;  %v2990_v5 = vmul.f32 %v2145_v9, %v233_v44  ;;  %v865_v62 = vadd.f32 %v2683_v52, %v829_v21  ;;  %v203_v2 = vmul.f32 0.03125, %v154_v1 }
 0x13a   :  { %v830_v0 = vmul.f32 %v2634_v37, %v794_v61  ;;  %v1790_v17 = vld [vmem:[#allocation2] sm:$0xff]  ;;  %v509_v30 = vsub.f32 1.5, %v508_v23  ;;  %v3645_v29 = vunpack.c.h.bf16 %v2377_v18  ;;  %165 = vadd.xlane.f32.xlu2 %v113_v50  ;;  %v205_v44 = vmul.f32 0.03125, %v158_v59 }
 0x13b   :  { %2022 = vmatpush.bf16.msra.mxu3 %v2498_v48  ;;  %v746_v48 = vmul.f32 %v2971_v49, %v2916_v15  ;;  %1242 = vmatmul.bf16.gmra.mxu0 %v1790_v17  ;;  %v806_v53 = vmul.f32 %v2634_v37, %v770_v6  ;;  %v297_v20 = vmul.f32 %v2990_v5, %v2990_v5  ;;  %vm752_vm8 = vweird.f32 %v2971_v49 }
 0x13c   :  { %v866_v12 = vadd.f32 %v2683_v52, %v830_v0  ;;  %1331 = vmatmul.bf16.gmra.mxu1 %v1790_v17  ;;  %v236_v25 = vsub.f32 %v3645_v29, %v204_v3  ;;  %1420 = vmatmul.bf16.gmra.mxu2 %v1790_v17  ;;  %v2059_v35 = vpop.eup %2058  ;;  %v510_v63 = vmul.f32 %v2929_v11, %v509_v30  ;;  %v3648_v4 = vunpack.c.l.bf16 %v2377_v18  ;;  %vm3019_vm10 = vmor %vm751_vm5, %vm752_vm8 }
 0x13d   :  { %v747_v51 = vmul.f32 %v2971_v49, %v746_v48  ;;  %v2061_v47 = vpop.eup %2060  ;;  %v842_v10 = vadd.f32 %v2683_v52, %v806_v53  ;;  %v516_v31 = vmul.f32 %v2059_v35, %v2954_v41  ;;  %341 = vadd.xlane.f32.xlu0 %v297_v20  ;;  %v1872_v61 = vunpack.c.h.bf16 %v2945_v46 }
 0x13e   :  { %v1966_v26 = vpack.c.bf16 %v866_v12, %v865_v62  ;;  %v235_v21 = vsub.f32 %v3648_v4, %v203_v2  ;;  %v756_v13 = vmul.f32 %v2061_v47, %v2956_v19  ;;  %v3651_v0 = vunpack.c.l.bf16 %v2396_v39 }
 0x13f   :  { %v748_v28 = vmul.f32 0.5, %v747_v51  ;;  %2023 = vmatpush.bf16.msra.mxu3 %v2526_v7  ;;  %v1906_v23 = vpack.c.bf16 %v842_v10, %v841_v16  ;;  %v517_v3 = vmul.f32 %v2059_v35, %v516_v31  ;;  %v3026_v18 = vmul.f32 %v2145_v9, %v236_v25 }
 0x140   :  { %2001 = vst [vmem:[#allocation2 + $0x78] sm:$0xff] %v1966_v26   ;;  %v237_v43 = vsub.f32 %v3651_v0, %v205_v44  ;;  %v514_v48 = vsel %vm3008_vm9, %v2929_v11, %v510_v63  ;;  %v757_v16 = vmul.f32 %v2061_v47, %v756_v13  ;;  %v114_v59 = vmul.f32 %v1872_v61, %v2145_v9 }
 0x141   :  { %v749_v7 = vsub.f32 1.5, %v748_v28  ;;  %1989 = vst [vmem:[#allocation2 + $0x58] sm:$0xff] %v1906_v23   ;;  %v518_v15 = vmul.f32 0.5, %v517_v3  ;;  %v300_v17 = vmul.f32 %v3026_v18, %v3026_v18  ;;  %v3039_v6 = vmul.f32 %v2145_v9, %v235_v21 }
 0x142   :  { %v758_v30 = vmul.f32 0.5, %v757_v16  ;;  %vm761_vm11 = vweird.f32 %v2956_v19  ;;  %vm762_vm12 = vweird.f32 %v2061_v47  ;;  %vm522_vm13 = vweird.f32 %v2059_v35 }
 0x143   :  { %v750_v1 = vmul.f32 %v2971_v49, %v749_v7  ;;  %2024 = vmatpush.bf16.msra.mxu3 %v2552_v45  ;;  %v3048_v45 = vld [vmem:[%s3612_s0 + $0x58] sm:$0xff]   ;;  %v519_v50 = vsub.f32 1.5, %v518_v15  ;;  %347 = vadd.xlane.f32.xlu2 %v300_v17  ;;  %v299_v62 = vmul.f32 %v3039_v6, %v3039_v6  ;;  %v3053_v12 = vmul.f32 %v2145_v9, %v237_v43  ;;  %vm3059_vm15 = vmor %vm761_vm11, %vm762_vm12 }
 0x144   :  { %vm521_vm14 = vweird.f32 %v2954_v41  ;;  %v759_v19 = vsub.f32 1.5, %v758_v30  ;;  %v1875_v29 = vunpack.c.l.bf16 %v3048_v45 }
 0x145   :  { %v754_v11 = vsel %vm3019_vm10, %v2971_v49, %v750_v1  ;;  %v771_v49 = vmul.f32 %v514_v48, %v2360_v36  ;;  %v520_v2 = vmul.f32 %v2059_v35, %v519_v50  ;;  %167 = vadd.xlane.f32.xlu0 %v114_v59  ;;  %345 = vadd.xlane.f32.xlu1 %v299_v62  ;;  %v1876_v36 = vunpack.c.h.bf16 %v3048_v45  ;;  %vm523_vm0 = vmor %vm521_vm14, %vm522_vm13 }
 0x146   :  { %v795_v51 = vmul.f32 %v754_v11, %v2357_v38  ;;  %v760_v41 = vmul.f32 %v2061_v47, %v759_v19  ;;  %v301_v38 = vmul.f32 %v3053_v12, %v3053_v12 }
 0x147   :  { %2025 = vmatpush.bf16.msra.mxu3 %v2601_v14  ;;  %v3064_v25 = vld [vmem:[#allocation2 + $0x78] sm:$0xff]  ;;  %v524_v20 = vsel %vm523_vm0, %v2059_v35, %v520_v2  ;;  %v807_v14 = vmul.f32 %v2634_v37, %v771_v49  ;;  %v115_v35 = vmul.f32 %v1875_v29, %v2145_v9  ;;  %v116_v22 = vmul.f32 %v1876_v36, %v2145_v9 }
 0x148   :  { %v772_v44 = vmul.f32 %v524_v20, %v2384_v34  ;;  %v764_v26 = vsel %vm3059_vm15, %v2061_v47, %v760_v41  ;;  %v1791_v63 = vld [vmem:[#allocation2 + $0x58] sm:$0xff]  ;;  %1307 = vmatmul.bf16.gmra.mxu3 %v3064_v25  ;;  %v831_v28 = vmul.f32 %v2634_v37, %v795_v51  ;;  %v3654_v51 = vunpack.c.h.bf16 %v2396_v39 }
 0x149   :  { %v796_v10 = vmul.f32 %v764_v26, %v2381_v42  ;;  %v843_v42 = vadd.f32 %v2683_v52, %v807_v14 }
 0x14a   :  { %v808_v34 = vmul.f32 %v2634_v37, %v772_v44  ;;  %v867_v4 = vadd.f32 %v2683_v52, %v831_v28 }
 0x14b   :  { %2026 = vmatpush.bf16.msra.mxu3 %v2838_v33  ;;  %1247 = vmatmul.bf16.gmra.mxu0 %v1791_v63  ;;  %v832_v47 = vmul.f32 %v2634_v37, %v796_v10 }
 0x14c   :  { %1336 = vmatmul.bf16.gmra.mxu1 %v1791_v63  ;;  %349 = vadd.xlane.f32.xlu2 %v301_v38  ;;  %v844_v31 = vadd.f32 %v2683_v52, %v808_v34  ;;  %v3655_v34 = vunpack.c.l.bf16 %v2616_v55 }
 0x14d   :  { %1425 = vmatmul.bf16.gmra.mxu2 %v1791_v63  ;;  %v868_v21 = vadd.f32 %v2683_v52, %v832_v47  ;;  %169 = vadd.xlane.f32.xlu0 %v115_v35 }
 0x14e   :  { %171 = vadd.xlane.f32.xlu1 %v116_v22  ;;  %v1911_v7 = vpack.c.bf16 %v844_v31, %v843_v42 }
 0x14f   :  { %v1971_v33 = vpack.c.bf16 %v868_v21, %v867_v4 }
 0x150   :  { %1990 = vst [vmem:[#allocation2 + $0x18] sm:$0xff] %v1911_v7  }
 0x151   :  { %2002 = vst [vmem:[#allocation2 + $0x28] sm:$0xff] %v1971_v33  }
 0x157   :  { %v1792_v13 = vld [vmem:[#allocation2 + $0x18] sm:$0xff] }
 0x158   :  { %v3090_v23 = vld [vmem:[#allocation2 + $0x28] sm:$0xff] }
 0x159   :  { %1312 = vmatmul.bf16.gmra.mxu3 %v3090_v23 }
 0x15b   :  { %1252 = vmatmul.bf16.gmra.mxu0 %v1792_v13 }
 0x15c   :  { %1341 = vmatmul.bf16.gmra.mxu1 %v1792_v13 }
 0x15d   :  { %1430 = vmatmul.bf16.gmra.mxu2 %v1792_v13 }
 0x169   :  { %1386 = vmatmul.bf16.vlgmr.msrb.gmra.mxu3 %v2840_v60 }
 0x179   :  { %1391 = vmatmul.bf16.gmra.mxu3 %v2964_v58 }
 0x17b   :  { %v336_v40 = vpop.xlane.xlu2 %335 }
 0x17c   :  { %v390_v3 = vmul.f32 0.03125, %v336_v40 }
 0x17e   :  { %v422_v0 = vadd.f32 1e-06, %v390_v3 }
 0x180   :  { %2062 = vrsqrt.f32 %v422_v0  ;;  %vm541_vm1 = vweird.f32 %v422_v0 }
 0x184   :  { %v334_v43 = vpop.xlane.xlu1 %333 }
 0x185   :  { %v389_v1 = vmul.f32 0.03125, %v334_v43 }
 0x186   :  { %v2063_v48 = vpop.eup %2062 }
 0x187   :  { %v536_v16 = vmul.f32 %v2063_v48, %v422_v0  ;;  %v421_v15 = vadd.f32 1e-06, %v389_v1  ;;  %vm542_vm2 = vweird.f32 %v2063_v48  ;;  %v997_v1 = vld [vmem:[%s3616_s2] sm:$0x7] }
 0x188   :  { %vm543_vm3 = vmor %vm541_vm1, %vm542_vm2 }
 0x189   :  { %v537_v59 = vmul.f32 %v2063_v48, %v536_v16  ;;  %1396 = vmatmul.bf16.gmra.mxu3 %v3064_v25  ;;  %2064 = vrsqrt.f32 %v421_v15  ;;  %vm531_vm5 = vweird.f32 %v421_v15 }
 0x18b   :  { %v538_v17 = vmul.f32 0.5, %v537_v59 }
 0x18c   :  { %v160_v30 = vpop.xlane.xlu1 %159  ;;  %v340_v50 = vpop.xlane.xlu0 %339 }
 0x18d   :  { %v539_v11 = vsub.f32 1.5, %v538_v17  ;;  %v206_v62 = vmul.f32 0.03125, %v160_v30  ;;  %v392_v49 = vmul.f32 0.03125, %v340_v50 }
 0x18f   :  { %v2065_v19 = vpop.eup %2064  ;;  %v238_v2 = vsub.f32 %v3654_v51, %v206_v62  ;;  %v424_v53 = vadd.f32 1e-06, %v392_v49  ;;  %v540_v41 = vmul.f32 %v2063_v48, %v539_v11  ;;  %v3122_v11 = vperm.slane %v997_v1, 1 }
 0x190   :  { %v526_v20 = vmul.f32 %v2065_v19, %v421_v15  ;;  %vm532_vm4 = vweird.f32 %v2065_v19 }
 0x191   :  { %2066 = vrsqrt.f32 %v424_v53  ;;  %v3099_v38 = vmul.f32 %v2145_v9, %v238_v2  ;;  %v544_v26 = vsel %vm543_vm3, %v2063_v48, %v540_v41  ;;  %vm533_vm6 = vmor %vm531_vm5, %vm532_vm4  ;;  %vm561_vm7 = vweird.f32 %v424_v53 }
 0x192   :  { %v527_v14 = vmul.f32 %v2065_v19, %v526_v20  ;;  %v774_v22 = vmul.f32 %v544_v26, %v2580_v32 }
 0x193   :  { %v302_v44 = vmul.f32 %v3099_v38, %v3099_v38 }
 0x194   :  { %v528_v63 = vmul.f32 0.5, %v527_v14  ;;  %v162_v28 = vpop.xlane.xlu1 %161  ;;  %v810_v40 = vmul.f32 %v2634_v37, %v774_v22 }
 0x195   :  { %v207_v10 = vmul.f32 0.03125, %v162_v28  ;;  %351 = vadd.xlane.f32.xlu0 %v302_v44 }
 0x196   :  { %v529_v35 = vsub.f32 1.5, %v528_v63  ;;  %v846_v16 = vadd.f32 %v2683_v52, %v810_v40 }
 0x197   :  { %v2067_v39 = vpop.eup %2066  ;;  %v239_v47 = vsub.f32 %v3655_v34, %v207_v10  ;;  %v3142_v34 = vperm.slane %v997_v1, 2 }
 0x198   :  { %v530_v42 = vmul.f32 %v2065_v19, %v529_v35  ;;  %v556_v31 = vmul.f32 %v2067_v39, %v424_v53  ;;  %vm562_vm8 = vweird.f32 %v2067_v39 }
 0x199   :  { %1401 = vmatmul.bf16.gmra.mxu3 %v3090_v23  ;;  %v3108_v7 = vmul.f32 %v2145_v9, %v239_v47  ;;  %vm3126_vm9 = vmor %vm561_vm7, %vm562_vm8 }
 0x19a   :  { %v338_v4 = vpop.xlane.xlu2 %337  ;;  %v534_v33 = vsel %vm533_vm6, %v2065_v19, %v530_v42  ;;  %v557_v13 = vmul.f32 %v2067_v39, %v556_v31 }
 0x19b   :  { %v391_v21 = vmul.f32 0.03125, %v338_v4  ;;  %v773_v32 = vmul.f32 %v534_v33, %v2676_v54  ;;  %v303_v0 = vmul.f32 %v3108_v7, %v3108_v7  ;;  %v3120_v54 = vperm.slane %v997_v1, 0 }
 0x19c   :  { %v558_v43 = vmul.f32 0.5, %v557_v13 }
 0x19d   :  { %v423_v3 = vadd.f32 1e-06, %v391_v21  ;;  %v809_v48 = vmul.f32 %v2634_v37, %v773_v32  ;;  %353 = vadd.xlane.f32.xlu1 %v303_v0 }
 0x19e   :  { %v559_v59 = vsub.f32 1.5, %v558_v43 }
 0x19f   :  { %2068 = vrsqrt.f32 %v423_v3  ;;  %v845_v15 = vadd.f32 %v2683_v52, %v809_v48  ;;  %vm551_vm11 = vweird.f32 %v423_v3 }
 0x1a0   :  { %v560_v49 = vmul.f32 %v2067_v39, %v559_v59 }
 0x1a1   :  { %v1916_v30 = vpack.c.bf16 %v846_v16, %v845_v15 }
 0x1a2   :  { %v164_v17 = vpop.xlane.xlu2 %163  ;;  %v564_v55 = vsel %vm3126_vm9, %v2067_v39, %v560_v49 }
 0x1a3   :  { %v208_v50 = vmul.f32 0.03125, %v164_v17  ;;  %1991 = vst [vmem:[#allocation2 + $0x50] sm:$0xff] %v1916_v30   ;;  %v776_v39 = vmul.f32 %v564_v55, %v2735_v56 }
 0x1a5   :  { %v2069_v62 = vpop.eup %2068  ;;  %v240_v19 = vsub.f32 %v1868_v8, %v208_v50  ;;  %v812_v43 = vmul.f32 %v2634_v37, %v776_v39 }
 0x1a6   :  { %v1238_v51 = vpop.f32.mrf.mxu0  ;;  %v546_v41 = vmul.f32 %v2069_v62, %v423_v3  ;;  %v1327_v14 = vpop.f32.mrf.mxu1  ;;  %vm552_vm10 = vweird.f32 %v2069_v62 }
 0x1a7   :  { %v1239_v20 = vadd.f32 %v1238_v51, %v3120_v54  ;;  %v344_v44 = vpop.xlane.xlu1 %343  ;;  %v3132_v53 = vmul.f32 %v2145_v9, %v240_v19  ;;  %v1328_v26 = vadd.f32 %v1327_v14, %v3122_v11  ;;  %vm553_vm12 = vmor %vm551_vm11, %vm552_vm10  ;;  %v848_v19 = vadd.f32 %v2683_v52, %v812_v43 }
 0x1a8   :  { %v547_v63 = vmul.f32 %v2069_v62, %v546_v41  ;;  %v394_v28 = vmul.f32 0.03125, %v344_v44 }
 0x1a9   :  { %v304_v8 = vmul.f32 %v3132_v53, %v3132_v53  ;;  %v1496_v10 = vpack.c.bf16 %v1328_v26, %v1239_v20  ;;  %1475 = vmatmul.bf16.vlgmr.msra.gmra.mxu3 %v2840_v60  ;;  %v3147_v47 = vpop.f32.mrf.mxu3 }
 0x1aa   :  { %v548_v35 = vmul.f32 0.5, %v547_v63  ;;  %v3139_v22 = vadd.f32 1e-06, %v394_v28  ;;  %v1793_v31 = vld [vmem:[#allocation2 + $0x50] sm:$0xff] }
 0x1ab   :  { %355 = vadd.xlane.f32.xlu2 %v304_v8  ;;  %1560 = vst [vmem:[%s3617_s5] sm:$0xff] %v1496_v10  ;;  %1257 = vmatmul.bf16.gmra.mxu0 %v1793_v31 }
 0x1ac   :  { %v549_v42 = vsub.f32 1.5, %v548_v35  ;;  %2070 = vrsqrt.f32 %v3139_v22  ;;  %1346 = vmatmul.bf16.gmra.mxu1 %v1793_v31  ;;  %1435 = vmatmul.bf16.gmra.mxu2 %v1793_v31  ;;  %vm581_vm13 = vweird.f32 %v3139_v22 }
 0x1ad   :  { %v166_v60 = vpop.xlane.xlu2 %165 }
 0x1ae   :  { %v1416_v4 = vpop.f32.mrf.mxu2  ;;  %v1240_v21 = vpop.f32.mrf.mxu0  ;;  %v550_v33 = vmul.f32 %v2069_v62, %v549_v42  ;;  %v209_v0 = vmul.f32 0.03125, %v166_v60 }
 0x1af   :  { %v1417_v13 = vadd.f32 %v1416_v4, %v3142_v34  ;;  %v1241_v40 = vadd.f32 %v1240_v21, %v3120_v54  ;;  %v1329_v32 = vpop.f32.mrf.mxu1 }
 0x1b0   :  { %v1330_v56 = vadd.f32 %v1329_v32, %v3122_v11  ;;  %v554_v48 = vsel %vm553_vm12, %v2069_v62, %v550_v33  ;;  %v342_v1 = vpop.xlane.xlu0 %341  ;;  %v241_v15 = vsub.f32 %v1871_v24, %v209_v0 }
 0x1b1   :  { %v1497_v16 = vpack.c.bf16 %v1417_v13, %v1417_v13  ;;  %v775_v3 = vmul.f32 %v554_v48, %v2797_v27  ;;  %v393_v59 = vmul.f32 0.03125, %v342_v1  ;;  %v3171_v27 = vpop.f32.mrf.mxu3 }
 0x1b2   :  { %v1498_v17 = vpack.c.bf16 %v1330_v56, %v1241_v40  ;;  %v3158_v30 = vpop.eup %2070  ;;  %v3174_v24 = vmul.f32 %v2145_v9, %v241_v15 }
 0x1b3   :  { %1561 = vst [vmem:[%s3617_s5 + $0x8] sm:$0xf] %v1497_v16  ;;  %v811_v50 = vmul.f32 %v2634_v37, %v775_v3  ;;  %v576_v62 = vmul.f32 %v3158_v30, %v3139_v22  ;;  %v3166_v49 = vadd.f32 1e-06, %v393_v59  ;;  %vm582_vm14 = vweird.f32 %v3158_v30 }
 0x1b4   :  { %1562 = vst [vmem:[%s3617_s5 + $0xc] sm:$0xff] %v1498_v17  ;;  %v305_v20 = vmul.f32 %v3174_v24, %v3174_v24  ;;  %vm3203_vm15 = vmor %vm581_vm13, %vm582_vm14 }
 0x1b5   :  { %v847_v51 = vadd.f32 %v2683_v52, %v811_v50  ;;  %v577_v37 = vmul.f32 %v3158_v30, %v576_v62  ;;  %2072 = vrsqrt.f32 %v3166_v49  ;;  %vm571_vm1 = vweird.f32 %v3166_v49 }
 0x1b6   :  { %v1418_v2 = vpop.f32.mrf.mxu2  ;;  %v348_v41 = vpop.xlane.xlu2 %347  ;;  %357 = vadd.xlane.f32.xlu0 %v305_v20 }
 0x1b7   :  { %v1419_v14 = vadd.f32 %v1418_v2, %v3142_v34  ;;  %v1921_v44 = vpack.c.bf16 %v848_v19, %v847_v51  ;;  %v578_v26 = vmul.f32 0.5, %v577_v37  ;;  %v396_v63 = vmul.f32 0.03125, %v348_v41 }
 0x1b8   :  { %v1243_v28 = vpop.f32.mrf.mxu0  ;;  %v168_v52 = vpop.xlane.xlu0 %167 }
 0x1b9   :  { %v1332_v55 = vpop.f32.mrf.mxu1  ;;  %v1499_v8 = vpack.c.bf16 %v1419_v14, %v1419_v14  ;;  %v346_v10 = vpop.xlane.xlu1 %345  ;;  %v1244_v35 = vadd.f32 %v1243_v28, %v3120_v54  ;;  %1992 = vst [vmem:[#allocation2 + $0x68] sm:$0xff] %v1921_v44   ;;  %v579_v42 = vsub.f32 1.5, %v578_v26  ;;  %v3187_v31 = vadd.f32 1e-06, %v396_v63  ;;  %1480 = vmatmul.bf16.gmra.mxu3 %v2964_v58 }
 0x1ba   :  { %v1333_v39 = vadd.f32 %v1332_v55, %v3122_v11  ;;  %v210_v4 = vmul.f32 0.03125, %v168_v52  ;;  %v395_v21 = vmul.f32 0.03125, %v346_v10  ;;  %v3197_v32 = vpop.f32.mrf.mxu3 }
 0x1bb   :  { %1563 = vst [vmem:[%s3617_s5 + $0x14] sm:$0xf] %v1499_v8  ;;  %v2073_v60 = vpop.eup %2072  ;;  %v580_v13 = vmul.f32 %v3158_v30, %v579_v42  ;;  %2074 = vrsqrt.f32 %v3187_v31  ;;  %vm601_vm3 = vweird.f32 %v3187_v31 }
 0x1bc   :  { %v1500_v33 = vpack.c.bf16 %v1333_v39, %v1244_v35  ;;  %v242_v40 = vsub.f32 %v1872_v61, %v210_v4  ;;  %v566_v58 = vmul.f32 %v2073_v60, %v3166_v49  ;;  %v3208_v56 = vadd.f32 1e-06, %v395_v21 }
 0x1bd   :  { %v584_v22 = vsel %vm3203_vm15, %v3158_v30, %v580_v13  ;;  %vm572_vm0 = vweird.f32 %v2073_v60 }
 0x1be   :  { %1564 = vst [vmem:[%s3617_s5 + $0x18] sm:$0xff] %v1500_v33  ;;  %v3214_v46 = vmul.f32 %v2145_v9, %v242_v40  ;;  %v567_v61 = vmul.f32 %v2073_v60, %v566_v58  ;;  %2076 = vrsqrt.f32 %v3208_v56  ;;  %v778_v41 = vmul.f32 %v584_v22, %v2919_v57  ;;  %vm573_vm2 = vmor %vm571_vm1, %vm572_vm0 }
 0x1bf   :  { %v1421_v43 = vpop.f32.mrf.mxu2  ;;  %vm591_vm7 = vweird.f32 %v3208_v56 }
 0x1c0   :  { %v306_v48 = vmul.f32 %v3214_v46, %v3214_v46  ;;  %v1422_v1 = vadd.f32 %v1421_v43, %v3142_v34  ;;  %v1245_v16 = vpop.f32.mrf.mxu0  ;;  %v568_v15 = vmul.f32 0.5, %v567_v61  ;;  %v170_v59 = vpop.xlane.xlu0 %169  ;;  %v1794_v50 = vld [vmem:[#allocation2 + $0x68] sm:$0xff] }
 0x1c1   :  { %v1334_v3 = vpop.f32.mrf.mxu1  ;;  %v172_v17 = vpop.xlane.xlu1 %171  ;;  %v1246_v62 = vadd.f32 %v1245_v16, %v3120_v54  ;;  %v211_v37 = vmul.f32 0.03125, %v170_v59  ;;  %1262 = vmatmul.bf16.gmra.mxu0 %v1794_v50  ;;  %1351 = vmatmul.bf16.gmra.mxu1 %v1794_v50  ;;  %v3279_v16 = vld [vmem:[%s3614_s4] ss:$0 sm:$0xff] }
 0x1c2   :  { %v1335_v19 = vadd.f32 %v1334_v3, %v3122_v11  ;;  %v3225_v51 = vpop.eup %2074  ;;  %359 = vadd.xlane.f32.xlu1 %v306_v48  ;;  %v1501_v30 = vpack.c.bf16 %v1422_v1, %v1422_v1  ;;  %v212_v2 = vmul.f32 0.03125, %v172_v17  ;;  %v569_v20 = vsub.f32 1.5, %v568_v15  ;;  %1440 = vmatmul.bf16.gmra.mxu2 %v1794_v50  ;;  %v3237_v63 = vpop.f32.mrf.mxu3 }
 0x1c3   :  { %v596_v14 = vmul.f32 %v3225_v51, %v3187_v31  ;;  %v243_v44 = vsub.f32 %v1875_v29, %v211_v37  ;;  %vm602_vm4 = vweird.f32 %v3225_v51 }
 0x1c4   :  { %1565 = vst [vmem:[%s3617_s5 + $0x20] sm:$0xf] %v1501_v30  ;;  %v244_v26 = vsub.f32 %v1876_v36, %v212_v2  ;;  %v2077_v57 = vpop.eup %2076  ;;  %v570_v28 = vmul.f32 %v2073_v60, %v569_v20  ;;  %v1502_v52 = vpack.c.bf16 %v1335_v19, %v1246_v62  ;;  %v3252_v36 = vld [vmem:[%s3613_s3] ss:$0 sm:$0xff]  ;;  %vm3270_vm5 = vmor %vm601_vm3, %vm602_vm4 }
 0x1c5   :  { %v597_v55 = vmul.f32 %v3225_v51, %v596_v14  ;;  %v586_v29 = vmul.f32 %v2077_v57, %v3208_v56  ;;  %v3244_v8 = vmul.f32 %v2145_v9, %v243_v44  ;;  %v814_v49 = vmul.f32 %v3252_v36, %v778_v41 }
 0x1c6   :  { %v3247_v45 = vmul.f32 %v2145_v9, %v244_v26  ;;  %v574_v10 = vsel %vm573_vm2, %v2073_v60, %v570_v28  ;;  %1566 = vst [vmem:[%s3617_s5 + $0x24] sm:$0xff] %v1502_v52  ;;  %vm592_vm6 = vweird.f32 %v2077_v57 }
 0x1c7   :  { %v598_v35 = vmul.f32 0.5, %v597_v55  ;;  %v1423_v39 = vpop.f32.mrf.mxu2  ;;  %v777_v42 = vmul.f32 %v574_v10, %v2990_v5  ;;  %v587_v9 = vmul.f32 %v2077_v57, %v586_v29  ;;  %v307_v4 = vmul.f32 %v3244_v8, %v3244_v8  ;;  %vm593_vm8 = vmor %vm591_vm7, %vm592_vm6 }
 0x1c8   :  { %v1424_v21 = vadd.f32 %v1423_v39, %v3142_v34  ;;  %v1248_v33 = vpop.f32.mrf.mxu0  ;;  %v308_v60 = vmul.f32 %v3247_v45, %v3247_v45  ;;  %v850_v31 = vadd.f32 %v3279_v16, %v814_v49 }
 0x1c9   :  { %v1337_v13 = vpop.f32.mrf.mxu1  ;;  %v599_v40 = vsub.f32 1.5, %v598_v35  ;;  %v1249_v0 = vadd.f32 %v1248_v33, %v3120_v54  ;;  %v813_v61 = vmul.f32 %v3252_v36, %v777_v42  ;;  %v588_v43 = vmul.f32 0.5, %v587_v9  ;;  %361 = vadd.xlane.f32.xlu2 %v307_v4  ;;  %1485 = vmatmul.bf16.gmra.mxu3 %v3064_v25 }
 0x1ca   :  { %v1338_v58 = vadd.f32 %v1337_v13, %v3122_v11  ;;  %v1503_v22 = vpack.c.bf16 %v1424_v21, %v1424_v21  ;;  %363 = vadd.xlane.f32.xlu0 %v308_v60 }
 0x1cb   :  { %v600_v48 = vmul.f32 %v3225_v51, %v599_v40  ;;  %v849_v3 = vadd.f32 %v3279_v16, %v813_v61  ;;  %v589_v15 = vsub.f32 1.5, %v588_v43  ;;  %v3286_v59 = vpop.f32.mrf.mxu3 }
 0x1cc   :  { %v1504_v1 = vpack.c.bf16 %v1338_v58, %v1249_v0  ;;  %1567 = vst [vmem:[%s3617_s5 + $0x2c] sm:$0xf] %v1503_v22 }
 0x1cd   :  { %v604_v25 = vsel %vm3270_vm5, %v3225_v51, %v600_v48  ;;  %v1926_v17 = vpack.c.bf16 %v850_v31, %v849_v3  ;;  %v590_v62 = vmul.f32 %v2077_v57, %v589_v15  ;;  %v1299_v3 = vadd.f32 %v3147_v47, %v3120_v54 }
 0x1ce   :  { %1568 = vst [vmem:[%s3617_s5 + $0x30] sm:$0xff] %v1504_v1  ;;  %v780_v50 = vmul.f32 %v604_v25, %v3026_v18 }
 0x1cf   :  { %1993 = vst [vmem:[#allocation2 + $0x8] sm:$0xff] %v1926_v17   ;;  %v594_v37 = vsel %vm593_vm8, %v2077_v57, %v590_v62  ;;  %v350_v17 = vpop.xlane.xlu2 %349 }
 0x1d0   :  { %v1426_v19 = vpop.f32.mrf.mxu2  ;;  %v1250_v2 = vpop.f32.mrf.mxu0  ;;  %v816_v51 = vmul.f32 %v3252_v36, %v780_v50  ;;  %v779_v20 = vmul.f32 %v594_v37, %v3039_v6  ;;  %v397_v50 = vmul.f32 0.03125, %v350_v17 }
 0x1d1   :  { %v1427_v30 = vadd.f32 %v1426_v19, %v3142_v34  ;;  %v1339_v41 = vpop.f32.mrf.mxu1  ;;  %v1251_v14 = vadd.f32 %v1250_v2, %v3120_v54  ;;  %v1301_v19 = vadd.f32 %v3171_v27, %v3120_v54 }
 0x1d2   :  { %v1340_v44 = vadd.f32 %v1339_v41, %v3122_v11  ;;  %v815_v26 = vmul.f32 %v3252_v36, %v779_v20  ;;  %v852_v28 = vadd.f32 %v3279_v16, %v816_v51  ;;  %v429_v2 = vadd.f32 1e-06, %v397_v50 }
 0x1d3   :  { %v1505_v18 = vpack.c.bf16 %v1427_v30, %v1427_v30  ;;  %v3305_v57 = vpop.f32.mrf.mxu3  ;;  %v1304_v41 = vadd.f32 %v3197_v32, %v3120_v54 }
 0x1d4   :  { %v1506_v56 = vpack.c.bf16 %v1340_v44, %v1251_v14  ;;  %v851_v55 = vadd.f32 %v3279_v16, %v815_v26  ;;  %2078 = vrsqrt.f32 %v429_v2  ;;  %vm611_vm9 = vweird.f32 %v429_v2 }
 0x1d5   :  { %1569 = vst [vmem:[%s3617_s5 + $0x38] sm:$0xf] %v1505_v18  ;;  %v1306_v18 = vadd.f32 %v3237_v63, %v3120_v54 }
 0x1d6   :  { %1570 = vst [vmem:[%s3617_s5 + $0x3c] sm:$0xff] %v1506_v56  ;;  %v1931_v6 = vpack.c.bf16 %v852_v28, %v851_v55  ;;  %v1795_v52 = vld [vmem:[#allocation2 + $0x8] sm:$0xff] }
 0x1d7   :  { %1267 = vmatmul.bf16.gmra.mxu0 %v1795_v52  ;;  %1356 = vmatmul.bf16.gmra.mxu1 %v1795_v52 }
 0x1d8   :  { %v1428_v29 = vpop.f32.mrf.mxu2  ;;  %v1253_v10 = vpop.f32.mrf.mxu0  ;;  %1994 = vst [vmem:[#allocation2 + $0x48] sm:$0xff] %v1931_v6   ;;  %1445 = vmatmul.bf16.gmra.mxu2 %v1795_v52 }
 0x1d9   :  { %v1429_v49 = vadd.f32 %v1428_v29, %v3142_v34  ;;  %v1254_v35 = vadd.f32 %v1253_v10, %v3120_v54  ;;  %v1342_v39 = vpop.f32.mrf.mxu1  ;;  %1490 = vmatmul.bf16.gmra.mxu3 %v3090_v23 }
 0x1da   :  { %v1343_v9 = vadd.f32 %v1342_v39, %v3122_v11  ;;  %v2079_v27 = vpop.eup %2078 }
 0x1db   :  { %v1507_v42 = vpack.c.bf16 %v1429_v49, %v1429_v49  ;;  %v606_v44 = vmul.f32 %v2079_v27, %v429_v2  ;;  %v1309_v49 = vadd.f32 %v3286_v59, %v3120_v54  ;;  %vm612_vm10 = vweird.f32 %v2079_v27 }
 0x1dc   :  { %v1508_v4 = vpack.c.bf16 %v1343_v9, %v1254_v35  ;;  %v3322_v21 = vpop.f32.mrf.mxu3  ;;  %v1311_v59 = vadd.f32 %v3305_v57, %v3120_v54  ;;  %vm613_vm11 = vmor %vm611_vm9, %vm612_vm10 }
 0x1dd   :  { %1571 = vst [vmem:[%s3617_s5 + $0x44] sm:$0xf] %v1507_v42  ;;  %v607_v28 = vmul.f32 %v2079_v27, %v606_v44  ;;  %v1314_v57 = vadd.f32 %v3322_v21, %v3120_v54 }
 0x1de   :  { %1572 = vst [vmem:[%s3617_s5 + $0x48] sm:$0xff] %v1508_v4 }
 0x1df   :  { %v1796_v5 = vld [vmem:[#allocation2 + $0x48] sm:$0xff]  ;;  %v608_v29 = vmul.f32 0.5, %v607_v28 }
 0x1e0   :  { %v1431_v33 = vpop.f32.mrf.mxu2  ;;  %v1255_v40 = vpop.f32.mrf.mxu0 }
 0x1e1   :  { %v1432_v13 = vadd.f32 %v1431_v33, %v3142_v34  ;;  %v1256_v60 = vadd.f32 %v1255_v40, %v3120_v54  ;;  %v1344_v0 = vpop.f32.mrf.mxu1  ;;  %v609_v35 = vsub.f32 1.5, %v608_v29 }
 0x1e2   :  { %v1345_v23 = vadd.f32 %v1344_v0, %v3122_v11 }
 0x1e3   :  { %v1509_v58 = vpack.c.bf16 %v1432_v13, %v1432_v13  ;;  %v610_v13 = vmul.f32 %v2079_v27, %v609_v35 }
 0x1e4   :  { %v1510_v61 = vpack.c.bf16 %v1345_v23, %v1256_v60  ;;  %v3333_v43 = vpop.f32.mrf.mxu3 }
 0x1e5   :  { %1573 = vst [vmem:[%s3617_s5 + $0x50] sm:$0xf] %v1509_v58  ;;  %v614_v23 = vsel %vm613_vm11, %v2079_v27, %v610_v13  ;;  %v1316_v27 = vadd.f32 %v3333_v43, %v3120_v54 }
 0x1e6   :  { %1574 = vst [vmem:[%s3617_s5 + $0x54] sm:$0xff] %v1510_v61 }
 0x1e7   :  { %1272 = vmatmul.bf16.gmra.mxu0 %v1796_v5  ;;  %1361 = vmatmul.bf16.gmra.mxu1 %v1796_v5 }
 0x1e8   :  { %v1433_v22 = vpop.f32.mrf.mxu2  ;;  %1450 = vmatmul.bf16.gmra.mxu2 %v1796_v5 }
 0x1e9   :  { %v1434_v48 = vadd.f32 %v1433_v22, %v3142_v34 }
 0x1eb   :  { %v1511_v1 = vpack.c.bf16 %v1434_v48, %v1434_v48  ;;  %v781_v48 = vmul.f32 %v614_v23, %v3053_v12 }
 0x1ec   :  { %v1387_v31 = vpop.f32.mrf.mxu3 }
 0x1ed   :  { %1575 = vst [vmem:[%s3617_s5 + $0x5c] sm:$0xf] %v1511_v1  ;;  %v1388_v15 = vadd.f32 %v1387_v31, %v3122_v11 }
 0x1ef   :  { %v1544_v25 = vpack.c.bf16 %v1388_v15, %v1299_v3 }
 0x1f1   :  { %1608 = vst [vmem:[%s3617_s5 + $0x120] sm:$0xff] %v1544_v25 }
 0x1f4   :  { %v1389_v62 = vpop.f32.mrf.mxu3 }
 0x1f5   :  { %v1390_v37 = vadd.f32 %v1389_v62, %v3122_v11 }
 0x1f7   :  { %v1546_v30 = vpack.c.bf16 %v1390_v37, %v1301_v19  ;;  %v817_v37 = vmul.f32 %v3252_v36, %v781_v48 }
 0x1f9   :  { %1610 = vst [vmem:[%s3617_s5 + $0x12c] sm:$0xff] %v1546_v30 }
 0x1fc   :  { %v1392_v47 = vpop.f32.mrf.mxu3 }
 0x1fd   :  { %v1393_v51 = vadd.f32 %v1392_v47, %v3122_v11 }
 0x1ff   :  { %v1548_v20 = vpack.c.bf16 %v1393_v51, %v1304_v41  ;;  %v853_v41 = vadd.f32 %v3279_v16, %v817_v37 }
 0x201   :  { %1612 = vst [vmem:[%s3617_s5 + $0x138] sm:$0xff] %v1548_v20 }
 0x204   :  { %v1394_v14 = vpop.f32.mrf.mxu3 }
 0x205   :  { %v1395_v26 = vadd.f32 %v1394_v14, %v3122_v11 }
 0x207   :  { %v1550_v56 = vpack.c.bf16 %v1395_v26, %v1306_v18 }
 0x208   :  { %v352_v32 = vpop.xlane.xlu0 %351 }
 0x209   :  { %1614 = vst [vmem:[%s3617_s5 + $0x144] sm:$0xff] %v1550_v56  ;;  %v398_v55 = vmul.f32 0.03125, %v352_v32 }
 0x20b   :  { %v430_v6 = vadd.f32 1e-06, %v398_v55 }
 0x20c   :  { %v1397_v52 = vpop.f32.mrf.mxu3 }
 0x20d   :  { %v1398_v10 = vadd.f32 %v1397_v52, %v3122_v11  ;;  %2080 = vrsqrt.f32 %v430_v6  ;;  %vm621_vm13 = vweird.f32 %v430_v6 }
 0x20f   :  { %v1552_v63 = vpack.c.bf16 %v1398_v10, %v1309_v49 }
 0x210   :  { %v354_v39 = vpop.xlane.xlu1 %353 }
 0x211   :  { %1616 = vst [vmem:[%s3617_s5 + $0x150] sm:$0xff] %v1552_v63  ;;  %v399_v42 = vmul.f32 0.03125, %v354_v39 }
 0x213   :  { %v2081_v9 = vpop.eup %2080  ;;  %v431_v4 = vadd.f32 1e-06, %v399_v42 }
 0x214   :  { %v1399_v33 = vpop.f32.mrf.mxu3  ;;  %v616_v40 = vmul.f32 %v2081_v9, %v430_v6  ;;  %vm622_vm12 = vweird.f32 %v2081_v9 }
 0x215   :  { %v1400_v60 = vadd.f32 %v1399_v33, %v3122_v11  ;;  %2082 = vrsqrt.f32 %v431_v4  ;;  %vm623_vm14 = vmor %vm621_vm13, %vm622_vm12  ;;  %vm631_vm15 = vweird.f32 %v431_v4 }
 0x216   :  { %v617_v0 = vmul.f32 %v2081_v9, %v616_v40 }
 0x217   :  { %v1554_v58 = vpack.c.bf16 %v1400_v60, %v1311_v59 }
 0x218   :  { %v618_v61 = vmul.f32 0.5, %v617_v0 }
 0x219   :  { %1618 = vst [vmem:[%s3617_s5 + $0x15c] sm:$0xff] %v1554_v58 }
 0x21a   :  { %v619_v5 = vsub.f32 1.5, %v618_v61 }
 0x21b   :  { %v2083_v22 = vpop.eup %2082 }
 0x21c   :  { %v1402_v1 = vpop.f32.mrf.mxu3  ;;  %v620_v31 = vmul.f32 %v2081_v9, %v619_v5  ;;  %v626_v3 = vmul.f32 %v2083_v22, %v431_v4  ;;  %vm632_vm0 = vweird.f32 %v2083_v22 }
 0x21d   :  { %v1403_v25 = vadd.f32 %v1402_v1, %v3122_v11  ;;  %vm633_vm1 = vmor %vm631_vm15, %vm632_vm0 }
 0x21e   :  { %v356_v15 = vpop.xlane.xlu2 %355  ;;  %v624_v50 = vsel %vm623_vm14, %v2081_v9, %v620_v31  ;;  %v627_v62 = vmul.f32 %v2083_v22, %v626_v3 }
 0x21f   :  { %v400_v17 = vmul.f32 0.03125, %v356_v15  ;;  %v1556_v19 = vpack.c.bf16 %v1403_v25, %v1314_v57  ;;  %v782_v30 = vmul.f32 %v624_v50, %v3099_v38 }
 0x220   :  { %v628_v2 = vmul.f32 0.5, %v627_v62 }
 0x221   :  { %v432_v12 = vadd.f32 1e-06, %v400_v17  ;;  %1620 = vst [vmem:[%s3617_s5 + $0x168] sm:$0xff] %v1556_v19  ;;  %v818_v21 = vmul.f32 %v3252_v36, %v782_v30 }
 0x222   :  { %v629_v47 = vsub.f32 1.5, %v628_v2 }
 0x223   :  { %2084 = vrsqrt.f32 %v432_v12  ;;  %v854_v51 = vadd.f32 %v3279_v16, %v818_v21  ;;  %vm641_vm3 = vweird.f32 %v432_v12 }
 0x224   :  { %v1404_v20 = vpop.f32.mrf.mxu3  ;;  %v630_v44 = vmul.f32 %v2083_v22, %v629_v47 }
 0x225   :  { %v1405_v38 = vadd.f32 %v1404_v20, %v3122_v11  ;;  %v1936_v14 = vpack.c.bf16 %v854_v51, %v853_v41 }
 0x226   :  { %v634_v55 = vsel %vm633_vm1, %v2083_v22, %v630_v44 }
 0x227   :  { %v1558_v18 = vpack.c.bf16 %v1405_v38, %v1316_v27  ;;  %1995 = vst [vmem:[#allocation2 + $0x40] sm:$0xff] %v1936_v14   ;;  %v783_v42 = vmul.f32 %v634_v55, %v3108_v7 }
 0x228   :  { %v1258_v32 = vpop.f32.mrf.mxu0 }
 0x229   :  { %v2085_v26 = vpop.eup %2084  ;;  %1622 = vst [vmem:[%s3617_s5 + $0x174] sm:$0xff] %v1558_v18  ;;  %v358_v28 = vpop.xlane.xlu0 %357  ;;  %v1259_v52 = vadd.f32 %v1258_v32, %v3120_v54  ;;  %v819_v0 = vmul.f32 %v3252_v36, %v783_v42 }
 0x22a   :  { %v636_v56 = vmul.f32 %v2085_v26, %v432_v12  ;;  %v401_v43 = vmul.f32 0.03125, %v358_v28  ;;  %v1347_v29 = vpop.f32.mrf.mxu1  ;;  %vm642_vm2 = vweird.f32 %v2085_v26 }
 0x22b   :  { %v1348_v49 = vadd.f32 %v1347_v29, %v3122_v11  ;;  %vm643_vm4 = vmor %vm641_vm3, %vm642_vm2  ;;  %v855_v19 = vadd.f32 %v3279_v16, %v819_v0 }
 0x22c   :  { %v637_v6 = vmul.f32 %v2085_v26, %v636_v56  ;;  %v1476_v10 = vpop.f32.mrf.mxu3  ;;  %v3395_v35 = vadd.f32 1e-06, %v401_v43 }
 0x22d   :  { %v1477_v39 = vadd.f32 %v1476_v10, %v3142_v34  ;;  %v1512_v9 = vpack.c.bf16 %v1348_v49, %v1259_v52 }
 0x22e   :  { %v638_v63 = vmul.f32 0.5, %v637_v6  ;;  %2086 = vrsqrt.f32 %v3395_v35  ;;  %v1797_v13 = vld [vmem:[#allocation2 + $0x40] sm:$0xff]  ;;  %vm651_vm5 = vweird.f32 %v3395_v35 }
 0x22f   :  { %v1545_v33 = vpack.c.bf16 %v1477_v39, %v1477_v39  ;;  %1576 = vst [vmem:[%s3617_s5 + $0x60] sm:$0xff] %v1512_v9  ;;  %v1436_v40 = vpop.f32.mrf.mxu2  ;;  %1277 = vmatmul.bf16.gmra.mxu0 %v1797_v13  ;;  %1366 = vmatmul.bf16.gmra.mxu1 %v1797_v13 }
 0x230   :  { %v639_v4 = vsub.f32 1.5, %v638_v63  ;;  %v1437_v7 = vadd.f32 %v1436_v40, %v3142_v34  ;;  %1455 = vmatmul.bf16.gmra.mxu2 %v1797_v13  ;;  %v1260_v60 = vpop.f32.mrf.mxu0 }
 0x231   :  { %1609 = vst [vmem:[%s3617_s5 + $0x128] sm:$0xf] %v1545_v33  ;;  %v1261_v61 = vadd.f32 %v1260_v60, %v3120_v54 }
 0x232   :  { %v640_v59 = vmul.f32 %v2085_v26, %v639_v4  ;;  %v1349_v5 = vpop.f32.mrf.mxu1  ;;  %v1513_v57 = vpack.c.bf16 %v1437_v7, %v1437_v7 }
 0x233   :  { %v1350_v1 = vadd.f32 %v1349_v5, %v3122_v11 }
 0x234   :  { %v644_v58 = vsel %vm643_vm4, %v2085_v26, %v640_v59  ;;  %v1478_v31 = vpop.f32.mrf.mxu3  ;;  %v2087_v3 = vpop.eup %2086  ;;  %1577 = vst [vmem:[%s3617_s5 + $0x68] sm:$0xf] %v1513_v57 }
 0x235   :  { %v360_v23 = vpop.xlane.xlu1 %359  ;;  %v784_v22 = vmul.f32 %v644_v58, %v3132_v53  ;;  %v1479_v15 = vadd.f32 %v1478_v31, %v3142_v34  ;;  %v646_v17 = vmul.f32 %v2087_v3, %v3395_v35  ;;  %v1514_v62 = vpack.c.bf16 %v1350_v1, %v1261_v61 }
 0x236   :  { %v402_v48 = vmul.f32 0.03125, %v360_v23  ;;  %vm652_vm6 = vweird.f32 %v2087_v3 }
 0x237   :  { %v820_v25 = vmul.f32 %v3252_v36, %v784_v22  ;;  %v1547_v53 = vpack.c.bf16 %v1479_v15, %v1479_v15  ;;  %v647_v30 = vmul.f32 %v2087_v3, %v646_v17  ;;  %1578 = vst [vmem:[%s3617_s5 + $0x6c] sm:$0xff] %v1514_v62  ;;  %v1438_v12 = vpop.f32.mrf.mxu2  ;;  %vm653_vm7 = vmor %vm651_vm5, %vm652_vm6 }
 0x238   :  { %v3414_v50 = vadd.f32 1e-06, %v402_v48  ;;  %v1439_v47 = vadd.f32 %v1438_v12, %v3142_v34 }
 0x239   :  { %v856_v37 = vadd.f32 %v3279_v16, %v820_v25  ;;  %v648_v21 = vmul.f32 0.5, %v647_v30  ;;  %1611 = vst [vmem:[%s3617_s5 + $0x134] sm:$0xf] %v1547_v53 }
 0x23a   :  { %2088 = vrsqrt.f32 %v3414_v50  ;;  %v1515_v27 = vpack.c.bf16 %v1439_v47, %v1439_v47  ;;  %vm661_vm9 = vweird.f32 %v3414_v50 }
 0x23b   :  { %v1941_v2 = vpack.c.bf16 %v856_v37, %v855_v19  ;;  %v649_v51 = vsub.f32 1.5, %v648_v21 }
 0x23c   :  { %v362_v41 = vpop.xlane.xlu2 %361  ;;  %v1481_v14 = vpop.f32.mrf.mxu3  ;;  %1579 = vst [vmem:[%s3617_s5 + $0x74] sm:$0xf] %v1515_v27 }
 0x23d   :  { %1996 = vst [vmem:[#allocation2 + $0x20] sm:$0xff] %v1941_v2   ;;  %v403_v20 = vmul.f32 0.03125, %v362_v41  ;;  %v364_v38 = vpop.xlane.xlu0 %363  ;;  %v650_v26 = vmul.f32 %v2087_v3, %v649_v51  ;;  %v1482_v55 = vadd.f32 %v1481_v14, %v3142_v34 }
 0x23e   :  { %v404_v44 = vmul.f32 0.03125, %v364_v38  ;;  %v1263_v28 = vpop.f32.mrf.mxu0  ;;  %v1352_v32 = vpop.f32.mrf.mxu1 }
 0x23f   :  { %v3430_v56 = vadd.f32 1e-06, %v403_v20  ;;  %v1264_v52 = vadd.f32 %v1263_v28, %v3120_v54  ;;  %v1353_v29 = vadd.f32 %v1352_v32, %v3122_v11  ;;  %v654_v10 = vsel %vm653_vm7, %v2087_v3, %v650_v26 }
 0x240   :  { %v2089_v18 = vpop.eup %2088  ;;  %v3437_v43 = vadd.f32 1e-06, %v404_v44  ;;  %v1549_v39 = vpack.c.bf16 %v1482_v55, %v1482_v55  ;;  %v785_v33 = vmul.f32 %v654_v10, %v3174_v24 }
 0x241   :  { %v656_v6 = vmul.f32 %v2089_v18, %v3414_v50  ;;  %2090 = vrsqrt.f32 %v3430_v56  ;;  %v1516_v63 = vpack.c.bf16 %v1353_v29, %v1264_v52  ;;  %vm662_vm8 = vweird.f32 %v2089_v18 }
 0x242   :  { %2092 = vrsqrt.f32 %v3437_v43  ;;  %1613 = vst [vmem:[%s3617_s5 + $0x140] sm:$0xf] %v1549_v39  ;;  %vm663_vm10 = vmor %vm661_vm9, %vm662_vm8  ;;  %v821_v57 = vmul.f32 %v3252_v36, %v785_v33  ;;  %vm671_vm11 = vweird.f32 %v3430_v56  ;;  %vm681_vm15 = vweird.f32 %v3437_v43 }
 0x243   :  { %v657_v49 = vmul.f32 %v2089_v18, %v656_v6  ;;  %1580 = vst [vmem:[%s3617_s5 + $0x78] sm:$0xff] %v1516_v63 }
 0x244   :  { %v1798_v9 = vld [vmem:[#allocation2 + $0x20] sm:$0xff]  ;;  %v1483_v4 = vpop.f32.mrf.mxu3  ;;  %v857_v19 = vadd.f32 %v3279_v16, %v821_v57 }
 0x245   :  { %v658_v42 = vmul.f32 0.5, %v657_v49  ;;  %v1441_v35 = vpop.f32.mrf.mxu2  ;;  %1282 = vmatmul.bf16.gmra.mxu0 %v1798_v9  ;;  %1371 = vmatmul.bf16.gmra.mxu1 %v1798_v9  ;;  %v1484_v59 = vadd.f32 %v1483_v4, %v3142_v34 }
 0x246   :  { %v1442_v7 = vadd.f32 %v1441_v35, %v3142_v34  ;;  %1460 = vmatmul.bf16.gmra.mxu2 %v1798_v9  ;;  %v1265_v60 = vpop.f32.mrf.mxu0  ;;  %v1354_v0 = vpop.f32.mrf.mxu1 }
 0x247   :  { %v659_v13 = vsub.f32 1.5, %v658_v42  ;;  %v2091_v40 = vpop.eup %2090  ;;  %v1266_v61 = vadd.f32 %v1265_v60, %v3120_v54  ;;  %v1355_v48 = vadd.f32 %v1354_v0, %v3122_v11  ;;  %v1551_v3 = vpack.c.bf16 %v1484_v59, %v1484_v59 }
 0x248   :  { %v2093_v58 = vpop.eup %2092  ;;  %v666_v24 = vmul.f32 %v2091_v40, %v3430_v56  ;;  %v1517_v22 = vpack.c.bf16 %v1442_v7, %v1442_v7  ;;  %vm672_vm12 = vweird.f32 %v2091_v40 }
 0x249   :  { %v660_v23 = vmul.f32 %v2089_v18, %v659_v13  ;;  %v676_v5 = vmul.f32 %v2093_v58, %v3437_v43  ;;  %v1518_v17 = vpack.c.bf16 %v1355_v48, %v1266_v61  ;;  %1615 = vst [vmem:[%s3617_s5 + $0x14c] sm:$0xf] %v1551_v3  ;;  %vm682_vm13 = vweird.f32 %v2093_v58  ;;  %vm673_vm14 = vmor %vm671_vm11, %vm672_vm12 }
 0x24a   :  { %v667_v31 = vmul.f32 %v2091_v40, %v666_v24  ;;  %1581 = vst [vmem:[%s3617_s5 + $0x80] sm:$0xf] %v1517_v22  ;;  %vm683_vm0 = vmor %vm681_vm15, %vm682_vm13 }
 0x24b   :  { %v664_v1 = vsel %vm663_vm10, %v2089_v18, %v660_v23  ;;  %v677_v25 = vmul.f32 %v2093_v58, %v676_v5  ;;  %1582 = vst [vmem:[%s3617_s5 + $0x84] sm:$0xff] %v1518_v17 }
 0x24c   :  { %v786_v15 = vmul.f32 %v664_v1, %v3214_v46  ;;  %v668_v50 = vmul.f32 0.5, %v667_v31  ;;  %v1486_v46 = vpop.f32.mrf.mxu3 }
 0x24d   :  { %v678_v53 = vmul.f32 0.5, %v677_v25  ;;  %v1443_v30 = vpop.f32.mrf.mxu2  ;;  %v1487_v12 = vadd.f32 %v1486_v46, %v3142_v34 }
 0x24e   :  { %v822_v62 = vmul.f32 %v3252_v36, %v786_v15  ;;  %v669_v37 = vsub.f32 1.5, %v668_v50  ;;  %v1444_v47 = vadd.f32 %v1443_v30, %v3142_v34 }
 0x24f   :  { %v679_v21 = vsub.f32 1.5, %v678_v53  ;;  %v1553_v51 = vpack.c.bf16 %v1487_v12, %v1487_v12 }
 0x250   :  { %v858_v2 = vadd.f32 %v3279_v16, %v822_v62  ;;  %v670_v41 = vmul.f32 %v2091_v40, %v669_v37  ;;  %v1519_v38 = vpack.c.bf16 %v1444_v47, %v1444_v47 }
 0x251   :  { %v680_v27 = vmul.f32 %v2093_v58, %v679_v21  ;;  %1617 = vst [vmem:[%s3617_s5 + $0x158] sm:$0xf] %v1553_v51 }
 0x252   :  { %v1946_v20 = vpack.c.bf16 %v858_v2, %v857_v19  ;;  %v674_v14 = vsel %vm673_vm14, %v2091_v40, %v670_v41  ;;  %1583 = vst [vmem:[%s3617_s5 + $0x8c] sm:$0xf] %v1519_v38 }
 0x253   :  { %v787_v44 = vmul.f32 %v674_v14, %v3244_v8  ;;  %v684_v18 = vsel %vm683_vm0, %v2093_v58, %v680_v27 }
 0x254   :  { %1997 = vst [vmem:[#allocation2 + $0x10] sm:$0xff] %v1946_v20   ;;  %v788_v26 = vmul.f32 %v684_v18, %v3247_v45  ;;  %v1268_v28 = vpop.f32.mrf.mxu0  ;;  %v1357_v32 = vpop.f32.mrf.mxu1 }
 0x255   :  { %v823_v56 = vmul.f32 %v3252_v36, %v787_v44  ;;  %v1269_v6 = vadd.f32 %v1268_v28, %v3120_v54  ;;  %v1358_v43 = vadd.f32 %v1357_v32, %v3122_v11  ;;  %v1488_v52 = vpop.f32.mrf.mxu3 }
 0x256   :  { %v824_v55 = vmul.f32 %v3252_v36, %v788_v26  ;;  %v1489_v8 = vadd.f32 %v1488_v52, %v3142_v34 }
 0x257   :  { %v859_v29 = vadd.f32 %v3279_v16, %v823_v56  ;;  %v1520_v49 = vpack.c.bf16 %v1358_v43, %v1269_v6 }
 0x258   :  { %v860_v45 = vadd.f32 %v3279_v16, %v824_v55  ;;  %v1555_v10 = vpack.c.bf16 %v1489_v8, %v1489_v8 }
 0x259   :  { %1584 = vst [vmem:[%s3617_s5 + $0x90] sm:$0xff] %v1520_v49 }
 0x25a   :  { %v1951_v63 = vpack.c.bf16 %v860_v45, %v859_v29  ;;  %1619 = vst [vmem:[%s3617_s5 + $0x164] sm:$0xf] %v1555_v10 }
 0x25b   :  { %v1799_v39 = vld [vmem:[#allocation2 + $0x10] sm:$0xff]  ;;  %v1446_v36 = vpop.f32.mrf.mxu2 }
 0x25c   :  { %1998 = vst [vmem:[#allocation2 + $0x38] sm:$0xff] %v1951_v63   ;;  %1287 = vmatmul.bf16.gmra.mxu0 %v1799_v39  ;;  %1376 = vmatmul.bf16.gmra.mxu1 %v1799_v39  ;;  %v1447_v42 = vadd.f32 %v1446_v36, %v3142_v34  ;;  %v1270_v16 = vpop.f32.mrf.mxu0  ;;  %v1359_v9 = vpop.f32.mrf.mxu1 }
 0x25d   :  { %1465 = vmatmul.bf16.gmra.mxu2 %v1799_v39  ;;  %v1271_v4 = vadd.f32 %v1270_v16, %v3120_v54  ;;  %v1360_v33 = vadd.f32 %v1359_v9, %v3122_v11  ;;  %v1491_v13 = vpop.f32.mrf.mxu3 }
 0x25e   :  { %v1521_v35 = vpack.c.bf16 %v1447_v42, %v1447_v42  ;;  %v1492_v59 = vadd.f32 %v1491_v13, %v3142_v34 }
 0x25f   :  { %v1522_v40 = vpack.c.bf16 %v1360_v33, %v1271_v4 }
 0x260   :  { %1585 = vst [vmem:[%s3617_s5 + $0x98] sm:$0xf] %v1521_v35  ;;  %v1557_v7 = vpack.c.bf16 %v1492_v59, %v1492_v59 }
 0x261   :  { %1586 = vst [vmem:[%s3617_s5 + $0x9c] sm:$0xff] %v1522_v40 }
 0x262   :  { %1621 = vst [vmem:[%s3617_s5 + $0x170] sm:$0xf] %v1557_v7 }
 0x263   :  { %v1448_v60 = vpop.f32.mrf.mxu2  ;;  %v1800_v1 = vld [vmem:[#allocation2 + $0x38] sm:$0xff] }
 0x264   :  { %v1449_v0 = vadd.f32 %v1448_v60, %v3142_v34  ;;  %v1273_v58 = vpop.f32.mrf.mxu0  ;;  %v1362_v23 = vpop.f32.mrf.mxu1 }
 0x265   :  { %v1274_v24 = vadd.f32 %v1273_v58, %v3120_v54  ;;  %v1363_v61 = vadd.f32 %v1362_v23, %v3122_v11  ;;  %v1493_v5 = vpop.f32.mrf.mxu3 }
 0x266   :  { %v1523_v22 = vpack.c.bf16 %v1449_v0, %v1449_v0  ;;  %v1494_v48 = vadd.f32 %v1493_v5, %v3142_v34 }
 0x267   :  { %v1524_v57 = vpack.c.bf16 %v1363_v61, %v1274_v24 }
 0x268   :  { %1587 = vst [vmem:[%s3617_s5 + $0xa4] sm:$0xf] %v1523_v22  ;;  %v1559_v31 = vpack.c.bf16 %v1494_v48, %v1494_v48 }
 0x269   :  { %1588 = vst [vmem:[%s3617_s5 + $0xa8] sm:$0xff] %v1524_v57 }
 0x26a   :  { %1623 = vst [vmem:[%s3617_s5 + $0x17c] sm:$0xf] %v1559_v31 }
 0x26b   :  { %v1451_v3 = vpop.f32.mrf.mxu2 }
 0x26c   :  { %1292 = vmatmul.bf16.gmra.mxu0 %v1800_v1  ;;  %1381 = vmatmul.bf16.gmra.mxu1 %v1800_v1  ;;  %v1452_v15 = vadd.f32 %v1451_v3, %v3142_v34  ;;  %v1275_v25 = vpop.f32.mrf.mxu0  ;;  %v1364_v17 = vpop.f32.mrf.mxu1 }
 0x26d   :  { %1470 = vmatmul.bf16.gmra.mxu2 %v1800_v1  ;;  %v1276_v50 = vadd.f32 %v1275_v25, %v3120_v54  ;;  %v1365_v62 = vadd.f32 %v1364_v17, %v3122_v11 }
 0x26e   :  { %v1525_v53 = vpack.c.bf16 %v1452_v15, %v1452_v15 }
 0x26f   :  { %v1526_v46 = vpack.c.bf16 %v1365_v62, %v1276_v50 }
 0x270   :  { %1589 = vst [vmem:[%s3617_s5 + $0xb0] sm:$0xf] %v1525_v53 }
 0x271   :  { %1590 = vst [vmem:[%s3617_s5 + $0xb4] sm:$0xff] %v1526_v46 }
 0x273   :  { %v1453_v19 = vpop.f32.mrf.mxu2 }
 0x274   :  { %v1454_v37 = vadd.f32 %v1453_v19, %v3142_v34 }
 0x276   :  { %v1527_v30 = vpack.c.bf16 %v1454_v37, %v1454_v37 }
 0x278   :  { %1591 = vst [vmem:[%s3617_s5 + $0xbc] sm:$0xf] %v1527_v30 }
 0x2ac   :  { %v1278_v12 = vpop.f32.mrf.mxu0  ;;  %v1367_v2 = vpop.f32.mrf.mxu1 }
 0x2ad   :  { %v1279_v21 = vadd.f32 %v1278_v12, %v3120_v54  ;;  %v1368_v47 = vadd.f32 %v1367_v2, %v3122_v11 }
 0x2af   :  { %v1528_v41 = vpack.c.bf16 %v1368_v47, %v1279_v21 }
 0x2b1   :  { %1592 = vst [vmem:[%s3617_s5 + $0xc0] sm:$0xff] %v1528_v41 }
 0x2b3   :  { %v1456_v51 = vpop.f32.mrf.mxu2 }
 0x2b4   :  { %v1457_v20 = vadd.f32 %v1456_v51, %v3142_v34  ;;  %v1280_v27 = vpop.f32.mrf.mxu0  ;;  %v1369_v38 = vpop.f32.mrf.mxu1 }
 0x2b5   :  { %v1281_v14 = vadd.f32 %v1280_v27, %v3120_v54  ;;  %v1370_v44 = vadd.f32 %v1369_v38, %v3122_v11 }
 0x2b6   :  { %v1529_v18 = vpack.c.bf16 %v1457_v20, %v1457_v20 }
 0x2b7   :  { %v1530_v26 = vpack.c.bf16 %v1370_v44, %v1281_v14 }
 0x2b8   :  { %1593 = vst [vmem:[%s3617_s5 + $0xc8] sm:$0xf] %v1529_v18 }
 0x2b9   :  { %1594 = vst [vmem:[%s3617_s5 + $0xcc] sm:$0xff] %v1530_v26 }
 0x2bb   :  { %v1458_v56 = vpop.f32.mrf.mxu2 }
 0x2bc   :  { %v1459_v28 = vadd.f32 %v1458_v56, %v3142_v34 }
 0x2be   :  { %v1531_v32 = vpack.c.bf16 %v1459_v28, %v1459_v28 }
 0x2c0   :  { %1595 = vst [vmem:[%s3617_s5 + $0xd4] sm:$0xf] %v1531_v32 }
 0x2c2   :  { %v1283_v55 = vpop.f32.mrf.mxu0  ;;  %v1372_v6 = vpop.f32.mrf.mxu1 }
 0x2c3   :  { %v1284_v43 = vadd.f32 %v1283_v55, %v3120_v54  ;;  %v1373_v52 = vadd.f32 %v1372_v6, %v3122_v11 }
 0x2c5   :  { %v1532_v8 = vpack.c.bf16 %v1373_v52, %v1284_v43 }
 0x2c7   :  { %1596 = vst [vmem:[%s3617_s5 + $0xd8] sm:$0xff] %v1532_v8 }
 0x2c9   :  { %v1461_v29 = vpop.f32.mrf.mxu2 }
 0x2ca   :  { %v1462_v45 = vadd.f32 %v1461_v29, %v3142_v34  ;;  %v1285_v49 = vpop.f32.mrf.mxu0  ;;  %v1374_v10 = vpop.f32.mrf.mxu1 }
 0x2cb   :  { %v1286_v63 = vadd.f32 %v1285_v49, %v3120_v54  ;;  %v1375_v39 = vadd.f32 %v1374_v10, %v3122_v11 }
 0x2cc   :  { %v1533_v36 = vpack.c.bf16 %v1462_v45, %v1462_v45 }
 0x2cd   :  { %v1534_v42 = vpack.c.bf16 %v1375_v39, %v1286_v63 }
 0x2ce   :  { %1597 = vst [vmem:[%s3617_s5 + $0xe0] sm:$0xf] %v1533_v36 }
 0x2cf   :  { %1598 = vst [vmem:[%s3617_s5 + $0xe4] sm:$0xff] %v1534_v42 }
 0x2d1   :  { %v1463_v16 = vpop.f32.mrf.mxu2 }
 0x2d2   :  { %v1464_v9 = vadd.f32 %v1463_v16, %v3142_v34 }
 0x2d4   :  { %v1535_v4 = vpack.c.bf16 %v1464_v9, %v1464_v9 }
 0x2d6   :  { %1599 = vst [vmem:[%s3617_s5 + $0xec] sm:$0xf] %v1535_v4 }
 0x2d9   :  { %v1288_v33 = vpop.f32.mrf.mxu0  ;;  %v1377_v13 = vpop.f32.mrf.mxu1 }
 0x2da   :  { %v1289_v35 = vadd.f32 %v1288_v33, %v3120_v54  ;;  %v1378_v59 = vadd.f32 %v1377_v13, %v3122_v11 }
 0x2dc   :  { %v1536_v40 = vpack.c.bf16 %v1378_v59, %v1289_v35 }
 0x2de   :  { %1600 = vst [vmem:[%s3617_s5 + $0xf0] sm:$0xff] %v1536_v40 }
 0x2e0   :  { %v1466_v7 = vpop.f32.mrf.mxu2 }
 0x2e1   :  { %v1467_v60 = vadd.f32 %v1466_v7, %v3142_v34  ;;  %v1290_v0 = vpop.f32.mrf.mxu0  ;;  %v1379_v58 = vpop.f32.mrf.mxu1 }
 0x2e2   :  { %v1291_v23 = vadd.f32 %v1290_v0, %v3120_v54  ;;  %v1380_v24 = vadd.f32 %v1379_v58, %v3122_v11 }
 0x2e3   :  { %v1537_v61 = vpack.c.bf16 %v1467_v60, %v1467_v60 }
 0x2e4   :  { %v1538_v5 = vpack.c.bf16 %v1380_v24, %v1291_v23 }
 0x2e5   :  { %1601 = vst [vmem:[%s3617_s5 + $0xf8] sm:$0xf] %v1537_v61 }
 0x2e6   :  { %1602 = vst [vmem:[%s3617_s5 + $0xfc] sm:$0xff] %v1538_v5 }
 0x2e8   :  { %v1468_v22 = vpop.f32.mrf.mxu2 }
 0x2e9   :  { %v1469_v48 = vadd.f32 %v1468_v22, %v3142_v34  ;;  %v1293_v57 = vpop.f32.mrf.mxu0  ;;  %v1382_v1 = vpop.f32.mrf.mxu1 }
 0x2ea   :  { %v1294_v31 = vadd.f32 %v1293_v57, %v3120_v54  ;;  %v1383_v3 = vadd.f32 %v1382_v1, %v3122_v11 }
 0x2eb   :  { %v1539_v15 = vpack.c.bf16 %v1469_v48, %v1469_v48 }
 0x2ec   :  { %v1540_v25 = vpack.c.bf16 %v1383_v3, %v1294_v31 }
 0x2ed   :  { %1603 = vst [vmem:[%s3617_s5 + $0x104] sm:$0xf] %v1539_v15 }
 0x2ee   :  { %1604 = vst [vmem:[%s3617_s5 + $0x108] sm:$0xff] %v1540_v25 }
 0x2f0   :  { %v1471_v17 = vpop.f32.mrf.mxu2 }
 0x2f1   :  { %v1472_v50 = vadd.f32 %v1471_v17, %v3142_v34  ;;  %v1295_v62 = vpop.f32.mrf.mxu0  ;;  %v1384_v53 = vpop.f32.mrf.mxu1 }
 0x2f2   :  { %v1296_v46 = vadd.f32 %v1295_v62, %v3120_v54  ;;  %v1385_v19 = vadd.f32 %v1384_v53, %v3122_v11 }
 0x2f3   :  { %v1541_v37 = vpack.c.bf16 %v1472_v50, %v1472_v50 }
 0x2f4   :  { %v1542_v30 = vpack.c.bf16 %v1385_v19, %v1296_v46 }
 0x2f5   :  { %1605 = vst [vmem:[%s3617_s5 + $0x110] sm:$0xf] %v1541_v37 }
 0x2f6   :  { %1606 = vst [vmem:[%s3617_s5 + $0x114] sm:$0xff] %v1542_v30 }
 0x2f8   :  { %v1473_v12 = vpop.f32.mrf.mxu2 }
 0x2f9   :  { %v1474_v2 = vadd.f32 %v1473_v12, %v3142_v34 }
 0x2fb   :  { %v1543_v21 = vpack.c.bf16 %v1474_v2, %v1474_v2 }
 0x2fd   :  { %1607 = vst [vmem:[%s3617_s5 + $0x11c] sm:$0xf] %v1543_v21 }

// kernel: dino_forward.20
= control target key start
LH: loop header
LB: loop body
LE: loop exit
PB: predicated region body
PF: predicated region fallthrough
CT: control target
= control target key end

     0   :  { %10 = vsyncpa [#allocation3], 0  ;;  %s871_s21 = smov [#allocation2]   ;;  %s872_s23 = smov 64   ;;  %s1125_s0 = inlined_call_operand.vmem [shape: bf16[256,128], index: 0, kind: input, shape index: {}]   ;;  %s1126_s1 = inlined_call_operand.hbm [shape: bf16[128,128], index: 1, kind: input, shape index: {}]   ;;  %s1127_s2 = inlined_call_operand.vmem [shape: f32[1,128], index: 2, kind: input, shape index: {}]   ;;  %s1128_s3 = inlined_call_operand.vmem [shape: bf16[256,128], index: 3, kind: input, shape index: {}, may-alias: {3,5}]   ;;  %s1129_s4 = inlined_call_operand.vmem [shape: f32[1,128], index: 4, kind: input, shape index: {}]   ;;  %s1130_s5 = inlined_call_operand.vmem [shape: bf16[256,128], index: 5, kind: output, shape index: {}, may-alias: {3,5}]  }
   0x1   :  { %s17_s20 = sshll.u32 %s1126_s1, 4  ;;  %s19_s22 = sshll.u32 %s871_s21, 4  ;;  %s18_s20 = int_to_ptr.hbm [resolvable:$true] %s17_s20  ;;  %s20_s22 = int_to_ptr.vmem [resolvable:$true] %s19_s22 }
   0x2   :  { %s873_s24 = smov 4  }
   0x3   :  { %25 = dma.hbm_to_vmem [thread:$0]  %s18_s20, 1024, %s20_s22, [#allocation3], %s872_s23, %s872_s23, %s873_s24  }
   0x4   :  { %869 = dma.done.wait [#allocation3], 1024  }
   0x5   :  { %870 = vsyncadd [#allocation3], 4294966272  ;;  %v641_v0 = vld [vmem:[#allocation2 + $0x38] sm:$0xff]  ;;  %v640_v1 = vld [vmem:[#allocation2 + $0x30] sm:$0xff] }
   0x6   :  { %232 = vmatpush.bf16.msra.mxu0 %v641_v0  ;;  %816 = vmatpush.bf16.msra.mxu1 %v641_v0  ;;  %v639_v2 = vld [vmem:[#allocation2 + $0x28] sm:$0xff]  ;;  %v638_v3 = vld [vmem:[#allocation2 + $0x20] sm:$0xff]  ;;  %v637_v4 = vld [vmem:[#allocation2 + $0x18] sm:$0xff] }
   0x7   :  { %817 = vmatpush.bf16.msra.mxu2 %v641_v0  ;;  %818 = vmatpush.bf16.msra.mxu3 %v641_v0  ;;  %v636_v5 = vld [vmem:[#allocation2 + $0x10] sm:$0xff]  ;;  %v635_v6 = vld [vmem:[#allocation2 + $0x8] sm:$0xff]  ;;  %v634_v7 = vld [vmem:[#allocation2] sm:$0xff] }
   0x8   :  { %v618_v8 = vld [vmem:[%s1125_s0] sm:$0xff]  ;;  %v619_v12 = vld [vmem:[%s1125_s0 + $0x8] sm:$0xff]  ;;  %v620_v16 = vld [vmem:[%s1125_s0 + $0x10] sm:$0xff] }
   0x9   :  { %v622_v9 = vld [vmem:[%s1125_s0 + $0x20] sm:$0xff]  ;;  %v623_v13 = vld [vmem:[%s1125_s0 + $0x28] sm:$0xff]  ;;  %v624_v17 = vld [vmem:[%s1125_s0 + $0x30] sm:$0xff] }
   0xa   :  { %233 = vmatpush.bf16.msra.mxu0 %v640_v1  ;;  %819 = vmatpush.bf16.msra.mxu1 %v640_v1  ;;  %v626_v10 = vld [vmem:[%s1125_s0 + $0x40] sm:$0xff]  ;;  %v627_v14 = vld [vmem:[%s1125_s0 + $0x48] sm:$0xff]  ;;  %v628_v18 = vld [vmem:[%s1125_s0 + $0x50] sm:$0xff] }
   0xb   :  { %820 = vmatpush.bf16.msra.mxu2 %v640_v1  ;;  %821 = vmatpush.bf16.msra.mxu3 %v640_v1  ;;  %v630_v11 = vld [vmem:[%s1125_s0 + $0x60] sm:$0xff]  ;;  %v631_v15 = vld [vmem:[%s1125_s0 + $0x68] sm:$0xff]  ;;  %v632_v19 = vld [vmem:[%s1125_s0 + $0x70] sm:$0xff] }
   0xc   :  { %v621_v20 = vld [vmem:[%s1125_s0 + $0x18] sm:$0xff]  ;;  %v958_v26 = vld [vmem:[%s1127_s2] ss:$0 sm:$0xff] }
   0xd   :  { %v625_v21 = vld [vmem:[%s1125_s0 + $0x38] sm:$0xff]  ;;  %v643_v28 = vld [vmem:[%s1128_s3] sm:$0xff]  }
   0xe   :  { %234 = vmatpush.bf16.msra.mxu0 %v639_v2  ;;  %822 = vmatpush.bf16.msra.mxu1 %v639_v2  ;;  %v629_v22 = vld [vmem:[%s1125_s0 + $0x58] sm:$0xff]  ;;  %v967_v29 = vld [vmem:[%s1129_s4] ss:$0 sm:$0xff]  ;;  %v644_v34 = vunpack.c.l.bf16 %v643_v28  ;;  %v645_v37 = vunpack.c.h.bf16 %v643_v28 }
   0xf   :  { %823 = vmatpush.bf16.msra.mxu2 %v639_v2  ;;  %824 = vmatpush.bf16.msra.mxu3 %v639_v2  ;;  %v633_v23 = vld [vmem:[%s1125_s0 + $0x78] sm:$0xff]  ;;  %v789_v31 = vld [vmem:[%s1128_s3 + $0x20] sm:$0xff]  }
  0x10   :  { %v660_v35 = vunpack.c.l.bf16 %v789_v31  ;;  %v661_v39 = vunpack.c.h.bf16 %v789_v31  ;;  %v793_v44 = vld [vmem:[%s1128_s3 + $0x40] sm:$0xff]  }
  0x11   :  { %v797_v45 = vld [vmem:[%s1128_s3 + $0x60] sm:$0xff]   ;;  %v676_v54 = vunpack.c.l.bf16 %v793_v44  ;;  %v677_v59 = vunpack.c.h.bf16 %v793_v44 }
  0x12   :  { %235 = vmatpush.bf16.msra.mxu0 %v638_v3  ;;  %825 = vmatpush.bf16.msra.mxu1 %v638_v3  ;;  %v692_v55 = vunpack.c.l.bf16 %v797_v45  ;;  %v693_v61 = vunpack.c.h.bf16 %v797_v45 }
  0x13   :  { %826 = vmatpush.bf16.msra.mxu2 %v638_v3  ;;  %827 = vmatpush.bf16.msra.mxu3 %v638_v3 }
  0x16   :  { %236 = vmatpush.bf16.msra.mxu0 %v637_v4  ;;  %828 = vmatpush.bf16.msra.mxu1 %v637_v4 }
  0x17   :  { %829 = vmatpush.bf16.msra.mxu2 %v637_v4  ;;  %830 = vmatpush.bf16.msra.mxu3 %v637_v4 }
  0x1a   :  { %237 = vmatpush.bf16.msra.mxu0 %v636_v5  ;;  %831 = vmatpush.bf16.msra.mxu1 %v636_v5 }
  0x1b   :  { %832 = vmatpush.bf16.msra.mxu2 %v636_v5  ;;  %833 = vmatpush.bf16.msra.mxu3 %v636_v5 }
  0x1e   :  { %238 = vmatpush.bf16.msra.mxu0 %v635_v6  ;;  %834 = vmatpush.bf16.msra.mxu1 %v635_v6 }
  0x1f   :  { %835 = vmatpush.bf16.msra.mxu2 %v635_v6  ;;  %836 = vmatpush.bf16.msra.mxu3 %v635_v6 }
  0x22   :  { %239 = vmatpush.bf16.msra.mxu0 %v634_v7  ;;  %837 = vmatpush.bf16.msra.mxu1 %v634_v7 }
  0x23   :  { %838 = vmatpush.bf16.msra.mxu2 %v634_v7  ;;  %839 = vmatpush.bf16.msra.mxu3 %v634_v7 }
  0x25   :  { %240 = vmatmul.bf16.vlgmr.msra.gmra.mxu0 %v618_v8  ;;  %260 = vmatmul.bf16.vlgmr.msra.gmra.mxu1 %v622_v9 }
  0x26   :  { %280 = vmatmul.bf16.vlgmr.msra.gmra.mxu2 %v626_v10  ;;  %300 = vmatmul.bf16.vlgmr.msra.gmra.mxu3 %v630_v11 }
  0x35   :  { %245 = vmatmul.bf16.gmra.mxu0 %v619_v12  ;;  %265 = vmatmul.bf16.gmra.mxu1 %v623_v13 }
  0x36   :  { %285 = vmatmul.bf16.gmra.mxu2 %v627_v14  ;;  %305 = vmatmul.bf16.gmra.mxu3 %v631_v15 }
  0x45   :  { %250 = vmatmul.bf16.gmra.mxu0 %v620_v16  ;;  %270 = vmatmul.bf16.gmra.mxu1 %v624_v17 }
  0x46   :  { %290 = vmatmul.bf16.gmra.mxu2 %v628_v18  ;;  %310 = vmatmul.bf16.gmra.mxu3 %v632_v19 }
  0x55   :  { %255 = vmatmul.bf16.gmra.mxu0 %v621_v20  ;;  %275 = vmatmul.bf16.gmra.mxu1 %v625_v21 }
  0x56   :  { %295 = vmatmul.bf16.gmra.mxu2 %v629_v22  ;;  %315 = vmatmul.bf16.gmra.mxu3 %v633_v23 }
  0xa2   :  { %v241_v24 = vpop.f32.mrf.mxu0  ;;  %v261_v25 = vpop.f32.mrf.mxu1 }
  0xa3   :  { %v242_v27 = vadd.f32 %v958_v26, %v241_v24  ;;  %v262_v30 = vadd.f32 %v958_v26, %v261_v25 }
  0xa5   :  { %v389_v40 = vmul.f32 %v967_v29, %v242_v27  ;;  %v397_v41 = vmul.f32 %v967_v29, %v262_v30 }
  0xa7   :  { %v421_v50 = vadd.f32 %v644_v34, %v389_v40  ;;  %v429_v51 = vadd.f32 %v660_v35, %v397_v41 }
  0xa9   :  { %v281_v32 = vpop.f32.mrf.mxu2  ;;  %v301_v33 = vpop.f32.mrf.mxu3 }
  0xaa   :  { %v243_v36 = vpop.f32.mrf.mxu0  ;;  %v263_v38 = vpop.f32.mrf.mxu1  ;;  %v282_v48 = vadd.f32 %v958_v26, %v281_v32  ;;  %v302_v49 = vadd.f32 %v958_v26, %v301_v33 }
  0xab   :  { %v244_v42 = vadd.f32 %v958_v26, %v243_v36  ;;  %v264_v43 = vadd.f32 %v958_v26, %v263_v38 }
  0xac   :  { %v405_v62 = vmul.f32 %v967_v29, %v282_v48  ;;  %v413_v63 = vmul.f32 %v967_v29, %v302_v49 }
  0xad   :  { %v390_v46 = vmul.f32 %v967_v29, %v244_v42  ;;  %v398_v47 = vmul.f32 %v967_v29, %v264_v43 }
  0xae   :  { %v437_v6 = vadd.f32 %v676_v54, %v405_v62  ;;  %v445_v7 = vadd.f32 %v692_v55, %v413_v63 }
  0xaf   :  { %v422_v52 = vadd.f32 %v645_v37, %v390_v46  ;;  %v430_v53 = vadd.f32 %v661_v39, %v398_v47 }
  0xb1   :  { %v709_v56 = vpack.c.bf16 %v422_v52, %v421_v50  ;;  %v729_v57 = vpack.c.bf16 %v430_v53, %v429_v51  ;;  %v283_v58 = vpop.f32.mrf.mxu2  ;;  %v303_v60 = vpop.f32.mrf.mxu3 }
  0xb2   :  { %v284_v0 = vadd.f32 %v958_v26, %v283_v58  ;;  %v304_v1 = vadd.f32 %v958_v26, %v303_v60  ;;  %v246_v2 = vpop.f32.mrf.mxu0  ;;  %v266_v3 = vpop.f32.mrf.mxu1 }
  0xb3   :  { %710 = vst [vmem:[%s1130_s5] sm:$0xff] %v709_v56   ;;  %v247_v10 = vadd.f32 %v958_v26, %v246_v2  ;;  %v267_v12 = vadd.f32 %v958_v26, %v266_v3 }
  0xb4   :  { %804 = vst [vmem:[%s1130_s5 + $0x20] sm:$0xff] %v729_v57   ;;  %v406_v4 = vmul.f32 %v967_v29, %v284_v0  ;;  %v414_v5 = vmul.f32 %v967_v29, %v304_v1 }
  0xb5   :  { %v391_v24 = vmul.f32 %v967_v29, %v247_v10  ;;  %v399_v25 = vmul.f32 %v967_v29, %v267_v12 }
  0xb6   :  { %v438_v8 = vadd.f32 %v677_v59, %v406_v4  ;;  %v446_v9 = vadd.f32 %v693_v61, %v414_v5 }
  0xb8   :  { %v749_v14 = vpack.c.bf16 %v438_v8, %v437_v6  ;;  %v769_v15 = vpack.c.bf16 %v446_v9, %v445_v7 }
  0xb9   :  { %v286_v16 = vpop.f32.mrf.mxu2  ;;  %v306_v17 = vpop.f32.mrf.mxu3 }
  0xba   :  { %v248_v20 = vpop.f32.mrf.mxu0  ;;  %v268_v22 = vpop.f32.mrf.mxu1  ;;  %v287_v34 = vadd.f32 %v958_v26, %v286_v16  ;;  %v307_v35 = vadd.f32 %v958_v26, %v306_v17 }
  0xbb   :  { %v786_v11 = vld [vmem:[%s1128_s3 + $0x8] sm:$0xff]   ;;  %v249_v27 = vadd.f32 %v958_v26, %v248_v20  ;;  %v269_v28 = vadd.f32 %v958_v26, %v268_v22 }
  0xbc   :  { %v790_v13 = vld [vmem:[%s1128_s3 + $0x28] sm:$0xff]   ;;  %v648_v18 = vunpack.c.l.bf16 %v786_v11  ;;  %v649_v21 = vunpack.c.h.bf16 %v786_v11  ;;  %v407_v48 = vmul.f32 %v967_v29, %v287_v34  ;;  %v415_v49 = vmul.f32 %v967_v29, %v307_v35 }
  0xbd   :  { %808 = vst [vmem:[%s1130_s5 + $0x40] sm:$0xff] %v749_v14   ;;  %v664_v19 = vunpack.c.l.bf16 %v790_v13  ;;  %v665_v23 = vunpack.c.h.bf16 %v790_v13  ;;  %v392_v32 = vmul.f32 %v967_v29, %v249_v27  ;;  %v400_v33 = vmul.f32 %v967_v29, %v269_v28 }
  0xbe   :  { %812 = vst [vmem:[%s1130_s5 + $0x60] sm:$0xff] %v769_v15   ;;  %v423_v36 = vadd.f32 %v648_v18, %v391_v24 }
  0xbf   :  { %v431_v37 = vadd.f32 %v664_v19, %v399_v25  ;;  %v424_v38 = vadd.f32 %v649_v21, %v392_v32  ;;  %v432_v39 = vadd.f32 %v665_v23, %v400_v33 }
  0xc1   :  { %v714_v42 = vpack.c.bf16 %v424_v38, %v423_v36  ;;  %v734_v43 = vpack.c.bf16 %v432_v39, %v431_v37  ;;  %v288_v44 = vpop.f32.mrf.mxu2  ;;  %v308_v46 = vpop.f32.mrf.mxu3 }
  0xc2   :  { %v289_v50 = vadd.f32 %v958_v26, %v288_v44  ;;  %v309_v51 = vadd.f32 %v958_v26, %v308_v46  ;;  %v251_v52 = vpop.f32.mrf.mxu0  ;;  %v271_v53 = vpop.f32.mrf.mxu1 }
  0xc3   :  { %v252_v60 = vadd.f32 %v958_v26, %v251_v52  ;;  %v272_v62 = vadd.f32 %v958_v26, %v271_v53 }
  0xc4   :  { %v408_v54 = vmul.f32 %v967_v29, %v289_v50  ;;  %v416_v55 = vmul.f32 %v967_v29, %v309_v51 }
  0xc5   :  { %v794_v30 = vld [vmem:[%s1128_s3 + $0x48] sm:$0xff]   ;;  %v393_v10 = vmul.f32 %v967_v29, %v252_v60  ;;  %v401_v11 = vmul.f32 %v967_v29, %v272_v62 }
  0xc6   :  { %v798_v31 = vld [vmem:[%s1128_s3 + $0x68] sm:$0xff]   ;;  %v680_v40 = vunpack.c.l.bf16 %v794_v30  ;;  %v681_v45 = vunpack.c.h.bf16 %v794_v30 }
  0xc7   :  { %v696_v41 = vunpack.c.l.bf16 %v798_v31  ;;  %v697_v47 = vunpack.c.h.bf16 %v798_v31  ;;  %801 = vst [vmem:[%s1130_s5 + $0x8] sm:$0xff] %v714_v42  }
  0xc8   :  { %805 = vst [vmem:[%s1130_s5 + $0x28] sm:$0xff] %v734_v43   ;;  %v439_v56 = vadd.f32 %v680_v40, %v407_v48  ;;  %v440_v58 = vadd.f32 %v681_v45, %v408_v54 }
  0xc9   :  { %v447_v57 = vadd.f32 %v696_v41, %v415_v49  ;;  %v448_v59 = vadd.f32 %v697_v47, %v416_v55  ;;  %v291_v2 = vpop.f32.mrf.mxu2  ;;  %v311_v3 = vpop.f32.mrf.mxu3 }
  0xca   :  { %v754_v0 = vpack.c.bf16 %v440_v58, %v439_v56  ;;  %v253_v6 = vpop.f32.mrf.mxu0  ;;  %v273_v8 = vpop.f32.mrf.mxu1  ;;  %v292_v18 = vadd.f32 %v958_v26, %v291_v2  ;;  %v312_v19 = vadd.f32 %v958_v26, %v311_v3 }
  0xcb   :  { %v774_v1 = vpack.c.bf16 %v448_v59, %v447_v57  ;;  %v254_v12 = vadd.f32 %v958_v26, %v253_v6  ;;  %v274_v13 = vadd.f32 %v958_v26, %v273_v8 }
  0xcc   :  { %v409_v34 = vmul.f32 %v967_v29, %v292_v18  ;;  %v417_v35 = vmul.f32 %v967_v29, %v312_v19 }
  0xcd   :  { %v394_v16 = vmul.f32 %v967_v29, %v254_v12  ;;  %v402_v17 = vmul.f32 %v967_v29, %v274_v13 }
  0xcf   :  { %v787_v61 = vld [vmem:[%s1128_s3 + $0x10] sm:$0xff]  }
  0xd0   :  { %v791_v63 = vld [vmem:[%s1128_s3 + $0x30] sm:$0xff]   ;;  %v652_v4 = vunpack.c.l.bf16 %v787_v61  ;;  %v653_v7 = vunpack.c.h.bf16 %v787_v61 }
  0xd1   :  { %809 = vst [vmem:[%s1130_s5 + $0x48] sm:$0xff] %v754_v0   ;;  %v668_v5 = vunpack.c.l.bf16 %v791_v63  ;;  %v669_v9 = vunpack.c.h.bf16 %v791_v63  ;;  %v293_v30 = vpop.f32.mrf.mxu2  ;;  %v313_v32 = vpop.f32.mrf.mxu3 }
  0xd2   :  { %813 = vst [vmem:[%s1130_s5 + $0x68] sm:$0xff] %v774_v1   ;;  %v425_v20 = vadd.f32 %v652_v4, %v393_v10  ;;  %v426_v22 = vadd.f32 %v653_v7, %v394_v16  ;;  %v294_v36 = vadd.f32 %v958_v26, %v293_v30  ;;  %v314_v37 = vadd.f32 %v958_v26, %v313_v32  ;;  %v256_v38 = vpop.f32.mrf.mxu0  ;;  %v276_v39 = vpop.f32.mrf.mxu1 }
  0xd3   :  { %v433_v21 = vadd.f32 %v668_v5, %v401_v11  ;;  %v434_v23 = vadd.f32 %v669_v9, %v402_v17  ;;  %v257_v46 = vadd.f32 %v958_v26, %v256_v38  ;;  %v277_v48 = vadd.f32 %v958_v26, %v276_v39 }
  0xd4   :  { %v719_v27 = vpack.c.bf16 %v426_v22, %v425_v20  ;;  %v410_v40 = vmul.f32 %v967_v29, %v294_v36  ;;  %v418_v41 = vmul.f32 %v967_v29, %v314_v37 }
  0xd5   :  { %v739_v28 = vpack.c.bf16 %v434_v23, %v433_v21  ;;  %v395_v60 = vmul.f32 %v967_v29, %v257_v46  ;;  %v403_v61 = vmul.f32 %v967_v29, %v277_v48 }
  0xd9   :  { %v795_v14 = vld [vmem:[%s1128_s3 + $0x50] sm:$0xff]   ;;  %v296_v52 = vpop.f32.mrf.mxu2  ;;  %v316_v53 = vpop.f32.mrf.mxu3 }
  0xda   :  { %v799_v15 = vld [vmem:[%s1128_s3 + $0x70] sm:$0xff]   ;;  %v684_v24 = vunpack.c.l.bf16 %v795_v14  ;;  %v685_v31 = vunpack.c.h.bf16 %v795_v14  ;;  %v258_v56 = vpop.f32.mrf.mxu0  ;;  %v278_v58 = vpop.f32.mrf.mxu1  ;;  %v297_v4 = vadd.f32 %v958_v26, %v296_v52  ;;  %v317_v5 = vadd.f32 %v958_v26, %v316_v53 }
  0xdb   :  { %v700_v25 = vunpack.c.l.bf16 %v799_v15  ;;  %v701_v33 = vunpack.c.h.bf16 %v799_v15  ;;  %802 = vst [vmem:[%s1130_s5 + $0x10] sm:$0xff] %v719_v27   ;;  %v259_v62 = vadd.f32 %v958_v26, %v258_v56  ;;  %v279_v63 = vadd.f32 %v958_v26, %v278_v58 }
  0xdc   :  { %806 = vst [vmem:[%s1130_s5 + $0x30] sm:$0xff] %v739_v28   ;;  %v441_v42 = vadd.f32 %v684_v24, %v409_v34  ;;  %v442_v44 = vadd.f32 %v685_v31, %v410_v40  ;;  %v411_v18 = vmul.f32 %v967_v29, %v297_v4  ;;  %v419_v19 = vmul.f32 %v967_v29, %v317_v5 }
  0xdd   :  { %v449_v43 = vadd.f32 %v700_v25, %v417_v35  ;;  %v450_v45 = vadd.f32 %v701_v33, %v418_v41  ;;  %v396_v2 = vmul.f32 %v967_v29, %v259_v62  ;;  %v404_v3 = vmul.f32 %v967_v29, %v279_v63 }
  0xde   :  { %v759_v50 = vpack.c.bf16 %v442_v44, %v441_v42 }
  0xdf   :  { %v779_v51 = vpack.c.bf16 %v450_v45, %v449_v43 }
  0xe1   :  { %v298_v14 = vpop.f32.mrf.mxu2  ;;  %v318_v16 = vpop.f32.mrf.mxu3 }
  0xe2   :  { %v299_v20 = vadd.f32 %v958_v26, %v298_v14  ;;  %v319_v21 = vadd.f32 %v958_v26, %v318_v16 }
  0xe3   :  { %v788_v47 = vld [vmem:[%s1128_s3 + $0x18] sm:$0xff]  }
  0xe4   :  { %v792_v49 = vld [vmem:[%s1128_s3 + $0x38] sm:$0xff]   ;;  %v656_v54 = vunpack.c.l.bf16 %v788_v47  ;;  %v657_v57 = vunpack.c.h.bf16 %v788_v47  ;;  %v412_v22 = vmul.f32 %v967_v29, %v299_v20  ;;  %v420_v23 = vmul.f32 %v967_v29, %v319_v21 }
  0xe5   :  { %810 = vst [vmem:[%s1130_s5 + $0x50] sm:$0xff] %v759_v50   ;;  %v672_v55 = vunpack.c.l.bf16 %v792_v49  ;;  %v673_v59 = vunpack.c.h.bf16 %v792_v49 }
  0xe6   :  { %814 = vst [vmem:[%s1130_s5 + $0x70] sm:$0xff] %v779_v51   ;;  %v427_v6 = vadd.f32 %v656_v54, %v395_v60  ;;  %v428_v8 = vadd.f32 %v657_v57, %v396_v2 }
  0xe7   :  { %v435_v7 = vadd.f32 %v672_v55, %v403_v61  ;;  %v436_v9 = vadd.f32 %v673_v59, %v404_v3 }
  0xe8   :  { %v724_v12 = vpack.c.bf16 %v428_v8, %v427_v6 }
  0xe9   :  { %v744_v13 = vpack.c.bf16 %v436_v9, %v435_v7 }
  0xed   :  { %v796_v0 = vld [vmem:[%s1128_s3 + $0x58] sm:$0xff]  }
  0xee   :  { %v800_v1 = vld [vmem:[%s1128_s3 + $0x78] sm:$0xff]   ;;  %v688_v10 = vunpack.c.l.bf16 %v796_v0  ;;  %v689_v15 = vunpack.c.h.bf16 %v796_v0 }
  0xef   :  { %v704_v11 = vunpack.c.l.bf16 %v800_v1  ;;  %v705_v17 = vunpack.c.h.bf16 %v800_v1  ;;  %803 = vst [vmem:[%s1130_s5 + $0x18] sm:$0xff] %v724_v12  }
  0xf0   :  { %807 = vst [vmem:[%s1130_s5 + $0x38] sm:$0xff] %v744_v13   ;;  %v443_v24 = vadd.f32 %v688_v10, %v411_v18  ;;  %v444_v27 = vadd.f32 %v689_v15, %v412_v22 }
  0xf1   :  { %v451_v25 = vadd.f32 %v704_v11, %v419_v19  ;;  %v452_v28 = vadd.f32 %v705_v17, %v420_v23 }
  0xf2   :  { %v764_v30 = vpack.c.bf16 %v444_v27, %v443_v24 }
  0xf3   :  { %v784_v31 = vpack.c.bf16 %v452_v28, %v451_v25 }
  0xf4   :  { %811 = vst [vmem:[%s1130_s5 + $0x58] sm:$0xff] %v764_v30  }
  0xf5   :  { %815 = vst [vmem:[%s1130_s5 + $0x78] sm:$0xff] %v784_v31  }
  0xf6   :  { %521 = vsyncpa [#allocation3], 1 }

// kernel: dino_forward.16
= control target key start
LH: loop header
LB: loop body
LE: loop exit
PB: predicated region body
PF: predicated region fallthrough
CT: control target
= control target key end

     0   :  { %v88_v0 = vlaneseq  ;;  %v2122_v8 = vmov 0.0   ;;  %s3430_s0 = inlined_call_operand.vmem [shape: bf16[256,128], index: 0, kind: input, shape index: {}]   ;;  %s3431_s3 = inlined_call_operand.vmem [shape: f32[1,128], index: 3, kind: input, shape index: {}]   ;;  %s3432_s4 = inlined_call_operand.vmem [shape: f32[1,128], index: 4, kind: input, shape index: {}]   ;;  %s3433_s1 = inlined_call_operand.vmem [shape: bf16[128,128], index: 1, kind: input, shape index: {}]   ;;  %s3434_s2 = inlined_call_operand.vmem [shape: f32[1,128], index: 2, kind: input, shape index: {}]   ;;  %s3435_s5 = inlined_call_operand.vmem [shape: bf16[256,128], index: 5, kind: output, shape index: {}]  }
   0x1   :  { %v2156_v1 = vld [vmem:[%s3430_s0 + $0x60] sm:$0xff]   ;;  %v2202_v20 = vld [vmem:[%s3430_s0 + $0x48] sm:$0xff]   ;;  %v2258_v42 = vld [vmem:[%s3430_s0 + $0x50] sm:$0xff]  }
   0x2   :  { %v2161_v2 = vld [vmem:[%s3430_s0 + $0x40] sm:$0xff]   ;;  %v1745_v4 = vunpack.c.l.bf16 %v2156_v1  ;;  %v89_v5 = vand.u32 127, %v88_v0  ;;  %v1746_v13 = vunpack.c.h.bf16 %v2156_v1  ;;  %v1733_v23 = vunpack.c.l.bf16 %v2202_v20  ;;  %v2219_v27 = vld [vmem:[%s3430_s0 + $0x68] sm:$0xff]   ;;  %v2275_v49 = vld [vmem:[%s3430_s0 + $0x70] sm:$0xff]  }
   0x3   :  { %v2166_v3 = vld [vmem:[%s3430_s0] sm:$0xff]   ;;  %v1729_v6 = vunpack.c.l.bf16 %v2161_v2  ;;  %v1730_v14 = vunpack.c.h.bf16 %v2161_v2  ;;  %v1749_v28 = vunpack.c.l.bf16 %v2219_v27  ;;  %v1734_v29 = vunpack.c.h.bf16 %v2202_v20  ;;  %v2236_v34 = vld [vmem:[%s3430_s0 + $0x8] sm:$0xff]   ;;  %v2280_v50 = vld [vmem:[%s3430_s0 + $0x10] sm:$0xff]  }
   0x4   :  { %v1697_v7 = vunpack.c.l.bf16 %v2166_v3  ;;  %vm90_vm0 = vcmp.lt.s32.totalorder %v89_v5, 32  ;;  %v1698_v15 = vunpack.c.h.bf16 %v2166_v3  ;;  %v2197_v19 = vld [vmem:[%s3430_s0 + $0x20] sm:$0xff]   ;;  %v1750_v30 = vunpack.c.h.bf16 %v2219_v27  ;;  %v2241_v35 = vld [vmem:[%s3430_s0 + $0x28] sm:$0xff]   ;;  %v2297_v57 = vld [vmem:[%s3430_s0 + $0x30] sm:$0xff]  }
   0x5   :  { %v2171_v9 = vsel %vm90_vm0, 1.0, %v2122_v8  ;;  %v1714_v21 = vunpack.c.h.bf16 %v2197_v19  ;;  %v1713_v22 = vunpack.c.l.bf16 %v2197_v19  ;;  %v1702_v36 = vunpack.c.h.bf16 %v2236_v34  ;;  %v2314_v0 = vld [vmem:[%s3430_s0 + $0x58] sm:$0xff]  }
   0x6   :  { %v117_v10 = vmul.f32 %v1745_v4, %v2171_v9  ;;  %v109_v11 = vmul.f32 %v1729_v6, %v2171_v9  ;;  %v93_v12 = vmul.f32 %v1697_v7, %v2171_v9  ;;  %v118_v16 = vmul.f32 %v1746_v13, %v2171_v9  ;;  %v2319_v5 = vld [vmem:[%s3430_s0 + $0x78] sm:$0xff]  }
   0x7   :  { %v110_v17 = vmul.f32 %v1730_v14, %v2171_v9  ;;  %v94_v18 = vmul.f32 %v1698_v15, %v2171_v9  ;;  %v102_v24 = vmul.f32 %v1714_v21, %v2171_v9  ;;  %v101_v25 = vmul.f32 %v1713_v22, %v2171_v9 }
   0x8   :  { %173 = vadd.xlane.f32.xlu1 %v117_v10  ;;  %157 = vadd.xlane.f32.xlu0 %v109_v11  ;;  %v111_v26 = vmul.f32 %v1733_v23, %v2171_v9  ;;  %v119_v31 = vmul.f32 %v1749_v28, %v2171_v9  ;;  %v112_v32 = vmul.f32 %v1734_v29, %v2171_v9  ;;  %v1701_v37 = vunpack.c.l.bf16 %v2236_v34 }
   0x9   :  { %125 = vadd.xlane.f32.xlu2 %v93_v12  ;;  %v120_v33 = vmul.f32 %v1750_v30, %v2171_v9  ;;  %v1717_v38 = vunpack.c.l.bf16 %v2241_v35  ;;  %v96_v39 = vmul.f32 %v1702_v36, %v2171_v9  ;;  %v1737_v43 = vunpack.c.l.bf16 %v2258_v42 }
   0xa   :  { %v95_v40 = vmul.f32 %v1701_v37, %v2171_v9  ;;  %v1718_v44 = vunpack.c.h.bf16 %v2241_v35  ;;  %v1738_v45 = vunpack.c.h.bf16 %v2258_v42  ;;  %v1754_v51 = vunpack.c.h.bf16 %v2275_v49 }
   0xb   :  { %v103_v41 = vmul.f32 %v1717_v38, %v2171_v9  ;;  %v113_v46 = vmul.f32 %v1737_v43, %v2171_v9  ;;  %v1753_v52 = vunpack.c.l.bf16 %v2275_v49  ;;  %v1705_v53 = vunpack.c.l.bf16 %v2280_v50 }
   0xc   :  { %v104_v47 = vmul.f32 %v1718_v44, %v2171_v9  ;;  %v114_v48 = vmul.f32 %v1738_v45, %v2171_v9  ;;  %v122_v54 = vmul.f32 %v1754_v51, %v2171_v9  ;;  %v1721_v58 = vunpack.c.l.bf16 %v2297_v57 }
   0xd   :  { %v121_v55 = vmul.f32 %v1753_v52, %v2171_v9  ;;  %v97_v56 = vmul.f32 %v1705_v53, %v2171_v9  ;;  %v1706_v59 = vunpack.c.h.bf16 %v2280_v50  ;;  %v1722_v60 = vunpack.c.h.bf16 %v2297_v57 }
   0xe   :  { %v105_v61 = vmul.f32 %v1721_v58, %v2171_v9  ;;  %v1742_v8 = vunpack.c.h.bf16 %v2314_v0  ;;  %v1741_v10 = vunpack.c.l.bf16 %v2314_v0  ;;  %v1757_v11 = vunpack.c.l.bf16 %v2319_v5 }
   0xf   :  { %v98_v62 = vmul.f32 %v1706_v59, %v2171_v9  ;;  %v106_v63 = vmul.f32 %v1722_v60, %v2171_v9 }
  0x10   :  { %175 = vadd.xlane.f32.xlu1 %v118_v16  ;;  %159 = vadd.xlane.f32.xlu0 %v110_v17  ;;  %v116_v12 = vmul.f32 %v1742_v8, %v2171_v9  ;;  %v115_v16 = vmul.f32 %v1741_v10, %v2171_v9  ;;  %v123_v17 = vmul.f32 %v1757_v11, %v2171_v9 }
  0x11   :  { %127 = vadd.xlane.f32.xlu2 %v94_v18  ;;  %v2336_v18 = vld [vmem:[%s3430_s0 + $0x38] sm:$0xff]  }
  0x18   :  { %143 = vadd.xlane.f32.xlu1 %v102_v24  ;;  %141 = vadd.xlane.f32.xlu0 %v101_v25  ;;  %v2341_v24 = vld [vmem:[%s3430_s0 + $0x18] sm:$0xff]   ;;  %v1758_v25 = vunpack.c.h.bf16 %v2319_v5 }
  0x19   :  { %161 = vadd.xlane.f32.xlu2 %v111_v26  ;;  %v1725_v26 = vunpack.c.l.bf16 %v2336_v18 }
  0x20   :  { %177 = vadd.xlane.f32.xlu1 %v119_v31  ;;  %163 = vadd.xlane.f32.xlu0 %v112_v32  ;;  %v1709_v31 = vunpack.c.l.bf16 %v2341_v24  ;;  %v124_v32 = vmul.f32 %v1758_v25, %v2171_v9 }
  0x21   :  { %179 = vadd.xlane.f32.xlu2 %v120_v33  ;;  %v107_v33 = vmul.f32 %v1725_v26, %v2171_v9 }
  0x28   :  { %131 = vadd.xlane.f32.xlu1 %v96_v39  ;;  %129 = vadd.xlane.f32.xlu0 %v95_v40  ;;  %v99_v39 = vmul.f32 %v1709_v31, %v2171_v9  ;;  %v1710_v40 = vunpack.c.h.bf16 %v2341_v24 }
  0x29   :  { %145 = vadd.xlane.f32.xlu2 %v103_v41  ;;  %v1726_v41 = vunpack.c.h.bf16 %v2336_v18  ;;  %v1694_v18 = vld [vmem:[%s3433_s1 + $0x38] sm:$0xff] }
  0x2a   :  { %1965 = vmatpush.bf16.msra.mxu2 %v1694_v18  ;;  %1966 = vmatpush.bf16.msra.mxu3 %v1694_v18 }
  0x2b   :  { %1129 = vmatpush.bf16.msra.mxu0 %v1694_v18  ;;  %1964 = vmatpush.bf16.msra.mxu1 %v1694_v18 }
  0x30   :  { %165 = vadd.xlane.f32.xlu1 %v113_v46  ;;  %147 = vadd.xlane.f32.xlu0 %v104_v47  ;;  %v100_v46 = vmul.f32 %v1710_v40, %v2171_v9  ;;  %v108_v47 = vmul.f32 %v1726_v41, %v2171_v9 }
  0x31   :  { %167 = vadd.xlane.f32.xlu2 %v114_v48 }
  0x38   :  { %183 = vadd.xlane.f32.xlu1 %v122_v54  ;;  %181 = vadd.xlane.f32.xlu0 %v121_v55 }
  0x39   :  { %133 = vadd.xlane.f32.xlu2 %v97_v56 }
  0x40   :  { %149 = vadd.xlane.f32.xlu1 %v105_v61  ;;  %135 = vadd.xlane.f32.xlu0 %v98_v62 }
  0x41   :  { %151 = vadd.xlane.f32.xlu2 %v106_v63 }
  0x48   :  { %171 = vadd.xlane.f32.xlu1 %v116_v12  ;;  %169 = vadd.xlane.f32.xlu0 %v115_v16 }
  0x49   :  { %185 = vadd.xlane.f32.xlu2 %v123_v17 }
  0x50   :  { %187 = vadd.xlane.f32.xlu0 %v124_v32  ;;  %153 = vadd.xlane.f32.xlu1 %v107_v33 }
  0x51   :  { %137 = vadd.xlane.f32.xlu2 %v99_v39 }
  0x58   :  { %139 = vadd.xlane.f32.xlu0 %v100_v46 }
  0x59   :  { %155 = vadd.xlane.f32.xlu2 %v108_v47 }
  0x7b   :  { %v174_v48 = vpop.xlane.xlu1 %173  ;;  %v158_v54 = vpop.xlane.xlu0 %157 }
  0x7c   :  { %v213_v55 = vmul.f32 0.03125, %v174_v48  ;;  %v205_v56 = vmul.f32 0.03125, %v158_v54  ;;  %v126_v61 = vpop.xlane.xlu2 %125 }
  0x7d   :  { %v189_v12 = vmul.f32 0.03125, %v126_v61 }
  0x7e   :  { %v245_v62 = vsub.f32 %v1745_v4, %v213_v55  ;;  %v237_v63 = vsub.f32 %v1729_v6, %v205_v56 }
  0x7f   :  { %v221_v39 = vsub.f32 %v1697_v7, %v189_v12 }
  0x80   :  { %v2368_v16 = vmul.f32 %v2171_v9, %v237_v63  ;;  %v2371_v17 = vmul.f32 %v2171_v9, %v245_v62 }
  0x81   :  { %v2384_v61 = vmul.f32 %v2171_v9, %v221_v39 }
  0x82   :  { %v301_v32 = vmul.f32 %v2368_v16, %v2368_v16  ;;  %v309_v33 = vmul.f32 %v2371_v17, %v2371_v17 }
  0x83   :  { %v176_v4 = vpop.xlane.xlu1 %175  ;;  %v160_v46 = vpop.xlane.xlu0 %159  ;;  %v285_v12 = vmul.f32 %v2384_v61, %v2384_v61 }
  0x84   :  { %v214_v47 = vmul.f32 0.03125, %v176_v4  ;;  %v206_v6 = vmul.f32 0.03125, %v160_v46  ;;  %v128_v48 = vpop.xlane.xlu2 %127  ;;  %349 = vadd.xlane.f32.xlu1 %v301_v32  ;;  %365 = vadd.xlane.f32.xlu0 %v309_v33 }
  0x85   :  { %v190_v56 = vmul.f32 0.03125, %v128_v48 }
  0x86   :  { %v246_v54 = vsub.f32 %v1746_v13, %v214_v47  ;;  %v238_v55 = vsub.f32 %v1730_v14, %v206_v6 }
  0x87   :  { %v222_v63 = vsub.f32 %v1698_v15, %v190_v56 }
  0x88   :  { %v2387_v62 = vmul.f32 %v2171_v9, %v246_v54  ;;  %v2390_v7 = vmul.f32 %v2171_v9, %v238_v55 }
  0x89   :  { %v2405_v46 = vmul.f32 %v2171_v9, %v222_v63 }
  0x8a   :  { %v310_v1 = vmul.f32 %v2387_v62, %v2387_v62  ;;  %v302_v2 = vmul.f32 %v2390_v7, %v2390_v7 }
  0x8b   :  { %v144_v13 = vpop.xlane.xlu1 %143  ;;  %v142_v14 = vpop.xlane.xlu0 %141 }
  0x8c   :  { %v198_v32 = vmul.f32 0.03125, %v144_v13  ;;  %v197_v33 = vmul.f32 0.03125, %v142_v14  ;;  %v162_v39 = vpop.xlane.xlu2 %161  ;;  %367 = vadd.xlane.f32.xlu1 %v310_v1  ;;  %351 = vadd.xlane.f32.xlu2 %v302_v2 }
  0x8d   :  { %317 = vadd.xlane.f32.xlu0 %v285_v12  ;;  %v207_v4 = vmul.f32 0.03125, %v162_v39 }
  0x8e   :  { %v230_v3 = vsub.f32 %v1714_v21, %v198_v32  ;;  %v229_v15 = vsub.f32 %v1713_v22, %v197_v33  ;;  %v286_v21 = vmul.f32 %v2405_v46, %v2405_v46 }
  0x8f   :  { %v239_v48 = vsub.f32 %v1733_v23, %v207_v4 }
  0x90   :  { %v2408_v47 = vmul.f32 %v2171_v9, %v229_v15  ;;  %v2411_v6 = vmul.f32 %v2171_v9, %v230_v3 }
  0x91   :  { %v2426_v14 = vmul.f32 %v2171_v9, %v239_v48 }
  0x92   :  { %v293_v54 = vmul.f32 %v2408_v47, %v2408_v47  ;;  %v294_v19 = vmul.f32 %v2411_v6, %v2411_v6 }
  0x93   :  { %v178_v22 = vpop.xlane.xlu1 %177  ;;  %v164_v55 = vpop.xlane.xlu0 %163 }
  0x94   :  { %v215_v56 = vmul.f32 0.03125, %v178_v22  ;;  %v208_v63 = vmul.f32 0.03125, %v164_v55  ;;  %v180_v1 = vpop.xlane.xlu2 %179  ;;  %333 = vadd.xlane.f32.xlu2 %v293_v54  ;;  %319 = vadd.xlane.f32.xlu1 %v286_v21 }
  0x95   :  { %335 = vadd.xlane.f32.xlu0 %v294_v19  ;;  %v216_v13 = vmul.f32 0.03125, %v180_v1 }
  0x96   :  { %v247_v23 = vsub.f32 %v1749_v28, %v215_v56  ;;  %v240_v2 = vsub.f32 %v1734_v29, %v208_v63  ;;  %v303_v28 = vmul.f32 %v2426_v14, %v2426_v14 }
  0x97   :  { %v248_v33 = vsub.f32 %v1750_v30, %v216_v13 }
  0x98   :  { %v2429_v12 = vmul.f32 %v2171_v9, %v240_v2  ;;  %v2432_v32 = vmul.f32 %v2171_v9, %v247_v23 }
  0x99   :  { %v2447_v19 = vmul.f32 %v2171_v9, %v248_v33 }
  0x9a   :  { %v304_v39 = vmul.f32 %v2429_v12, %v2429_v12  ;;  %v311_v20 = vmul.f32 %v2432_v32, %v2432_v32 }
  0x9b   :  { %v132_v29 = vpop.xlane.xlu1 %131  ;;  %v130_v3 = vpop.xlane.xlu0 %129 }
  0x9c   :  { %v192_v15 = vmul.f32 0.03125, %v132_v29  ;;  %v191_v4 = vmul.f32 0.03125, %v130_v3  ;;  %v146_v48 = vpop.xlane.xlu2 %145  ;;  %355 = vadd.xlane.f32.xlu2 %v304_v39  ;;  %353 = vadd.xlane.f32.xlu1 %v303_v28 }
  0x9d   :  { %369 = vadd.xlane.f32.xlu0 %v311_v20  ;;  %v199_v54 = vmul.f32 0.03125, %v146_v48 }
  0x9e   :  { %v224_v27 = vsub.f32 %v1702_v36, %v192_v15  ;;  %v223_v30 = vsub.f32 %v1701_v37, %v191_v4  ;;  %v312_v36 = vmul.f32 %v2447_v19, %v2447_v19 }
  0x9f   :  { %v231_v55 = vsub.f32 %v1717_v38, %v199_v54 }
  0xa0   :  { %v2450_v21 = vmul.f32 %v2171_v9, %v223_v30  ;;  %v2453_v22 = vmul.f32 %v2171_v9, %v224_v27 }
  0xa1   :  { %v2468_v39 = vmul.f32 %v2171_v9, %v231_v55 }
  0xa2   :  { %v287_v56 = vmul.f32 %v2450_v21, %v2450_v21  ;;  %v288_v34 = vmul.f32 %v2453_v22, %v2453_v22 }
  0xa3   :  { %v166_v37 = vpop.xlane.xlu1 %165  ;;  %v148_v63 = vpop.xlane.xlu0 %147 }
  0xa4   :  { %v209_v1 = vmul.f32 0.03125, %v166_v37  ;;  %v200_v23 = vmul.f32 0.03125, %v148_v63  ;;  %v168_v2 = vpop.xlane.xlu2 %167  ;;  %321 = vadd.xlane.f32.xlu2 %v287_v56  ;;  %371 = vadd.xlane.f32.xlu1 %v312_v36 }
  0xa5   :  { %323 = vadd.xlane.f32.xlu0 %v288_v34  ;;  %v210_v33 = vmul.f32 0.03125, %v168_v2 }
  0xa6   :  { %v241_v38 = vsub.f32 %v1737_v43, %v209_v1  ;;  %v232_v13 = vsub.f32 %v1718_v44, %v200_v23  ;;  %v295_v43 = vmul.f32 %v2468_v39, %v2468_v39 }
  0xa7   :  { %v242_v29 = vsub.f32 %v1738_v45, %v210_v33 }
  0xa8   :  { %v2471_v20 = vmul.f32 %v2171_v9, %v232_v13  ;;  %v2474_v28 = vmul.f32 %v2171_v9, %v241_v38 }
  0xa9   :  { %v2489_v54 = vmul.f32 %v2171_v9, %v242_v29 }
  0xaa   :  { %v296_v3 = vmul.f32 %v2471_v20, %v2471_v20  ;;  %v305_v35 = vmul.f32 %v2474_v28, %v2474_v28 }
  0xab   :  { %v184_v44 = vpop.xlane.xlu1 %183  ;;  %v182_v15 = vpop.xlane.xlu0 %181 }
  0xac   :  { %v218_v4 = vmul.f32 0.03125, %v184_v44  ;;  %v217_v48 = vmul.f32 0.03125, %v182_v15  ;;  %v134_v27 = vpop.xlane.xlu2 %133  ;;  %339 = vadd.xlane.f32.xlu2 %v296_v3  ;;  %337 = vadd.xlane.f32.xlu1 %v295_v43 }
  0xad   :  { %357 = vadd.xlane.f32.xlu0 %v305_v35  ;;  %v193_v30 = vmul.f32 0.03125, %v134_v27 }
  0xae   :  { %v250_v42 = vsub.f32 %v1754_v51, %v218_v4  ;;  %v249_v45 = vsub.f32 %v1753_v52, %v217_v48  ;;  %v306_v51 = vmul.f32 %v2489_v54, %v2489_v54 }
  0xaf   :  { %v225_v34 = vsub.f32 %v1705_v53, %v193_v30 }
  0xb0   :  { %v2492_v55 = vmul.f32 %v2171_v9, %v249_v45  ;;  %v2495_v56 = vmul.f32 %v2171_v9, %v250_v42 }
  0xb1   :  { %v2510_v13 = vmul.f32 %v2171_v9, %v225_v34 }
  0xb2   :  { %v313_v36 = vmul.f32 %v2492_v55, %v2492_v55  ;;  %v314_v49 = vmul.f32 %v2495_v56, %v2495_v56 }
  0xb3   :  { %v150_v52 = vpop.xlane.xlu1 %149  ;;  %v136_v37 = vpop.xlane.xlu0 %135 }
  0xb4   :  { %v201_v63 = vmul.f32 0.03125, %v150_v52  ;;  %v194_v1 = vmul.f32 0.03125, %v136_v37  ;;  %v152_v23 = vpop.xlane.xlu2 %151  ;;  %373 = vadd.xlane.f32.xlu2 %v313_v36  ;;  %359 = vadd.xlane.f32.xlu1 %v306_v51 }
  0xb5   :  { %375 = vadd.xlane.f32.xlu0 %v314_v49  ;;  %v202_v38 = vmul.f32 0.03125, %v152_v23 }
  0xb6   :  { %v233_v53 = vsub.f32 %v1721_v58, %v201_v63  ;;  %v226_v2 = vsub.f32 %v1706_v59, %v194_v1  ;;  %v289_v58 = vmul.f32 %v2510_v13, %v2510_v13 }
  0xb7   :  { %v234_v3 = vsub.f32 %v1722_v60, %v202_v38 }
  0xb8   :  { %v2513_v33 = vmul.f32 %v2171_v9, %v226_v2  ;;  %v2516_v29 = vmul.f32 %v2171_v9, %v233_v53 }
  0xb9   :  { %v2531_v27 = vmul.f32 %v2171_v9, %v234_v3 }
  0xba   :  { %v290_v35 = vmul.f32 %v2513_v33, %v2513_v33  ;;  %v297_v50 = vmul.f32 %v2516_v29, %v2516_v29 }
  0xbb   :  { %v172_v59 = vpop.xlane.xlu1 %171  ;;  %v170_v43 = vpop.xlane.xlu0 %169 }
  0xbc   :  { %v212_v44 = vmul.f32 0.03125, %v172_v59  ;;  %v211_v15 = vmul.f32 0.03125, %v170_v43  ;;  %v186_v4 = vpop.xlane.xlu2 %185  ;;  %327 = vadd.xlane.f32.xlu2 %v290_v35  ;;  %325 = vadd.xlane.f32.xlu1 %v289_v58 }
  0xbd   :  { %341 = vadd.xlane.f32.xlu0 %v297_v50  ;;  %v219_v48 = vmul.f32 0.03125, %v186_v4 }
  0xbe   :  { %v244_v57 = vsub.f32 %v1742_v8, %v212_v44  ;;  %v243_v60 = vsub.f32 %v1741_v10, %v211_v15  ;;  %v298_v8 = vmul.f32 %v2531_v27, %v2531_v27 }
  0xbf   :  { %v251_v30 = vsub.f32 %v1757_v11, %v219_v48 }
  0xc0   :  { %v2534_v42 = vmul.f32 %v2171_v9, %v243_v60  ;;  %v2537_v45 = vmul.f32 %v2171_v9, %v244_v57 }
  0xc1   :  { %v2550_v63 = vmul.f32 %v2171_v9, %v251_v30 }
  0xc2   :  { %v307_v34 = vmul.f32 %v2534_v42, %v2534_v42  ;;  %v308_v0 = vmul.f32 %v2537_v45, %v2537_v45 }
  0xc3   :  { %v188_v10 = vpop.xlane.xlu0 %187  ;;  %v154_v36 = vpop.xlane.xlu1 %153  ;;  %v315_v5 = vmul.f32 %v2550_v63, %v2550_v63 }
  0xc4   :  { %v220_v49 = vmul.f32 0.03125, %v188_v10  ;;  %v138_v51 = vpop.xlane.xlu2 %137  ;;  %361 = vadd.xlane.f32.xlu2 %v307_v34  ;;  %343 = vadd.xlane.f32.xlu1 %v298_v8  ;;  %v203_v52 = vmul.f32 0.03125, %v154_v36  ;;  %v1692_v34 = vld [vmem:[%s3433_s1 + $0x28] sm:$0xff] }
  0xc5   :  { %v195_v37 = vmul.f32 0.03125, %v138_v51  ;;  %363 = vadd.xlane.f32.xlu0 %v308_v0  ;;  %v1691_v0 = vld [vmem:[%s3433_s1 + $0x20] sm:$0xff] }
  0xc6   :  { %v252_v11 = vsub.f32 %v1758_v25, %v220_v49  ;;  %v235_v23 = vsub.f32 %v1725_v26, %v203_v52 }
  0xc7   :  { %v227_v1 = vsub.f32 %v1709_v31, %v195_v37 }
  0xc8   :  { %v2557_v53 = vmul.f32 %v2171_v9, %v252_v11  ;;  %v2569_v26 = vmul.f32 %v2171_v9, %v235_v23 }
  0xc9   :  { %v2560_v2 = vmul.f32 %v2171_v9, %v227_v1 }
  0xca   :  { %v316_v38 = vmul.f32 %v2557_v53, %v2557_v53  ;;  %v299_v43 = vmul.f32 %v2569_v26, %v2569_v26 }
  0xcb   :  { %v140_v25 = vpop.xlane.xlu0 %139  ;;  %v291_v3 = vmul.f32 %v2560_v2, %v2560_v2 }
  0xcc   :  { %v196_v31 = vmul.f32 0.03125, %v140_v25  ;;  %v156_v35 = vpop.xlane.xlu2 %155  ;;  %379 = vadd.xlane.f32.xlu2 %v316_v38  ;;  %377 = vadd.xlane.f32.xlu1 %v315_v5 }
  0xcd   :  { %v204_v50 = vmul.f32 0.03125, %v156_v35  ;;  %329 = vadd.xlane.f32.xlu0 %v291_v3 }
  0xce   :  { %v228_v58 = vsub.f32 %v1710_v40, %v196_v31  ;;  %v1690_v31 = vld [vmem:[%s3433_s1 + $0x18] sm:$0xff] }
  0xcf   :  { %v236_v59 = vsub.f32 %v1726_v41, %v204_v50 }
  0xd0   :  { %v2578_v44 = vmul.f32 %v2171_v9, %v228_v58 }
  0xd1   :  { %v2581_v15 = vmul.f32 %v2171_v9, %v236_v59  ;;  %v1693_v9 = vld [vmem:[%s3433_s1 + $0x30] sm:$0xff] }
  0xd2   :  { %v292_v4 = vmul.f32 %v2578_v44, %v2578_v44  ;;  %1968 = vmatpush.bf16.msra.mxu2 %v1693_v9  ;;  %1969 = vmatpush.bf16.msra.mxu3 %v1693_v9 }
  0xd3   :  { %v300_v57 = vmul.f32 %v2581_v15, %v2581_v15  ;;  %1130 = vmatpush.bf16.msra.mxu0 %v1693_v9  ;;  %1967 = vmatpush.bf16.msra.mxu1 %v1693_v9 }
  0xd4   :  { %345 = vadd.xlane.f32.xlu2 %v299_v43  ;;  %331 = vadd.xlane.f32.xlu1 %v292_v4 }
  0xd5   :  { %347 = vadd.xlane.f32.xlu0 %v300_v57 }
  0xd6   :  { %1971 = vmatpush.bf16.msra.mxu2 %v1692_v34  ;;  %1972 = vmatpush.bf16.msra.mxu3 %v1692_v34 }
  0xd7   :  { %1131 = vmatpush.bf16.msra.mxu0 %v1692_v34  ;;  %1970 = vmatpush.bf16.msra.mxu1 %v1692_v34 }
  0xda   :  { %1974 = vmatpush.bf16.msra.mxu2 %v1691_v0  ;;  %1975 = vmatpush.bf16.msra.mxu3 %v1691_v0 }
  0xdb   :  { %1132 = vmatpush.bf16.msra.mxu0 %v1691_v0  ;;  %1973 = vmatpush.bf16.msra.mxu1 %v1691_v0 }
  0xde   :  { %1977 = vmatpush.bf16.msra.mxu2 %v1690_v31  ;;  %1978 = vmatpush.bf16.msra.mxu3 %v1690_v31 }
  0xdf   :  { %1133 = vmatpush.bf16.msra.mxu0 %v1690_v31  ;;  %1976 = vmatpush.bf16.msra.mxu1 %v1690_v31 }
  0xf7   :  { %v350_v24 = vpop.xlane.xlu1 %349  ;;  %v366_v40 = vpop.xlane.xlu0 %365 }
  0xf8   :  { %v397_v41 = vmul.f32 0.03125, %v350_v24  ;;  %v405_v60 = vmul.f32 0.03125, %v366_v40  ;;  %v1689_v40 = vld [vmem:[%s3433_s1 + $0x10] sm:$0xff] }
  0xf9   :  { %1980 = vmatpush.bf16.msra.mxu2 %v1689_v40  ;;  %1981 = vmatpush.bf16.msra.mxu3 %v1689_v40 }
  0xfa   :  { %v429_v48 = vadd.f32 1e-06, %v397_v41  ;;  %v2593_v30 = vadd.f32 1e-06, %v405_v60  ;;  %1134 = vmatpush.bf16.msra.mxu0 %v1689_v40  ;;  %1979 = vmatpush.bf16.msra.mxu1 %v1689_v40  ;;  %v1687_v40 = vld [vmem:[%s3433_s1] sm:$0xff] }
  0xfc   :  { %1992 = vrsqrt.f32 %v429_v48  ;;  %vm611_vm2 = vweird.f32 %v429_v48  ;;  %vm691_vm4 = vweird.f32 %v2593_v30 }
  0xfd   :  { %1994 = vrsqrt.f32 %v2593_v30 }
  0xff   :  { %v368_v8 = vpop.xlane.xlu1 %367  ;;  %v352_v10 = vpop.xlane.xlu2 %351 }
 0x100   :  { %v406_v36 = vmul.f32 0.03125, %v368_v8  ;;  %v318_v49 = vpop.xlane.xlu0 %317  ;;  %v398_v51 = vmul.f32 0.03125, %v352_v10 }
 0x101   :  { %v381_v52 = vmul.f32 0.03125, %v318_v49 }
 0x102   :  { %v1993_v37 = vpop.eup %1992  ;;  %v2602_v11 = vadd.f32 1e-06, %v406_v36  ;;  %v2604_v1 = vadd.f32 1e-06, %v398_v51 }
 0x103   :  { %v2606_v23 = vpop.eup %1994  ;;  %v606_v38 = vmul.f32 %v1993_v37, %v429_v48  ;;  %v2608_v5 = vadd.f32 1e-06, %v381_v52  ;;  %vm612_vm1 = vweird.f32 %v1993_v37  ;;  %v2689_v48 = vld [vmem:[%s3432_s4] ss:$0 sm:$0xff] }
 0x104   :  { %v686_v25 = vmul.f32 %v2606_v23, %v2593_v30  ;;  %1996 = vrsqrt.f32 %v2602_v11  ;;  %vm692_vm3 = vweird.f32 %v2606_v23  ;;  %vm2637_vm5 = vmor %vm611_vm2, %vm612_vm1  ;;  %vm701_vm7 = vweird.f32 %v2602_v11 }
 0x105   :  { %v607_v3 = vmul.f32 %v1993_v37, %v606_v38  ;;  %1998 = vrsqrt.f32 %v2608_v5  ;;  %vm2651_vm6 = vmor %vm691_vm4, %vm692_vm3  ;;  %vm451_vm8 = vweird.f32 %v2608_v5  ;;  %vm621_vm9 = vweird.f32 %v2604_v1 }
 0x106   :  { %v687_v35 = vmul.f32 %v2606_v23, %v686_v25  ;;  %2000 = vrsqrt.f32 %v2604_v1 }
 0x107   :  { %v608_v50 = vmul.f32 0.5, %v607_v3  ;;  %v320_v58 = vpop.xlane.xlu1 %319  ;;  %v334_v59 = vpop.xlane.xlu2 %333 }
 0x108   :  { %v688_v43 = vmul.f32 0.5, %v687_v35  ;;  %v336_v4 = vpop.xlane.xlu0 %335  ;;  %v382_v57 = vmul.f32 0.03125, %v320_v58  ;;  %v389_v18 = vmul.f32 0.03125, %v334_v59  ;;  %v1688_v35 = vld [vmem:[%s3433_s1 + $0x8] sm:$0xff]  ;;  %v2670_v58 = vld [vmem:[%s3431_s3] ss:$0 sm:$0xff] }
 0x109   :  { %v609_v9 = vsub.f32 1.5, %v608_v50  ;;  %v390_v24 = vmul.f32 0.03125, %v336_v4  ;;  %1983 = vmatpush.bf16.msra.mxu2 %v1688_v35  ;;  %1984 = vmatpush.bf16.msra.mxu3 %v1688_v35 }
 0x10a   :  { %v2622_v41 = vpop.eup %1996  ;;  %v689_v60 = vsub.f32 1.5, %v688_v43  ;;  %v2625_v34 = vadd.f32 1e-06, %v382_v57  ;;  %v2645_v30 = vadd.f32 1e-06, %v389_v18  ;;  %1135 = vmatpush.bf16.msra.mxu0 %v1688_v35  ;;  %1982 = vmatpush.bf16.msra.mxu1 %v1688_v35 }
 0x10b   :  { %v2627_v0 = vpop.eup %1998  ;;  %v610_v8 = vmul.f32 %v1993_v37, %v609_v9  ;;  %v696_v10 = vmul.f32 %v2622_v41, %v2602_v11  ;;  %v2632_v36 = vadd.f32 1e-06, %v390_v24  ;;  %vm702_vm10 = vweird.f32 %v2622_v41 }
 0x10c   :  { %v2634_v49 = vpop.eup %2000  ;;  %v690_v51 = vmul.f32 %v2606_v23, %v689_v60  ;;  %v446_v52 = vmul.f32 %v2627_v0, %v2608_v5  ;;  %2002 = vrsqrt.f32 %v2625_v34  ;;  %vm452_vm11 = vweird.f32 %v2627_v0  ;;  %vm703_vm13 = vmor %vm701_vm7, %vm702_vm10 }
 0x10d   :  { %v614_v38 = vsel %vm2637_vm5, %v1993_v37, %v610_v8  ;;  %v697_v3 = vmul.f32 %v2622_v41, %v696_v10  ;;  %v616_v31 = vmul.f32 %v2634_v49, %v2604_v1  ;;  %2004 = vrsqrt.f32 %v2632_v36  ;;  %1986 = vmatpush.bf16.msra.mxu2 %v1687_v40  ;;  %1987 = vmatpush.bf16.msra.mxu3 %v1687_v40  ;;  %vm2711_vm15 = vmor %vm451_vm8, %vm452_vm11 }
 0x10e   :  { %v694_v50 = vsel %vm2651_vm6, %v2606_v23, %v690_v51  ;;  %v447_v37 = vmul.f32 %v2627_v0, %v446_v52  ;;  %v781_v59 = vmul.f32 %v614_v38, %v2368_v16  ;;  %2006 = vrsqrt.f32 %v2645_v30  ;;  %1136 = vmatpush.bf16.msra.mxu0 %v1687_v40  ;;  %1985 = vmatpush.bf16.msra.mxu1 %v1687_v40 }
 0x10f   :  { %v698_v43 = vmul.f32 0.5, %v697_v3  ;;  %v617_v4 = vmul.f32 %v2634_v49, %v616_v31  ;;  %v354_v57 = vpop.xlane.xlu1 %353  ;;  %v789_v23 = vmul.f32 %v694_v50, %v2371_v17  ;;  %vm622_vm12 = vweird.f32 %v2634_v49  ;;  %v356_v3 = vpop.xlane.xlu2 %355 }
 0x110   :  { %v448_v18 = vmul.f32 0.5, %v447_v37  ;;  %v370_v9 = vpop.xlane.xlu0 %369  ;;  %v399_v10 = vmul.f32 0.03125, %v354_v57  ;;  %v817_v51 = vmul.f32 %v2670_v58, %v781_v59  ;;  %vm461_vm14 = vweird.f32 %v2625_v34  ;;  %vm623_vm1 = vmor %vm621_vm9, %vm622_vm12 }
 0x111   :  { %v699_v24 = vsub.f32 1.5, %v698_v43  ;;  %v618_v16 = vmul.f32 0.5, %v617_v4  ;;  %v407_v8 = vmul.f32 0.03125, %v370_v9  ;;  %v825_v35 = vmul.f32 %v2670_v58, %v789_v23 }
 0x112   :  { %v2683_v60 = vpop.eup %2002  ;;  %v449_v17 = vsub.f32 1.5, %v448_v18  ;;  %vm541_vm0 = vweird.f32 %v2632_v36  ;;  %v2719_v57 = vadd.f32 1e-06, %v399_v10  ;;  %v853_v9 = vadd.f32 %v2689_v48, %v817_v51 }
 0x113   :  { %v700_v52 = vmul.f32 %v2622_v41, %v699_v24  ;;  %v619_v38 = vsub.f32 1.5, %v618_v16  ;;  %v456_v25 = vmul.f32 %v2683_v60, %v2625_v34  ;;  %v2695_v31 = vpop.eup %2004  ;;  %v2704_v37 = vadd.f32 1e-06, %v407_v8 }
 0x114   :  { %v450_v50 = vmul.f32 %v2627_v0, %v449_v17  ;;  %v536_v4 = vmul.f32 %v2695_v31, %v2632_v36  ;;  %v2721_v23 = vpop.eup %2006  ;;  %vm531_vm2 = vweird.f32 %v2645_v30  ;;  %v861_v40 = vadd.f32 %v2689_v48, %v825_v35 }
 0x115   :  { %v704_v59 = vsel %vm703_vm13, %v2622_v41, %v700_v52  ;;  %v620_v11 = vmul.f32 %v2634_v49, %v619_v38  ;;  %v457_v18 = vmul.f32 %v2683_v60, %v456_v25  ;;  %2008 = vrsqrt.f32 %v2704_v37 }
 0x116   :  { %v790_v41 = vmul.f32 %v704_v59, %v2387_v62  ;;  %v454_v5 = vsel %vm2711_vm15, %v2627_v0, %v450_v50  ;;  %v537_v16 = vmul.f32 %v2695_v31, %v536_v4  ;;  %v526_v62 = vmul.f32 %v2721_v23, %v2645_v30 }
 0x117   :  { %v624_v24 = vsel %vm623_vm1, %v2634_v49, %v620_v11  ;;  %v372_v0 = vpop.xlane.xlu1 %371  ;;  %v458_v8 = vmul.f32 0.5, %v457_v18  ;;  %v765_v51 = vmul.f32 %v454_v5, %v2384_v61  ;;  %vm462_vm3 = vweird.f32 %v2683_v60 }
 0x118   :  { %v826_v1 = vmul.f32 %v2670_v58, %v790_v41  ;;  %v782_v17 = vmul.f32 %v624_v24, %v2390_v7  ;;  %v324_v10 = vpop.xlane.xlu0 %323  ;;  %v538_v52 = vmul.f32 0.5, %v537_v16  ;;  %v527_v49 = vmul.f32 %v2721_v23, %v526_v62  ;;  %vm463_vm6 = vmor %vm461_vm14, %vm462_vm3  ;;  %v322_v16 = vpop.xlane.xlu2 %321 }
 0x119   :  { %v459_v50 = vsub.f32 1.5, %v458_v8  ;;  %2010 = vrsqrt.f32 %v2719_v57  ;;  %vm542_vm4 = vweird.f32 %v2695_v31  ;;  %vm532_vm5 = vweird.f32 %v2721_v23 }
 0x11a   :  { %v862_v38 = vadd.f32 %v2689_v48, %v826_v1  ;;  %v818_v25 = vmul.f32 %v2670_v58, %v782_v17  ;;  %v539_v35 = vsub.f32 1.5, %v538_v52  ;;  %v528_v7 = vmul.f32 0.5, %v527_v49  ;;  %vm543_vm7 = vmor %vm541_vm0, %vm542_vm4 }
 0x11b   :  { %v2750_v59 = vpop.eup %2008  ;;  %v460_v11 = vmul.f32 %v2683_v60, %v459_v50  ;;  %v400_v4 = vmul.f32 0.03125, %v356_v3  ;;  %v801_v41 = vmul.f32 %v2670_v58, %v765_v51  ;;  %v384_v1 = vmul.f32 0.03125, %v324_v10  ;;  %vm533_vm8 = vmor %vm531_vm2, %vm532_vm5 }
 0x11c   :  { %v1822_v61 = vpack.c.bf16 %v862_v38, %v861_v40  ;;  %v854_v43 = vadd.f32 %v2689_v48, %v818_v25  ;;  %v540_v5 = vmul.f32 %v2695_v31, %v539_v35  ;;  %v529_v18 = vsub.f32 1.5, %v528_v7 }
 0x11d   :  { %v706_v24 = vmul.f32 %v2750_v59, %v2704_v37  ;;  %v464_v3 = vsel %vm463_vm6, %v2683_v60, %v460_v11  ;;  %v2767_v40 = vadd.f32 1e-06, %v400_v4  ;;  %vm711_vm9 = vweird.f32 %v2704_v37 }
 0x11e   :  { %1945 = vst [vmem:[#allocation2 + $0x60] sm:$0xff] %v1822_v61   ;;  %v1802_v62 = vpack.c.bf16 %v854_v43, %v853_v9  ;;  %v544_v34 = vsel %vm543_vm7, %v2695_v31, %v540_v5  ;;  %v766_v17 = vmul.f32 %v464_v3, %v2405_v46  ;;  %v530_v8 = vmul.f32 %v2721_v23, %v529_v18 }
 0x11f   :  { %v707_v51 = vmul.f32 %v2750_v59, %v706_v24  ;;  %v338_v52 = vpop.xlane.xlu1 %337  ;;  %v2773_v9 = vpop.eup %2010  ;;  %v774_v36 = vmul.f32 %v544_v34, %v2411_v6  ;;  %2012 = vrsqrt.f32 %v2767_v40  ;;  %v2782_v46 = vadd.f32 1e-06, %v384_v1 }
 0x120   :  { %1941 = vst [vmem:[#allocation2 + $0x40] sm:$0xff] %v1802_v62   ;;  %v802_v60 = vmul.f32 %v2670_v58, %v766_v17  ;;  %v534_v31 = vsel %vm533_vm8, %v2721_v23, %v530_v8  ;;  %v626_v49 = vmul.f32 %v2773_v9, %v2719_v57  ;;  %v358_v6 = vpop.xlane.xlu0 %357  ;;  %v837_v38 = vadd.f32 %v2689_v48, %v801_v41  ;;  %v340_v8 = vpop.xlane.xlu2 %339 }
 0x121   :  { %v708_v10 = vmul.f32 0.5, %v707_v51  ;;  %v810_v30 = vmul.f32 %v2670_v58, %v774_v36  ;;  %v773_v25 = vmul.f32 %v534_v31, %v2408_v47  ;;  %2014 = vrsqrt.f32 %v2782_v46 }
 0x122   :  { %v838_v50 = vadd.f32 %v2689_v48, %v802_v60  ;;  %vm712_vm10 = vweird.f32 %v2750_v59  ;;  %v627_v23 = vmul.f32 %v2773_v9, %v626_v49  ;;  %v408_v43 = vmul.f32 0.03125, %v372_v0 }
 0x123   :  { %v709_v35 = vsub.f32 1.5, %v708_v10  ;;  %v846_v7 = vadd.f32 %v2689_v48, %v810_v30  ;;  %v809_v61 = vmul.f32 %v2670_v58, %v773_v25  ;;  %v383_v11 = vmul.f32 0.03125, %v322_v16  ;;  %vm713_vm12 = vmor %vm711_vm9, %vm712_vm10 }
 0x124   :  { %v1762_v4 = vpack.c.bf16 %v838_v50, %v837_v38  ;;  %v628_v5 = vmul.f32 0.5, %v627_v23  ;;  %vm632_vm11 = vweird.f32 %v2773_v9  ;;  %v2804_v62 = vadd.f32 1e-06, %v408_v43 }
 0x125   :  { %v710_v41 = vmul.f32 %v2750_v59, %v709_v35  ;;  %v1683_v47 = vld [vmem:[#allocation2 + $0x60] sm:$0xff]  ;;  %v2799_v18 = vpop.eup %2012  ;;  %v845_v24 = vadd.f32 %v2689_v48, %v809_v61  ;;  %v2806_v3 = vadd.f32 1e-06, %v383_v11  ;;  %v401_v0 = vmul.f32 0.03125, %v358_v6 }
 0x126   :  { %1763 = vst [vmem:[#allocation2 + $0x30] sm:$0xff] %v1762_v4   ;;  %v629_v1 = vsub.f32 1.5, %v628_v5  ;;  %v636_v34 = vmul.f32 %v2799_v18, %v2767_v40  ;;  %v391_v17 = vmul.f32 0.03125, %v338_v52  ;;  %1197 = vmatmul.bf16.vlgmr.msra.gmra.mxu3 %v1683_v47  ;;  %2016 = vrsqrt.f32 %v2804_v62 }
 0x127   :  { %v714_v16 = vsel %vm713_vm12, %v2750_v59, %v710_v41  ;;  %v1679_v51 = vld [vmem:[#allocation2 + $0x40] sm:$0xff]  ;;  %v2811_v36 = vpop.eup %2014  ;;  %v1782_v37 = vpack.c.bf16 %v846_v7, %v845_v24  ;;  %v360_v31 = vpop.xlane.xlu1 %359  ;;  %vm631_vm13 = vweird.f32 %v2719_v57  ;;  %2018 = vrsqrt.f32 %v2806_v3 }
 0x128   :  { %v791_v60 = vmul.f32 %v714_v16, %v2432_v32  ;;  %v630_v10 = vmul.f32 %v2773_v9, %v629_v1  ;;  %v637_v59 = vmul.f32 %v2799_v18, %v636_v34  ;;  %v476_v52 = vmul.f32 %v2811_v36, %v2782_v46  ;;  %1177 = vmatmul.bf16.vlgmr.msra.gmra.mxu2 %v1679_v51  ;;  %vm633_vm14 = vmor %vm631_vm13, %vm632_vm11  ;;  %v376_v30 = vpop.xlane.xlu0 %375 }
 0x129   :  { %1937 = vst [vmem:[#allocation2 + $0x50] sm:$0xff] %v1782_v37   ;;  %v2823_v32 = vadd.f32 1e-06, %v401_v0  ;;  %v2827_v57 = vadd.f32 1e-06, %v391_v17  ;;  %vm641_vm15 = vweird.f32 %v2767_v40  ;;  %vm642_vm0 = vweird.f32 %v2799_v18 }
 0x12a   :  { %v634_v49 = vsel %vm633_vm14, %v2773_v9, %v630_v10  ;;  %v638_v6 = vmul.f32 0.5, %v637_v59  ;;  %v477_v38 = vmul.f32 %v2811_v36, %v476_v52  ;;  %v827_v25 = vmul.f32 %v2670_v58, %v791_v60  ;;  %vm643_vm3 = vmor %vm641_vm15, %vm642_vm0 }
 0x12b   :  { %v783_v50 = vmul.f32 %v634_v49, %v2426_v14  ;;  %2020 = vrsqrt.f32 %v2823_v32  ;;  %vm481_vm1 = vweird.f32 %v2782_v46  ;;  %v392_v61 = vmul.f32 0.03125, %v340_v8  ;;  %v2861_v8 = vpop.xlane.xlu2 %373 }
 0x12c   :  { %v639_v35 = vsub.f32 1.5, %v638_v6  ;;  %v478_v23 = vmul.f32 0.5, %v477_v38  ;;  %2022 = vrsqrt.f32 %v2827_v57  ;;  %v2835_v9 = vpop.eup %2016  ;;  %v410_v43 = vmul.f32 0.03125, %v376_v30 }
 0x12d   :  { %v819_v7 = vmul.f32 %v2670_v58, %v783_v50  ;;  %v1671_v11 = vld [vmem:[#allocation2 + $0x30] sm:$0xff]  ;;  %vm482_vm2 = vweird.f32 %v2811_v36  ;;  %v716_v41 = vmul.f32 %v2835_v9, %v2804_v62  ;;  %v2843_v5 = vpop.eup %2018  ;;  %v2846_v47 = vadd.f32 %v2689_v48, %v827_v25 }
 0x12e   :  { %v640_v14 = vmul.f32 %v2799_v18, %v639_v35  ;;  %v479_v4 = vsub.f32 1.5, %v478_v23  ;;  %vm721_vm4 = vweird.f32 %v2804_v62  ;;  %v2853_v24 = vadd.f32 1e-06, %v392_v61  ;;  %1137 = vmatmul.bf16.vlgmr.msra.gmra.mxu0 %v1671_v11  ;;  %vm483_vm6 = vmor %vm481_vm1, %vm482_vm2 }
 0x12f   :  { %v402_v0 = vmul.f32 0.03125, %v360_v31  ;;  %v717_v34 = vmul.f32 %v2835_v9, %v716_v41  ;;  %v466_v17 = vmul.f32 %v2843_v5, %v2806_v3  ;;  %vm471_vm5 = vweird.f32 %v2806_v3  ;;  %v2874_v31 = vpop.xlane.xlu1 %325 }
 0x130   :  { %v644_v16 = vsel %vm643_vm3, %v2799_v18, %v640_v14  ;;  %v480_v1 = vmul.f32 %v2811_v36, %v479_v4  ;;  %v1675_v40 = vld [vmem:[#allocation2 + $0x50] sm:$0xff]  ;;  %v855_v37 = vadd.f32 %v2689_v48, %v819_v7  ;;  %2024 = vrsqrt.f32 %v2853_v24 }
 0x131   :  { %v2863_v51 = vpop.eup %2020  ;;  %v784_v60 = vmul.f32 %v644_v16, %v2429_v12  ;;  %v2872_v18 = vadd.f32 1e-06, %v410_v43  ;;  %v718_v52 = vmul.f32 0.5, %v717_v34  ;;  %v467_v49 = vmul.f32 %v2843_v5, %v466_v17  ;;  %1157 = vmatmul.bf16.vlgmr.msra.gmra.mxu1 %v1675_v40  ;;  %v342_v34 = vpop.xlane.xlu0 %341 }
 0x132   :  { %v2876_v10 = vpop.eup %2022  ;;  %v484_v59 = vsel %vm483_vm6, %v2811_v36, %v480_v1  ;;  %v646_v12 = vmul.f32 %v2863_v51, %v2823_v32  ;;  %v2886_v30 = vadd.f32 1e-06, %v402_v0  ;;  %vm722_vm7 = vweird.f32 %v2835_v9 }
 0x133   :  { %v820_v46 = vmul.f32 %v2670_v58, %v784_v60  ;;  %v768_v6 = vmul.f32 %v484_v59, %v2453_v22  ;;  %v546_v38 = vmul.f32 %v2876_v10, %v2827_v57  ;;  %v719_v25 = vsub.f32 1.5, %v718_v52  ;;  %vm723_vm10 = vmor %vm721_vm4, %vm722_vm7  ;;  %v328_v60 = vpop.xlane.xlu2 %327 }
 0x134   :  { %v468_v36 = vmul.f32 0.5, %v467_v49  ;;  %v647_v50 = vmul.f32 %v2863_v51, %v646_v12  ;;  %vm472_vm8 = vweird.f32 %v2843_v5  ;;  %vm651_vm9 = vweird.f32 %v2823_v32 }
 0x135   :  { %v856_v35 = vadd.f32 %v2689_v48, %v820_v46  ;;  %v547_v23 = vmul.f32 %v2876_v10, %v546_v38  ;;  %2026 = vrsqrt.f32 %v2872_v18  ;;  %v804_v22 = vmul.f32 %v2670_v58, %v768_v6  ;;  %vm473_vm12 = vmor %vm471_vm5, %vm472_vm8 }
 0x136   :  { %v720_v7 = vmul.f32 %v2835_v9, %v719_v25  ;;  %v469_v61 = vsub.f32 1.5, %v468_v36  ;;  %v648_v43 = vmul.f32 0.5, %v647_v50  ;;  %v2897_v11 = vpop.eup %2024  ;;  %vm551_vm11 = vweird.f32 %v2827_v57 }
 0x137   :  { %v1807_v14 = vpack.c.bf16 %v856_v35, %v855_v37  ;;  %v548_v4 = vmul.f32 0.5, %v547_v23  ;;  %2028 = vrsqrt.f32 %v2886_v30  ;;  %v556_v1 = vmul.f32 %v2897_v11, %v2853_v24  ;;  %v344_v12 = vpop.xlane.xlu1 %343 }
 0x138   :  { %v724_v41 = vsel %vm723_vm10, %v2835_v9, %v720_v7  ;;  %v470_v0 = vmul.f32 %v2843_v5, %v469_v61  ;;  %v649_v16 = vsub.f32 1.5, %v648_v43  ;;  %vm552_vm13 = vweird.f32 %v2876_v10 }
 0x139   :  { %1942 = vst [vmem:[#allocation2 + $0x20] sm:$0xff] %v1807_v14   ;;  %v792_v17 = vmul.f32 %v724_v41, %v2447_v19  ;;  %v549_v62 = vsub.f32 1.5, %v548_v4  ;;  %vm561_vm14 = vweird.f32 %v2853_v24  ;;  %v840_v9 = vadd.f32 %v2689_v48, %v804_v22  ;;  %vm553_vm0 = vmor %vm551_vm11, %vm552_vm13 }
 0x13a   :  { %v474_v40 = vsel %vm473_vm12, %v2843_v5, %v470_v0  ;;  %vm652_vm15 = vweird.f32 %v2863_v51  ;;  %v557_v37 = vmul.f32 %v2897_v11, %v556_v1  ;;  %v650_v52 = vmul.f32 %v2863_v51, %v649_v16 }
 0x13b   :  { %v2918_v19 = vpop.eup %2026  ;;  %v828_v59 = vmul.f32 %v2670_v58, %v792_v17  ;;  %v767_v3 = vmul.f32 %v474_v40, %v2450_v21  ;;  %v550_v49 = vmul.f32 %v2876_v10, %v549_v62  ;;  %vm562_vm1 = vweird.f32 %v2897_v11  ;;  %vm2939_vm2 = vmor %vm651_vm9, %vm652_vm15  ;;  %v364_v17 = vpop.xlane.xlu0 %363 }
 0x13c   :  { %v558_v5 = vmul.f32 0.5, %v557_v37  ;;  %v736_v46 = vmul.f32 %v2918_v19, %v2872_v18  ;;  %v409_v6 = vmul.f32 0.03125, %v2861_v8  ;;  %v393_v50 = vmul.f32 0.03125, %v342_v34  ;;  %vm563_vm4 = vmor %vm561_vm14, %vm562_vm1 }
 0x13d   :  { %v2930_v38 = vpop.eup %2028  ;;  %v864_v21 = vadd.f32 %v2689_v48, %v828_v59  ;;  %v803_v25 = vmul.f32 %v2670_v58, %v767_v3  ;;  %v554_v36 = vsel %vm553_vm0, %v2876_v10, %v550_v49  ;;  %v654_v32 = vsel %vm2939_vm2, %v2863_v51, %v650_v52 }
 0x13e   :  { %v775_v35 = vmul.f32 %v554_v36, %v2468_v39  ;;  %v559_v8 = vsub.f32 1.5, %v558_v5  ;;  %v737_v23 = vmul.f32 %v2918_v19, %v736_v46  ;;  %v656_v22 = vmul.f32 %v2930_v38, %v2886_v30 }
 0x13f   :  { %v1827_v7 = vpack.c.bf16 %v864_v21, %v2846_v47  ;;  %v839_v10 = vadd.f32 %v2689_v48, %v803_v25  ;;  %vm741_vm3 = vweird.f32 %v2872_v18  ;;  %vm742_vm5 = vweird.f32 %v2918_v19  ;;  %v378_v52 = vpop.xlane.xlu1 %377 }
 0x140   :  { %v811_v61 = vmul.f32 %v2670_v58, %v775_v35  ;;  %v560_v39 = vmul.f32 %v2897_v11, %v559_v8  ;;  %v738_v43 = vmul.f32 0.5, %v737_v23  ;;  %v657_v14 = vmul.f32 %v2930_v38, %v656_v22  ;;  %v1680_v4 = vld [vmem:[#allocation2 + $0x20] sm:$0xff]  ;;  %vm743_vm7 = vmor %vm741_vm3, %vm742_vm5 }
 0x141   :  { %1946 = vst [vmem:[#allocation2 + $0x70] sm:$0xff] %v1827_v7   ;;  %v1767_v41 = vpack.c.bf16 %v840_v9, %v839_v10  ;;  %v2961_v47 = vadd.f32 1e-06, %v409_v6  ;;  %v2963_v51 = vadd.f32 1e-06, %v393_v50  ;;  %v785_v0 = vmul.f32 %v654_v32, %v2474_v28  ;;  %1182 = vmatmul.bf16.gmra.mxu2 %v1680_v4 }
 0x142   :  { %v564_v16 = vsel %vm563_vm4, %v2897_v11, %v560_v39  ;;  %v739_v1 = vsub.f32 1.5, %v738_v43  ;;  %v658_v34 = vmul.f32 0.5, %v657_v14  ;;  %v847_v62 = vadd.f32 %v2689_v48, %v811_v61  ;;  %v362_v11 = vpop.xlane.xlu2 %361 }
 0x143   :  { %1934 = vst [vmem:[#allocation2] sm:$0xff] %v1767_v41   ;;  %v776_v24 = vmul.f32 %v564_v16, %v2471_v20  ;;  %vm662_vm6 = vweird.f32 %v2930_v38  ;;  %2030 = vrsqrt.f32 %v2961_v47  ;;  %v385_v28 = vmul.f32 0.03125, %v2874_v31  ;;  %v330_v39 = vpop.xlane.xlu0 %329 }
 0x144   :  { %v740_v9 = vmul.f32 %v2918_v19, %v739_v1  ;;  %v659_v40 = vsub.f32 1.5, %v658_v34  ;;  %2032 = vrsqrt.f32 %v2963_v51  ;;  %v386_v20 = vmul.f32 0.03125, %v328_v60 }
 0x145   :  { %v812_v37 = vmul.f32 %v2670_v58, %v776_v24  ;;  %v404_v59 = vmul.f32 0.03125, %v364_v17  ;;  %v394_v3 = vmul.f32 0.03125, %v344_v12  ;;  %vm661_vm8 = vweird.f32 %v2886_v30 }
 0x146   :  { %v744_v49 = vsel %vm743_vm7, %v2918_v19, %v740_v9  ;;  %v660_v5 = vmul.f32 %v2930_v38, %v659_v40  ;;  %v2982_v46 = vadd.f32 1e-06, %v385_v28  ;;  %vm663_vm9 = vmor %vm661_vm8, %vm662_vm6  ;;  %v2988_v18 = vadd.f32 1e-06, %v386_v20 }
 0x147   :  { %v848_v31 = vadd.f32 %v2689_v48, %v812_v37  ;;  %v794_v6 = vmul.f32 %v744_v49, %v2495_v56  ;;  %v2990_v60 = vadd.f32 1e-06, %v404_v59  ;;  %v821_v12 = vmul.f32 %v2670_v58, %v785_v0 }
 0x148   :  { %v664_v19 = vsel %vm663_vm9, %v2930_v38, %v660_v5  ;;  %2034 = vrsqrt.f32 %v2982_v46  ;;  %v2995_v30 = vadd.f32 1e-06, %v394_v3  ;;  %v1684_v21 = vld [vmem:[#allocation2 + $0x70] sm:$0xff]  ;;  %v403_v50 = vmul.f32 0.03125, %v362_v11 }
 0x149   :  { %v2997_v25 = vpop.eup %2030  ;;  %v1787_v36 = vpack.c.bf16 %v848_v31, %v847_v62  ;;  %v786_v56 = vmul.f32 %v664_v19, %v2489_v54  ;;  %2036 = vrsqrt.f32 %v2988_v18  ;;  %v830_v35 = vmul.f32 %v2670_v58, %v794_v6  ;;  %1202 = vmatmul.bf16.gmra.mxu3 %v1684_v21  ;;  %v332_v62 = vpop.xlane.xlu1 %331 }
 0x14a   :  { %v3001_v57 = vpop.eup %2032  ;;  %v726_v38 = vmul.f32 %v2997_v25, %v2961_v47  ;;  %2038 = vrsqrt.f32 %v2990_v60  ;;  %v1672_v8 = vld [vmem:[#allocation2] sm:$0xff]  ;;  %v857_v22 = vadd.f32 %v2689_v48, %v821_v12  ;;  %vm731_vm10 = vweird.f32 %v2961_v47  ;;  %v380_v0 = vpop.xlane.xlu2 %379 }
 0x14b   :  { %1938 = vst [vmem:[#allocation2 + $0x68] sm:$0xff] %v1787_v36   ;;  %v822_v23 = vmul.f32 %v2670_v58, %v786_v56  ;;  %v566_v54 = vmul.f32 %v3001_v57, %v2963_v51  ;;  %2040 = vrsqrt.f32 %v2995_v30  ;;  %1142 = vmatmul.bf16.gmra.mxu0 %v1672_v8  ;;  %vm571_vm11 = vweird.f32 %v2963_v51 }
 0x14c   :  { %v727_v7 = vmul.f32 %v2997_v25, %v726_v38  ;;  %v3017_v61 = vadd.f32 1e-06, %v403_v50  ;;  %v3022_v14 = vadd.f32 %v2689_v48, %v830_v35  ;;  %vm732_vm12 = vweird.f32 %v2997_v25 }
 0x14d   :  { %v858_v10 = vadd.f32 %v2689_v48, %v822_v23  ;;  %v567_v32 = vmul.f32 %v3001_v57, %v566_v54  ;;  %v411_v41 = vmul.f32 0.03125, %v378_v52  ;;  %vm572_vm13 = vweird.f32 %v3001_v57  ;;  %vm733_vm1 = vmor %vm731_vm10, %vm732_vm12 }
 0x14e   :  { %v3019_v43 = vpop.eup %2034  ;;  %v728_v4 = vmul.f32 0.5, %v727_v7  ;;  %vm491_vm14 = vweird.f32 %v2982_v46  ;;  %vm501_vm15 = vweird.f32 %v2988_v18  ;;  %2042 = vrsqrt.f32 %v3017_v61  ;;  %vm3070_vm4 = vmor %vm571_vm11, %vm572_vm13 }
 0x14f   :  { %v3025_v16 = vpop.eup %2036  ;;  %v1812_v1 = vpack.c.bf16 %v858_v10, %v857_v22  ;;  %v568_v34 = vmul.f32 0.5, %v567_v32  ;;  %v486_v17 = vmul.f32 %v3019_v43, %v2982_v46  ;;  %v3037_v28 = vmul.f32 0.03125, %v330_v39 }
 0x150   :  { %v3031_v24 = vpop.eup %2038  ;;  %v729_v9 = vsub.f32 1.5, %v728_v4  ;;  %v496_v40 = vmul.f32 %v3025_v16, %v2988_v18  ;;  %vm681_vm0 = vweird.f32 %v2990_v60  ;;  %v3043_v59 = vmul.f32 0.03125, %v380_v0 }
 0x151   :  { %1943 = vst [vmem:[#allocation2 + $0x10] sm:$0xff] %v1812_v1   ;;  %v569_v11 = vsub.f32 1.5, %v568_v34  ;;  %v487_v37 = vmul.f32 %v3019_v43, %v486_v17  ;;  %v676_v20 = vmul.f32 %v3031_v24, %v2990_v60  ;;  %v3045_v3 = vpop.eup %2040  ;;  %v3049_v5 = vadd.f32 1e-06, %v411_v41 }
 0x152   :  { %v730_v52 = vmul.f32 %v2997_v25, %v729_v9  ;;  %v497_v49 = vmul.f32 %v3025_v16, %v496_v40  ;;  %v3051_v31 = vmul.f32 0.03125, %v332_v62  ;;  %v1676_v6 = vld [vmem:[#allocation2 + $0x68] sm:$0xff]  ;;  %v576_v36 = vmul.f32 %v3045_v3, %v2995_v30 }
 0x153   :  { %v570_v12 = vmul.f32 %v3001_v57, %v569_v11  ;;  %v488_v19 = vmul.f32 0.5, %v487_v37  ;;  %v677_v21 = vmul.f32 %v3031_v24, %v676_v20  ;;  %vm492_vm2 = vweird.f32 %v3019_v43  ;;  %1162 = vmatmul.bf16.gmra.mxu1 %v1676_v6 }
 0x154   :  { %v734_v56 = vsel %vm733_vm1, %v2997_v25, %v730_v52  ;;  %v498_v50 = vmul.f32 0.5, %v497_v49  ;;  %vm581_vm3 = vweird.f32 %v2995_v30  ;;  %2044 = vrsqrt.f32 %v3049_v5  ;;  %v2043_v8 = vpop.eup %2042  ;;  %vm493_vm7 = vmor %vm491_vm14, %vm492_vm2 }
 0x155   :  { %v793_v47 = vmul.f32 %v734_v56, %v2492_v55  ;;  %v489_v38 = vsub.f32 1.5, %v488_v19  ;;  %vm502_vm5 = vweird.f32 %v3025_v16  ;;  %v678_v25 = vmul.f32 0.5, %v677_v21  ;;  %v348_v21 = vpop.xlane.xlu0 %347 }
 0x156   :  { %v574_v23 = vsel %vm3070_vm4, %v3001_v57, %v570_v12  ;;  %v499_v54 = vsub.f32 1.5, %v498_v50  ;;  %vm682_vm6 = vweird.f32 %v3031_v24  ;;  %v577_v55 = vmul.f32 %v3045_v3, %v576_v36  ;;  %vm503_vm10 = vmor %vm501_vm15, %vm502_vm5 }
 0x157   :  { %v829_v51 = vmul.f32 %v2670_v58, %v793_v47  ;;  %v490_v22 = vmul.f32 %v3019_v43, %v489_v38  ;;  %v679_v7 = vsub.f32 1.5, %v678_v25  ;;  %v666_v10 = vmul.f32 %v2043_v8, %v3017_v61  ;;  %vm683_vm11 = vmor %vm681_vm0, %vm682_vm6 }
 0x158   :  { %v500_v32 = vmul.f32 %v3025_v16, %v499_v54  ;;  %v578_v57 = vmul.f32 0.5, %v577_v55  ;;  %vm582_vm8 = vweird.f32 %v3045_v3  ;;  %vm671_vm9 = vweird.f32 %v3017_v61  ;;  %v1681_v39 = vld [vmem:[#allocation2 + $0x10] sm:$0xff] }
 0x159   :  { %v865_v4 = vadd.f32 %v2689_v48, %v829_v51  ;;  %v494_v41 = vsel %vm493_vm7, %v3019_v43, %v490_v22  ;;  %v680_v46 = vmul.f32 %v3031_v24, %v679_v7  ;;  %v667_v0 = vmul.f32 %v2043_v8, %v666_v10  ;;  %1187 = vmatmul.bf16.gmra.mxu2 %v1681_v39  ;;  %vm583_vm12 = vmor %vm581_vm3, %vm582_vm8 }
 0x15a   :  { %v3097_v1 = vpop.eup %2044  ;;  %v777_v34 = vmul.f32 %v574_v23, %v2516_v29  ;;  %v769_v17 = vmul.f32 %v494_v41, %v2510_v13  ;;  %v504_v62 = vsel %vm503_vm10, %v3025_v16, %v500_v32  ;;  %v579_v43 = vsub.f32 1.5, %v578_v57 }
 0x15b   :  { %v1832_v18 = vpack.c.bf16 %v3022_v14, %v865_v4  ;;  %v770_v9 = vmul.f32 %v504_v62, %v2513_v33  ;;  %v684_v40 = vsel %vm683_vm11, %v3031_v24, %v680_v46  ;;  %v668_v11 = vmul.f32 0.5, %v667_v0 }
 0x15c   :  { %v805_v29 = vmul.f32 %v2670_v58, %v769_v17  ;;  %v788_v13 = vmul.f32 %v684_v40, %v2537_v45  ;;  %v580_v16 = vmul.f32 %v3045_v3, %v579_v43  ;;  %v746_v37 = vmul.f32 %v3097_v1, %v3049_v5 }
 0x15d   :  { %1947 = vst [vmem:[#allocation2 + $0x78] sm:$0xff] %v1832_v18   ;;  %v806_v60 = vmul.f32 %v2670_v58, %v770_v9  ;;  %v669_v33 = vsub.f32 1.5, %v668_v11  ;;  %vm672_vm13 = vweird.f32 %v2043_v8  ;;  %v3120_v14 = vadd.f32 1e-06, %v3037_v28 }
 0x15e   :  { %v813_v45 = vmul.f32 %v2670_v58, %v777_v34  ;;  %v841_v24 = vadd.f32 %v2689_v48, %v805_v29  ;;  %v584_v20 = vsel %vm583_vm12, %v3045_v3, %v580_v16  ;;  %v747_v52 = vmul.f32 %v3097_v1, %v746_v37  ;;  %vm673_vm14 = vmor %vm671_vm9, %vm672_vm13 }
 0x15f   :  { %v842_v49 = vadd.f32 %v2689_v48, %v806_v60  ;;  %v778_v6 = vmul.f32 %v584_v20, %v2531_v27  ;;  %v670_v12 = vmul.f32 %v2043_v8, %v669_v33  ;;  %2046 = vrsqrt.f32 %v3120_v14  ;;  %v346_v27 = vpop.xlane.xlu2 %345 }
 0x160   :  { %v824_v30 = vmul.f32 %v2670_v58, %v788_v13  ;;  %v748_v28 = vmul.f32 0.5, %v747_v52  ;;  %v3133_v19 = vadd.f32 1e-06, %v3043_v59  ;;  %v3137_v50 = vadd.f32 1e-06, %v3051_v31 }
 0x161   :  { %v1772_v3 = vpack.c.bf16 %v842_v49, %v841_v24  ;;  %v814_v36 = vmul.f32 %v2670_v58, %v778_v6  ;;  %v674_v56 = vsel %vm673_vm14, %v2043_v8, %v670_v12  ;;  %v849_v61 = vadd.f32 %v2689_v48, %v813_v45 }
 0x162   :  { %v787_v47 = vmul.f32 %v674_v56, %v2534_v42  ;;  %v749_v35 = vsub.f32 1.5, %v748_v28  ;;  %2048 = vrsqrt.f32 %v3133_v19  ;;  %v396_v38 = vmul.f32 0.03125, %v348_v21 }
 0x163   :  { %1935 = vst [vmem:[#allocation2 + $0x58] sm:$0xff] %v1772_v3   ;;  %v850_v59 = vadd.f32 %v2689_v48, %v814_v36  ;;  %2050 = vrsqrt.f32 %v3137_v50  ;;  %v860_v25 = vadd.f32 %v2689_v48, %v824_v30  ;;  %v395_v31 = vmul.f32 0.03125, %v346_v27 }
 0x164   :  { %v823_v8 = vmul.f32 %v2670_v58, %v787_v47  ;;  %v1685_v23 = vld [vmem:[#allocation2 + $0x78] sm:$0xff]  ;;  %v3146_v42 = vadd.f32 1e-06, %v396_v38  ;;  %v750_v22 = vmul.f32 %v3097_v1, %v749_v35  ;;  %vm752_vm15 = vweird.f32 %v3097_v1  ;;  %v2121_v38 = vld [vmem:[%s3432_s4] ss:$0 sm:$0xff] }
 0x165   :  { %v2047_v54 = vpop.eup %2046  ;;  %v1792_v55 = vpack.c.bf16 %v850_v59, %v849_v61  ;;  %1207 = vmatmul.bf16.gmra.mxu3 %v1685_v23  ;;  %v3153_v10 = vadd.f32 1e-06, %v395_v31  ;;  %vm751_vm0 = vweird.f32 %v3049_v5  ;;  %vm511_vm3 = vweird.f32 %v3120_v14 }
 0x166   :  { %v859_v51 = vadd.f32 %v2689_v48, %v823_v8  ;;  %v506_v7 = vmul.f32 %v2047_v54, %v3120_v14  ;;  %2052 = vrsqrt.f32 %v3146_v42  ;;  %vm753_vm1 = vmor %vm751_vm0, %vm752_vm15  ;;  %vm512_vm2 = vweird.f32 %v2047_v54 }
 0x167   :  { %1939 = vst [vmem:[#allocation2 + $0x8] sm:$0xff] %v1792_v55   ;;  %2054 = vrsqrt.f32 %v3153_v10  ;;  %v754_v46 = vsel %vm753_vm1, %v3097_v1, %v750_v22  ;;  %vm513_vm4 = vmor %vm511_vm3, %vm512_vm2  ;;  %vm761_vm7 = vweird.f32 %v3133_v19  ;;  %vm521_vm9 = vweird.f32 %v3137_v50 }
 0x168   :  { %v2049_v32 = vpop.eup %2048  ;;  %v1817_v57 = vpack.c.bf16 %v860_v25, %v859_v51  ;;  %v507_v39 = vmul.f32 %v2047_v54, %v506_v7  ;;  %v795_v9 = vmul.f32 %v754_v46, %v2550_v63  ;;  %vm601_vm12 = vweird.f32 %v3146_v42 }
 0x169   :  { %v2051_v4 = vpop.eup %2050  ;;  %v756_v41 = vmul.f32 %v2049_v32, %v3133_v19  ;;  %vm762_vm5 = vweird.f32 %v2049_v32  ;;  %v2120_v19 = vld [vmem:[%s3431_s3] ss:$0 sm:$0xff]  ;;  %vm591_vm15 = vweird.f32 %v3153_v10 }
 0x16a   :  { %1944 = vst [vmem:[#allocation2 + $0x38] sm:$0xff] %v1817_v57   ;;  %v508_v0 = vmul.f32 0.5, %v507_v39  ;;  %v516_v34 = vmul.f32 %v2051_v4, %v3137_v50  ;;  %v1673_v17 = vld [vmem:[#allocation2 + $0x58] sm:$0xff]  ;;  %vm522_vm6 = vweird.f32 %v2051_v4  ;;  %v831_v63 = vmul.f32 %v2670_v58, %v795_v9  ;;  %vm763_vm8 = vmor %vm761_vm7, %vm762_vm5 }
 0x16b   :  { %v757_v62 = vmul.f32 %v2049_v32, %v756_v41  ;;  %1147 = vmatmul.bf16.gmra.mxu0 %v1673_v17  ;;  %vm523_vm10 = vmor %vm521_vm9, %vm522_vm6 }
 0x16c   :  { %v509_v43 = vsub.f32 1.5, %v508_v0  ;;  %v517_v18 = vmul.f32 %v2051_v4, %v516_v34  ;;  %v2053_v5 = vpop.eup %2052  ;;  %v867_v3 = vadd.f32 %v2689_v48, %v831_v63 }
 0x16d   :  { %v758_v40 = vmul.f32 0.5, %v757_v62  ;;  %v596_v13 = vmul.f32 %v2053_v5, %v3146_v42  ;;  %v2055_v16 = vpop.eup %2054  ;;  %vm602_vm11 = vweird.f32 %v2053_v5 }
 0x16e   :  { %v510_v11 = vmul.f32 %v2047_v54, %v509_v43  ;;  %v518_v29 = vmul.f32 0.5, %v517_v18  ;;  %v1677_v1 = vld [vmem:[#allocation2 + $0x8] sm:$0xff]  ;;  %v586_v24 = vmul.f32 %v2055_v16, %v3153_v10  ;;  %vm592_vm13 = vweird.f32 %v2055_v16  ;;  %vm603_vm14 = vmor %vm601_vm12, %vm602_vm11 }
 0x16f   :  { %v759_v37 = vsub.f32 1.5, %v758_v40  ;;  %v597_v45 = vmul.f32 %v2053_v5, %v596_v13  ;;  %1167 = vmatmul.bf16.gmra.mxu1 %v1677_v1  ;;  %vm593_vm0 = vmor %vm591_vm15, %vm592_vm13 }
 0x170   :  { %v514_v60 = vsel %vm513_vm4, %v2047_v54, %v510_v11  ;;  %v519_v33 = vsub.f32 1.5, %v518_v29  ;;  %v587_v12 = vmul.f32 %v2055_v16, %v586_v24 }
 0x171   :  { %v771_v20 = vmul.f32 %v514_v60, %v2560_v2  ;;  %v760_v14 = vmul.f32 %v2049_v32, %v759_v37  ;;  %v1682_v52 = vld [vmem:[#allocation2 + $0x38] sm:$0xff]  ;;  %v598_v6 = vmul.f32 0.5, %v597_v45 }
 0x172   :  { %v520_v49 = vmul.f32 %v2051_v4, %v519_v33  ;;  %1192 = vmatmul.bf16.gmra.mxu2 %v1682_v52  ;;  %v588_v2 = vmul.f32 0.5, %v587_v12 }
 0x173   :  { %v764_v30 = vsel %vm763_vm8, %v2049_v32, %v760_v14  ;;  %v599_v21 = vsub.f32 1.5, %v598_v6  ;;  %v807_v36 = vmul.f32 %v2120_v19, %v771_v20 }
 0x174   :  { %v796_v28 = vmul.f32 %v764_v30, %v2557_v53  ;;  %v524_v58 = vsel %vm523_vm10, %v2051_v4, %v520_v49  ;;  %v589_v47 = vsub.f32 1.5, %v588_v2 }
 0x175   :  { %v772_v56 = vmul.f32 %v524_v58, %v2578_v44  ;;  %v600_v27 = vmul.f32 %v2053_v5, %v599_v21  ;;  %v843_v44 = vadd.f32 %v2121_v38, %v807_v36 }
 0x176   :  { %v832_v50 = vmul.f32 %v2120_v19, %v796_v28  ;;  %v590_v59 = vmul.f32 %v2055_v16, %v589_v47 }
 0x177   :  { %v808_v35 = vmul.f32 %v2120_v19, %v772_v56  ;;  %v604_v61 = vsel %vm603_vm14, %v2053_v5, %v600_v27 }
 0x178   :  { %v868_v53 = vadd.f32 %v2689_v48, %v832_v50  ;;  %v780_v8 = vmul.f32 %v604_v61, %v2581_v15  ;;  %v594_v23 = vsel %vm593_vm0, %v2055_v16, %v590_v59  ;;  %v3187_v15 = vld [vmem:[%s3434_s2] ss:$0 sm:$0xff] }
 0x179   :  { %v844_v25 = vadd.f32 %v2121_v38, %v808_v35  ;;  %v779_v42 = vmul.f32 %v594_v23, %v2569_v26 }
 0x17a   :  { %v1837_v31 = vpack.c.bf16 %v868_v53, %v867_v3  ;;  %v816_v55 = vmul.f32 %v2120_v19, %v780_v8 }
 0x17b   :  { %v1777_v54 = vpack.c.bf16 %v844_v25, %v843_v44  ;;  %v815_v51 = vmul.f32 %v2120_v19, %v779_v42 }
 0x17c   :  { %1948 = vst [vmem:[#allocation2 + $0x28] sm:$0xff] %v1837_v31   ;;  %v852_v48 = vadd.f32 %v2121_v38, %v816_v55 }
 0x17d   :  { %1936 = vst [vmem:[#allocation2 + $0x18] sm:$0xff] %v1777_v54   ;;  %v851_v22 = vadd.f32 %v2121_v38, %v815_v51 }
 0x17f   :  { %v1797_v7 = vpack.c.bf16 %v852_v48, %v851_v22 }
 0x181   :  { %1940 = vst [vmem:[#allocation2 + $0x48] sm:$0xff] %v1797_v7  }
 0x183   :  { %v1686_v10 = vld [vmem:[#allocation2 + $0x28] sm:$0xff] }
 0x184   :  { %v1674_v32 = vld [vmem:[#allocation2 + $0x18] sm:$0xff]  ;;  %1212 = vmatmul.bf16.gmra.mxu3 %v1686_v10 }
 0x185   :  { %1152 = vmatmul.bf16.gmra.mxu0 %v1674_v32 }
 0x188   :  { %v1678_v57 = vld [vmem:[#allocation2 + $0x48] sm:$0xff] }
 0x189   :  { %1172 = vmatmul.bf16.gmra.mxu1 %v1678_v57 }
 0x1a9   :  { %v1198_v39 = vpop.f32.mrf.mxu3 }
 0x1aa   :  { %v3190_v26 = vadd.f32 %v3187_v15, %v1198_v39 }
 0x1ab   :  { %v1178_v4 = vpop.f32.mrf.mxu2  ;;  %v1138_v0 = vpop.f32.mrf.mxu0 }
 0x1ac   :  { %v3193_v41 = vadd.f32 %v3187_v15, %v1178_v4  ;;  %v1274_v46 = vmul.f32 0.044715, %v3190_v26  ;;  %v3197_v34 = vadd.f32 %v3187_v15, %v1138_v0  ;;  %v1242_v57 = vmul.f32 0.5, %v3190_v26 }
 0x1ae   :  { %v1266_v17 = vmul.f32 0.044715, %v3193_v41  ;;  %v1306_v62 = vmul.f32 %v1274_v46, %v3190_v26  ;;  %v1250_v43 = vmul.f32 0.044715, %v3197_v34  ;;  %v1158_v18 = vpop.f32.mrf.mxu1  ;;  %v1234_v46 = vmul.f32 0.5, %v3193_v41 }
 0x1af   :  { %v3205_v40 = vadd.f32 %v3187_v15, %v1158_v18  ;;  %v1218_v18 = vmul.f32 0.5, %v3197_v34 }
 0x1b0   :  { %v1298_v5 = vmul.f32 %v1266_v17, %v3193_v41  ;;  %v1338_v9 = vmul.f32 %v1306_v62, %v3190_v26  ;;  %v1282_v11 = vmul.f32 %v1250_v43, %v3197_v34 }
 0x1b1   :  { %v1200_v29 = vpop.f32.mrf.mxu3  ;;  %v1258_v1 = vmul.f32 0.044715, %v3205_v40 }
 0x1b2   :  { %v1330_v13 = vmul.f32 %v1298_v5, %v3193_v41  ;;  %v1370_v16 = vadd.f32 %v1338_v9, %v3190_v26  ;;  %v1314_v37 = vmul.f32 %v1282_v11, %v3197_v34  ;;  %v1201_v33 = vadd.f32 %v3187_v15, %v1200_v29 }
 0x1b3   :  { %v1180_v60 = vpop.f32.mrf.mxu2  ;;  %v1290_v24 = vmul.f32 %v1258_v1, %v3205_v40  ;;  %v1140_v20 = vpop.f32.mrf.mxu0  ;;  %v1226_v9 = vmul.f32 0.5, %v3205_v40 }
 0x1b4   :  { %v1362_v45 = vadd.f32 %v1330_v13, %v3193_v41  ;;  %v1181_v63 = vadd.f32 %v3187_v15, %v1180_v60  ;;  %v1275_v14 = vmul.f32 0.044715, %v1201_v33  ;;  %v1141_v52 = vadd.f32 %v3187_v15, %v1140_v20 }
 0x1b5   :  { %v1346_v49 = vadd.f32 %v1314_v37, %v3197_v34  ;;  %v1322_v6 = vmul.f32 %v1290_v24, %v3205_v40  ;;  %v1402_v12 = vmul.f32 0.7978846, %v1370_v16  ;;  %v1243_v0 = vmul.f32 0.5, %v1201_v33 }
 0x1b6   :  { %v1267_v30 = vmul.f32 0.044715, %v1181_v63  ;;  %v1307_v28 = vmul.f32 %v1275_v14, %v1201_v33  ;;  %v1160_v58 = vpop.f32.mrf.mxu1  ;;  %v1394_v21 = vmul.f32 0.7978846, %v1362_v45  ;;  %v1251_v3 = vmul.f32 0.044715, %v1141_v52 }
 0x1b7   :  { %v1354_v2 = vadd.f32 %v1322_v6, %v3205_v40  ;;  %v3221_v19 = vadd.f32 %v3187_v15, %v1160_v58  ;;  %v1378_v50 = vmul.f32 0.7978846, %v1346_v49  ;;  %2056 = vtanh.f32 %v1402_v12 }
 0x1b8   :  { %v1299_v36 = vmul.f32 %v1267_v30, %v1181_v63  ;;  %v1339_v56 = vmul.f32 %v1307_v28, %v1201_v33  ;;  %v1283_v27 = vmul.f32 %v1251_v3, %v1141_v52  ;;  %2058 = vtanh.f32 %v1394_v21 }
 0x1b9   :  { %v1259_v47 = vmul.f32 0.044715, %v3221_v19  ;;  %v1386_v61 = vmul.f32 0.7978846, %v1354_v2  ;;  %2060 = vtanh.f32 %v1378_v50  ;;  %v1235_v11 = vmul.f32 0.5, %v1181_v63 }
 0x1ba   :  { %v1331_v35 = vmul.f32 %v1299_v36, %v1181_v63  ;;  %v1371_v53 = vadd.f32 %v1339_v56, %v1201_v33  ;;  %v1315_v59 = vmul.f32 %v1283_v27, %v1141_v52  ;;  %v1219_v60 = vmul.f32 0.5, %v1141_v52 }
 0x1bb   :  { %v1291_v38 = vmul.f32 %v1259_v47, %v3221_v19  ;;  %v1227_v6 = vmul.f32 0.5, %v3221_v19 }
 0x1bc   :  { %v1363_v44 = vadd.f32 %v1331_v35, %v1181_v63  ;;  %v1403_v25 = vmul.f32 0.7978846, %v1371_v53  ;;  %v1347_v8 = vadd.f32 %v1315_v59, %v1141_v52 }
 0x1bd   :  { %v1323_v31 = vmul.f32 %v1291_v38, %v3221_v19  ;;  %v2057_v42 = vpop.eup %2056 }
 0x1be   :  { %v1395_v23 = vmul.f32 0.7978846, %v1363_v44  ;;  %2062 = vtanh.f32 %v1403_v25  ;;  %v1379_v54 = vmul.f32 0.7978846, %v1347_v8  ;;  %v2059_v48 = vpop.eup %2058  ;;  %v1466_v7 = vadd.f32 1.0, %v2057_v42 }
 0x1bf   :  { %2064 = vtanh.f32 %v1386_v61  ;;  %v1355_v55 = vadd.f32 %v1323_v31, %v3221_v19  ;;  %v2061_v22 = vpop.eup %2060  ;;  %v1458_v32 = vadd.f32 1.0, %v2059_v48 }
 0x1c0   :  { %2066 = vtanh.f32 %v1395_v23  ;;  %v1442_v5 = vadd.f32 1.0, %v2061_v22  ;;  %v1498_v13 = vmul.f32 %v1466_v7, %v1242_v57 }
 0x1c1   :  { %2068 = vtanh.f32 %v1379_v54  ;;  %v1387_v51 = vmul.f32 0.7978846, %v1355_v55  ;;  %v1490_v37 = vmul.f32 %v1458_v32, %v1234_v46 }
 0x1c2   :  { %v1474_v40 = vmul.f32 %v1442_v5, %v1218_v18 }
 0x1c3   :  { %2070 = vtanh.f32 %v1387_v51 }
 0x1c4   :  { %v2063_v10 = vpop.eup %2062  ;;  %v1183_v39 = vpop.f32.mrf.mxu2 }
 0x1c5   :  { %v2065_v4 = vpop.eup %2064  ;;  %v1467_v17 = vadd.f32 1.0, %v2063_v10  ;;  %v3230_v62 = vadd.f32 %v3187_v15, %v1183_v39 }
 0x1c6   :  { %v2067_v43 = vpop.eup %2066  ;;  %v1450_v41 = vadd.f32 1.0, %v2065_v4 }
 0x1c7   :  { %v2069_v29 = vpop.eup %2068  ;;  %v1459_v1 = vadd.f32 1.0, %v2067_v43  ;;  %v1499_v26 = vmul.f32 %v1467_v17, %v1243_v0  ;;  %v1268_v16 = vmul.f32 0.044715, %v3230_v62 }
 0x1c8   :  { %v1443_v33 = vadd.f32 1.0, %v2069_v29  ;;  %v1143_v45 = vpop.f32.mrf.mxu0  ;;  %v1482_v58 = vmul.f32 %v1450_v41, %v1226_v9 }
 0x1c9   :  { %v2071_v24 = vpop.eup %2070  ;;  %v1491_v20 = vmul.f32 %v1459_v1, %v1235_v11  ;;  %v1902_v14 = vpack.c.bf16 %v1499_v26, %v1498_v13  ;;  %v1300_v34 = vmul.f32 %v1268_v16, %v3230_v62  ;;  %v3237_v49 = vadd.f32 %v3187_v15, %v1143_v45 }
 0x1ca   :  { %v1475_v63 = vmul.f32 %v1443_v33, %v1219_v60  ;;  %v1451_v12 = vadd.f32 1.0, %v2071_v24 }
 0x1cb   :  { %v1882_v30 = vpack.c.bf16 %v1491_v20, %v1490_v37  ;;  %1960 = vst [vmem:[%s3435_s5 + $0x60] sm:$0xff] %v1902_v14   ;;  %v1332_v52 = vmul.f32 %v1300_v34, %v3230_v62  ;;  %v1252_v28 = vmul.f32 0.044715, %v3237_v49 }
 0x1cc   :  { %v1842_v21 = vpack.c.bf16 %v1475_v63, %v1474_v40  ;;  %v1483_v2 = vmul.f32 %v1451_v12, %v1227_v6  ;;  %v1185_v3 = vpop.f32.mrf.mxu2  ;;  %v1203_v36 = vpop.f32.mrf.mxu3  ;;  %v1236_v12 = vmul.f32 0.5, %v3230_v62 }
 0x1cd   :  { %1956 = vst [vmem:[%s3435_s5 + $0x40] sm:$0xff] %v1882_v30   ;;  %v1364_v19 = vadd.f32 %v1332_v52, %v3230_v62  ;;  %v1284_v56 = vmul.f32 %v1252_v28, %v3237_v49  ;;  %v1186_v50 = vadd.f32 %v3187_v15, %v1185_v3  ;;  %v3252_v27 = vadd.f32 %v3187_v15, %v1203_v36 }
 0x1ce   :  { %1843 = vst [vmem:[%s3435_s5] sm:$0xff] %v1842_v21   ;;  %v1862_v47 = vpack.c.bf16 %v1483_v2, %v1482_v58 }
 0x1cf   :  { %v1316_v35 = vmul.f32 %v1284_v56, %v3237_v49  ;;  %v1269_v53 = vmul.f32 0.044715, %v1186_v50  ;;  %v1276_v61 = vmul.f32 0.044715, %v3252_v27  ;;  %v1396_v44 = vmul.f32 0.7978846, %v1364_v19 }
 0x1d0   :  { %1952 = vst [vmem:[%s3435_s5 + $0x20] sm:$0xff] %v1862_v47   ;;  %v1145_v59 = vpop.f32.mrf.mxu0  ;;  %v1163_v38 = vpop.f32.mrf.mxu1  ;;  %v1237_v30 = vmul.f32 0.5, %v1186_v50 }
 0x1d1   :  { %v1348_v25 = vadd.f32 %v1316_v35, %v3237_v49  ;;  %v1301_v8 = vmul.f32 %v1269_v53, %v1186_v50  ;;  %v1146_v31 = vadd.f32 %v3187_v15, %v1145_v59  ;;  %v1308_v23 = vmul.f32 %v1276_v61, %v3252_v27 }
 0x1d2   :  { %v3266_v54 = vadd.f32 %v3187_v15, %v1163_v38  ;;  %2072 = vtanh.f32 %v1396_v44  ;;  %v1220_v35 = vmul.f32 0.5, %v3237_v49 }
 0x1d3   :  { %v1333_v55 = vmul.f32 %v1301_v8, %v1186_v50  ;;  %v1253_v42 = vmul.f32 0.044715, %v1146_v31  ;;  %v1380_v48 = vmul.f32 0.7978846, %v1348_v25  ;;  %v1340_v51 = vmul.f32 %v1308_v23, %v3252_v27 }
 0x1d4   :  { %v1260_v22 = vmul.f32 0.044715, %v3266_v54  ;;  %v1205_v7 = vpop.f32.mrf.mxu3  ;;  %v1221_v62 = vmul.f32 0.5, %v1146_v31 }
 0x1d5   :  { %v1365_v10 = vadd.f32 %v1333_v55, %v1186_v50  ;;  %v1285_v32 = vmul.f32 %v1253_v42, %v1146_v31  ;;  %v3271_v57 = vadd.f32 %v3187_v15, %v1205_v7  ;;  %v1372_v39 = vadd.f32 %v1340_v51, %v3252_v27 }
 0x1d6   :  { %v1292_v4 = vmul.f32 %v1260_v22, %v3266_v54  ;;  %2074 = vtanh.f32 %v1380_v48 }
 0x1d7   :  { %v1397_v46 = vmul.f32 0.7978846, %v1365_v10  ;;  %v1317_v0 = vmul.f32 %v1285_v32, %v1146_v31  ;;  %v1277_v17 = vmul.f32 0.044715, %v3271_v57  ;;  %v1404_v43 = vmul.f32 0.7978846, %v1372_v39 }
 0x1d8   :  { %v1324_v18 = vmul.f32 %v1292_v4, %v3266_v54  ;;  %v1165_v5 = vpop.f32.mrf.mxu1  ;;  %v2073_v1 = vpop.eup %2072  ;;  %v1245_v48 = vmul.f32 0.5, %v3271_v57 }
 0x1d9   :  { %2076 = vtanh.f32 %v1397_v46  ;;  %v1349_v9 = vadd.f32 %v1317_v0, %v1146_v31  ;;  %v1309_v11 = vmul.f32 %v1277_v17, %v3271_v57  ;;  %v3279_v29 = vadd.f32 %v3187_v15, %v1165_v5 }
 0x1da   :  { %v1356_v13 = vadd.f32 %v1324_v18, %v3266_v54  ;;  %2078 = vtanh.f32 %v1404_v43  ;;  %v1460_v14 = vadd.f32 1.0, %v2073_v1  ;;  %v1244_v31 = vmul.f32 0.5, %v3252_v27 }
 0x1db   :  { %v1381_v26 = vmul.f32 0.7978846, %v1349_v9  ;;  %v1341_v16 = vmul.f32 %v1309_v11, %v3271_v57  ;;  %v1261_v37 = vmul.f32 0.044715, %v3279_v29  ;;  %v1228_v17 = vmul.f32 0.5, %v3266_v54 }
 0x1dc   :  { %v1388_v41 = vmul.f32 0.7978846, %v1356_v13  ;;  %v1188_v60 = vpop.f32.mrf.mxu2  ;;  %v2075_v20 = vpop.eup %2074  ;;  %v1492_v2 = vmul.f32 %v1460_v14, %v1236_v12  ;;  %v1229_v9 = vmul.f32 0.5, %v3279_v29 }
 0x1dd   :  { %2080 = vtanh.f32 %v1381_v26  ;;  %v1373_v33 = vadd.f32 %v1341_v16, %v3271_v57  ;;  %v1293_v45 = vmul.f32 %v1261_v37, %v3279_v29  ;;  %v3287_v24 = vadd.f32 %v3187_v15, %v1188_v60 }
 0x1de   :  { %2082 = vtanh.f32 %v1388_v41  ;;  %v1444_v3 = vadd.f32 1.0, %v2075_v20 }
 0x1df   :  { %v2077_v34 = vpop.eup %2076  ;;  %v1405_v40 = vmul.f32 0.7978846, %v1373_v33  ;;  %v1325_v63 = vmul.f32 %v1293_v45, %v3279_v29  ;;  %v1270_v6 = vmul.f32 0.044715, %v3287_v24 }
 0x1e0   :  { %v1461_v52 = vadd.f32 1.0, %v2077_v34  ;;  %v2079_v21 = vpop.eup %2078  ;;  %v1476_v44 = vmul.f32 %v1444_v3, %v1220_v35 }
 0x1e1   :  { %2084 = vtanh.f32 %v1405_v40  ;;  %v1357_v28 = vadd.f32 %v1325_v63, %v3279_v29  ;;  %v1302_v58 = vmul.f32 %v1270_v6, %v3287_v24  ;;  %v1468_v25 = vadd.f32 1.0, %v2079_v21 }
 0x1e2   :  { %v1493_v36 = vmul.f32 %v1461_v52, %v1237_v30 }
 0x1e3   :  { %v2081_v19 = vpop.eup %2080  ;;  %v1389_v56 = vmul.f32 0.7978846, %v1357_v28  ;;  %v1334_v47 = vmul.f32 %v1302_v58, %v3287_v24  ;;  %v1500_v4 = vmul.f32 %v1468_v25, %v1244_v31 }
 0x1e4   :  { %v1887_v53 = vpack.c.bf16 %v1493_v36, %v1492_v2  ;;  %v1445_v50 = vadd.f32 1.0, %v2081_v19  ;;  %v1190_v61 = vpop.f32.mrf.mxu2  ;;  %v2083_v38 = vpop.eup %2082 }
 0x1e5   :  { %2086 = vtanh.f32 %v1389_v56  ;;  %v3297_v59 = vadd.f32 %v3187_v15, %v1190_v61  ;;  %v1366_v23 = vadd.f32 %v1334_v47, %v3287_v24  ;;  %v1452_v27 = vadd.f32 1.0, %v2083_v38 }
 0x1e6   :  { %1957 = vst [vmem:[%s3435_s5 + $0x48] sm:$0xff] %v1887_v53   ;;  %v1477_v8 = vmul.f32 %v1445_v50, %v1221_v62  ;;  %v1238_v50 = vmul.f32 0.5, %v3287_v24 }
 0x1e7   :  { %v2085_v55 = vpop.eup %2084  ;;  %v1271_v49 = vmul.f32 0.044715, %v3297_v59  ;;  %v1398_v0 = vmul.f32 0.7978846, %v1366_v23  ;;  %v1484_v41 = vmul.f32 %v1452_v27, %v1228_v17 }
 0x1e8   :  { %v1847_v42 = vpack.c.bf16 %v1477_v8, %v1476_v44  ;;  %v1469_v51 = vadd.f32 1.0, %v2085_v55  ;;  %v1208_v22 = vpop.f32.mrf.mxu3  ;;  %v1148_v7 = vpop.f32.mrf.mxu0  ;;  %v1239_v8 = vmul.f32 0.5, %v3297_v59 }
 0x1e9   :  { %v3307_v10 = vadd.f32 %v3187_v15, %v1208_v22  ;;  %v3310_v32 = vadd.f32 %v3187_v15, %v1148_v7  ;;  %v1303_v39 = vmul.f32 %v1271_v49, %v3297_v59  ;;  %2088 = vtanh.f32 %v1398_v0 }
 0x1ea   :  { %1949 = vst [vmem:[%s3435_s5 + $0x8] sm:$0xff] %v1847_v42   ;;  %v1501_v46 = vmul.f32 %v1469_v51, %v1245_v48 }
 0x1eb   :  { %v2087_v57 = vpop.eup %2086  ;;  %v1278_v43 = vmul.f32 0.044715, %v3307_v10  ;;  %v1254_v18 = vmul.f32 0.044715, %v3310_v32  ;;  %v1335_v13 = vmul.f32 %v1303_v39, %v3297_v59 }
 0x1ec   :  { %v1907_v5 = vpack.c.bf16 %v1501_v46, %v1500_v4  ;;  %v1453_v11 = vadd.f32 1.0, %v2087_v57  ;;  %v1168_v1 = vpop.f32.mrf.mxu1 }
 0x1ed   :  { %v1310_v26 = vmul.f32 %v1278_v43, %v3307_v10  ;;  %v1286_v16 = vmul.f32 %v1254_v18, %v3310_v32  ;;  %v3324_v37 = vadd.f32 %v3187_v15, %v1168_v1  ;;  %v1367_v29 = vadd.f32 %v1335_v13, %v3297_v59 }
 0x1ee   :  { %1961 = vst [vmem:[%s3435_s5 + $0x68] sm:$0xff] %v1907_v5   ;;  %v1485_v54 = vmul.f32 %v1453_v11, %v1229_v9 }
 0x1ef   :  { %v1342_v60 = vmul.f32 %v1310_v26, %v3307_v10  ;;  %v1318_v33 = vmul.f32 %v1286_v16, %v3310_v32  ;;  %v1262_v45 = vmul.f32 0.044715, %v3324_v37  ;;  %v1399_v14 = vmul.f32 0.7978846, %v1367_v29  ;;  %v2089_v28 = vpop.eup %2088 }
 0x1f0   :  { %v1867_v20 = vpack.c.bf16 %v1485_v54, %v1484_v41  ;;  %v1210_v34 = vpop.f32.mrf.mxu3  ;;  %v1150_v40 = vpop.f32.mrf.mxu0  ;;  %v1462_v61 = vadd.f32 1.0, %v2089_v28  ;;  %v1246_v54 = vmul.f32 0.5, %v3307_v10 }
 0x1f1   :  { %v1374_v63 = vadd.f32 %v1342_v60, %v3307_v10  ;;  %v3335_v6 = vadd.f32 %v3187_v15, %v1210_v34  ;;  %v3338_v12 = vadd.f32 %v3187_v15, %v1150_v40  ;;  %v1350_v30 = vadd.f32 %v1318_v33, %v3310_v32 }
 0x1f2   :  { %1953 = vst [vmem:[%s3435_s5 + $0x28] sm:$0xff] %v1867_v20   ;;  %2090 = vtanh.f32 %v1399_v14  ;;  %v1294_v52 = vmul.f32 %v1262_v45, %v3324_v37  ;;  %v1494_v22 = vmul.f32 %v1462_v61, %v1238_v50  ;;  %v1222_v20 = vmul.f32 0.5, %v3310_v32 }
 0x1f3   :  { %v1406_v58 = vmul.f32 0.7978846, %v1374_v63  ;;  %v1279_v21 = vmul.f32 0.044715, %v3335_v6  ;;  %v1255_v2 = vmul.f32 0.044715, %v3338_v12 }
 0x1f4   :  { %v1326_v3 = vmul.f32 %v1294_v52, %v3324_v37  ;;  %v1170_v36 = vpop.f32.mrf.mxu1  ;;  %v1382_v47 = vmul.f32 0.7978846, %v1350_v30  ;;  %v1247_v14 = vmul.f32 0.5, %v3335_v6  ;;  %v1230_v34 = vmul.f32 0.5, %v3324_v37 }
 0x1f5   :  { %v1193_v19 = vpop.f32.mrf.mxu2  ;;  %v1171_v56 = vadd.f32 %v3187_v15, %v1170_v36  ;;  %v1311_v35 = vmul.f32 %v1279_v21, %v3335_v6  ;;  %v1287_v53 = vmul.f32 %v1255_v2, %v3338_v12  ;;  %2092 = vtanh.f32 %v1406_v58 }
 0x1f6   :  { %v1358_v62 = vadd.f32 %v1326_v3, %v3324_v37  ;;  %v3354_v38 = vadd.f32 %v3187_v15, %v1193_v19  ;;  %2094 = vtanh.f32 %v1382_v47  ;;  %v1223_v52 = vmul.f32 0.5, %v3338_v12 }
 0x1f7   :  { %v1263_v44 = vmul.f32 0.044715, %v1171_v56  ;;  %v1343_v23 = vmul.f32 %v1311_v35, %v3335_v6  ;;  %v1319_v55 = vmul.f32 %v1287_v53, %v3338_v12  ;;  %v1231_v28 = vmul.f32 0.5, %v1171_v56 }
 0x1f8   :  { %v2091_v25 = vpop.eup %2090  ;;  %v1390_v31 = vmul.f32 0.7978846, %v1358_v62  ;;  %v1272_v42 = vmul.f32 0.044715, %v3354_v38 }
 0x1f9   :  { %v1463_v49 = vadd.f32 1.0, %v2091_v25  ;;  %v1295_v48 = vmul.f32 %v1263_v44, %v1171_v56  ;;  %v1375_v24 = vadd.f32 %v1343_v23, %v3335_v6  ;;  %v1351_v51 = vadd.f32 %v1319_v55, %v3338_v12 }
 0x1fa   :  { %v1304_v39 = vmul.f32 %v1272_v42, %v3354_v38  ;;  %2096 = vtanh.f32 %v1390_v31 }
 0x1fb   :  { %v1495_v7 = vmul.f32 %v1463_v49, %v1239_v8  ;;  %v1327_v4 = vmul.f32 %v1295_v48, %v1171_v56  ;;  %v1407_v59 = vmul.f32 0.7978846, %v1375_v24  ;;  %v1383_v27 = vmul.f32 0.7978846, %v1351_v51  ;;  %v2093_v43 = vpop.eup %2092 }
 0x1fc   :  { %v1336_v0 = vmul.f32 %v1304_v39, %v3354_v38  ;;  %v2095_v11 = vpop.eup %2094  ;;  %v1470_v29 = vadd.f32 1.0, %v2093_v43  ;;  %v1240_v39 = vmul.f32 0.5, %v3354_v38 }
 0x1fd   :  { %v1892_v46 = vpack.c.bf16 %v1495_v7, %v1494_v22  ;;  %v1359_v57 = vadd.f32 %v1327_v4, %v1171_v56  ;;  %v1195_v17 = vpop.f32.mrf.mxu2  ;;  %2098 = vtanh.f32 %v1407_v59  ;;  %v1446_v60 = vadd.f32 1.0, %v2095_v11 }
 0x1fe   :  { %v3365_v18 = vadd.f32 %v3187_v15, %v1195_v17  ;;  %2100 = vtanh.f32 %v1383_v27  ;;  %v1368_v5 = vadd.f32 %v1336_v0, %v3354_v38  ;;  %v1502_v32 = vmul.f32 %v1470_v29, %v1246_v54 }
 0x1ff   :  { %1958 = vst [vmem:[%s3435_s5 + $0x50] sm:$0xff] %v1892_v46   ;;  %v1391_v9 = vmul.f32 0.7978846, %v1359_v57  ;;  %v1478_v36 = vmul.f32 %v1446_v60, %v1222_v20 }
 0x200   :  { %v1273_v13 = vmul.f32 0.044715, %v3365_v18  ;;  %v1400_v1 = vmul.f32 0.7978846, %v1368_v5  ;;  %v2097_v41 = vpop.eup %2096 }
 0x201   :  { %2102 = vtanh.f32 %v1391_v9  ;;  %v1454_v21 = vadd.f32 1.0, %v2097_v41  ;;  %v1241_v9 = vmul.f32 0.5, %v3365_v18 }
 0x202   :  { %v1305_v26 = vmul.f32 %v1273_v13, %v3365_v18  ;;  %v1153_v16 = vpop.f32.mrf.mxu0  ;;  %2104 = vtanh.f32 %v1400_v1 }
 0x203   :  { %v3375_v33 = vadd.f32 %v3187_v15, %v1153_v16  ;;  %v2099_v45 = vpop.eup %2098  ;;  %v1486_v25 = vmul.f32 %v1454_v21, %v1230_v34 }
 0x204   :  { %v1337_v40 = vmul.f32 %v1305_v26, %v3365_v18  ;;  %v2101_v63 = vpop.eup %2100  ;;  %v1471_v30 = vadd.f32 1.0, %v2099_v45 }
 0x205   :  { %v1256_v10 = vmul.f32 0.044715, %v3375_v33  ;;  %v1447_v58 = vadd.f32 1.0, %v2101_v63 }
 0x206   :  { %v1369_v2 = vadd.f32 %v1337_v40, %v3365_v18  ;;  %v1503_v6 = vmul.f32 %v1471_v30, %v1247_v14  ;;  %v1173_v56 = vpop.f32.mrf.mxu1 }
 0x207   :  { %v2103_v3 = vpop.eup %2102  ;;  %v1213_v19 = vpop.f32.mrf.mxu3  ;;  %v1288_v37 = vmul.f32 %v1256_v10, %v3375_v33  ;;  %v1479_v47 = vmul.f32 %v1447_v58, %v1223_v52  ;;  %v3390_v61 = vadd.f32 %v3187_v15, %v1173_v56 }
 0x208   :  { %v1455_v35 = vadd.f32 1.0, %v2103_v3  ;;  %v1401_v53 = vmul.f32 0.7978846, %v1369_v2  ;;  %v3386_v12 = vadd.f32 %v3187_v15, %v1213_v19  ;;  %v1912_v62 = vpack.c.bf16 %v1503_v6, %v1502_v32  ;;  %v2105_v49 = vpop.eup %2104 }
 0x209   :  { %v1320_v50 = vmul.f32 %v1288_v37, %v3375_v33  ;;  %v1852_v44 = vpack.c.bf16 %v1479_v47, %v1478_v36  ;;  %v1264_v48 = vmul.f32 0.044715, %v3390_v61  ;;  %v1464_v4 = vadd.f32 1.0, %v2105_v49 }
 0x20a   :  { %v1487_v8 = vmul.f32 %v1455_v35, %v1231_v28  ;;  %2106 = vtanh.f32 %v1401_v53  ;;  %v1155_v23 = vpop.f32.mrf.mxu0  ;;  %1962 = vst [vmem:[%s3435_s5 + $0x70] sm:$0xff] %v1912_v62   ;;  %v1280_v55 = vmul.f32 0.044715, %v3386_v12  ;;  %v1224_v36 = vmul.f32 0.5, %v3375_v33 }
 0x20b   :  { %1950 = vst [vmem:[%s3435_s5 + $0x10] sm:$0xff] %v1852_v44   ;;  %v1352_v42 = vadd.f32 %v1320_v50, %v3375_v33  ;;  %v1156_v24 = vadd.f32 %v3187_v15, %v1155_v23  ;;  %v1296_v22 = vmul.f32 %v1264_v48, %v3390_v61  ;;  %v1496_v41 = vmul.f32 %v1464_v4, %v1240_v39 }
 0x20c   :  { %v1872_v31 = vpack.c.bf16 %v1487_v8, %v1486_v25  ;;  %v1312_v51 = vmul.f32 %v1280_v55, %v3386_v12  ;;  %v1248_v50 = vmul.f32 0.5, %v3386_v12  ;;  %v1232_v23 = vmul.f32 0.5, %v3390_v61 }
 0x20d   :  { %v1257_v7 = vmul.f32 0.044715, %v1156_v24  ;;  %v1384_v0 = vmul.f32 0.7978846, %v1352_v42  ;;  %v1328_v57 = vmul.f32 %v1296_v22, %v3390_v61  ;;  %v1225_v6 = vmul.f32 0.5, %v1156_v24 }
 0x20e   :  { %1954 = vst [vmem:[%s3435_s5 + $0x30] sm:$0xff] %v1872_v31   ;;  %v1344_v59 = vmul.f32 %v1312_v51, %v3386_v12  ;;  %v1175_v5 = vpop.f32.mrf.mxu1 }
 0x20f   :  { %v1215_v27 = vpop.f32.mrf.mxu3  ;;  %v1289_v43 = vmul.f32 %v1257_v7, %v1156_v24  ;;  %v1176_v1 = vadd.f32 %v3187_v15, %v1175_v5  ;;  %v1360_v38 = vadd.f32 %v1328_v57, %v3390_v61  ;;  %2108 = vtanh.f32 %v1384_v0 }
 0x210   :  { %v2107_v46 = vpop.eup %2106  ;;  %v1216_v17 = vadd.f32 %v3187_v15, %v1215_v27  ;;  %v1376_v13 = vadd.f32 %v1344_v59, %v3386_v12 }
 0x211   :  { %v1465_v11 = vadd.f32 1.0, %v2107_v46  ;;  %v1321_v16 = vmul.f32 %v1289_v43, %v1156_v24  ;;  %v1265_v60 = vmul.f32 0.044715, %v1176_v1  ;;  %v1392_v34 = vmul.f32 0.7978846, %v1360_v38 }
 0x212   :  { %v1281_v26 = vmul.f32 0.044715, %v1216_v17  ;;  %v1408_v29 = vmul.f32 0.7978846, %v1376_v13  ;;  %v1249_v44 = vmul.f32 0.5, %v1216_v17  ;;  %v1233_v55 = vmul.f32 0.5, %v1176_v1 }
 0x213   :  { %v1497_v54 = vmul.f32 %v1465_v11, %v1241_v9  ;;  %v1353_v20 = vadd.f32 %v1321_v16, %v1156_v24  ;;  %v1297_v40 = vmul.f32 %v1265_v60, %v1176_v1 }
 0x214   :  { %v1313_v45 = vmul.f32 %v1281_v26, %v1216_v17  ;;  %2110 = vtanh.f32 %v1408_v29 }
 0x215   :  { %v1897_v14 = vpack.c.bf16 %v1497_v54, %v1496_v41  ;;  %v1385_v63 = vmul.f32 0.7978846, %v1353_v20  ;;  %v1329_v15 = vmul.f32 %v1297_v40, %v1176_v1  ;;  %v2109_v28 = vpop.eup %2108 }
 0x216   :  { %v1345_v18 = vmul.f32 %v1313_v45, %v1216_v17  ;;  %v1448_v2 = vadd.f32 1.0, %v2109_v28 }
 0x217   :  { %1959 = vst [vmem:[%s3435_s5 + $0x58] sm:$0xff] %v1897_v14   ;;  %2112 = vtanh.f32 %v1385_v63  ;;  %v1361_v52 = vadd.f32 %v1329_v15, %v1176_v1 }
 0x218   :  { %v1377_v30 = vadd.f32 %v1345_v18, %v1216_v17  ;;  %2114 = vtanh.f32 %v1392_v34  ;;  %v1480_v47 = vmul.f32 %v1448_v2, %v1224_v36 }
 0x219   :  { %v1393_v58 = vmul.f32 0.7978846, %v1361_v52 }
 0x21a   :  { %v1409_v10 = vmul.f32 0.7978846, %v1377_v30  ;;  %v2111_v21 = vpop.eup %2110 }
 0x21b   :  { %v1472_v37 = vadd.f32 1.0, %v2111_v21 }
 0x21c   :  { %2116 = vtanh.f32 %v1409_v10 }
 0x21d   :  { %2118 = vtanh.f32 %v1393_v58  ;;  %v2113_v3 = vpop.eup %2112  ;;  %v1504_v31 = vmul.f32 %v1472_v37, %v1248_v50 }
 0x21e   :  { %v2115_v32 = vpop.eup %2114  ;;  %v1449_v19 = vadd.f32 1.0, %v2113_v3 }
 0x21f   :  { %v1456_v56 = vadd.f32 1.0, %v2115_v32 }
 0x220   :  { %v1481_v35 = vmul.f32 %v1449_v19, %v1225_v6 }
 0x221   :  { %v1488_v33 = vmul.f32 %v1456_v56, %v1232_v23 }
 0x222   :  { %v2117_v53 = vpop.eup %2116  ;;  %v1857_v8 = vpack.c.bf16 %v1481_v35, %v1480_v47 }
 0x223   :  { %v2119_v62 = vpop.eup %2118  ;;  %v1473_v25 = vadd.f32 1.0, %v2117_v53 }
 0x224   :  { %v1457_v49 = vadd.f32 1.0, %v2119_v62  ;;  %1951 = vst [vmem:[%s3435_s5 + $0x18] sm:$0xff] %v1857_v8  }
 0x225   :  { %v1505_v42 = vmul.f32 %v1473_v25, %v1249_v44 }
 0x226   :  { %v1489_v48 = vmul.f32 %v1457_v49, %v1233_v55 }
 0x227   :  { %v1917_v24 = vpack.c.bf16 %v1505_v42, %v1504_v31 }
 0x228   :  { %v1877_v51 = vpack.c.bf16 %v1489_v48, %v1488_v33 }
 0x229   :  { %1963 = vst [vmem:[%s3435_s5 + $0x78] sm:$0xff] %v1917_v24  }
 0x22a   :  { %1955 = vst [vmem:[%s3435_s5 + $0x38] sm:$0xff] %v1877_v51  }

// kernel: dino_forward.23
= control target key start
LH: loop header
LB: loop body
LE: loop exit
PB: predicated region body
PF: predicated region fallthrough
CT: control target
= control target key end

     0   :  { %v16_v0 = vlaneseq  ;;  %v64_v4 = vmov 0.0   ;;  %s97_s0 = inlined_call_operand.vmem [shape: bf16[8,128], index: 0, kind: input, shape index: {}]   ;;  %s98_s1 = inlined_call_operand.vmem [shape: f32[1,128], index: 1, kind: input, shape index: {}]   ;;  %s99_s2 = inlined_call_operand.vmem [shape: f32[1,128], index: 2, kind: input, shape index: {}]   ;;  %s100_s3 = inlined_call_operand.vmem [shape: f32[8,128], index: 3, kind: output, shape index: {}]  }
   0x1   :  { %v14_v1 = vld [vmem:[%s97_s0] sm:$0xf] }
   0x2   :  { %v15_v2 = vunpack.c.l.bf16 %v14_v1  ;;  %v17_v3 = vand.u32 127, %v16_v0  ;;  %v60_v21 = vld [vmem:[%s98_s1] ss:$0 sm:$0xff] }
   0x3   :  { %v61_v23 = vld [vmem:[%s99_s2] ss:$0 sm:$0xff] }
   0x4   :  { %vm18_vm0 = vcmp.lt.s32.totalorder %v17_v3, 32 }
   0x5   :  { %v58_v5 = vsel %vm18_vm0, 1.0, %v64_v4 }
   0x6   :  { %v21_v6 = vmul.f32 %v58_v5, %v15_v2 }
   0x8   :  { %22 = vadd.xlane.f32.xlu0 %v21_v6 }
  0x7b   :  { %v23_v7 = vpop.xlane.xlu0 %22 }
  0x7c   :  { %v24_v8 = vmul.f32 0.03125, %v23_v7 }
  0x7e   :  { %v25_v9 = vsub.f32 %v15_v2, %v24_v8 }
  0x80   :  { %v26_v10 = vmul.f32 %v58_v5, %v25_v9 }
  0x82   :  { %v27_v11 = vmul.f32 %v26_v10, %v26_v10 }
  0x84   :  { %28 = vadd.xlane.f32.xlu0 %v27_v11 }
  0xf7   :  { %v29_v12 = vpop.xlane.xlu0 %28 }
  0xf8   :  { %v30_v13 = vmul.f32 0.03125, %v29_v12 }
  0xfa   :  { %v31_v14 = vadd.f32 1e-06, %v30_v13 }
  0xfc   :  { %62 = vrsqrt.f32 %v31_v14  ;;  %vm38_vm2 = vweird.f32 %v31_v14 }
 0x102   :  { %v63_v15 = vpop.eup %62 }
 0x103   :  { %v33_v16 = vmul.f32 %v63_v15, %v31_v14  ;;  %vm39_vm1 = vweird.f32 %v63_v15 }
 0x104   :  { %vm40_vm3 = vmor %vm38_vm2, %vm39_vm1 }
 0x105   :  { %v34_v17 = vmul.f32 %v63_v15, %v33_v16 }
 0x107   :  { %v35_v18 = vmul.f32 0.5, %v34_v17 }
 0x109   :  { %v36_v19 = vsub.f32 1.5, %v35_v18 }
 0x10b   :  { %v37_v20 = vmul.f32 %v63_v15, %v36_v19 }
 0x10d   :  { %v41_v22 = vsel %vm40_vm3, %v63_v15, %v37_v20 }
 0x10e   :  { %v42_v24 = vmul.f32 %v41_v22, %v26_v10 }
 0x110   :  { %v47_v25 = vmul.f32 %v60_v21, %v42_v24 }
 0x112   :  { %v52_v26 = vadd.f32 %v61_v23, %v47_v25 }
 0x114   :  { %53 = vst [vmem:[%s100_s3] sm:$0xff] %v52_v26 }

// kernel: dino_forward.21
= control target key start
LH: loop header
LB: loop body
LE: loop exit
PB: predicated region body
PF: predicated region fallthrough
CT: control target
= control target key end

     0   :  { %10 = vsyncpa [#allocation4], 0  ;;  %s2168_s21 = smov [#allocation3]   ;;  %s2169_s23 = smov 64   ;;  %s3451_s0 = inlined_call_operand.vmem [shape: bf16[256,128], index: 0, kind: input, shape index: {}]   ;;  %s3452_s1 = inlined_call_operand.hbm [shape: bf16[128,128], index: 1, kind: input, shape index: {}]   ;;  %s3453_s2 = inlined_call_operand.vmem [shape: f32[1,128], index: 2, kind: input, shape index: {}]   ;;  %s3454_s3 = inlined_call_operand.vmem [shape: f32[1,128], index: 3, kind: input, shape index: {}]   ;;  %s3455_s4 = inlined_call_operand.vmem [shape: f32[1,128], index: 4, kind: input, shape index: {}]   ;;  %s3456_s5 = inlined_call_operand.vmem [shape: bf16[256,128], index: 5, kind: output, shape index: {}]  }
   0x1   :  { %s17_s20 = sshll.u32 %s3452_s1, 4  ;;  %s19_s22 = sshll.u32 %s2168_s21, 4  ;;  %s18_s20 = int_to_ptr.hbm [resolvable:$true] %s17_s20  ;;  %s20_s22 = int_to_ptr.vmem [resolvable:$true] %s19_s22 }
   0x2   :  { %s2170_s24 = smov 4  }
   0x3   :  { %25 = dma.hbm_to_vmem [thread:$0]  %s18_s20, 1024, %s20_s22, [#allocation4], %s2169_s23, %s2169_s23, %s2170_s24  }
   0x4   :  { %2166 = dma.done.wait [#allocation4], 1024  }
   0x5   :  { %2167 = vsyncadd [#allocation4], 4294966272  ;;  %v104_v0 = vlaneseq  ;;  %v2208_v2 = vld [vmem:[%s3451_s0 + $0x60] sm:$0xff]   ;;  %v2171_v3 = vmov 0.0   ;;  %v2254_v20 = vld [vmem:[%s3451_s0 + $0x48] sm:$0xff]  }
   0x6   :  { %v2215_v5 = vld [vmem:[%s3451_s0 + $0x40] sm:$0xff]   ;;  %v1762_v7 = vunpack.c.l.bf16 %v2208_v2  ;;  %v1763_v13 = vunpack.c.h.bf16 %v2208_v2  ;;  %v1750_v23 = vunpack.c.l.bf16 %v2254_v20  ;;  %v2271_v27 = vld [vmem:[%s3451_s0 + $0x68] sm:$0xff]   ;;  %v1751_v29 = vunpack.c.h.bf16 %v2254_v20  ;;  %v2310_v42 = vld [vmem:[%s3451_s0 + $0x50] sm:$0xff]  }
   0x7   :  { %v105_v1 = vand.u32 127, %v104_v0  ;;  %v2220_v6 = vld [vmem:[%s3451_s0] sm:$0xff]   ;;  %v1746_v8 = vunpack.c.l.bf16 %v2215_v5  ;;  %v1747_v14 = vunpack.c.h.bf16 %v2215_v5  ;;  %v1766_v28 = vunpack.c.l.bf16 %v2271_v27  ;;  %v2288_v34 = vld [vmem:[%s3451_s0 + $0x8] sm:$0xff]   ;;  %v2327_v49 = vld [vmem:[%s3451_s0 + $0x70] sm:$0xff]  }
   0x8   :  { %v1714_v9 = vunpack.c.l.bf16 %v2220_v6  ;;  %v1715_v15 = vunpack.c.h.bf16 %v2220_v6  ;;  %v2249_v19 = vld [vmem:[%s3451_s0 + $0x20] sm:$0xff]   ;;  %v1767_v30 = vunpack.c.h.bf16 %v2271_v27  ;;  %v2293_v35 = vld [vmem:[%s3451_s0 + $0x28] sm:$0xff]   ;;  %v1719_v36 = vunpack.c.h.bf16 %v2288_v34  ;;  %v2332_v50 = vld [vmem:[%s3451_s0 + $0x10] sm:$0xff]  }
   0x9   :  { %vm106_vm0 = vcmp.lt.s32.totalorder %v105_v1, 32  ;;  %v1731_v21 = vunpack.c.h.bf16 %v2249_v19  ;;  %v1730_v22 = vunpack.c.l.bf16 %v2249_v19  ;;  %v1718_v37 = vunpack.c.l.bf16 %v2288_v34  ;;  %v2349_v57 = vld [vmem:[%s3451_s0 + $0x30] sm:$0xff]   ;;  %v2366_v0 = vld [vmem:[%s3451_s0 + $0x58] sm:$0xff]  }
   0xa   :  { %v2210_v4 = vsel %vm106_vm0, 1.0, %v2171_v3  ;;  %v1734_v38 = vunpack.c.l.bf16 %v2293_v35  ;;  %v1754_v43 = vunpack.c.l.bf16 %v2310_v42  ;;  %v1735_v44 = vunpack.c.h.bf16 %v2293_v35  ;;  %v2371_v1 = vld [vmem:[%s3451_s0 + $0x78] sm:$0xff]  }
   0xb   :  { %v133_v10 = vmul.f32 %v1762_v7, %v2210_v4  ;;  %v125_v11 = vmul.f32 %v1746_v8, %v2210_v4  ;;  %v109_v12 = vmul.f32 %v1714_v9, %v2210_v4  ;;  %v134_v16 = vmul.f32 %v1763_v13, %v2210_v4 }
   0xc   :  { %v126_v17 = vmul.f32 %v1747_v14, %v2210_v4  ;;  %v110_v18 = vmul.f32 %v1715_v15, %v2210_v4  ;;  %v118_v24 = vmul.f32 %v1731_v21, %v2210_v4  ;;  %v117_v25 = vmul.f32 %v1730_v22, %v2210_v4 }
   0xd   :  { %189 = vadd.xlane.f32.xlu1 %v133_v10  ;;  %173 = vadd.xlane.f32.xlu0 %v125_v11  ;;  %v127_v26 = vmul.f32 %v1750_v23, %v2210_v4  ;;  %v135_v31 = vmul.f32 %v1766_v28, %v2210_v4  ;;  %v128_v32 = vmul.f32 %v1751_v29, %v2210_v4  ;;  %v1755_v45 = vunpack.c.h.bf16 %v2310_v42 }
   0xe   :  { %141 = vadd.xlane.f32.xlu2 %v109_v12  ;;  %v136_v33 = vmul.f32 %v1767_v30, %v2210_v4  ;;  %v112_v39 = vmul.f32 %v1719_v36, %v2210_v4  ;;  %v111_v40 = vmul.f32 %v1718_v37, %v2210_v4  ;;  %v119_v41 = vmul.f32 %v1734_v38, %v2210_v4 }
   0xf   :  { %v129_v46 = vmul.f32 %v1754_v43, %v2210_v4  ;;  %v120_v47 = vmul.f32 %v1735_v44, %v2210_v4  ;;  %v130_v48 = vmul.f32 %v1755_v45, %v2210_v4  ;;  %v1771_v51 = vunpack.c.h.bf16 %v2327_v49 }
  0x10   :  { %v1770_v52 = vunpack.c.l.bf16 %v2327_v49  ;;  %v1722_v53 = vunpack.c.l.bf16 %v2332_v50  ;;  %v1738_v58 = vunpack.c.l.bf16 %v2349_v57  ;;  %v1723_v59 = vunpack.c.h.bf16 %v2332_v50 }
  0x11   :  { %v138_v54 = vmul.f32 %v1771_v51, %v2210_v4  ;;  %v1739_v60 = vunpack.c.h.bf16 %v2349_v57  ;;  %v1759_v3 = vunpack.c.h.bf16 %v2366_v0  ;;  %v1758_v10 = vunpack.c.l.bf16 %v2366_v0 }
  0x12   :  { %v137_v55 = vmul.f32 %v1770_v52, %v2210_v4  ;;  %v113_v56 = vmul.f32 %v1722_v53, %v2210_v4  ;;  %v121_v61 = vmul.f32 %v1738_v58, %v2210_v4  ;;  %v114_v62 = vmul.f32 %v1723_v59, %v2210_v4 }
  0x13   :  { %v122_v63 = vmul.f32 %v1739_v60, %v2210_v4  ;;  %v1774_v11 = vunpack.c.l.bf16 %v2371_v1  ;;  %v132_v12 = vmul.f32 %v1759_v3, %v2210_v4 }
  0x15   :  { %191 = vadd.xlane.f32.xlu1 %v134_v16  ;;  %175 = vadd.xlane.f32.xlu0 %v126_v17  ;;  %v131_v16 = vmul.f32 %v1758_v10, %v2210_v4  ;;  %v139_v17 = vmul.f32 %v1774_v11, %v2210_v4 }
  0x16   :  { %143 = vadd.xlane.f32.xlu2 %v110_v18  ;;  %v2388_v18 = vld [vmem:[%s3451_s0 + $0x38] sm:$0xff]  }
  0x1d   :  { %159 = vadd.xlane.f32.xlu1 %v118_v24  ;;  %157 = vadd.xlane.f32.xlu0 %v117_v25  ;;  %v2393_v24 = vld [vmem:[%s3451_s0 + $0x18] sm:$0xff]   ;;  %v1775_v25 = vunpack.c.h.bf16 %v2371_v1 }
  0x1e   :  { %177 = vadd.xlane.f32.xlu2 %v127_v26  ;;  %v1742_v26 = vunpack.c.l.bf16 %v2388_v18 }
  0x25   :  { %193 = vadd.xlane.f32.xlu1 %v135_v31  ;;  %179 = vadd.xlane.f32.xlu0 %v128_v32  ;;  %v1726_v31 = vunpack.c.l.bf16 %v2393_v24  ;;  %v140_v32 = vmul.f32 %v1775_v25, %v2210_v4 }
  0x26   :  { %195 = vadd.xlane.f32.xlu2 %v136_v33  ;;  %v123_v33 = vmul.f32 %v1742_v26, %v2210_v4 }
  0x2d   :  { %147 = vadd.xlane.f32.xlu1 %v112_v39  ;;  %145 = vadd.xlane.f32.xlu0 %v111_v40  ;;  %v115_v39 = vmul.f32 %v1726_v31, %v2210_v4  ;;  %v1727_v40 = vunpack.c.h.bf16 %v2393_v24  ;;  %v1710_v24 = vld [vmem:[#allocation3 + $0x30] sm:$0xff] }
  0x2e   :  { %161 = vadd.xlane.f32.xlu2 %v119_v41  ;;  %v1743_v41 = vunpack.c.h.bf16 %v2388_v18  ;;  %v1711_v18 = vld [vmem:[#allocation3 + $0x38] sm:$0xff] }
  0x2f   :  { %1982 = vmatpush.bf16.msra.mxu2 %v1711_v18  ;;  %1983 = vmatpush.bf16.msra.mxu3 %v1711_v18 }
  0x30   :  { %1145 = vmatpush.bf16.msra.mxu0 %v1711_v18  ;;  %1981 = vmatpush.bf16.msra.mxu1 %v1711_v18 }
  0x33   :  { %1985 = vmatpush.bf16.msra.mxu2 %v1710_v24  ;;  %1986 = vmatpush.bf16.msra.mxu3 %v1710_v24 }
  0x34   :  { %1146 = vmatpush.bf16.msra.mxu0 %v1710_v24  ;;  %1984 = vmatpush.bf16.msra.mxu1 %v1710_v24 }
  0x35   :  { %181 = vadd.xlane.f32.xlu1 %v129_v46  ;;  %163 = vadd.xlane.f32.xlu0 %v120_v47  ;;  %v116_v46 = vmul.f32 %v1727_v40, %v2210_v4  ;;  %v124_v47 = vmul.f32 %v1743_v41, %v2210_v4 }
  0x36   :  { %183 = vadd.xlane.f32.xlu2 %v130_v48 }
  0x3d   :  { %199 = vadd.xlane.f32.xlu1 %v138_v54  ;;  %197 = vadd.xlane.f32.xlu0 %v137_v55 }
  0x3e   :  { %149 = vadd.xlane.f32.xlu2 %v113_v56 }
  0x45   :  { %165 = vadd.xlane.f32.xlu1 %v121_v61  ;;  %151 = vadd.xlane.f32.xlu0 %v114_v62 }
  0x46   :  { %167 = vadd.xlane.f32.xlu2 %v122_v63 }
  0x4d   :  { %187 = vadd.xlane.f32.xlu1 %v132_v12  ;;  %185 = vadd.xlane.f32.xlu0 %v131_v16 }
  0x4e   :  { %201 = vadd.xlane.f32.xlu2 %v139_v17 }
  0x55   :  { %203 = vadd.xlane.f32.xlu0 %v140_v32  ;;  %169 = vadd.xlane.f32.xlu1 %v123_v33 }
  0x56   :  { %153 = vadd.xlane.f32.xlu2 %v115_v39 }
  0x5d   :  { %155 = vadd.xlane.f32.xlu0 %v116_v46 }
  0x5e   :  { %171 = vadd.xlane.f32.xlu2 %v124_v47 }
  0x80   :  { %v190_v48 = vpop.xlane.xlu1 %189  ;;  %v174_v54 = vpop.xlane.xlu0 %173 }
  0x81   :  { %v229_v55 = vmul.f32 0.03125, %v190_v48  ;;  %v221_v56 = vmul.f32 0.03125, %v174_v54  ;;  %v142_v61 = vpop.xlane.xlu2 %141 }
  0x82   :  { %v205_v12 = vmul.f32 0.03125, %v142_v61 }
  0x83   :  { %v261_v62 = vsub.f32 %v1762_v7, %v229_v55  ;;  %v253_v63 = vsub.f32 %v1746_v8, %v221_v56 }
  0x84   :  { %v237_v39 = vsub.f32 %v1714_v9, %v205_v12 }
  0x85   :  { %v2420_v16 = vmul.f32 %v2210_v4, %v253_v63  ;;  %v2423_v17 = vmul.f32 %v2210_v4, %v261_v62 }
  0x86   :  { %v2436_v61 = vmul.f32 %v2210_v4, %v237_v39 }
  0x87   :  { %v317_v32 = vmul.f32 %v2420_v16, %v2420_v16  ;;  %v325_v33 = vmul.f32 %v2423_v17, %v2423_v17 }
  0x88   :  { %v192_v7 = vpop.xlane.xlu1 %191  ;;  %v176_v46 = vpop.xlane.xlu0 %175  ;;  %v301_v12 = vmul.f32 %v2436_v61, %v2436_v61 }
  0x89   :  { %v230_v47 = vmul.f32 0.03125, %v192_v7  ;;  %v222_v8 = vmul.f32 0.03125, %v176_v46  ;;  %v144_v48 = vpop.xlane.xlu2 %143  ;;  %365 = vadd.xlane.f32.xlu1 %v317_v32  ;;  %381 = vadd.xlane.f32.xlu0 %v325_v33 }
  0x8a   :  { %v206_v56 = vmul.f32 0.03125, %v144_v48 }
  0x8b   :  { %v262_v54 = vsub.f32 %v1763_v13, %v230_v47  ;;  %v254_v55 = vsub.f32 %v1747_v14, %v222_v8 }
  0x8c   :  { %v238_v63 = vsub.f32 %v1715_v15, %v206_v56 }
  0x8d   :  { %v2439_v62 = vmul.f32 %v2210_v4, %v262_v54  ;;  %v2442_v9 = vmul.f32 %v2210_v4, %v254_v55 }
  0x8e   :  { %v2457_v46 = vmul.f32 %v2210_v4, %v238_v63 }
  0x8f   :  { %v326_v2 = vmul.f32 %v2439_v62, %v2439_v62  ;;  %v318_v5 = vmul.f32 %v2442_v9, %v2442_v9 }
  0x90   :  { %v160_v13 = vpop.xlane.xlu1 %159  ;;  %v158_v14 = vpop.xlane.xlu0 %157 }
  0x91   :  { %v214_v32 = vmul.f32 0.03125, %v160_v13  ;;  %v213_v33 = vmul.f32 0.03125, %v158_v14  ;;  %v178_v39 = vpop.xlane.xlu2 %177  ;;  %383 = vadd.xlane.f32.xlu1 %v326_v2  ;;  %367 = vadd.xlane.f32.xlu2 %v318_v5 }
  0x92   :  { %333 = vadd.xlane.f32.xlu0 %v301_v12  ;;  %v223_v7 = vmul.f32 0.03125, %v178_v39 }
  0x93   :  { %v246_v6 = vsub.f32 %v1731_v21, %v214_v32  ;;  %v245_v15 = vsub.f32 %v1730_v22, %v213_v33  ;;  %v302_v21 = vmul.f32 %v2457_v46, %v2457_v46 }
  0x94   :  { %v255_v48 = vsub.f32 %v1750_v23, %v223_v7 }
  0x95   :  { %v2460_v47 = vmul.f32 %v2210_v4, %v245_v15  ;;  %v2463_v8 = vmul.f32 %v2210_v4, %v246_v6 }
  0x96   :  { %v2478_v14 = vmul.f32 %v2210_v4, %v255_v48 }
  0x97   :  { %v309_v54 = vmul.f32 %v2460_v47, %v2460_v47  ;;  %v310_v19 = vmul.f32 %v2463_v8, %v2463_v8 }
  0x98   :  { %v194_v22 = vpop.xlane.xlu1 %193  ;;  %v180_v55 = vpop.xlane.xlu0 %179 }
  0x99   :  { %v231_v56 = vmul.f32 0.03125, %v194_v22  ;;  %v224_v63 = vmul.f32 0.03125, %v180_v55  ;;  %v196_v2 = vpop.xlane.xlu2 %195  ;;  %349 = vadd.xlane.f32.xlu2 %v309_v54  ;;  %335 = vadd.xlane.f32.xlu1 %v302_v21 }
  0x9a   :  { %351 = vadd.xlane.f32.xlu0 %v310_v19  ;;  %v232_v13 = vmul.f32 0.03125, %v196_v2 }
  0x9b   :  { %v263_v23 = vsub.f32 %v1766_v28, %v231_v56  ;;  %v256_v5 = vsub.f32 %v1751_v29, %v224_v63  ;;  %v319_v28 = vmul.f32 %v2478_v14, %v2478_v14 }
  0x9c   :  { %v264_v33 = vsub.f32 %v1767_v30, %v232_v13 }
  0x9d   :  { %v2481_v12 = vmul.f32 %v2210_v4, %v256_v5  ;;  %v2484_v32 = vmul.f32 %v2210_v4, %v263_v23 }
  0x9e   :  { %v2499_v19 = vmul.f32 %v2210_v4, %v264_v33 }
  0x9f   :  { %v320_v39 = vmul.f32 %v2481_v12, %v2481_v12  ;;  %v327_v20 = vmul.f32 %v2484_v32, %v2484_v32 }
  0xa0   :  { %v148_v29 = vpop.xlane.xlu1 %147  ;;  %v146_v6 = vpop.xlane.xlu0 %145 }
  0xa1   :  { %v208_v15 = vmul.f32 0.03125, %v148_v29  ;;  %v207_v7 = vmul.f32 0.03125, %v146_v6  ;;  %v162_v48 = vpop.xlane.xlu2 %161  ;;  %371 = vadd.xlane.f32.xlu2 %v320_v39  ;;  %369 = vadd.xlane.f32.xlu1 %v319_v28 }
  0xa2   :  { %385 = vadd.xlane.f32.xlu0 %v327_v20  ;;  %v215_v54 = vmul.f32 0.03125, %v162_v48 }
  0xa3   :  { %v240_v27 = vsub.f32 %v1719_v36, %v208_v15  ;;  %v239_v30 = vsub.f32 %v1718_v37, %v207_v7  ;;  %v328_v36 = vmul.f32 %v2499_v19, %v2499_v19 }
  0xa4   :  { %v247_v55 = vsub.f32 %v1734_v38, %v215_v54 }
  0xa5   :  { %v2502_v21 = vmul.f32 %v2210_v4, %v239_v30  ;;  %v2505_v22 = vmul.f32 %v2210_v4, %v240_v27 }
  0xa6   :  { %v2520_v39 = vmul.f32 %v2210_v4, %v247_v55 }
  0xa7   :  { %v303_v56 = vmul.f32 %v2502_v21, %v2502_v21  ;;  %v304_v34 = vmul.f32 %v2505_v22, %v2505_v22 }
  0xa8   :  { %v182_v37 = vpop.xlane.xlu1 %181  ;;  %v164_v63 = vpop.xlane.xlu0 %163 }
  0xa9   :  { %v225_v2 = vmul.f32 0.03125, %v182_v37  ;;  %v216_v23 = vmul.f32 0.03125, %v164_v63  ;;  %v184_v5 = vpop.xlane.xlu2 %183  ;;  %337 = vadd.xlane.f32.xlu2 %v303_v56  ;;  %387 = vadd.xlane.f32.xlu1 %v328_v36 }
  0xaa   :  { %339 = vadd.xlane.f32.xlu0 %v304_v34  ;;  %v226_v33 = vmul.f32 0.03125, %v184_v5 }
  0xab   :  { %v257_v38 = vsub.f32 %v1754_v43, %v225_v2  ;;  %v248_v13 = vsub.f32 %v1735_v44, %v216_v23  ;;  %v311_v43 = vmul.f32 %v2520_v39, %v2520_v39 }
  0xac   :  { %v258_v29 = vsub.f32 %v1755_v45, %v226_v33 }
  0xad   :  { %v2523_v20 = vmul.f32 %v2210_v4, %v248_v13  ;;  %v2526_v28 = vmul.f32 %v2210_v4, %v257_v38 }
  0xae   :  { %v2541_v54 = vmul.f32 %v2210_v4, %v258_v29 }
  0xaf   :  { %v312_v6 = vmul.f32 %v2523_v20, %v2523_v20  ;;  %v321_v35 = vmul.f32 %v2526_v28, %v2526_v28 }
  0xb0   :  { %v200_v44 = vpop.xlane.xlu1 %199  ;;  %v198_v15 = vpop.xlane.xlu0 %197 }
  0xb1   :  { %v234_v7 = vmul.f32 0.03125, %v200_v44  ;;  %v233_v48 = vmul.f32 0.03125, %v198_v15  ;;  %v150_v27 = vpop.xlane.xlu2 %149  ;;  %355 = vadd.xlane.f32.xlu2 %v312_v6  ;;  %353 = vadd.xlane.f32.xlu1 %v311_v43 }
  0xb2   :  { %373 = vadd.xlane.f32.xlu0 %v321_v35  ;;  %v209_v30 = vmul.f32 0.03125, %v150_v27 }
  0xb3   :  { %v266_v42 = vsub.f32 %v1771_v51, %v234_v7  ;;  %v265_v45 = vsub.f32 %v1770_v52, %v233_v48  ;;  %v322_v51 = vmul.f32 %v2541_v54, %v2541_v54 }
  0xb4   :  { %v241_v34 = vsub.f32 %v1722_v53, %v209_v30 }
  0xb5   :  { %v2544_v55 = vmul.f32 %v2210_v4, %v265_v45  ;;  %v2547_v56 = vmul.f32 %v2210_v4, %v266_v42 }
  0xb6   :  { %v2562_v13 = vmul.f32 %v2210_v4, %v241_v34 }
  0xb7   :  { %v329_v36 = vmul.f32 %v2544_v55, %v2544_v55  ;;  %v330_v49 = vmul.f32 %v2547_v56, %v2547_v56 }
  0xb8   :  { %v166_v52 = vpop.xlane.xlu1 %165  ;;  %v152_v37 = vpop.xlane.xlu0 %151 }
  0xb9   :  { %v217_v63 = vmul.f32 0.03125, %v166_v52  ;;  %v210_v2 = vmul.f32 0.03125, %v152_v37  ;;  %v168_v23 = vpop.xlane.xlu2 %167  ;;  %389 = vadd.xlane.f32.xlu2 %v329_v36  ;;  %375 = vadd.xlane.f32.xlu1 %v322_v51 }
  0xba   :  { %391 = vadd.xlane.f32.xlu0 %v330_v49  ;;  %v218_v38 = vmul.f32 0.03125, %v168_v23 }
  0xbb   :  { %v249_v53 = vsub.f32 %v1738_v58, %v217_v63  ;;  %v242_v5 = vsub.f32 %v1723_v59, %v210_v2  ;;  %v305_v58 = vmul.f32 %v2562_v13, %v2562_v13 }
  0xbc   :  { %v250_v6 = vsub.f32 %v1739_v60, %v218_v38 }
  0xbd   :  { %v2565_v33 = vmul.f32 %v2210_v4, %v242_v5  ;;  %v2568_v29 = vmul.f32 %v2210_v4, %v249_v53 }
  0xbe   :  { %v2583_v27 = vmul.f32 %v2210_v4, %v250_v6 }
  0xbf   :  { %v306_v35 = vmul.f32 %v2565_v33, %v2565_v33  ;;  %v313_v50 = vmul.f32 %v2568_v29, %v2568_v29 }
  0xc0   :  { %v188_v59 = vpop.xlane.xlu1 %187  ;;  %v186_v43 = vpop.xlane.xlu0 %185 }
  0xc1   :  { %v228_v44 = vmul.f32 0.03125, %v188_v59  ;;  %v227_v15 = vmul.f32 0.03125, %v186_v43  ;;  %v202_v7 = vpop.xlane.xlu2 %201  ;;  %343 = vadd.xlane.f32.xlu2 %v306_v35  ;;  %341 = vadd.xlane.f32.xlu1 %v305_v58 }
  0xc2   :  { %357 = vadd.xlane.f32.xlu0 %v313_v50  ;;  %v235_v48 = vmul.f32 0.03125, %v202_v7 }
  0xc3   :  { %v260_v57 = vsub.f32 %v1759_v3, %v228_v44  ;;  %v259_v60 = vsub.f32 %v1758_v10, %v227_v15  ;;  %v314_v3 = vmul.f32 %v2583_v27, %v2583_v27 }
  0xc4   :  { %v267_v30 = vsub.f32 %v1774_v11, %v235_v48 }
  0xc5   :  { %v2586_v42 = vmul.f32 %v2210_v4, %v259_v60  ;;  %v2589_v45 = vmul.f32 %v2210_v4, %v260_v57 }
  0xc6   :  { %v2602_v63 = vmul.f32 %v2210_v4, %v267_v30 }
  0xc7   :  { %v323_v34 = vmul.f32 %v2586_v42, %v2586_v42  ;;  %v324_v0 = vmul.f32 %v2589_v45, %v2589_v45 }
  0xc8   :  { %v204_v10 = vpop.xlane.xlu0 %203  ;;  %v170_v36 = vpop.xlane.xlu1 %169  ;;  %v331_v1 = vmul.f32 %v2602_v63, %v2602_v63 }
  0xc9   :  { %v236_v49 = vmul.f32 0.03125, %v204_v10  ;;  %v154_v51 = vpop.xlane.xlu2 %153  ;;  %377 = vadd.xlane.f32.xlu2 %v323_v34  ;;  %359 = vadd.xlane.f32.xlu1 %v314_v3  ;;  %v219_v52 = vmul.f32 0.03125, %v170_v36  ;;  %v1709_v34 = vld [vmem:[#allocation3 + $0x28] sm:$0xff] }
  0xca   :  { %v211_v37 = vmul.f32 0.03125, %v154_v51  ;;  %379 = vadd.xlane.f32.xlu0 %v324_v0  ;;  %1988 = vmatpush.bf16.msra.mxu2 %v1709_v34  ;;  %v1708_v0 = vld [vmem:[#allocation3 + $0x20] sm:$0xff] }
  0xcb   :  { %v268_v11 = vsub.f32 %v1775_v25, %v236_v49  ;;  %v251_v23 = vsub.f32 %v1742_v26, %v219_v52  ;;  %1989 = vmatpush.bf16.msra.mxu3 %v1709_v34  ;;  %1147 = vmatpush.bf16.msra.mxu0 %v1709_v34 }
  0xcc   :  { %v243_v2 = vsub.f32 %v1726_v31, %v211_v37  ;;  %1987 = vmatpush.bf16.msra.mxu1 %v1709_v34 }
  0xcd   :  { %v2609_v53 = vmul.f32 %v2210_v4, %v268_v11  ;;  %v2621_v26 = vmul.f32 %v2210_v4, %v251_v23 }
  0xce   :  { %v2612_v5 = vmul.f32 %v2210_v4, %v243_v2  ;;  %1991 = vmatpush.bf16.msra.mxu2 %v1708_v0 }
  0xcf   :  { %v332_v38 = vmul.f32 %v2609_v53, %v2609_v53  ;;  %v315_v43 = vmul.f32 %v2621_v26, %v2621_v26  ;;  %1992 = vmatpush.bf16.msra.mxu3 %v1708_v0  ;;  %1148 = vmatpush.bf16.msra.mxu0 %v1708_v0 }
  0xd0   :  { %v156_v25 = vpop.xlane.xlu0 %155  ;;  %v307_v6 = vmul.f32 %v2612_v5, %v2612_v5  ;;  %1990 = vmatpush.bf16.msra.mxu1 %v1708_v0 }
  0xd1   :  { %v212_v31 = vmul.f32 0.03125, %v156_v25  ;;  %v172_v35 = vpop.xlane.xlu2 %171  ;;  %395 = vadd.xlane.f32.xlu2 %v332_v38  ;;  %393 = vadd.xlane.f32.xlu1 %v331_v1 }
  0xd2   :  { %v220_v50 = vmul.f32 0.03125, %v172_v35  ;;  %345 = vadd.xlane.f32.xlu0 %v307_v6 }
  0xd3   :  { %v244_v58 = vsub.f32 %v1727_v40, %v212_v31  ;;  %v1707_v31 = vld [vmem:[#allocation3 + $0x18] sm:$0xff] }
  0xd4   :  { %v252_v59 = vsub.f32 %v1743_v41, %v220_v50  ;;  %1994 = vmatpush.bf16.msra.mxu2 %v1707_v31  ;;  %1995 = vmatpush.bf16.msra.mxu3 %v1707_v31 }
  0xd5   :  { %v2630_v44 = vmul.f32 %v2210_v4, %v244_v58  ;;  %1149 = vmatpush.bf16.msra.mxu0 %v1707_v31  ;;  %1993 = vmatpush.bf16.msra.mxu1 %v1707_v31 }
  0xd6   :  { %v2633_v15 = vmul.f32 %v2210_v4, %v252_v59 }
  0xd7   :  { %v308_v7 = vmul.f32 %v2630_v44, %v2630_v44 }
  0xd8   :  { %v316_v57 = vmul.f32 %v2633_v15, %v2633_v15 }
  0xd9   :  { %361 = vadd.xlane.f32.xlu2 %v315_v43  ;;  %347 = vadd.xlane.f32.xlu1 %v308_v7 }
  0xda   :  { %363 = vadd.xlane.f32.xlu0 %v316_v57 }
  0xfc   :  { %v366_v4 = vpop.xlane.xlu1 %365  ;;  %v382_v40 = vpop.xlane.xlu0 %381 }
  0xfd   :  { %v413_v41 = vmul.f32 0.03125, %v366_v4  ;;  %v421_v60 = vmul.f32 0.03125, %v382_v40  ;;  %v1706_v40 = vld [vmem:[#allocation3 + $0x10] sm:$0xff] }
  0xfe   :  { %1997 = vmatpush.bf16.msra.mxu2 %v1706_v40  ;;  %1998 = vmatpush.bf16.msra.mxu3 %v1706_v40 }
  0xff   :  { %v445_v48 = vadd.f32 1e-06, %v413_v41  ;;  %v2639_v30 = vadd.f32 1e-06, %v421_v60  ;;  %1150 = vmatpush.bf16.msra.mxu0 %v1706_v40  ;;  %1996 = vmatpush.bf16.msra.mxu1 %v1706_v40  ;;  %v1704_v40 = vld [vmem:[#allocation3] sm:$0xff] }
 0x101   :  { %2012 = vrsqrt.f32 %v445_v48  ;;  %vm627_vm2 = vweird.f32 %v445_v48  ;;  %vm707_vm4 = vweird.f32 %v2639_v30 }
 0x102   :  { %2014 = vrsqrt.f32 %v2639_v30 }
 0x104   :  { %v384_v3 = vpop.xlane.xlu1 %383  ;;  %v368_v10 = vpop.xlane.xlu2 %367 }
 0x105   :  { %v422_v36 = vmul.f32 0.03125, %v384_v3  ;;  %v334_v49 = vpop.xlane.xlu0 %333  ;;  %v414_v51 = vmul.f32 0.03125, %v368_v10 }
 0x106   :  { %v397_v52 = vmul.f32 0.03125, %v334_v49 }
 0x107   :  { %v2013_v37 = vpop.eup %2012  ;;  %v2642_v11 = vadd.f32 1e-06, %v422_v36  ;;  %v2644_v2 = vadd.f32 1e-06, %v414_v51 }
 0x108   :  { %v2646_v23 = vpop.eup %2014  ;;  %v622_v38 = vmul.f32 %v2013_v37, %v445_v48  ;;  %v2648_v1 = vadd.f32 1e-06, %v397_v52  ;;  %vm628_vm1 = vweird.f32 %v2013_v37  ;;  %v2717_v48 = vld [vmem:[%s3455_s4] ss:$0 sm:$0xff] }
 0x109   :  { %v702_v25 = vmul.f32 %v2646_v23, %v2639_v30  ;;  %2016 = vrsqrt.f32 %v2642_v11  ;;  %vm708_vm3 = vweird.f32 %v2646_v23  ;;  %vm2671_vm5 = vmor %vm627_vm2, %vm628_vm1  ;;  %vm717_vm7 = vweird.f32 %v2642_v11 }
 0x10a   :  { %v623_v6 = vmul.f32 %v2013_v37, %v622_v38  ;;  %2018 = vrsqrt.f32 %v2648_v1  ;;  %vm2685_vm6 = vmor %vm707_vm4, %vm708_vm3  ;;  %vm467_vm8 = vweird.f32 %v2648_v1  ;;  %vm637_vm9 = vweird.f32 %v2644_v2 }
 0x10b   :  { %v703_v35 = vmul.f32 %v2646_v23, %v702_v25  ;;  %2020 = vrsqrt.f32 %v2644_v2 }
 0x10c   :  { %v624_v50 = vmul.f32 0.5, %v623_v6  ;;  %v336_v58 = vpop.xlane.xlu1 %335  ;;  %v350_v59 = vpop.xlane.xlu2 %349 }
 0x10d   :  { %v704_v43 = vmul.f32 0.5, %v703_v35  ;;  %v352_v7 = vpop.xlane.xlu0 %351  ;;  %v398_v57 = vmul.f32 0.03125, %v336_v58  ;;  %v405_v18 = vmul.f32 0.03125, %v350_v59  ;;  %v1705_v35 = vld [vmem:[#allocation3 + $0x8] sm:$0xff]  ;;  %v2701_v58 = vld [vmem:[%s3454_s3] ss:$0 sm:$0xff] }
 0x10e   :  { %v625_v24 = vsub.f32 1.5, %v624_v50  ;;  %v406_v4 = vmul.f32 0.03125, %v352_v7  ;;  %2000 = vmatpush.bf16.msra.mxu2 %v1705_v35  ;;  %2001 = vmatpush.bf16.msra.mxu3 %v1705_v35 }
 0x10f   :  { %v2656_v41 = vpop.eup %2016  ;;  %v705_v60 = vsub.f32 1.5, %v704_v43  ;;  %v2659_v34 = vadd.f32 1e-06, %v398_v57  ;;  %v2679_v30 = vadd.f32 1e-06, %v405_v18  ;;  %1151 = vmatpush.bf16.msra.mxu0 %v1705_v35  ;;  %1999 = vmatpush.bf16.msra.mxu1 %v1705_v35 }
 0x110   :  { %v2661_v0 = vpop.eup %2018  ;;  %v626_v3 = vmul.f32 %v2013_v37, %v625_v24  ;;  %v712_v10 = vmul.f32 %v2656_v41, %v2642_v11  ;;  %v2666_v36 = vadd.f32 1e-06, %v406_v4  ;;  %vm718_vm10 = vweird.f32 %v2656_v41 }
 0x111   :  { %v2668_v49 = vpop.eup %2020  ;;  %v706_v51 = vmul.f32 %v2646_v23, %v705_v60  ;;  %v462_v52 = vmul.f32 %v2661_v0, %v2648_v1  ;;  %2022 = vrsqrt.f32 %v2659_v34  ;;  %vm468_vm11 = vweird.f32 %v2661_v0  ;;  %vm719_vm13 = vmor %vm717_vm7, %vm718_vm10 }
 0x112   :  { %v630_v38 = vsel %vm2671_vm5, %v2013_v37, %v626_v3  ;;  %v713_v6 = vmul.f32 %v2656_v41, %v712_v10  ;;  %v632_v31 = vmul.f32 %v2668_v49, %v2644_v2  ;;  %2024 = vrsqrt.f32 %v2666_v36  ;;  %2003 = vmatpush.bf16.msra.mxu2 %v1704_v40  ;;  %2004 = vmatpush.bf16.msra.mxu3 %v1704_v40  ;;  %vm2739_vm15 = vmor %vm467_vm8, %vm468_vm11 }
 0x113   :  { %v710_v50 = vsel %vm2685_vm6, %v2646_v23, %v706_v51  ;;  %v463_v37 = vmul.f32 %v2661_v0, %v462_v52  ;;  %v797_v59 = vmul.f32 %v630_v38, %v2420_v16  ;;  %2026 = vrsqrt.f32 %v2679_v30  ;;  %1152 = vmatpush.bf16.msra.mxu0 %v1704_v40  ;;  %2002 = vmatpush.bf16.msra.mxu1 %v1704_v40 }
 0x114   :  { %v714_v43 = vmul.f32 0.5, %v713_v6  ;;  %v633_v7 = vmul.f32 %v2668_v49, %v632_v31  ;;  %v370_v57 = vpop.xlane.xlu1 %369  ;;  %v805_v23 = vmul.f32 %v710_v50, %v2423_v17  ;;  %vm638_vm12 = vweird.f32 %v2668_v49  ;;  %v372_v6 = vpop.xlane.xlu2 %371 }
 0x115   :  { %v464_v18 = vmul.f32 0.5, %v463_v37  ;;  %v386_v24 = vpop.xlane.xlu0 %385  ;;  %v415_v10 = vmul.f32 0.03125, %v370_v57  ;;  %v833_v51 = vmul.f32 %v2701_v58, %v797_v59  ;;  %vm477_vm14 = vweird.f32 %v2659_v34  ;;  %vm639_vm1 = vmor %vm637_vm9, %vm638_vm12 }
 0x116   :  { %v715_v4 = vsub.f32 1.5, %v714_v43  ;;  %v634_v16 = vmul.f32 0.5, %v633_v7  ;;  %v423_v17 = vmul.f32 0.03125, %v386_v24  ;;  %v841_v35 = vmul.f32 %v2701_v58, %v805_v23 }
 0x117   :  { %v2711_v60 = vpop.eup %2022  ;;  %v465_v3 = vsub.f32 1.5, %v464_v18  ;;  %vm557_vm0 = vweird.f32 %v2666_v36  ;;  %v2747_v57 = vadd.f32 1e-06, %v415_v10  ;;  %v869_v24 = vadd.f32 %v2717_v48, %v833_v51 }
 0x118   :  { %v716_v52 = vmul.f32 %v2656_v41, %v715_v4  ;;  %v635_v38 = vsub.f32 1.5, %v634_v16  ;;  %v472_v25 = vmul.f32 %v2711_v60, %v2659_v34  ;;  %v2723_v31 = vpop.eup %2024  ;;  %v2732_v37 = vadd.f32 1e-06, %v423_v17 }
 0x119   :  { %v466_v50 = vmul.f32 %v2661_v0, %v465_v3  ;;  %v552_v7 = vmul.f32 %v2723_v31, %v2666_v36  ;;  %v2749_v23 = vpop.eup %2026  ;;  %vm547_vm2 = vweird.f32 %v2679_v30  ;;  %v877_v40 = vadd.f32 %v2717_v48, %v841_v35 }
 0x11a   :  { %v720_v59 = vsel %vm719_vm13, %v2656_v41, %v716_v52  ;;  %v636_v11 = vmul.f32 %v2668_v49, %v635_v38  ;;  %v473_v18 = vmul.f32 %v2711_v60, %v472_v25  ;;  %2028 = vrsqrt.f32 %v2732_v37 }
 0x11b   :  { %v806_v41 = vmul.f32 %v720_v59, %v2439_v62  ;;  %v470_v1 = vsel %vm2739_vm15, %v2661_v0, %v466_v50  ;;  %v553_v16 = vmul.f32 %v2723_v31, %v552_v7  ;;  %v542_v62 = vmul.f32 %v2749_v23, %v2679_v30 }
 0x11c   :  { %v640_v4 = vsel %vm639_vm1, %v2668_v49, %v636_v11  ;;  %v388_v0 = vpop.xlane.xlu1 %387  ;;  %v474_v17 = vmul.f32 0.5, %v473_v18  ;;  %v781_v51 = vmul.f32 %v470_v1, %v2436_v61  ;;  %vm478_vm3 = vweird.f32 %v2711_v60 }
 0x11d   :  { %v842_v2 = vmul.f32 %v2701_v58, %v806_v41  ;;  %v798_v3 = vmul.f32 %v640_v4, %v2442_v9  ;;  %v340_v10 = vpop.xlane.xlu0 %339  ;;  %v554_v52 = vmul.f32 0.5, %v553_v16  ;;  %v543_v49 = vmul.f32 %v2749_v23, %v542_v62  ;;  %vm479_vm6 = vmor %vm477_vm14, %vm478_vm3  ;;  %v338_v16 = vpop.xlane.xlu2 %337 }
 0x11e   :  { %v475_v50 = vsub.f32 1.5, %v474_v17  ;;  %2030 = vrsqrt.f32 %v2747_v57  ;;  %vm558_vm4 = vweird.f32 %v2723_v31  ;;  %vm548_vm5 = vweird.f32 %v2749_v23 }
 0x11f   :  { %v878_v38 = vadd.f32 %v2717_v48, %v842_v2  ;;  %v834_v25 = vmul.f32 %v2701_v58, %v798_v3  ;;  %v555_v35 = vsub.f32 1.5, %v554_v52  ;;  %v544_v9 = vmul.f32 0.5, %v543_v49  ;;  %vm559_vm7 = vmor %vm557_vm0, %vm558_vm4 }
 0x120   :  { %v2778_v59 = vpop.eup %2028  ;;  %v476_v11 = vmul.f32 %v2711_v60, %v475_v50  ;;  %v416_v7 = vmul.f32 0.03125, %v372_v6  ;;  %v817_v41 = vmul.f32 %v2701_v58, %v781_v51  ;;  %v400_v2 = vmul.f32 0.03125, %v340_v10  ;;  %vm549_vm8 = vmor %vm547_vm2, %vm548_vm5 }
 0x121   :  { %v1839_v61 = vpack.c.bf16 %v878_v38, %v877_v40  ;;  %v870_v43 = vadd.f32 %v2717_v48, %v834_v25  ;;  %v556_v1 = vmul.f32 %v2723_v31, %v555_v35  ;;  %v545_v18 = vsub.f32 1.5, %v544_v9 }
 0x122   :  { %v722_v4 = vmul.f32 %v2778_v59, %v2732_v37  ;;  %v480_v6 = vsel %vm479_vm6, %v2711_v60, %v476_v11  ;;  %v2795_v40 = vadd.f32 1e-06, %v416_v7  ;;  %vm727_vm9 = vweird.f32 %v2732_v37 }
 0x123   :  { %1962 = vst [vmem:[#allocation2 + $0x60] sm:$0xff] %v1839_v61   ;;  %v1819_v62 = vpack.c.bf16 %v870_v43, %v869_v24  ;;  %v560_v34 = vsel %vm559_vm7, %v2723_v31, %v556_v1  ;;  %v782_v3 = vmul.f32 %v480_v6, %v2457_v46  ;;  %v546_v17 = vmul.f32 %v2749_v23, %v545_v18 }
 0x124   :  { %v723_v51 = vmul.f32 %v2778_v59, %v722_v4  ;;  %v354_v52 = vpop.xlane.xlu1 %353  ;;  %v2801_v24 = vpop.eup %2030  ;;  %v790_v36 = vmul.f32 %v560_v34, %v2463_v8  ;;  %2032 = vrsqrt.f32 %v2795_v40  ;;  %v2810_v46 = vadd.f32 1e-06, %v400_v2 }
 0x125   :  { %1958 = vst [vmem:[#allocation2 + $0x40] sm:$0xff] %v1819_v62   ;;  %v818_v60 = vmul.f32 %v2701_v58, %v782_v3  ;;  %v550_v31 = vsel %vm549_vm8, %v2749_v23, %v546_v17  ;;  %v642_v49 = vmul.f32 %v2801_v24, %v2747_v57  ;;  %v374_v8 = vpop.xlane.xlu0 %373  ;;  %v853_v38 = vadd.f32 %v2717_v48, %v817_v41  ;;  %v356_v17 = vpop.xlane.xlu2 %355 }
 0x126   :  { %v724_v10 = vmul.f32 0.5, %v723_v51  ;;  %v826_v30 = vmul.f32 %v2701_v58, %v790_v36  ;;  %v789_v25 = vmul.f32 %v550_v31, %v2460_v47  ;;  %2034 = vrsqrt.f32 %v2810_v46 }
 0x127   :  { %v854_v50 = vadd.f32 %v2717_v48, %v818_v60  ;;  %vm728_vm10 = vweird.f32 %v2778_v59  ;;  %v643_v23 = vmul.f32 %v2801_v24, %v642_v49  ;;  %v424_v43 = vmul.f32 0.03125, %v388_v0 }
 0x128   :  { %v725_v35 = vsub.f32 1.5, %v724_v10  ;;  %v862_v9 = vadd.f32 %v2717_v48, %v826_v30  ;;  %v825_v61 = vmul.f32 %v2701_v58, %v789_v25  ;;  %v399_v11 = vmul.f32 0.03125, %v338_v16  ;;  %vm729_vm12 = vmor %vm727_vm9, %vm728_vm10 }
 0x129   :  { %v1779_v7 = vpack.c.bf16 %v854_v50, %v853_v38  ;;  %v644_v1 = vmul.f32 0.5, %v643_v23  ;;  %vm648_vm11 = vweird.f32 %v2801_v24  ;;  %v2832_v62 = vadd.f32 1e-06, %v424_v43 }
 0x12a   :  { %v726_v41 = vmul.f32 %v2778_v59, %v725_v35  ;;  %v1700_v47 = vld [vmem:[#allocation2 + $0x60] sm:$0xff]  ;;  %v2827_v18 = vpop.eup %2032  ;;  %v861_v4 = vadd.f32 %v2717_v48, %v825_v61  ;;  %v2834_v6 = vadd.f32 1e-06, %v399_v11  ;;  %v417_v0 = vmul.f32 0.03125, %v374_v8 }
 0x12b   :  { %1780 = vst [vmem:[#allocation2 + $0x30] sm:$0xff] %v1779_v7   ;;  %v645_v2 = vsub.f32 1.5, %v644_v1  ;;  %v652_v34 = vmul.f32 %v2827_v18, %v2795_v40  ;;  %v407_v3 = vmul.f32 0.03125, %v354_v52  ;;  %1213 = vmatmul.bf16.vlgmr.msra.gmra.mxu3 %v1700_v47  ;;  %2036 = vrsqrt.f32 %v2832_v62 }
 0x12c   :  { %v730_v16 = vsel %vm729_vm12, %v2778_v59, %v726_v41  ;;  %v1696_v51 = vld [vmem:[#allocation2 + $0x40] sm:$0xff]  ;;  %v2839_v36 = vpop.eup %2034  ;;  %v1799_v37 = vpack.c.bf16 %v862_v9, %v861_v4  ;;  %v376_v31 = vpop.xlane.xlu1 %375  ;;  %vm647_vm13 = vweird.f32 %v2747_v57  ;;  %2038 = vrsqrt.f32 %v2834_v6 }
 0x12d   :  { %v807_v60 = vmul.f32 %v730_v16, %v2484_v32  ;;  %v646_v10 = vmul.f32 %v2801_v24, %v645_v2  ;;  %v653_v59 = vmul.f32 %v2827_v18, %v652_v34  ;;  %v492_v52 = vmul.f32 %v2839_v36, %v2810_v46  ;;  %1193 = vmatmul.bf16.vlgmr.msra.gmra.mxu2 %v1696_v51  ;;  %vm649_vm14 = vmor %vm647_vm13, %vm648_vm11  ;;  %v392_v30 = vpop.xlane.xlu0 %391 }
 0x12e   :  { %1954 = vst [vmem:[#allocation2 + $0x50] sm:$0xff] %v1799_v37   ;;  %v2851_v32 = vadd.f32 1e-06, %v417_v0  ;;  %v2855_v57 = vadd.f32 1e-06, %v407_v3  ;;  %vm657_vm15 = vweird.f32 %v2795_v40  ;;  %vm658_vm0 = vweird.f32 %v2827_v18 }
 0x12f   :  { %v650_v49 = vsel %vm649_vm14, %v2801_v24, %v646_v10  ;;  %v654_v8 = vmul.f32 0.5, %v653_v59  ;;  %v493_v38 = vmul.f32 %v2839_v36, %v492_v52  ;;  %v843_v25 = vmul.f32 %v2701_v58, %v807_v60  ;;  %vm659_vm3 = vmor %vm657_vm15, %vm658_vm0 }
 0x130   :  { %v799_v50 = vmul.f32 %v650_v49, %v2478_v14  ;;  %2040 = vrsqrt.f32 %v2851_v32  ;;  %vm497_vm1 = vweird.f32 %v2810_v46  ;;  %v408_v61 = vmul.f32 0.03125, %v356_v17  ;;  %v2889_v17 = vpop.xlane.xlu2 %389 }
 0x131   :  { %v655_v35 = vsub.f32 1.5, %v654_v8  ;;  %v494_v23 = vmul.f32 0.5, %v493_v38  ;;  %2042 = vrsqrt.f32 %v2855_v57  ;;  %v2863_v24 = vpop.eup %2036  ;;  %v426_v43 = vmul.f32 0.03125, %v392_v30 }
 0x132   :  { %v835_v9 = vmul.f32 %v2701_v58, %v799_v50  ;;  %v1688_v11 = vld [vmem:[#allocation2 + $0x30] sm:$0xff]  ;;  %vm498_vm2 = vweird.f32 %v2839_v36  ;;  %v732_v41 = vmul.f32 %v2863_v24, %v2832_v62  ;;  %v2871_v1 = vpop.eup %2038  ;;  %v2874_v47 = vadd.f32 %v2717_v48, %v843_v25 }
 0x133   :  { %v656_v14 = vmul.f32 %v2827_v18, %v655_v35  ;;  %v495_v7 = vsub.f32 1.5, %v494_v23  ;;  %vm737_vm4 = vweird.f32 %v2832_v62  ;;  %v2881_v4 = vadd.f32 1e-06, %v408_v61  ;;  %1153 = vmatmul.bf16.vlgmr.msra.gmra.mxu0 %v1688_v11  ;;  %vm499_vm6 = vmor %vm497_vm1, %vm498_vm2 }
 0x134   :  { %v418_v0 = vmul.f32 0.03125, %v376_v31  ;;  %v733_v34 = vmul.f32 %v2863_v24, %v732_v41  ;;  %v482_v3 = vmul.f32 %v2871_v1, %v2834_v6  ;;  %vm487_vm5 = vweird.f32 %v2834_v6  ;;  %v2902_v31 = vpop.xlane.xlu1 %341 }
 0x135   :  { %v660_v16 = vsel %vm659_vm3, %v2827_v18, %v656_v14  ;;  %v496_v2 = vmul.f32 %v2839_v36, %v495_v7  ;;  %v1692_v40 = vld [vmem:[#allocation2 + $0x50] sm:$0xff]  ;;  %v871_v37 = vadd.f32 %v2717_v48, %v835_v9  ;;  %2044 = vrsqrt.f32 %v2881_v4 }
 0x136   :  { %v2891_v51 = vpop.eup %2040  ;;  %v800_v60 = vmul.f32 %v660_v16, %v2481_v12  ;;  %v2900_v18 = vadd.f32 1e-06, %v426_v43  ;;  %v734_v52 = vmul.f32 0.5, %v733_v34  ;;  %v483_v49 = vmul.f32 %v2871_v1, %v482_v3  ;;  %1173 = vmatmul.bf16.vlgmr.msra.gmra.mxu1 %v1692_v40  ;;  %v358_v34 = vpop.xlane.xlu0 %357 }
 0x137   :  { %v2904_v10 = vpop.eup %2042  ;;  %v500_v59 = vsel %vm499_vm6, %v2839_v36, %v496_v2  ;;  %v662_v12 = vmul.f32 %v2891_v51, %v2851_v32  ;;  %v2914_v30 = vadd.f32 1e-06, %v418_v0  ;;  %vm738_vm7 = vweird.f32 %v2863_v24 }
 0x138   :  { %v836_v46 = vmul.f32 %v2701_v58, %v800_v60  ;;  %v784_v8 = vmul.f32 %v500_v59, %v2505_v22  ;;  %v562_v38 = vmul.f32 %v2904_v10, %v2855_v57  ;;  %v735_v25 = vsub.f32 1.5, %v734_v52  ;;  %vm739_vm10 = vmor %vm737_vm4, %vm738_vm7  ;;  %v344_v60 = vpop.xlane.xlu2 %343 }
 0x139   :  { %v484_v36 = vmul.f32 0.5, %v483_v49  ;;  %v663_v50 = vmul.f32 %v2891_v51, %v662_v12  ;;  %vm488_vm8 = vweird.f32 %v2871_v1  ;;  %vm667_vm9 = vweird.f32 %v2851_v32 }
 0x13a   :  { %v872_v35 = vadd.f32 %v2717_v48, %v836_v46  ;;  %v563_v23 = vmul.f32 %v2904_v10, %v562_v38  ;;  %2046 = vrsqrt.f32 %v2900_v18  ;;  %v820_v22 = vmul.f32 %v2701_v58, %v784_v8  ;;  %vm489_vm12 = vmor %vm487_vm5, %vm488_vm8 }
 0x13b   :  { %v736_v9 = vmul.f32 %v2863_v24, %v735_v25  ;;  %v485_v61 = vsub.f32 1.5, %v484_v36  ;;  %v664_v43 = vmul.f32 0.5, %v663_v50  ;;  %v2925_v11 = vpop.eup %2044  ;;  %vm567_vm11 = vweird.f32 %v2855_v57 }
 0x13c   :  { %v1824_v14 = vpack.c.bf16 %v872_v35, %v871_v37  ;;  %v564_v7 = vmul.f32 0.5, %v563_v23  ;;  %2048 = vrsqrt.f32 %v2914_v30  ;;  %v572_v2 = vmul.f32 %v2925_v11, %v2881_v4  ;;  %v360_v12 = vpop.xlane.xlu1 %359 }
 0x13d   :  { %v740_v41 = vsel %vm739_vm10, %v2863_v24, %v736_v9  ;;  %v486_v0 = vmul.f32 %v2871_v1, %v485_v61  ;;  %v665_v16 = vsub.f32 1.5, %v664_v43  ;;  %vm568_vm13 = vweird.f32 %v2904_v10 }
 0x13e   :  { %1959 = vst [vmem:[#allocation2 + $0x20] sm:$0xff] %v1824_v14   ;;  %v808_v3 = vmul.f32 %v740_v41, %v2499_v19  ;;  %v565_v62 = vsub.f32 1.5, %v564_v7  ;;  %vm577_vm14 = vweird.f32 %v2881_v4  ;;  %v856_v24 = vadd.f32 %v2717_v48, %v820_v22  ;;  %vm569_vm0 = vmor %vm567_vm11, %vm568_vm13 }
 0x13f   :  { %v490_v40 = vsel %vm489_vm12, %v2871_v1, %v486_v0  ;;  %vm668_vm15 = vweird.f32 %v2891_v51  ;;  %v573_v37 = vmul.f32 %v2925_v11, %v572_v2  ;;  %v666_v52 = vmul.f32 %v2891_v51, %v665_v16 }
 0x140   :  { %v2946_v19 = vpop.eup %2046  ;;  %v844_v59 = vmul.f32 %v2701_v58, %v808_v3  ;;  %v783_v6 = vmul.f32 %v490_v40, %v2502_v21  ;;  %v566_v49 = vmul.f32 %v2904_v10, %v565_v62  ;;  %vm578_vm1 = vweird.f32 %v2925_v11  ;;  %vm2967_vm2 = vmor %vm667_vm9, %vm668_vm15  ;;  %v380_v3 = vpop.xlane.xlu0 %379 }
 0x141   :  { %v574_v1 = vmul.f32 0.5, %v573_v37  ;;  %v752_v46 = vmul.f32 %v2946_v19, %v2900_v18  ;;  %v425_v8 = vmul.f32 0.03125, %v2889_v17  ;;  %v409_v50 = vmul.f32 0.03125, %v358_v34  ;;  %vm579_vm4 = vmor %vm577_vm14, %vm578_vm1 }
 0x142   :  { %v2958_v38 = vpop.eup %2048  ;;  %v880_v21 = vadd.f32 %v2717_v48, %v844_v59  ;;  %v819_v25 = vmul.f32 %v2701_v58, %v783_v6  ;;  %v570_v36 = vsel %vm569_vm0, %v2904_v10, %v566_v49  ;;  %v670_v32 = vsel %vm2967_vm2, %v2891_v51, %v666_v52 }
 0x143   :  { %v791_v35 = vmul.f32 %v570_v36, %v2520_v39  ;;  %v575_v17 = vsub.f32 1.5, %v574_v1  ;;  %v753_v23 = vmul.f32 %v2946_v19, %v752_v46  ;;  %v672_v22 = vmul.f32 %v2958_v38, %v2914_v30 }
 0x144   :  { %v1844_v9 = vpack.c.bf16 %v880_v21, %v2874_v47  ;;  %v855_v10 = vadd.f32 %v2717_v48, %v819_v25  ;;  %vm757_vm3 = vweird.f32 %v2900_v18  ;;  %vm758_vm5 = vweird.f32 %v2946_v19  ;;  %v394_v52 = vpop.xlane.xlu1 %393 }
 0x145   :  { %v827_v61 = vmul.f32 %v2701_v58, %v791_v35  ;;  %v576_v39 = vmul.f32 %v2925_v11, %v575_v17  ;;  %v754_v43 = vmul.f32 0.5, %v753_v23  ;;  %v673_v14 = vmul.f32 %v2958_v38, %v672_v22  ;;  %v1697_v7 = vld [vmem:[#allocation2 + $0x20] sm:$0xff]  ;;  %vm759_vm7 = vmor %vm757_vm3, %vm758_vm5 }
 0x146   :  { %1963 = vst [vmem:[#allocation2 + $0x70] sm:$0xff] %v1844_v9   ;;  %v1784_v41 = vpack.c.bf16 %v856_v24, %v855_v10  ;;  %v2989_v47 = vadd.f32 1e-06, %v425_v8  ;;  %v2991_v51 = vadd.f32 1e-06, %v409_v50  ;;  %v801_v0 = vmul.f32 %v670_v32, %v2526_v28  ;;  %1198 = vmatmul.bf16.gmra.mxu2 %v1697_v7 }
 0x147   :  { %v580_v16 = vsel %vm579_vm4, %v2925_v11, %v576_v39  ;;  %v755_v2 = vsub.f32 1.5, %v754_v43  ;;  %v674_v34 = vmul.f32 0.5, %v673_v14  ;;  %v863_v62 = vadd.f32 %v2717_v48, %v827_v61  ;;  %v378_v11 = vpop.xlane.xlu2 %377 }
 0x148   :  { %1951 = vst [vmem:[#allocation2] sm:$0xff] %v1784_v41   ;;  %v792_v4 = vmul.f32 %v580_v16, %v2523_v20  ;;  %vm678_vm6 = vweird.f32 %v2958_v38  ;;  %2050 = vrsqrt.f32 %v2989_v47  ;;  %v401_v28 = vmul.f32 0.03125, %v2902_v31  ;;  %v346_v39 = vpop.xlane.xlu0 %345 }
 0x149   :  { %v756_v24 = vmul.f32 %v2946_v19, %v755_v2  ;;  %v675_v40 = vsub.f32 1.5, %v674_v34  ;;  %2052 = vrsqrt.f32 %v2991_v51  ;;  %v402_v20 = vmul.f32 0.03125, %v344_v60 }
 0x14a   :  { %v828_v37 = vmul.f32 %v2701_v58, %v792_v4  ;;  %v420_v59 = vmul.f32 0.03125, %v380_v3  ;;  %v410_v6 = vmul.f32 0.03125, %v360_v12  ;;  %vm677_vm8 = vweird.f32 %v2914_v30 }
 0x14b   :  { %v760_v49 = vsel %vm759_vm7, %v2946_v19, %v756_v24  ;;  %v676_v1 = vmul.f32 %v2958_v38, %v675_v40  ;;  %v3010_v46 = vadd.f32 1e-06, %v401_v28  ;;  %vm679_vm9 = vmor %vm677_vm8, %vm678_vm6  ;;  %v3016_v18 = vadd.f32 1e-06, %v402_v20 }
 0x14c   :  { %v864_v31 = vadd.f32 %v2717_v48, %v828_v37  ;;  %v810_v8 = vmul.f32 %v760_v49, %v2547_v56  ;;  %v3018_v60 = vadd.f32 1e-06, %v420_v59  ;;  %v837_v12 = vmul.f32 %v2701_v58, %v801_v0 }
 0x14d   :  { %v680_v19 = vsel %vm679_vm9, %v2958_v38, %v676_v1  ;;  %2054 = vrsqrt.f32 %v3010_v46  ;;  %v3023_v30 = vadd.f32 1e-06, %v410_v6  ;;  %v1701_v21 = vld [vmem:[#allocation2 + $0x70] sm:$0xff]  ;;  %v419_v50 = vmul.f32 0.03125, %v378_v11 }
 0x14e   :  { %v3025_v25 = vpop.eup %2050  ;;  %v1804_v36 = vpack.c.bf16 %v864_v31, %v863_v62  ;;  %v802_v56 = vmul.f32 %v680_v19, %v2541_v54  ;;  %2056 = vrsqrt.f32 %v3016_v18  ;;  %v846_v35 = vmul.f32 %v2701_v58, %v810_v8  ;;  %1218 = vmatmul.bf16.gmra.mxu3 %v1701_v21  ;;  %v348_v62 = vpop.xlane.xlu1 %347 }
 0x14f   :  { %v3029_v57 = vpop.eup %2052  ;;  %v742_v38 = vmul.f32 %v3025_v25, %v2989_v47  ;;  %2058 = vrsqrt.f32 %v3018_v60  ;;  %v1689_v17 = vld [vmem:[#allocation2] sm:$0xff]  ;;  %v873_v22 = vadd.f32 %v2717_v48, %v837_v12  ;;  %vm747_vm10 = vweird.f32 %v2989_v47  ;;  %v396_v0 = vpop.xlane.xlu2 %395 }
 0x150   :  { %1955 = vst [vmem:[#allocation2 + $0x68] sm:$0xff] %v1804_v36   ;;  %v838_v23 = vmul.f32 %v2701_v58, %v802_v56  ;;  %v582_v54 = vmul.f32 %v3029_v57, %v2991_v51  ;;  %2060 = vrsqrt.f32 %v3023_v30  ;;  %1158 = vmatmul.bf16.gmra.mxu0 %v1689_v17  ;;  %vm587_vm11 = vweird.f32 %v2991_v51 }
 0x151   :  { %v743_v9 = vmul.f32 %v3025_v25, %v742_v38  ;;  %v3045_v61 = vadd.f32 1e-06, %v419_v50  ;;  %v3050_v14 = vadd.f32 %v2717_v48, %v846_v35  ;;  %vm748_vm12 = vweird.f32 %v3025_v25 }
 0x152   :  { %v874_v10 = vadd.f32 %v2717_v48, %v838_v23  ;;  %v583_v32 = vmul.f32 %v3029_v57, %v582_v54  ;;  %v427_v41 = vmul.f32 0.03125, %v394_v52  ;;  %vm588_vm13 = vweird.f32 %v3029_v57  ;;  %vm749_vm1 = vmor %vm747_vm10, %vm748_vm12 }
 0x153   :  { %v3047_v43 = vpop.eup %2054  ;;  %v744_v7 = vmul.f32 0.5, %v743_v9  ;;  %vm507_vm14 = vweird.f32 %v3010_v46  ;;  %vm517_vm15 = vweird.f32 %v3016_v18  ;;  %2062 = vrsqrt.f32 %v3045_v61  ;;  %vm3098_vm4 = vmor %vm587_vm11, %vm588_vm13 }
 0x154   :  { %v3053_v16 = vpop.eup %2056  ;;  %v1829_v2 = vpack.c.bf16 %v874_v10, %v873_v22  ;;  %v584_v34 = vmul.f32 0.5, %v583_v32  ;;  %v502_v3 = vmul.f32 %v3047_v43, %v3010_v46  ;;  %v3065_v28 = vmul.f32 0.03125, %v346_v39 }
 0x155   :  { %v3059_v4 = vpop.eup %2058  ;;  %v745_v24 = vsub.f32 1.5, %v744_v7  ;;  %v512_v40 = vmul.f32 %v3053_v16, %v3016_v18  ;;  %vm697_vm0 = vweird.f32 %v3018_v60  ;;  %v3071_v59 = vmul.f32 0.03125, %v396_v0 }
 0x156   :  { %1960 = vst [vmem:[#allocation2 + $0x10] sm:$0xff] %v1829_v2   ;;  %v585_v11 = vsub.f32 1.5, %v584_v34  ;;  %v503_v37 = vmul.f32 %v3047_v43, %v502_v3  ;;  %v692_v20 = vmul.f32 %v3059_v4, %v3018_v60  ;;  %v3073_v6 = vpop.eup %2060  ;;  %v3077_v1 = vadd.f32 1e-06, %v427_v41 }
 0x157   :  { %v746_v52 = vmul.f32 %v3025_v25, %v745_v24  ;;  %v513_v49 = vmul.f32 %v3053_v16, %v512_v40  ;;  %v3079_v31 = vmul.f32 0.03125, %v348_v62  ;;  %v1693_v8 = vld [vmem:[#allocation2 + $0x68] sm:$0xff]  ;;  %v592_v36 = vmul.f32 %v3073_v6, %v3023_v30 }
 0x158   :  { %v586_v12 = vmul.f32 %v3029_v57, %v585_v11  ;;  %v504_v19 = vmul.f32 0.5, %v503_v37  ;;  %v693_v21 = vmul.f32 %v3059_v4, %v692_v20  ;;  %vm508_vm2 = vweird.f32 %v3047_v43  ;;  %1178 = vmatmul.bf16.gmra.mxu1 %v1693_v8 }
 0x159   :  { %v750_v56 = vsel %vm749_vm1, %v3025_v25, %v746_v52  ;;  %v514_v50 = vmul.f32 0.5, %v513_v49  ;;  %vm597_vm3 = vweird.f32 %v3023_v30  ;;  %2064 = vrsqrt.f32 %v3077_v1  ;;  %v2063_v17 = vpop.eup %2062  ;;  %vm509_vm7 = vmor %vm507_vm14, %vm508_vm2 }
 0x15a   :  { %v809_v47 = vmul.f32 %v750_v56, %v2544_v55  ;;  %v505_v38 = vsub.f32 1.5, %v504_v19  ;;  %vm518_vm5 = vweird.f32 %v3053_v16  ;;  %v694_v25 = vmul.f32 0.5, %v693_v21  ;;  %v364_v21 = vpop.xlane.xlu0 %363 }
 0x15b   :  { %v590_v23 = vsel %vm3098_vm4, %v3029_v57, %v586_v12  ;;  %v515_v54 = vsub.f32 1.5, %v514_v50  ;;  %vm698_vm6 = vweird.f32 %v3059_v4  ;;  %v593_v55 = vmul.f32 %v3073_v6, %v592_v36  ;;  %vm519_vm10 = vmor %vm517_vm15, %vm518_vm5 }
 0x15c   :  { %v845_v51 = vmul.f32 %v2701_v58, %v809_v47  ;;  %v506_v22 = vmul.f32 %v3047_v43, %v505_v38  ;;  %v695_v9 = vsub.f32 1.5, %v694_v25  ;;  %v682_v10 = vmul.f32 %v2063_v17, %v3045_v61  ;;  %vm699_vm11 = vmor %vm697_vm0, %vm698_vm6 }
 0x15d   :  { %v516_v32 = vmul.f32 %v3053_v16, %v515_v54  ;;  %v594_v57 = vmul.f32 0.5, %v593_v55  ;;  %vm598_vm8 = vweird.f32 %v3073_v6  ;;  %vm687_vm9 = vweird.f32 %v3045_v61  ;;  %v1698_v39 = vld [vmem:[#allocation2 + $0x10] sm:$0xff] }
 0x15e   :  { %v881_v7 = vadd.f32 %v2717_v48, %v845_v51  ;;  %v510_v41 = vsel %vm509_vm7, %v3047_v43, %v506_v22  ;;  %v696_v46 = vmul.f32 %v3059_v4, %v695_v9  ;;  %v683_v0 = vmul.f32 %v2063_v17, %v682_v10  ;;  %1203 = vmatmul.bf16.gmra.mxu2 %v1698_v39  ;;  %vm599_vm12 = vmor %vm597_vm3, %vm598_vm8 }
 0x15f   :  { %v3125_v2 = vpop.eup %2064  ;;  %v793_v34 = vmul.f32 %v590_v23, %v2568_v29  ;;  %v785_v3 = vmul.f32 %v510_v41, %v2562_v13  ;;  %v520_v62 = vsel %vm519_vm10, %v3053_v16, %v516_v32  ;;  %v595_v43 = vsub.f32 1.5, %v594_v57 }
 0x160   :  { %v1849_v18 = vpack.c.bf16 %v3050_v14, %v881_v7  ;;  %v786_v24 = vmul.f32 %v520_v62, %v2565_v33  ;;  %v700_v40 = vsel %vm699_vm11, %v3059_v4, %v696_v46  ;;  %v684_v11 = vmul.f32 0.5, %v683_v0 }
 0x161   :  { %v821_v29 = vmul.f32 %v2701_v58, %v785_v3  ;;  %v804_v13 = vmul.f32 %v700_v40, %v2589_v45  ;;  %v596_v16 = vmul.f32 %v3073_v6, %v595_v43  ;;  %v762_v37 = vmul.f32 %v3125_v2, %v3077_v1 }
 0x162   :  { %1964 = vst [vmem:[#allocation2 + $0x78] sm:$0xff] %v1849_v18   ;;  %v822_v60 = vmul.f32 %v2701_v58, %v786_v24  ;;  %v685_v33 = vsub.f32 1.5, %v684_v11  ;;  %vm688_vm13 = vweird.f32 %v2063_v17  ;;  %v3148_v14 = vadd.f32 1e-06, %v3065_v28 }
 0x163   :  { %v829_v45 = vmul.f32 %v2701_v58, %v793_v34  ;;  %v857_v4 = vadd.f32 %v2717_v48, %v821_v29  ;;  %v600_v20 = vsel %vm599_vm12, %v3073_v6, %v596_v16  ;;  %v763_v52 = vmul.f32 %v3125_v2, %v762_v37  ;;  %vm689_vm14 = vmor %vm687_vm9, %vm688_vm13 }
 0x164   :  { %v858_v49 = vadd.f32 %v2717_v48, %v822_v60  ;;  %v794_v8 = vmul.f32 %v600_v20, %v2583_v27  ;;  %v686_v12 = vmul.f32 %v2063_v17, %v685_v33  ;;  %2066 = vrsqrt.f32 %v3148_v14  ;;  %v362_v27 = vpop.xlane.xlu2 %361 }
 0x165   :  { %v840_v30 = vmul.f32 %v2701_v58, %v804_v13  ;;  %v764_v28 = vmul.f32 0.5, %v763_v52  ;;  %v3161_v19 = vadd.f32 1e-06, %v3071_v59  ;;  %v3165_v50 = vadd.f32 1e-06, %v3079_v31 }
 0x166   :  { %v1789_v6 = vpack.c.bf16 %v858_v49, %v857_v4  ;;  %v830_v36 = vmul.f32 %v2701_v58, %v794_v8  ;;  %v690_v56 = vsel %vm689_vm14, %v2063_v17, %v686_v12  ;;  %v865_v61 = vadd.f32 %v2717_v48, %v829_v45 }
 0x167   :  { %v803_v47 = vmul.f32 %v690_v56, %v2586_v42  ;;  %v765_v35 = vsub.f32 1.5, %v764_v28  ;;  %2068 = vrsqrt.f32 %v3161_v19  ;;  %v412_v38 = vmul.f32 0.03125, %v364_v21 }
 0x168   :  { %1952 = vst [vmem:[#allocation2 + $0x58] sm:$0xff] %v1789_v6   ;;  %v866_v59 = vadd.f32 %v2717_v48, %v830_v36  ;;  %2070 = vrsqrt.f32 %v3165_v50  ;;  %v876_v25 = vadd.f32 %v2717_v48, %v840_v30  ;;  %v411_v31 = vmul.f32 0.03125, %v362_v27 }
 0x169   :  { %v839_v17 = vmul.f32 %v2701_v58, %v803_v47  ;;  %v1702_v23 = vld [vmem:[#allocation2 + $0x78] sm:$0xff]  ;;  %v3174_v42 = vadd.f32 1e-06, %v412_v38  ;;  %v766_v22 = vmul.f32 %v3125_v2, %v765_v35  ;;  %vm768_vm15 = vweird.f32 %v3125_v2  ;;  %v2141_v38 = vld [vmem:[%s3455_s4] ss:$0 sm:$0xff] }
 0x16a   :  { %v2067_v54 = vpop.eup %2066  ;;  %v1809_v55 = vpack.c.bf16 %v866_v59, %v865_v61  ;;  %1223 = vmatmul.bf16.gmra.mxu3 %v1702_v23  ;;  %v3181_v10 = vadd.f32 1e-06, %v411_v31  ;;  %vm767_vm0 = vweird.f32 %v3077_v1  ;;  %vm527_vm3 = vweird.f32 %v3148_v14 }
 0x16b   :  { %v875_v51 = vadd.f32 %v2717_v48, %v839_v17  ;;  %v522_v9 = vmul.f32 %v2067_v54, %v3148_v14  ;;  %2072 = vrsqrt.f32 %v3174_v42  ;;  %vm769_vm1 = vmor %vm767_vm0, %vm768_vm15  ;;  %vm528_vm2 = vweird.f32 %v2067_v54 }
 0x16c   :  { %1956 = vst [vmem:[#allocation2 + $0x8] sm:$0xff] %v1809_v55   ;;  %2074 = vrsqrt.f32 %v3181_v10  ;;  %v770_v46 = vsel %vm769_vm1, %v3125_v2, %v766_v22  ;;  %vm529_vm4 = vmor %vm527_vm3, %vm528_vm2  ;;  %vm777_vm7 = vweird.f32 %v3161_v19  ;;  %vm537_vm9 = vweird.f32 %v3165_v50 }
 0x16d   :  { %v2069_v32 = vpop.eup %2068  ;;  %v1834_v57 = vpack.c.bf16 %v876_v25, %v875_v51  ;;  %v523_v39 = vmul.f32 %v2067_v54, %v522_v9  ;;  %v811_v24 = vmul.f32 %v770_v46, %v2602_v63  ;;  %vm617_vm12 = vweird.f32 %v3174_v42 }
 0x16e   :  { %v2071_v7 = vpop.eup %2070  ;;  %v772_v41 = vmul.f32 %v2069_v32, %v3161_v19  ;;  %vm778_vm5 = vweird.f32 %v2069_v32  ;;  %v2140_v19 = vld [vmem:[%s3454_s3] ss:$0 sm:$0xff]  ;;  %vm607_vm15 = vweird.f32 %v3181_v10 }
 0x16f   :  { %1961 = vst [vmem:[#allocation2 + $0x38] sm:$0xff] %v1834_v57   ;;  %v524_v0 = vmul.f32 0.5, %v523_v39  ;;  %v532_v34 = vmul.f32 %v2071_v7, %v3165_v50  ;;  %v1690_v3 = vld [vmem:[#allocation2 + $0x58] sm:$0xff]  ;;  %vm538_vm6 = vweird.f32 %v2071_v7  ;;  %v847_v63 = vmul.f32 %v2701_v58, %v811_v24  ;;  %vm779_vm8 = vmor %vm777_vm7, %vm778_vm5 }
 0x170   :  { %v773_v62 = vmul.f32 %v2069_v32, %v772_v41  ;;  %1163 = vmatmul.bf16.gmra.mxu0 %v1690_v3  ;;  %vm539_vm10 = vmor %vm537_vm9, %vm538_vm6 }
 0x171   :  { %v525_v43 = vsub.f32 1.5, %v524_v0  ;;  %v533_v18 = vmul.f32 %v2071_v7, %v532_v34  ;;  %v2073_v1 = vpop.eup %2072  ;;  %v883_v6 = vadd.f32 %v2717_v48, %v847_v63 }
 0x172   :  { %v774_v40 = vmul.f32 0.5, %v773_v62  ;;  %v612_v13 = vmul.f32 %v2073_v1, %v3174_v42  ;;  %v2075_v16 = vpop.eup %2074  ;;  %vm618_vm11 = vweird.f32 %v2073_v1 }
 0x173   :  { %v526_v11 = vmul.f32 %v2067_v54, %v525_v43  ;;  %v534_v29 = vmul.f32 0.5, %v533_v18  ;;  %v1694_v2 = vld [vmem:[#allocation2 + $0x8] sm:$0xff]  ;;  %v602_v4 = vmul.f32 %v2075_v16, %v3181_v10  ;;  %vm608_vm13 = vweird.f32 %v2075_v16  ;;  %vm619_vm14 = vmor %vm617_vm12, %vm618_vm11 }
 0x174   :  { %v775_v37 = vsub.f32 1.5, %v774_v40  ;;  %v613_v45 = vmul.f32 %v2073_v1, %v612_v13  ;;  %1183 = vmatmul.bf16.gmra.mxu1 %v1694_v2  ;;  %vm609_vm0 = vmor %vm607_vm15, %vm608_vm13 }
 0x175   :  { %v530_v60 = vsel %vm529_vm4, %v2067_v54, %v526_v11  ;;  %v535_v33 = vsub.f32 1.5, %v534_v29  ;;  %v603_v12 = vmul.f32 %v2075_v16, %v602_v4 }
 0x176   :  { %v787_v20 = vmul.f32 %v530_v60, %v2612_v5  ;;  %v776_v14 = vmul.f32 %v2069_v32, %v775_v37  ;;  %v1699_v52 = vld [vmem:[#allocation2 + $0x38] sm:$0xff]  ;;  %v614_v8 = vmul.f32 0.5, %v613_v45 }
 0x177   :  { %v536_v49 = vmul.f32 %v2071_v7, %v535_v33  ;;  %1208 = vmatmul.bf16.gmra.mxu2 %v1699_v52  ;;  %v604_v5 = vmul.f32 0.5, %v603_v12 }
 0x178   :  { %v780_v30 = vsel %vm779_vm8, %v2069_v32, %v776_v14  ;;  %v615_v21 = vsub.f32 1.5, %v614_v8  ;;  %v823_v36 = vmul.f32 %v2140_v19, %v787_v20 }
 0x179   :  { %v812_v28 = vmul.f32 %v780_v30, %v2609_v53  ;;  %v540_v58 = vsel %vm539_vm10, %v2071_v7, %v536_v49  ;;  %v605_v47 = vsub.f32 1.5, %v604_v5 }
 0x17a   :  { %v788_v56 = vmul.f32 %v540_v58, %v2630_v44  ;;  %v616_v27 = vmul.f32 %v2073_v1, %v615_v21  ;;  %v859_v44 = vadd.f32 %v2141_v38, %v823_v36 }
 0x17b   :  { %v848_v50 = vmul.f32 %v2140_v19, %v812_v28  ;;  %v606_v59 = vmul.f32 %v2075_v16, %v605_v47 }
 0x17c   :  { %v824_v35 = vmul.f32 %v2140_v19, %v788_v56  ;;  %v620_v61 = vsel %vm619_vm14, %v2073_v1, %v616_v27 }
 0x17d   :  { %v884_v53 = vadd.f32 %v2717_v48, %v848_v50  ;;  %v796_v17 = vmul.f32 %v620_v61, %v2633_v15  ;;  %v610_v23 = vsel %vm609_vm0, %v2075_v16, %v606_v59  ;;  %v3215_v15 = vld [vmem:[%s3453_s2] ss:$0 sm:$0xff] }
 0x17e   :  { %v860_v25 = vadd.f32 %v2141_v38, %v824_v35  ;;  %v795_v42 = vmul.f32 %v610_v23, %v2621_v26 }
 0x17f   :  { %v1854_v31 = vpack.c.bf16 %v884_v53, %v883_v6  ;;  %v832_v55 = vmul.f32 %v2140_v19, %v796_v17 }
 0x180   :  { %v1794_v54 = vpack.c.bf16 %v860_v25, %v859_v44  ;;  %v831_v51 = vmul.f32 %v2140_v19, %v795_v42 }
 0x181   :  { %1965 = vst [vmem:[#allocation2 + $0x28] sm:$0xff] %v1854_v31   ;;  %v868_v48 = vadd.f32 %v2141_v38, %v832_v55 }
 0x182   :  { %1953 = vst [vmem:[#allocation2 + $0x18] sm:$0xff] %v1794_v54   ;;  %v867_v22 = vadd.f32 %v2141_v38, %v831_v51 }
 0x184   :  { %v1814_v9 = vpack.c.bf16 %v868_v48, %v867_v22 }
 0x186   :  { %1957 = vst [vmem:[#allocation2 + $0x48] sm:$0xff] %v1814_v9  }
 0x188   :  { %v1703_v10 = vld [vmem:[#allocation2 + $0x28] sm:$0xff] }
 0x189   :  { %v1691_v32 = vld [vmem:[#allocation2 + $0x18] sm:$0xff]  ;;  %1228 = vmatmul.bf16.gmra.mxu3 %v1703_v10 }
 0x18a   :  { %1168 = vmatmul.bf16.gmra.mxu0 %v1691_v32 }
 0x18d   :  { %v1695_v57 = vld [vmem:[#allocation2 + $0x48] sm:$0xff] }
 0x18e   :  { %1188 = vmatmul.bf16.gmra.mxu1 %v1695_v57 }
 0x1ae   :  { %v1214_v39 = vpop.f32.mrf.mxu3 }
 0x1af   :  { %v3218_v26 = vadd.f32 %v3215_v15, %v1214_v39 }
 0x1b0   :  { %v1194_v7 = vpop.f32.mrf.mxu2  ;;  %v1154_v0 = vpop.f32.mrf.mxu0 }
 0x1b1   :  { %v3221_v41 = vadd.f32 %v3215_v15, %v1194_v7  ;;  %v1290_v46 = vmul.f32 0.044715, %v3218_v26  ;;  %v3225_v34 = vadd.f32 %v3215_v15, %v1154_v0  ;;  %v1258_v57 = vmul.f32 0.5, %v3218_v26 }
 0x1b3   :  { %v1282_v3 = vmul.f32 0.044715, %v3221_v41  ;;  %v1322_v62 = vmul.f32 %v1290_v46, %v3218_v26  ;;  %v1266_v43 = vmul.f32 0.044715, %v3225_v34  ;;  %v1174_v18 = vpop.f32.mrf.mxu1  ;;  %v1250_v46 = vmul.f32 0.5, %v3221_v41 }
 0x1b4   :  { %v3233_v40 = vadd.f32 %v3215_v15, %v1174_v18  ;;  %v1234_v18 = vmul.f32 0.5, %v3225_v34 }
 0x1b5   :  { %v1314_v1 = vmul.f32 %v1282_v3, %v3221_v41  ;;  %v1354_v24 = vmul.f32 %v1322_v62, %v3218_v26  ;;  %v1298_v11 = vmul.f32 %v1266_v43, %v3225_v34 }
 0x1b6   :  { %v1216_v29 = vpop.f32.mrf.mxu3  ;;  %v1274_v2 = vmul.f32 0.044715, %v3233_v40 }
 0x1b7   :  { %v1346_v13 = vmul.f32 %v1314_v1, %v3221_v41  ;;  %v1386_v16 = vadd.f32 %v1354_v24, %v3218_v26  ;;  %v1330_v37 = vmul.f32 %v1298_v11, %v3225_v34  ;;  %v1217_v33 = vadd.f32 %v3215_v15, %v1216_v29 }
 0x1b8   :  { %v1196_v60 = vpop.f32.mrf.mxu2  ;;  %v1306_v4 = vmul.f32 %v1274_v2, %v3233_v40  ;;  %v1156_v20 = vpop.f32.mrf.mxu0  ;;  %v1242_v24 = vmul.f32 0.5, %v3233_v40 }
 0x1b9   :  { %v1378_v45 = vadd.f32 %v1346_v13, %v3221_v41  ;;  %v1197_v63 = vadd.f32 %v3215_v15, %v1196_v60  ;;  %v1291_v14 = vmul.f32 0.044715, %v1217_v33  ;;  %v1157_v52 = vadd.f32 %v3215_v15, %v1156_v20 }
 0x1ba   :  { %v1362_v49 = vadd.f32 %v1330_v37, %v3225_v34  ;;  %v1338_v8 = vmul.f32 %v1306_v4, %v3233_v40  ;;  %v1418_v12 = vmul.f32 0.7978846, %v1386_v16  ;;  %v1259_v0 = vmul.f32 0.5, %v1217_v33 }
 0x1bb   :  { %v1283_v30 = vmul.f32 0.044715, %v1197_v63  ;;  %v1323_v28 = vmul.f32 %v1291_v14, %v1217_v33  ;;  %v1176_v58 = vpop.f32.mrf.mxu1  ;;  %v1410_v21 = vmul.f32 0.7978846, %v1378_v45  ;;  %v1267_v6 = vmul.f32 0.044715, %v1157_v52 }
 0x1bc   :  { %v1370_v5 = vadd.f32 %v1338_v8, %v3233_v40  ;;  %v1177_v19 = vadd.f32 %v3215_v15, %v1176_v58  ;;  %v1394_v50 = vmul.f32 0.7978846, %v1362_v49  ;;  %2076 = vtanh.f32 %v1418_v12 }
 0x1bd   :  { %v1315_v36 = vmul.f32 %v1283_v30, %v1197_v63  ;;  %v1355_v56 = vmul.f32 %v1323_v28, %v1217_v33  ;;  %v1299_v27 = vmul.f32 %v1267_v6, %v1157_v52  ;;  %2078 = vtanh.f32 %v1410_v21 }
 0x1be   :  { %v1275_v47 = vmul.f32 0.044715, %v1177_v19  ;;  %v1402_v61 = vmul.f32 0.7978846, %v1370_v5  ;;  %2080 = vtanh.f32 %v1394_v50  ;;  %v1251_v11 = vmul.f32 0.5, %v1197_v63 }
 0x1bf   :  { %v1347_v35 = vmul.f32 %v1315_v36, %v1197_v63  ;;  %v1387_v53 = vadd.f32 %v1355_v56, %v1217_v33  ;;  %v1331_v59 = vmul.f32 %v1299_v27, %v1157_v52  ;;  %v1235_v60 = vmul.f32 0.5, %v1157_v52 }
 0x1c0   :  { %v1307_v38 = vmul.f32 %v1275_v47, %v1177_v19  ;;  %v1243_v8 = vmul.f32 0.5, %v1177_v19 }
 0x1c1   :  { %v1379_v44 = vadd.f32 %v1347_v35, %v1197_v63  ;;  %v1419_v25 = vmul.f32 0.7978846, %v1387_v53  ;;  %v1363_v17 = vadd.f32 %v1331_v59, %v1157_v52 }
 0x1c2   :  { %v1339_v31 = vmul.f32 %v1307_v38, %v1177_v19  ;;  %v2077_v42 = vpop.eup %2076 }
 0x1c3   :  { %v1411_v23 = vmul.f32 0.7978846, %v1379_v44  ;;  %2082 = vtanh.f32 %v1419_v25  ;;  %v1395_v54 = vmul.f32 0.7978846, %v1363_v17  ;;  %v2079_v48 = vpop.eup %2078  ;;  %v1482_v9 = vadd.f32 1.0, %v2077_v42 }
 0x1c4   :  { %2084 = vtanh.f32 %v1402_v61  ;;  %v1371_v55 = vadd.f32 %v1339_v31, %v1177_v19  ;;  %v2081_v22 = vpop.eup %2080  ;;  %v1474_v32 = vadd.f32 1.0, %v2079_v48 }
 0x1c5   :  { %2086 = vtanh.f32 %v1411_v23  ;;  %v1458_v1 = vadd.f32 1.0, %v2081_v22  ;;  %v1514_v13 = vmul.f32 %v1482_v9, %v1258_v57 }
 0x1c6   :  { %2088 = vtanh.f32 %v1395_v54  ;;  %v1403_v51 = vmul.f32 0.7978846, %v1371_v55  ;;  %v1506_v37 = vmul.f32 %v1474_v32, %v1250_v46 }
 0x1c7   :  { %v1490_v40 = vmul.f32 %v1458_v1, %v1234_v18 }
 0x1c8   :  { %2090 = vtanh.f32 %v1403_v51 }
 0x1c9   :  { %v2083_v10 = vpop.eup %2082  ;;  %v1199_v39 = vpop.f32.mrf.mxu2 }
 0x1ca   :  { %v2085_v7 = vpop.eup %2084  ;;  %v1483_v3 = vadd.f32 1.0, %v2083_v10  ;;  %v3252_v62 = vadd.f32 %v3215_v15, %v1199_v39 }
 0x1cb   :  { %v2087_v43 = vpop.eup %2086  ;;  %v1466_v41 = vadd.f32 1.0, %v2085_v7 }
 0x1cc   :  { %v2089_v29 = vpop.eup %2088  ;;  %v1475_v2 = vadd.f32 1.0, %v2087_v43  ;;  %v1515_v26 = vmul.f32 %v1483_v3, %v1259_v0  ;;  %v1284_v16 = vmul.f32 0.044715, %v3252_v62 }
 0x1cd   :  { %v1459_v33 = vadd.f32 1.0, %v2089_v29  ;;  %v1159_v45 = vpop.f32.mrf.mxu0  ;;  %v1498_v58 = vmul.f32 %v1466_v41, %v1242_v24 }
 0x1ce   :  { %v2091_v4 = vpop.eup %2090  ;;  %v1507_v20 = vmul.f32 %v1475_v2, %v1251_v11  ;;  %v1919_v14 = vpack.c.bf16 %v1515_v26, %v1514_v13  ;;  %v1316_v34 = vmul.f32 %v1284_v16, %v3252_v62  ;;  %v3259_v49 = vadd.f32 %v3215_v15, %v1159_v45 }
 0x1cf   :  { %v1491_v63 = vmul.f32 %v1459_v33, %v1235_v60  ;;  %v1467_v12 = vadd.f32 1.0, %v2091_v4 }
 0x1d0   :  { %v1899_v30 = vpack.c.bf16 %v1507_v20, %v1506_v37  ;;  %1977 = vst [vmem:[%s3456_s5 + $0x60] sm:$0xff] %v1919_v14   ;;  %v1348_v52 = vmul.f32 %v1316_v34, %v3252_v62  ;;  %v1268_v28 = vmul.f32 0.044715, %v3259_v49 }
 0x1d1   :  { %v1859_v21 = vpack.c.bf16 %v1491_v63, %v1490_v40  ;;  %v1499_v5 = vmul.f32 %v1467_v12, %v1243_v8  ;;  %v1201_v6 = vpop.f32.mrf.mxu2  ;;  %v1219_v36 = vpop.f32.mrf.mxu3  ;;  %v1252_v12 = vmul.f32 0.5, %v3252_v62 }
 0x1d2   :  { %1973 = vst [vmem:[%s3456_s5 + $0x40] sm:$0xff] %v1899_v30   ;;  %v1380_v19 = vadd.f32 %v1348_v52, %v3252_v62  ;;  %v1300_v56 = vmul.f32 %v1268_v28, %v3259_v49  ;;  %v1202_v50 = vadd.f32 %v3215_v15, %v1201_v6  ;;  %v3273_v27 = vadd.f32 %v3215_v15, %v1219_v36 }
 0x1d3   :  { %1860 = vst [vmem:[%s3456_s5] sm:$0xff] %v1859_v21   ;;  %v1879_v47 = vpack.c.bf16 %v1499_v5, %v1498_v58 }
 0x1d4   :  { %v1332_v35 = vmul.f32 %v1300_v56, %v3259_v49  ;;  %v1285_v53 = vmul.f32 0.044715, %v1202_v50  ;;  %v1292_v61 = vmul.f32 0.044715, %v3273_v27  ;;  %v1412_v44 = vmul.f32 0.7978846, %v1380_v19 }
 0x1d5   :  { %1969 = vst [vmem:[%s3456_s5 + $0x20] sm:$0xff] %v1879_v47   ;;  %v1161_v59 = vpop.f32.mrf.mxu0  ;;  %v1179_v38 = vpop.f32.mrf.mxu1  ;;  %v1253_v30 = vmul.f32 0.5, %v1202_v50 }
 0x1d6   :  { %v1364_v25 = vadd.f32 %v1332_v35, %v3259_v49  ;;  %v1317_v17 = vmul.f32 %v1285_v53, %v1202_v50  ;;  %v1162_v31 = vadd.f32 %v3215_v15, %v1161_v59  ;;  %v1324_v23 = vmul.f32 %v1292_v61, %v3273_v27 }
 0x1d7   :  { %v3287_v54 = vadd.f32 %v3215_v15, %v1179_v38  ;;  %2092 = vtanh.f32 %v1412_v44  ;;  %v1236_v35 = vmul.f32 0.5, %v3259_v49 }
 0x1d8   :  { %v1349_v55 = vmul.f32 %v1317_v17, %v1202_v50  ;;  %v1269_v42 = vmul.f32 0.044715, %v1162_v31  ;;  %v1396_v48 = vmul.f32 0.7978846, %v1364_v25  ;;  %v1356_v51 = vmul.f32 %v1324_v23, %v3273_v27 }
 0x1d9   :  { %v1276_v22 = vmul.f32 0.044715, %v3287_v54  ;;  %v1221_v9 = vpop.f32.mrf.mxu3  ;;  %v1237_v62 = vmul.f32 0.5, %v1162_v31 }
 0x1da   :  { %v1381_v10 = vadd.f32 %v1349_v55, %v1202_v50  ;;  %v1301_v32 = vmul.f32 %v1269_v42, %v1162_v31  ;;  %v3292_v57 = vadd.f32 %v3215_v15, %v1221_v9  ;;  %v1388_v39 = vadd.f32 %v1356_v51, %v3273_v27 }
 0x1db   :  { %v1308_v7 = vmul.f32 %v1276_v22, %v3287_v54  ;;  %2094 = vtanh.f32 %v1396_v48 }
 0x1dc   :  { %v1413_v46 = vmul.f32 0.7978846, %v1381_v10  ;;  %v1333_v0 = vmul.f32 %v1301_v32, %v1162_v31  ;;  %v1293_v3 = vmul.f32 0.044715, %v3292_v57  ;;  %v1420_v43 = vmul.f32 0.7978846, %v1388_v39 }
 0x1dd   :  { %v1340_v18 = vmul.f32 %v1308_v7, %v3287_v54  ;;  %v1181_v1 = vpop.f32.mrf.mxu1  ;;  %v2093_v2 = vpop.eup %2092  ;;  %v1261_v48 = vmul.f32 0.5, %v3292_v57 }
 0x1de   :  { %2096 = vtanh.f32 %v1413_v46  ;;  %v1365_v24 = vadd.f32 %v1333_v0, %v1162_v31  ;;  %v1325_v11 = vmul.f32 %v1293_v3, %v3292_v57  ;;  %v3300_v29 = vadd.f32 %v3215_v15, %v1181_v1 }
 0x1df   :  { %v1372_v13 = vadd.f32 %v1340_v18, %v3287_v54  ;;  %2098 = vtanh.f32 %v1420_v43  ;;  %v1476_v14 = vadd.f32 1.0, %v2093_v2  ;;  %v1260_v31 = vmul.f32 0.5, %v3273_v27 }
 0x1e0   :  { %v1397_v26 = vmul.f32 0.7978846, %v1365_v24  ;;  %v1357_v16 = vmul.f32 %v1325_v11, %v3292_v57  ;;  %v1277_v37 = vmul.f32 0.044715, %v3300_v29  ;;  %v1244_v3 = vmul.f32 0.5, %v3287_v54 }
 0x1e1   :  { %v1404_v41 = vmul.f32 0.7978846, %v1372_v13  ;;  %v1204_v60 = vpop.f32.mrf.mxu2  ;;  %v2095_v20 = vpop.eup %2094  ;;  %v1508_v5 = vmul.f32 %v1476_v14, %v1252_v12  ;;  %v1245_v24 = vmul.f32 0.5, %v3300_v29 }
 0x1e2   :  { %2100 = vtanh.f32 %v1397_v26  ;;  %v1389_v33 = vadd.f32 %v1357_v16, %v3292_v57  ;;  %v1309_v45 = vmul.f32 %v1277_v37, %v3300_v29  ;;  %v3308_v4 = vadd.f32 %v3215_v15, %v1204_v60 }
 0x1e3   :  { %2102 = vtanh.f32 %v1404_v41  ;;  %v1460_v6 = vadd.f32 1.0, %v2095_v20 }
 0x1e4   :  { %v2097_v34 = vpop.eup %2096  ;;  %v1421_v40 = vmul.f32 0.7978846, %v1389_v33  ;;  %v1341_v63 = vmul.f32 %v1309_v45, %v3300_v29  ;;  %v1286_v8 = vmul.f32 0.044715, %v3308_v4 }
 0x1e5   :  { %v1477_v52 = vadd.f32 1.0, %v2097_v34  ;;  %v2099_v21 = vpop.eup %2098  ;;  %v1492_v44 = vmul.f32 %v1460_v6, %v1236_v35 }
 0x1e6   :  { %2104 = vtanh.f32 %v1421_v40  ;;  %v1373_v28 = vadd.f32 %v1341_v63, %v3300_v29  ;;  %v1318_v58 = vmul.f32 %v1286_v8, %v3308_v4  ;;  %v1484_v25 = vadd.f32 1.0, %v2099_v21 }
 0x1e7   :  { %v1509_v36 = vmul.f32 %v1477_v52, %v1253_v30 }
 0x1e8   :  { %v2101_v19 = vpop.eup %2100  ;;  %v1405_v56 = vmul.f32 0.7978846, %v1373_v28  ;;  %v1350_v47 = vmul.f32 %v1318_v58, %v3308_v4  ;;  %v1516_v7 = vmul.f32 %v1484_v25, %v1260_v31 }
 0x1e9   :  { %v1904_v53 = vpack.c.bf16 %v1509_v36, %v1508_v5  ;;  %v1461_v50 = vadd.f32 1.0, %v2101_v19  ;;  %v1206_v61 = vpop.f32.mrf.mxu2  ;;  %v2103_v38 = vpop.eup %2102 }
 0x1ea   :  { %2106 = vtanh.f32 %v1405_v56  ;;  %v3318_v59 = vadd.f32 %v3215_v15, %v1206_v61  ;;  %v1382_v23 = vadd.f32 %v1350_v47, %v3308_v4  ;;  %v1468_v27 = vadd.f32 1.0, %v2103_v38 }
 0x1eb   :  { %1974 = vst [vmem:[%s3456_s5 + $0x48] sm:$0xff] %v1904_v53   ;;  %v1493_v17 = vmul.f32 %v1461_v50, %v1237_v62  ;;  %v1254_v50 = vmul.f32 0.5, %v3308_v4 }
 0x1ec   :  { %v2105_v55 = vpop.eup %2104  ;;  %v1287_v49 = vmul.f32 0.044715, %v3318_v59  ;;  %v1414_v0 = vmul.f32 0.7978846, %v1382_v23  ;;  %v1500_v41 = vmul.f32 %v1468_v27, %v1244_v3 }
 0x1ed   :  { %v1864_v42 = vpack.c.bf16 %v1493_v17, %v1492_v44  ;;  %v1485_v51 = vadd.f32 1.0, %v2105_v55  ;;  %v1224_v22 = vpop.f32.mrf.mxu3  ;;  %v1164_v9 = vpop.f32.mrf.mxu0  ;;  %v1255_v17 = vmul.f32 0.5, %v3318_v59 }
 0x1ee   :  { %v3328_v10 = vadd.f32 %v3215_v15, %v1224_v22  ;;  %v3331_v32 = vadd.f32 %v3215_v15, %v1164_v9  ;;  %v1319_v39 = vmul.f32 %v1287_v49, %v3318_v59  ;;  %2108 = vtanh.f32 %v1414_v0 }
 0x1ef   :  { %1966 = vst [vmem:[%s3456_s5 + $0x8] sm:$0xff] %v1864_v42   ;;  %v1517_v46 = vmul.f32 %v1485_v51, %v1261_v48 }
 0x1f0   :  { %v2107_v57 = vpop.eup %2106  ;;  %v1294_v43 = vmul.f32 0.044715, %v3328_v10  ;;  %v1270_v18 = vmul.f32 0.044715, %v3331_v32  ;;  %v1351_v13 = vmul.f32 %v1319_v39, %v3318_v59 }
 0x1f1   :  { %v1924_v1 = vpack.c.bf16 %v1517_v46, %v1516_v7  ;;  %v1469_v11 = vadd.f32 1.0, %v2107_v57  ;;  %v1184_v2 = vpop.f32.mrf.mxu1 }
 0x1f2   :  { %v1326_v26 = vmul.f32 %v1294_v43, %v3328_v10  ;;  %v1302_v16 = vmul.f32 %v1270_v18, %v3331_v32  ;;  %v3345_v37 = vadd.f32 %v3215_v15, %v1184_v2  ;;  %v1383_v29 = vadd.f32 %v1351_v13, %v3318_v59 }
 0x1f3   :  { %1978 = vst [vmem:[%s3456_s5 + $0x68] sm:$0xff] %v1924_v1   ;;  %v1501_v54 = vmul.f32 %v1469_v11, %v1245_v24 }
 0x1f4   :  { %v1358_v60 = vmul.f32 %v1326_v26, %v3328_v10  ;;  %v1334_v33 = vmul.f32 %v1302_v16, %v3331_v32  ;;  %v1278_v45 = vmul.f32 0.044715, %v3345_v37  ;;  %v1415_v14 = vmul.f32 0.7978846, %v1383_v29  ;;  %v2109_v28 = vpop.eup %2108 }
 0x1f5   :  { %v1884_v20 = vpack.c.bf16 %v1501_v54, %v1500_v41  ;;  %v1226_v34 = vpop.f32.mrf.mxu3  ;;  %v1166_v40 = vpop.f32.mrf.mxu0  ;;  %v1478_v61 = vadd.f32 1.0, %v2109_v28  ;;  %v1262_v54 = vmul.f32 0.5, %v3328_v10 }
 0x1f6   :  { %v1390_v63 = vadd.f32 %v1358_v60, %v3328_v10  ;;  %v3356_v8 = vadd.f32 %v3215_v15, %v1226_v34  ;;  %v3359_v12 = vadd.f32 %v3215_v15, %v1166_v40  ;;  %v1366_v30 = vadd.f32 %v1334_v33, %v3331_v32 }
 0x1f7   :  { %1970 = vst [vmem:[%s3456_s5 + $0x28] sm:$0xff] %v1884_v20   ;;  %2110 = vtanh.f32 %v1415_v14  ;;  %v1310_v52 = vmul.f32 %v1278_v45, %v3345_v37  ;;  %v1510_v22 = vmul.f32 %v1478_v61, %v1254_v50  ;;  %v1238_v20 = vmul.f32 0.5, %v3331_v32 }
 0x1f8   :  { %v1422_v58 = vmul.f32 0.7978846, %v1390_v63  ;;  %v1295_v21 = vmul.f32 0.044715, %v3356_v8  ;;  %v1271_v5 = vmul.f32 0.044715, %v3359_v12 }
 0x1f9   :  { %v1342_v6 = vmul.f32 %v1310_v52, %v3345_v37  ;;  %v1186_v36 = vpop.f32.mrf.mxu1  ;;  %v1398_v47 = vmul.f32 0.7978846, %v1366_v30  ;;  %v1263_v14 = vmul.f32 0.5, %v3356_v8  ;;  %v1246_v34 = vmul.f32 0.5, %v3345_v37 }
 0x1fa   :  { %v1209_v19 = vpop.f32.mrf.mxu2  ;;  %v1187_v56 = vadd.f32 %v3215_v15, %v1186_v36  ;;  %v1327_v35 = vmul.f32 %v1295_v21, %v3356_v8  ;;  %v1303_v53 = vmul.f32 %v1271_v5, %v3359_v12  ;;  %2112 = vtanh.f32 %v1422_v58 }
 0x1fb   :  { %v1374_v62 = vadd.f32 %v1342_v6, %v3345_v37  ;;  %v3375_v38 = vadd.f32 %v3215_v15, %v1209_v19  ;;  %2114 = vtanh.f32 %v1398_v47  ;;  %v1239_v52 = vmul.f32 0.5, %v3359_v12 }
 0x1fc   :  { %v1279_v44 = vmul.f32 0.044715, %v1187_v56  ;;  %v1359_v23 = vmul.f32 %v1327_v35, %v3356_v8  ;;  %v1335_v55 = vmul.f32 %v1303_v53, %v3359_v12  ;;  %v1247_v28 = vmul.f32 0.5, %v1187_v56 }
 0x1fd   :  { %v2111_v25 = vpop.eup %2110  ;;  %v1406_v31 = vmul.f32 0.7978846, %v1374_v62  ;;  %v1288_v42 = vmul.f32 0.044715, %v3375_v38 }
 0x1fe   :  { %v1479_v49 = vadd.f32 1.0, %v2111_v25  ;;  %v1311_v48 = vmul.f32 %v1279_v44, %v1187_v56  ;;  %v1391_v4 = vadd.f32 %v1359_v23, %v3356_v8  ;;  %v1367_v51 = vadd.f32 %v1335_v55, %v3359_v12 }
 0x1ff   :  { %v1320_v39 = vmul.f32 %v1288_v42, %v3375_v38  ;;  %2116 = vtanh.f32 %v1406_v31 }
 0x200   :  { %v1511_v9 = vmul.f32 %v1479_v49, %v1255_v17  ;;  %v1343_v7 = vmul.f32 %v1311_v48, %v1187_v56  ;;  %v1423_v59 = vmul.f32 0.7978846, %v1391_v4  ;;  %v1399_v27 = vmul.f32 0.7978846, %v1367_v51  ;;  %v2113_v43 = vpop.eup %2112 }
 0x201   :  { %v1352_v0 = vmul.f32 %v1320_v39, %v3375_v38  ;;  %v2115_v11 = vpop.eup %2114  ;;  %v1486_v29 = vadd.f32 1.0, %v2113_v43  ;;  %v1256_v39 = vmul.f32 0.5, %v3375_v38 }
 0x202   :  { %v1909_v46 = vpack.c.bf16 %v1511_v9, %v1510_v22  ;;  %v1375_v57 = vadd.f32 %v1343_v7, %v1187_v56  ;;  %v1211_v3 = vpop.f32.mrf.mxu2  ;;  %2118 = vtanh.f32 %v1423_v59  ;;  %v1462_v60 = vadd.f32 1.0, %v2115_v11 }
 0x203   :  { %v3386_v18 = vadd.f32 %v3215_v15, %v1211_v3  ;;  %2120 = vtanh.f32 %v1399_v27  ;;  %v1384_v1 = vadd.f32 %v1352_v0, %v3375_v38  ;;  %v1518_v32 = vmul.f32 %v1486_v29, %v1262_v54 }
 0x204   :  { %1975 = vst [vmem:[%s3456_s5 + $0x50] sm:$0xff] %v1909_v46   ;;  %v1407_v24 = vmul.f32 0.7978846, %v1375_v57  ;;  %v1494_v36 = vmul.f32 %v1462_v60, %v1238_v20 }
 0x205   :  { %v1289_v13 = vmul.f32 0.044715, %v3386_v18  ;;  %v1416_v2 = vmul.f32 0.7978846, %v1384_v1  ;;  %v2117_v41 = vpop.eup %2116 }
 0x206   :  { %2122 = vtanh.f32 %v1407_v24  ;;  %v1470_v21 = vadd.f32 1.0, %v2117_v41  ;;  %v1257_v24 = vmul.f32 0.5, %v3386_v18 }
 0x207   :  { %v1321_v26 = vmul.f32 %v1289_v13, %v3386_v18  ;;  %v1169_v16 = vpop.f32.mrf.mxu0  ;;  %2124 = vtanh.f32 %v1416_v2 }
 0x208   :  { %v3396_v33 = vadd.f32 %v3215_v15, %v1169_v16  ;;  %v2119_v45 = vpop.eup %2118  ;;  %v1502_v25 = vmul.f32 %v1470_v21, %v1246_v34 }
 0x209   :  { %v1353_v40 = vmul.f32 %v1321_v26, %v3386_v18  ;;  %v2121_v63 = vpop.eup %2120  ;;  %v1487_v30 = vadd.f32 1.0, %v2119_v45 }
 0x20a   :  { %v1272_v10 = vmul.f32 0.044715, %v3396_v33  ;;  %v1463_v58 = vadd.f32 1.0, %v2121_v63 }
 0x20b   :  { %v1385_v5 = vadd.f32 %v1353_v40, %v3386_v18  ;;  %v1519_v8 = vmul.f32 %v1487_v30, %v1263_v14  ;;  %v1189_v56 = vpop.f32.mrf.mxu1 }
 0x20c   :  { %v2123_v6 = vpop.eup %2122  ;;  %v1229_v19 = vpop.f32.mrf.mxu3  ;;  %v1304_v37 = vmul.f32 %v1272_v10, %v3396_v33  ;;  %v1495_v47 = vmul.f32 %v1463_v58, %v1239_v52  ;;  %v3411_v61 = vadd.f32 %v3215_v15, %v1189_v56 }
 0x20d   :  { %v1471_v35 = vadd.f32 1.0, %v2123_v6  ;;  %v1417_v53 = vmul.f32 0.7978846, %v1385_v5  ;;  %v3407_v12 = vadd.f32 %v3215_v15, %v1229_v19  ;;  %v1929_v62 = vpack.c.bf16 %v1519_v8, %v1518_v32  ;;  %v2125_v49 = vpop.eup %2124 }
 0x20e   :  { %v1336_v50 = vmul.f32 %v1304_v37, %v3396_v33  ;;  %v1869_v44 = vpack.c.bf16 %v1495_v47, %v1494_v36  ;;  %v1280_v48 = vmul.f32 0.044715, %v3411_v61  ;;  %v1480_v7 = vadd.f32 1.0, %v2125_v49 }
 0x20f   :  { %v1503_v17 = vmul.f32 %v1471_v35, %v1247_v28  ;;  %2126 = vtanh.f32 %v1417_v53  ;;  %v1171_v23 = vpop.f32.mrf.mxu0  ;;  %1979 = vst [vmem:[%s3456_s5 + $0x70] sm:$0xff] %v1929_v62   ;;  %v1296_v55 = vmul.f32 0.044715, %v3407_v12  ;;  %v1240_v36 = vmul.f32 0.5, %v3396_v33 }
 0x210   :  { %1967 = vst [vmem:[%s3456_s5 + $0x10] sm:$0xff] %v1869_v44   ;;  %v1368_v42 = vadd.f32 %v1336_v50, %v3396_v33  ;;  %v1172_v4 = vadd.f32 %v3215_v15, %v1171_v23  ;;  %v1312_v22 = vmul.f32 %v1280_v48, %v3411_v61  ;;  %v1512_v41 = vmul.f32 %v1480_v7, %v1256_v39 }
 0x211   :  { %v1889_v31 = vpack.c.bf16 %v1503_v17, %v1502_v25  ;;  %v1328_v51 = vmul.f32 %v1296_v55, %v3407_v12  ;;  %v1264_v50 = vmul.f32 0.5, %v3407_v12  ;;  %v1248_v23 = vmul.f32 0.5, %v3411_v61 }
 0x212   :  { %v1273_v9 = vmul.f32 0.044715, %v1172_v4  ;;  %v1400_v0 = vmul.f32 0.7978846, %v1368_v42  ;;  %v1344_v57 = vmul.f32 %v1312_v22, %v3411_v61  ;;  %v1241_v8 = vmul.f32 0.5, %v1172_v4 }
 0x213   :  { %1971 = vst [vmem:[%s3456_s5 + $0x30] sm:$0xff] %v1889_v31   ;;  %v1360_v59 = vmul.f32 %v1328_v51, %v3407_v12  ;;  %v1191_v1 = vpop.f32.mrf.mxu1 }
 0x214   :  { %v1231_v27 = vpop.f32.mrf.mxu3  ;;  %v1305_v43 = vmul.f32 %v1273_v9, %v1172_v4  ;;  %v1192_v2 = vadd.f32 %v3215_v15, %v1191_v1  ;;  %v1376_v38 = vadd.f32 %v1344_v57, %v3411_v61  ;;  %2128 = vtanh.f32 %v1400_v0 }
 0x215   :  { %v2127_v46 = vpop.eup %2126  ;;  %v1232_v3 = vadd.f32 %v3215_v15, %v1231_v27  ;;  %v1392_v13 = vadd.f32 %v1360_v59, %v3407_v12 }
 0x216   :  { %v1481_v11 = vadd.f32 1.0, %v2127_v46  ;;  %v1337_v16 = vmul.f32 %v1305_v43, %v1172_v4  ;;  %v1281_v60 = vmul.f32 0.044715, %v1192_v2  ;;  %v1408_v34 = vmul.f32 0.7978846, %v1376_v38 }
 0x217   :  { %v1297_v26 = vmul.f32 0.044715, %v1232_v3  ;;  %v1424_v29 = vmul.f32 0.7978846, %v1392_v13  ;;  %v1265_v44 = vmul.f32 0.5, %v1232_v3  ;;  %v1249_v55 = vmul.f32 0.5, %v1192_v2 }
 0x218   :  { %v1513_v54 = vmul.f32 %v1481_v11, %v1257_v24  ;;  %v1369_v20 = vadd.f32 %v1337_v16, %v1172_v4  ;;  %v1313_v40 = vmul.f32 %v1281_v60, %v1192_v2 }
 0x219   :  { %v1329_v45 = vmul.f32 %v1297_v26, %v1232_v3  ;;  %2130 = vtanh.f32 %v1424_v29 }
 0x21a   :  { %v1914_v14 = vpack.c.bf16 %v1513_v54, %v1512_v41  ;;  %v1401_v63 = vmul.f32 0.7978846, %v1369_v20  ;;  %v1345_v15 = vmul.f32 %v1313_v40, %v1192_v2  ;;  %v2129_v28 = vpop.eup %2128 }
 0x21b   :  { %v1361_v18 = vmul.f32 %v1329_v45, %v1232_v3  ;;  %v1464_v5 = vadd.f32 1.0, %v2129_v28 }
 0x21c   :  { %1976 = vst [vmem:[%s3456_s5 + $0x58] sm:$0xff] %v1914_v14   ;;  %2132 = vtanh.f32 %v1401_v63  ;;  %v1377_v52 = vadd.f32 %v1345_v15, %v1192_v2 }
 0x21d   :  { %v1393_v30 = vadd.f32 %v1361_v18, %v1232_v3  ;;  %2134 = vtanh.f32 %v1408_v34  ;;  %v1496_v47 = vmul.f32 %v1464_v5, %v1240_v36 }
 0x21e   :  { %v1409_v58 = vmul.f32 0.7978846, %v1377_v52 }
 0x21f   :  { %v1425_v10 = vmul.f32 0.7978846, %v1393_v30  ;;  %v2131_v21 = vpop.eup %2130 }
 0x220   :  { %v1488_v37 = vadd.f32 1.0, %v2131_v21 }
 0x221   :  { %2136 = vtanh.f32 %v1425_v10 }
 0x222   :  { %2138 = vtanh.f32 %v1409_v58  ;;  %v2133_v6 = vpop.eup %2132  ;;  %v1520_v31 = vmul.f32 %v1488_v37, %v1264_v50 }
 0x223   :  { %v2135_v32 = vpop.eup %2134  ;;  %v1465_v19 = vadd.f32 1.0, %v2133_v6 }
 0x224   :  { %v1472_v56 = vadd.f32 1.0, %v2135_v32 }
 0x225   :  { %v1497_v35 = vmul.f32 %v1465_v19, %v1241_v8 }
 0x226   :  { %v1504_v33 = vmul.f32 %v1472_v56, %v1248_v23 }
 0x227   :  { %v2137_v53 = vpop.eup %2136  ;;  %v1874_v17 = vpack.c.bf16 %v1497_v35, %v1496_v47 }
 0x228   :  { %v2139_v62 = vpop.eup %2138  ;;  %v1489_v25 = vadd.f32 1.0, %v2137_v53 }
 0x229   :  { %v1473_v49 = vadd.f32 1.0, %v2139_v62  ;;  %1968 = vst [vmem:[%s3456_s5 + $0x18] sm:$0xff] %v1874_v17  }
 0x22a   :  { %v1521_v42 = vmul.f32 %v1489_v25, %v1265_v44 }
 0x22b   :  { %v1505_v48 = vmul.f32 %v1473_v49, %v1249_v55 }
 0x22c   :  { %v1934_v4 = vpack.c.bf16 %v1521_v42, %v1520_v31 }
 0x22d   :  { %v1894_v51 = vpack.c.bf16 %v1505_v48, %v1504_v33 }
 0x22e   :  { %1980 = vst [vmem:[%s3456_s5 + $0x78] sm:$0xff] %v1934_v4  }
 0x22f   :  { %1972 = vst [vmem:[%s3456_s5 + $0x38] sm:$0xff] %v1894_v51  }
 0x230   :  { %1590 = vsyncpa [#allocation4], 1 }

</bundles_post_ra>
